<compile_context>
chip_gen: v7x
topology: tpu7x:2x2x1
jax: 0.10.0
libtpu: 0.0.40
codegen_flags: <defaults>
</compile_context>

<pallas_src>
import functools

import jax
import jax.numpy as jnp
import numpy as np
from jax import lax
from jax.experimental import pallas as pl
from jax.experimental.pallas import tpu as pltpu


# ----------------------------- helpers ------------------------------------ #

_INV_SQRT2 = 0.7071067811865475
_LN_EPS = 1e-5


def _gelu_exact(x):
    # torch.nn.GELU() default: exact erf formulation.
    return 0.5 * x * (1.0 + lax.erf(x * _INV_SQRT2))


def _layernorm(x, gamma, beta):
    # PyTorch LayerNorm: biased variance over last dim, eps=1e-5.
    mu = jnp.mean(x, axis=-1, keepdims=True)
    xc = x - mu
    var = jnp.mean(xc * xc, axis=-1, keepdims=True)
    return xc * lax.rsqrt(var + _LN_EPS) * gamma + beta


# ----------------------------- Pallas kernel ------------------------------- #

def dec_layer_kernel(
    hv_ref, he_ref, mattn_ref, mv_ref,
    w1v_ref, w1e_ref, b1_ref, w2_ref, b2_ref, w3_ref, b3_ref,
    g1_ref, be1_ref,
    win_ref, bin_ref, wout_ref, bout_ref,
    g2_ref, be2_ref,
    out_ref,
    *, scale,
):
    hv = hv_ref[...]                         # [tn, H]
    he = he_ref[...]                         # [tn, K, E]
    tn, K, E = he.shape
    H = hv.shape[1]

    # ---- W1 split: h_EV @ W1 == h_V @ W1[:H] (per node) + h_E @ W1[H:] ----
    hv_w1 = jnp.dot(hv, w1v_ref[...], preferred_element_type=jnp.float32)        # [tn, H]
    he_w1 = jnp.dot(he.reshape(tn * K, E), w1e_ref[...],
                    preferred_element_type=jnp.float32)                           # [tn*K, H]
    h1 = _gelu_exact(he_w1.reshape(tn, K, H) + hv_w1[:, None, :] + b1_ref[...])   # [tn, K, H]

    # ---- W2 + GELU -----------------------------------------------------------
    h2 = _gelu_exact(
        jnp.dot(h1.reshape(tn * K, H), w2_ref[...],
                preferred_element_type=jnp.float32) + b2_ref[...]
    ).reshape(tn, K, H)                                                           # [tn, K, H]

    # ---- mask + neighbor sum BEFORE W3 (W3 is linear, sum commutes) ----------
    m = mattn_ref[...]                                                            # [tn, K]
    s = jnp.sum(h2 * m[:, :, None], axis=1)                                       # [tn, H]
    msum = jnp.sum(m, axis=1, keepdims=True)                                      # [tn, 1]
    dh = (jnp.dot(s, w3_ref[...], preferred_element_type=jnp.float32)
          + msum * b3_ref[...]) * (1.0 / scale)                                   # [tn, H]

    # ---- residual + norm1 ----------------------------------------------------
    x = _layernorm(hv + dh, g1_ref[...], be1_ref[...])

    # ---- position-wise FFN ---------------------------------------------------
    ff = _gelu_exact(
        jnp.dot(x, win_ref[...], preferred_element_type=jnp.float32) + bin_ref[...]
    )
    ff = jnp.dot(ff, wout_ref[...], preferred_element_type=jnp.float32) + bout_ref[...]

    # ---- residual + norm2 + node mask ---------------------------------------
    x = _layernorm(x + ff, g2_ref[...], be2_ref[...])
    out_ref[...] = (x * mv_ref[...]).astype(out_ref.dtype)


# ----------------------------- wrapper ------------------------------------- #

def dec_layer_pallas(h_V, h_E, mask_attend, mask_V, params, *, scale=30, tn=128):
    N, H = h_V.shape
    _, K, E = h_E.shape
    (w1, b1, w2, b2, w3, b3, g1, be1, win, bin_, wout, bout, g2, be2) = params

    # Split W1 so the kernel never materializes the concatenated h_EV.
    w1v, w1e = w1[:H], w1[H:]

    # Pad node axis up to a multiple of the tile; padded rows are zero and get
    # sliced off (zero rows are numerically benign through the LayerNorms).
    n_blocks = pl.cdiv(N, tn)
    n_pad = n_blocks * tn
    if n_pad != N:
        pad = n_pad - N
        h_V = jnp.pad(h_V, ((0, pad), (0, 0)))
        h_E = jnp.pad(h_E, ((0, pad), (0, 0), (0, 0)))
        mask_attend = jnp.pad(mask_attend, ((0, pad), (0, 0)))
        mask_V = jnp.pad(mask_V, ((0, pad), (0, 0)))

    def full(a):
        nd = a.ndim
        return pl.BlockSpec(a.shape, lambda i, _nd=nd: (0,) * _nd)

    grid_spec = pltpu.PrefetchScalarGridSpec(
        num_scalar_prefetch=0,
        grid=(n_blocks,),
        in_specs=[
            pl.BlockSpec((tn, H), lambda i: (i, 0)),          # h_V
            pl.BlockSpec((tn, K, E), lambda i: (i, 0, 0)),    # h_E
            pl.BlockSpec((tn, K), lambda i: (i, 0)),          # mask_attend
            pl.BlockSpec((tn, 1), lambda i: (i, 0)),          # mask_V
            full(w1v), full(w1e), full(b1),
            full(w2), full(b2), full(w3), full(b3),
            full(g1), full(be1),
            full(win), full(bin_), full(wout), full(bout),
            full(g2), full(be2),
        ],
        out_specs=pl.BlockSpec((tn, H), lambda i: (i, 0)),
    )

    out = pl.pallas_call(
        functools.partial(dec_layer_kernel, scale=float(scale)),
        out_shape=jax.ShapeDtypeStruct((n_pad, H), h_V.dtype),
        grid_spec=grid_spec,
        compiler_params=pltpu.CompilerParams(
            dimension_semantics=("parallel",),
        ),
    )(h_V, h_E, mask_attend, mask_V,
      w1v, w1e, b1, w2, b2, w3, b3, g1, be1, win, bin_, wout, bout, g2, be2)

    return out[:N]


# ----------------------------- pure-JAX reference --------------------------- #

def dec_layer_ref(h_V, h_E, mask_attend, mask_V, params, *, scale=30):
    (w1, b1, w2, b2, w3, b3, g1, be1, win, bin_, wout, bout, g2, be2) = params
    N, H = h_V.shape
    K = h_E.shape[1]
    hv_exp = jnp.broadcast_to(h_V[:, None, :], (N, K, H))
    h_ev = jnp.concatenate([hv_exp, h_E], axis=-1)
    h = _gelu_exact(h_ev @ w1 + b1)
    h = _gelu_exact(h @ w2 + b2)
    h = h @ w3 + b3
    h = h * mask_attend[:, :, None]
    dh = jnp.sum(h, axis=1) / scale
    x = _layernorm(h_V + dh, g1, be1)
    ff = _gelu_exact(x @ win + bin_) @ wout + bout
    x = _layernorm(x + ff, g2, be2)
    return x * mask_V


# ----------------------------- main ----------------------------------------- #

if __name__ == "__main__":
    # Small, but with a ragged tail to exercise the padding path (N not a
    # multiple of tn) and >1 grid step.
    N, K, H, E = 200, 8, 32, 64       # nodes, neighbors, num_hidden, num_in
    FF = 4 * H
    scale = 30

    key = jax.random.PRNGKey(0)
    ks = jax.random.split(key, 20)

    # Deterministic synthetic parameters (stored as [in, out] for x @ W).
    w1 = 0.1 * jax.random.normal(ks[0], (H + E, H), jnp.float32)
    b1 = 0.1 * jax.random.normal(ks[1], (1, H), jnp.float32)
    w2 = 0.1 * jax.random.normal(ks[2], (H, H), jnp.float32)
    b2 = 0.1 * jax.random.normal(ks[3], (1, H), jnp.float32)
    w3 = 0.1 * jax.random.normal(ks[4], (H, H), jnp.float32)
    b3 = 0.1 * jax.random.normal(ks[5], (1, H), jnp.float32)
    g1 = 1.0 + 0.05 * jax.random.normal(ks[6], (1, H), jnp.float32)
    be1 = 0.05 * jax.random.normal(ks[7], (1, H), jnp.float32)
    win = 0.1 * jax.random.normal(ks[8], (H, FF), jnp.float32)
    bin_ = 0.1 * jax.random.normal(ks[9], (1, FF), jnp.float32)
    wout = 0.1 * jax.random.normal(ks[10], (FF, H), jnp.float32)
    bout = 0.1 * jax.random.normal(ks[11], (1, H), jnp.float32)
    g2 = 1.0 + 0.05 * jax.random.normal(ks[12], (1, H), jnp.float32)
    be2 = 0.05 * jax.random.normal(ks[13], (1, H), jnp.float32)
    params = (w1, b1, w2, b2, w3, b3, g1, be1, win, bin_, wout, bout, g2, be2)

    # Inputs.
    h_V = jax.random.normal(ks[14], (N, H), jnp.float32)
    h_E = jax.random.normal(ks[15], (N, K, E), jnp.float32)
    mask_attend = (jax.random.uniform(ks[16], (N, K)) > 0.2).astype(jnp.float32)
    mask_V = (jax.random.uniform(ks[17], (N, 1)) > 0.1).astype(jnp.float32)

    out = dec_layer_pallas(h_V, h_E, mask_attend, mask_V, params, scale=scale, tn=128)
    out = jax.block_until_ready(out)

    ref = dec_layer_ref(h_V, h_E, mask_attend, mask_V, params, scale=scale)
    np.testing.assert_allclose(np.asarray(out), np.asarray(ref), rtol=1e-5, atol=1e-5)

    print("KERNEL_OK")
</pallas_src>

<mosaic_0001>
module attributes {stable_mosaic.version = 11 : i64} {
  func.func @dec_layer_kernel(%arg0: i32, %arg1: memref<128x32xf32, #tpu.memory_space<vmem>>, %arg2: memref<128x8x64xf32, #tpu.memory_space<vmem>>, %arg3: memref<128x8xf32, #tpu.memory_space<vmem>>, %arg4: memref<128x1xf32, #tpu.memory_space<vmem>>, %arg5: memref<32x32xf32, #tpu.memory_space<vmem>>, %arg6: memref<64x32xf32, #tpu.memory_space<vmem>>, %arg7: memref<1x32xf32, #tpu.memory_space<vmem>>, %arg8: memref<32x32xf32, #tpu.memory_space<vmem>>, %arg9: memref<1x32xf32, #tpu.memory_space<vmem>>, %arg10: memref<32x32xf32, #tpu.memory_space<vmem>>, %arg11: memref<1x32xf32, #tpu.memory_space<vmem>>, %arg12: memref<1x32xf32, #tpu.memory_space<vmem>>, %arg13: memref<1x32xf32, #tpu.memory_space<vmem>>, %arg14: memref<32x128xf32, #tpu.memory_space<vmem>>, %arg15: memref<1x128xf32, #tpu.memory_space<vmem>>, %arg16: memref<128x32xf32, #tpu.memory_space<vmem>>, %arg17: memref<1x32xf32, #tpu.memory_space<vmem>>, %arg18: memref<1x32xf32, #tpu.memory_space<vmem>>, %arg19: memref<1x32xf32, #tpu.memory_space<vmem>>, %arg20: memref<128x32xf32, #tpu.memory_space<vmem>>) attributes {dimension_semantics = [#tpu.dimension_semantics<parallel>], iteration_bounds = array<i64: 2>, scalar_prefetch = 0 : i64, scratch_operands = 0 : i64, tpu.core_type = #tpu.core_type<tc>, window_params = [{transform_indices = @transform_0, window_bounds = array<i64: 128, 32>}, {transform_indices = @transform_1, window_bounds = array<i64: 128, 8, 64>}, {transform_indices = @transform_2, window_bounds = array<i64: 128, 8>}, {transform_indices = @transform_3, window_bounds = array<i64: 128, 1>}, {pipeline_mode = #tpu.pipeline_mode<synchronous>, transform_indices = @transform_4, window_bounds = array<i64: 32, 32>}, {pipeline_mode = #tpu.pipeline_mode<synchronous>, transform_indices = @transform_5, window_bounds = array<i64: 64, 32>}, {pipeline_mode = #tpu.pipeline_mode<synchronous>, transform_indices = @transform_6, window_bounds = array<i64: 1, 32>}, {pipeline_mode = #tpu.pipeline_mode<synchronous>, transform_indices = @transform_7, window_bounds = array<i64: 32, 32>}, {pipeline_mode = #tpu.pipeline_mode<synchronous>, transform_indices = @transform_8, window_bounds = array<i64: 1, 32>}, {pipeline_mode = #tpu.pipeline_mode<synchronous>, transform_indices = @transform_9, window_bounds = array<i64: 32, 32>}, {pipeline_mode = #tpu.pipeline_mode<synchronous>, transform_indices = @transform_10, window_bounds = array<i64: 1, 32>}, {pipeline_mode = #tpu.pipeline_mode<synchronous>, transform_indices = @transform_11, window_bounds = array<i64: 1, 32>}, {pipeline_mode = #tpu.pipeline_mode<synchronous>, transform_indices = @transform_12, window_bounds = array<i64: 1, 32>}, {pipeline_mode = #tpu.pipeline_mode<synchronous>, transform_indices = @transform_13, window_bounds = array<i64: 32, 128>}, {pipeline_mode = #tpu.pipeline_mode<synchronous>, transform_indices = @transform_14, window_bounds = array<i64: 1, 128>}, {pipeline_mode = #tpu.pipeline_mode<synchronous>, transform_indices = @transform_15, window_bounds = array<i64: 128, 32>}, {pipeline_mode = #tpu.pipeline_mode<synchronous>, transform_indices = @transform_16, window_bounds = array<i64: 1, 32>}, {pipeline_mode = #tpu.pipeline_mode<synchronous>, transform_indices = @transform_17, window_bounds = array<i64: 1, 32>}, {pipeline_mode = #tpu.pipeline_mode<synchronous>, transform_indices = @transform_18, window_bounds = array<i64: 1, 32>}, {transform_indices = @transform_19, window_bounds = array<i64: 128, 32>}]} {
    %c0 = arith.constant 0 : index
    %c0_0 = arith.constant 0 : index
    %0 = vector.load %arg1[%c0, %c0_0] : memref<128x32xf32, #tpu.memory_space<vmem>>, vector<128x32xf32>
    %c0_1 = arith.constant 0 : index
    %c0_2 = arith.constant 0 : index
    %c0_3 = arith.constant 0 : index
    %1 = vector.load %arg2[%c0_1, %c0_2, %c0_3] : memref<128x8x64xf32, #tpu.memory_space<vmem>>, vector<128x8x64xf32>
    %c0_4 = arith.constant 0 : index
    %c0_5 = arith.constant 0 : index
    %2 = vector.load %arg5[%c0_4, %c0_5] : memref<32x32xf32, #tpu.memory_space<vmem>>, vector<32x32xf32>
    %cst = arith.constant dense<0.000000e+00> : vector<128x32xf32>
    %3 = tpu.matmul %0, %2, %cst {dimension_numbers = #tpu.dot_dimension_numbers<[1], [0], [0], [1], [0, 0, 1, 1], [], []>} : vector<128x32xf32>, vector<32x32xf32>, vector<128x32xf32> -> vector<128x32xf32>
    %4 = vector.shape_cast %1 : vector<128x8x64xf32> to vector<1024x64xf32>
    %c0_6 = arith.constant 0 : index
    %c0_7 = arith.constant 0 : index
    %5 = vector.load %arg6[%c0_6, %c0_7] : memref<64x32xf32, #tpu.memory_space<vmem>>, vector<64x32xf32>
    %cst_8 = arith.constant dense<0.000000e+00> : vector<1024x32xf32>
    %6 = tpu.matmul %4, %5, %cst_8 {dimension_numbers = #tpu.dot_dimension_numbers<[1], [0], [0], [1], [0, 0, 1, 1], [], []>} : vector<1024x64xf32>, vector<64x32xf32>, vector<1024x32xf32> -> vector<1024x32xf32>
    %7 = vector.shape_cast %6 : vector<1024x32xf32> to vector<128x8x32xf32>
    %8 = vector.shape_cast %3 : vector<128x32xf32> to vector<128x1x32xf32>
    %9 = vector.broadcast %8 : vector<128x1x32xf32> to vector<128x8x32xf32>
    %10 = arith.addf %7, %9 : vector<128x8x32xf32>
    %c0_9 = arith.constant 0 : index
    %c0_10 = arith.constant 0 : index
    %11 = vector.load %arg7[%c0_9, %c0_10] : memref<1x32xf32, #tpu.memory_space<vmem>>, vector<1x32xf32>
    %12 = vector.shape_cast %11 : vector<1x32xf32> to vector<1x1x32xf32>
    %13 = vector.broadcast %12 : vector<1x1x32xf32> to vector<128x8x32xf32>
    %14 = arith.addf %10, %13 : vector<128x8x32xf32>
    %cst_11 = arith.constant 5.000000e-01 : f32
    %15 = vector.broadcast %cst_11 : f32 to vector<128x8x32xf32>
    %16 = arith.mulf %15, %14 : vector<128x8x32xf32>
    %cst_12 = arith.constant 0.707106769 : f32
    %17 = vector.broadcast %cst_12 : f32 to vector<128x8x32xf32>
    %18 = arith.mulf %14, %17 : vector<128x8x32xf32>
    %19 = math.erf %18 : vector<128x8x32xf32>
    %cst_13 = arith.constant 1.000000e+00 : f32
    %20 = vector.broadcast %cst_13 : f32 to vector<128x8x32xf32>
    %21 = arith.addf %20, %19 : vector<128x8x32xf32>
    %22 = arith.mulf %16, %21 : vector<128x8x32xf32>
    %23 = vector.shape_cast %22 : vector<128x8x32xf32> to vector<1024x32xf32>
    %c0_14 = arith.constant 0 : index
    %c0_15 = arith.constant 0 : index
    %24 = vector.load %arg8[%c0_14, %c0_15] : memref<32x32xf32, #tpu.memory_space<vmem>>, vector<32x32xf32>
    %cst_16 = arith.constant dense<0.000000e+00> : vector<1024x32xf32>
    %25 = tpu.matmul %23, %24, %cst_16 {dimension_numbers = #tpu.dot_dimension_numbers<[1], [0], [0], [1], [0, 0, 1, 1], [], []>} : vector<1024x32xf32>, vector<32x32xf32>, vector<1024x32xf32> -> vector<1024x32xf32>
    %c0_17 = arith.constant 0 : index
    %c0_18 = arith.constant 0 : index
    %26 = vector.load %arg9[%c0_17, %c0_18] : memref<1x32xf32, #tpu.memory_space<vmem>>, vector<1x32xf32>
    %27 = vector.broadcast %26 : vector<1x32xf32> to vector<1024x32xf32>
    %28 = arith.addf %25, %27 : vector<1024x32xf32>
    %cst_19 = arith.constant 5.000000e-01 : f32
    %29 = vector.broadcast %cst_19 : f32 to vector<1024x32xf32>
    %30 = arith.mulf %29, %28 : vector<1024x32xf32>
    %cst_20 = arith.constant 0.707106769 : f32
    %31 = vector.broadcast %cst_20 : f32 to vector<1024x32xf32>
    %32 = arith.mulf %28, %31 : vector<1024x32xf32>
    %33 = math.erf %32 : vector<1024x32xf32>
    %cst_21 = arith.constant 1.000000e+00 : f32
    %34 = vector.broadcast %cst_21 : f32 to vector<1024x32xf32>
    %35 = arith.addf %34, %33 : vector<1024x32xf32>
    %36 = arith.mulf %30, %35 : vector<1024x32xf32>
    %37 = vector.shape_cast %36 : vector<1024x32xf32> to vector<128x8x32xf32>
    %c0_22 = arith.constant 0 : index
    %c0_23 = arith.constant 0 : index
    %38 = vector.load %arg3[%c0_22, %c0_23] : memref<128x8xf32, #tpu.memory_space<vmem>>, vector<128x8xf32>
    %39 = vector.shape_cast %38 : vector<128x8xf32> to vector<128x8x1xf32>
    %40 = vector.broadcast %39 : vector<128x8x1xf32> to vector<128x8x32xf32>
    %41 = arith.mulf %37, %40 : vector<128x8x32xf32>
    %cst_24 = arith.constant dense<0.000000e+00> : vector<128x32xf32>
    %42 = vector.multi_reduction <add>, %41, %cst_24 [1] : vector<128x8x32xf32> to vector<128x32xf32>
    %cst_25 = arith.constant dense<0.000000e+00> : vector<128xf32>
    %43 = vector.multi_reduction <add>, %38, %cst_25 [1] : vector<128x8xf32> to vector<128xf32>
    %44 = vector.shape_cast %43 : vector<128xf32> to vector<128x1xf32>
    %c0_26 = arith.constant 0 : index
    %c0_27 = arith.constant 0 : index
    %45 = vector.load %arg10[%c0_26, %c0_27] : memref<32x32xf32, #tpu.memory_space<vmem>>, vector<32x32xf32>
    %cst_28 = arith.constant dense<0.000000e+00> : vector<128x32xf32>
    %46 = tpu.matmul %42, %45, %cst_28 {dimension_numbers = #tpu.dot_dimension_numbers<[1], [0], [0], [1], [0, 0, 1, 1], [], []>} : vector<128x32xf32>, vector<32x32xf32>, vector<128x32xf32> -> vector<128x32xf32>
    %c0_29 = arith.constant 0 : index
    %c0_30 = arith.constant 0 : index
    %47 = vector.load %arg11[%c0_29, %c0_30] : memref<1x32xf32, #tpu.memory_space<vmem>>, vector<1x32xf32>
    %48 = vector.broadcast %44 : vector<128x1xf32> to vector<128x32xf32>
    %49 = vector.broadcast %47 : vector<1x32xf32> to vector<128x32xf32>
    %50 = arith.mulf %48, %49 : vector<128x32xf32>
    %51 = arith.addf %46, %50 : vector<128x32xf32>
    %cst_31 = arith.constant 0.0333333351 : f32
    %52 = vector.broadcast %cst_31 : f32 to vector<128x32xf32>
    %53 = arith.mulf %51, %52 : vector<128x32xf32>
    %54 = arith.addf %0, %53 : vector<128x32xf32>
    %c0_32 = arith.constant 0 : index
    %c0_33 = arith.constant 0 : index
    %55 = vector.load %arg12[%c0_32, %c0_33] : memref<1x32xf32, #tpu.memory_space<vmem>>, vector<1x32xf32>
    %c0_34 = arith.constant 0 : index
    %c0_35 = arith.constant 0 : index
    %56 = vector.load %arg13[%c0_34, %c0_35] : memref<1x32xf32, #tpu.memory_space<vmem>>, vector<1x32xf32>
    %cst_36 = arith.constant dense<0.000000e+00> : vector<128xf32>
    %57 = vector.multi_reduction <add>, %54, %cst_36 [1] : vector<128x32xf32> to vector<128xf32>
    %58 = vector.shape_cast %57 : vector<128xf32> to vector<128x1xf32>
    %cst_37 = arith.constant 3.200000e+01 : f32
    %59 = vector.broadcast %cst_37 : f32 to vector<128x1xf32>
    %60 = arith.divf %58, %59 : vector<128x1xf32>
    %61 = vector.broadcast %60 : vector<128x1xf32> to vector<128x32xf32>
    %62 = arith.subf %54, %61 : vector<128x32xf32>
    %63 = arith.mulf %62, %62 : vector<128x32xf32>
    %cst_38 = arith.constant dense<0.000000e+00> : vector<128xf32>
    %64 = vector.multi_reduction <add>, %63, %cst_38 [1] : vector<128x32xf32> to vector<128xf32>
    %65 = vector.shape_cast %64 : vector<128xf32> to vector<128x1xf32>
    %cst_39 = arith.constant 3.200000e+01 : f32
    %66 = vector.broadcast %cst_39 : f32 to vector<128x1xf32>
    %67 = arith.divf %65, %66 : vector<128x1xf32>
    %cst_40 = arith.constant 9.99999974E-6 : f32
    %68 = vector.broadcast %cst_40 : f32 to vector<128x1xf32>
    %69 = arith.addf %67, %68 : vector<128x1xf32>
    %70 = math.rsqrt %69 : vector<128x1xf32>
    %71 = vector.broadcast %70 : vector<128x1xf32> to vector<128x32xf32>
    %72 = arith.mulf %62, %71 : vector<128x32xf32>
    %73 = vector.broadcast %55 : vector<1x32xf32> to vector<128x32xf32>
    %74 = arith.mulf %72, %73 : vector<128x32xf32>
    %75 = vector.broadcast %56 : vector<1x32xf32> to vector<128x32xf32>
    %76 = arith.addf %74, %75 : vector<128x32xf32>
    %c0_41 = arith.constant 0 : index
    %c0_42 = arith.constant 0 : index
    %77 = vector.load %arg14[%c0_41, %c0_42] : memref<32x128xf32, #tpu.memory_space<vmem>>, vector<32x128xf32>
    %cst_43 = arith.constant dense<0.000000e+00> : vector<128x128xf32>
    %78 = tpu.matmul %76, %77, %cst_43 {dimension_numbers = #tpu.dot_dimension_numbers<[1], [0], [0], [1], [0, 0, 1, 1], [], []>} : vector<128x32xf32>, vector<32x128xf32>, vector<128x128xf32> -> vector<128x128xf32>
    %c0_44 = arith.constant 0 : index
    %c0_45 = arith.constant 0 : index
    %79 = vector.load %arg15[%c0_44, %c0_45] : memref<1x128xf32, #tpu.memory_space<vmem>>, vector<1x128xf32>
    %80 = vector.broadcast %79 : vector<1x128xf32> to vector<128x128xf32>
    %81 = arith.addf %78, %80 : vector<128x128xf32>
    %cst_46 = arith.constant 5.000000e-01 : f32
    %82 = vector.broadcast %cst_46 : f32 to vector<128x128xf32>
    %83 = arith.mulf %82, %81 : vector<128x128xf32>
    %cst_47 = arith.constant 0.707106769 : f32
    %84 = vector.broadcast %cst_47 : f32 to vector<128x128xf32>
    %85 = arith.mulf %81, %84 : vector<128x128xf32>
    %86 = math.erf %85 : vector<128x128xf32>
    %cst_48 = arith.constant 1.000000e+00 : f32
    %87 = vector.broadcast %cst_48 : f32 to vector<128x128xf32>
    %88 = arith.addf %87, %86 : vector<128x128xf32>
    %89 = arith.mulf %83, %88 : vector<128x128xf32>
    %c0_49 = arith.constant 0 : index
    %c0_50 = arith.constant 0 : index
    %90 = vector.load %arg16[%c0_49, %c0_50] : memref<128x32xf32, #tpu.memory_space<vmem>>, vector<128x32xf32>
    %cst_51 = arith.constant dense<0.000000e+00> : vector<128x32xf32>
    %91 = tpu.matmul %89, %90, %cst_51 {dimension_numbers = #tpu.dot_dimension_numbers<[1], [0], [0], [1], [0, 0, 1, 1], [], []>} : vector<128x128xf32>, vector<128x32xf32>, vector<128x32xf32> -> vector<128x32xf32>
    %c0_52 = arith.constant 0 : index
    %c0_53 = arith.constant 0 : index
    %92 = vector.load %arg17[%c0_52, %c0_53] : memref<1x32xf32, #tpu.memory_space<vmem>>, vector<1x32xf32>
    %93 = vector.broadcast %92 : vector<1x32xf32> to vector<128x32xf32>
    %94 = arith.addf %91, %93 : vector<128x32xf32>
    %95 = arith.addf %76, %94 : vector<128x32xf32>
    %c0_54 = arith.constant 0 : index
    %c0_55 = arith.constant 0 : index
    %96 = vector.load %arg18[%c0_54, %c0_55] : memref<1x32xf32, #tpu.memory_space<vmem>>, vector<1x32xf32>
    %c0_56 = arith.constant 0 : index
    %c0_57 = arith.constant 0 : index
    %97 = vector.load %arg19[%c0_56, %c0_57] : memref<1x32xf32, #tpu.memory_space<vmem>>, vector<1x32xf32>
    %cst_58 = arith.constant dense<0.000000e+00> : vector<128xf32>
    %98 = vector.multi_reduction <add>, %95, %cst_58 [1] : vector<128x32xf32> to vector<128xf32>
    %99 = vector.shape_cast %98 : vector<128xf32> to vector<128x1xf32>
    %cst_59 = arith.constant 3.200000e+01 : f32
    %100 = vector.broadcast %cst_59 : f32 to vector<128x1xf32>
    %101 = arith.divf %99, %100 : vector<128x1xf32>
    %102 = vector.broadcast %101 : vector<128x1xf32> to vector<128x32xf32>
    %103 = arith.subf %95, %102 : vector<128x32xf32>
    %104 = arith.mulf %103, %103 : vector<128x32xf32>
    %cst_60 = arith.constant dense<0.000000e+00> : vector<128xf32>
    %105 = vector.multi_reduction <add>, %104, %cst_60 [1] : vector<128x32xf32> to vector<128xf32>
    %106 = vector.shape_cast %105 : vector<128xf32> to vector<128x1xf32>
    %cst_61 = arith.constant 3.200000e+01 : f32
    %107 = vector.broadcast %cst_61 : f32 to vector<128x1xf32>
    %108 = arith.divf %106, %107 : vector<128x1xf32>
    %cst_62 = arith.constant 9.99999974E-6 : f32
    %109 = vector.broadcast %cst_62 : f32 to vector<128x1xf32>
    %110 = arith.addf %108, %109 : vector<128x1xf32>
    %111 = math.rsqrt %110 : vector<128x1xf32>
    %112 = vector.broadcast %111 : vector<128x1xf32> to vector<128x32xf32>
    %113 = arith.mulf %103, %112 : vector<128x32xf32>
    %114 = vector.broadcast %96 : vector<1x32xf32> to vector<128x32xf32>
    %115 = arith.mulf %113, %114 : vector<128x32xf32>
    %116 = vector.broadcast %97 : vector<1x32xf32> to vector<128x32xf32>
    %117 = arith.addf %115, %116 : vector<128x32xf32>
    %c0_63 = arith.constant 0 : index
    %c0_64 = arith.constant 0 : index
    %118 = vector.load %arg4[%c0_63, %c0_64] : memref<128x1xf32, #tpu.memory_space<vmem>>, vector<128x1xf32>
    %119 = vector.broadcast %118 : vector<128x1xf32> to vector<128x32xf32>
    %120 = arith.mulf %117, %119 : vector<128x32xf32>
    %c0_65 = arith.constant 0 : index
    %c0_66 = arith.constant 0 : index
    %121 = vector.load %arg20[%c0_65, %c0_66] : memref<128x32xf32, #tpu.memory_space<vmem>>, vector<128x32xf32>
    tpu.vector_store %arg20[%c0_65, %c0_66], %120 {strides = array<i32>} : memref<128x32xf32, #tpu.memory_space<vmem>>, vector<128x32xf32>,
    return
  }
  func.func @transform_0(%arg0: i32) -> (i32, i32) {
    %c0_i32 = arith.constant 0 : i32
    %c0_i32_0 = arith.constant 0 : i32
    return %arg0, %c0_i32 : i32, i32
  }
  func.func @transform_1(%arg0: i32) -> (i32, i32, i32) {
    %c0_i32 = arith.constant 0 : i32
    %c0_i32_0 = arith.constant 0 : i32
    %c0_i32_1 = arith.constant 0 : i32
    return %arg0, %c0_i32, %c0_i32_0 : i32, i32, i32
  }
  func.func @transform_2(%arg0: i32) -> (i32, i32) {
    %c0_i32 = arith.constant 0 : i32
    %c0_i32_0 = arith.constant 0 : i32
    return %arg0, %c0_i32 : i32, i32
  }
  func.func @transform_3(%arg0: i32) -> (i32, i32) {
    %c0_i32 = arith.constant 0 : i32
    %c0_i32_0 = arith.constant 0 : i32
    return %arg0, %c0_i32 : i32, i32
  }
  func.func @transform_4(%arg0: i32) -> (i32, i32) {
    %c0_i32 = arith.constant 0 : i32
    %c0_i32_0 = arith.constant 0 : i32
    %c0_i32_1 = arith.constant 0 : i32
    return %c0_i32, %c0_i32_0 : i32, i32
  }
  func.func @transform_5(%arg0: i32) -> (i32, i32) {
    %c0_i32 = arith.constant 0 : i32
    %c0_i32_0 = arith.constant 0 : i32
    %c0_i32_1 = arith.constant 0 : i32
    return %c0_i32, %c0_i32_0 : i32, i32
  }
  func.func @transform_6(%arg0: i32) -> (i32, i32) {
    %c0_i32 = arith.constant 0 : i32
    %c0_i32_0 = arith.constant 0 : i32
    %c0_i32_1 = arith.constant 0 : i32
    return %c0_i32, %c0_i32_0 : i32, i32
  }
  func.func @transform_7(%arg0: i32) -> (i32, i32) {
    %c0_i32 = arith.constant 0 : i32
    %c0_i32_0 = arith.constant 0 : i32
    %c0_i32_1 = arith.constant 0 : i32
    return %c0_i32, %c0_i32_0 : i32, i32
  }
  func.func @transform_8(%arg0: i32) -> (i32, i32) {
    %c0_i32 = arith.constant 0 : i32
    %c0_i32_0 = arith.constant 0 : i32
    %c0_i32_1 = arith.constant 0 : i32
    return %c0_i32, %c0_i32_0 : i32, i32
  }
  func.func @transform_9(%arg0: i32) -> (i32, i32) {
    %c0_i32 = arith.constant 0 : i32
    %c0_i32_0 = arith.constant 0 : i32
    %c0_i32_1 = arith.constant 0 : i32
    return %c0_i32, %c0_i32_0 : i32, i32
  }
  func.func @transform_10(%arg0: i32) -> (i32, i32) {
    %c0_i32 = arith.constant 0 : i32
    %c0_i32_0 = arith.constant 0 : i32
    %c0_i32_1 = arith.constant 0 : i32
    return %c0_i32, %c0_i32_0 : i32, i32
  }
  func.func @transform_11(%arg0: i32) -> (i32, i32) {
    %c0_i32 = arith.constant 0 : i32
    %c0_i32_0 = arith.constant 0 : i32
    %c0_i32_1 = arith.constant 0 : i32
    return %c0_i32, %c0_i32_0 : i32, i32
  }
  func.func @transform_12(%arg0: i32) -> (i32, i32) {
    %c0_i32 = arith.constant 0 : i32
    %c0_i32_0 = arith.constant 0 : i32
    %c0_i32_1 = arith.constant 0 : i32
    return %c0_i32, %c0_i32_0 : i32, i32
  }
  func.func @transform_13(%arg0: i32) -> (i32, i32) {
    %c0_i32 = arith.constant 0 : i32
    %c0_i32_0 = arith.constant 0 : i32
    %c0_i32_1 = arith.constant 0 : i32
    return %c0_i32, %c0_i32_0 : i32, i32
  }
  func.func @transform_14(%arg0: i32) -> (i32, i32) {
    %c0_i32 = arith.constant 0 : i32
    %c0_i32_0 = arith.constant 0 : i32
    %c0_i32_1 = arith.constant 0 : i32
    return %c0_i32, %c0_i32_0 : i32, i32
  }
  func.func @transform_15(%arg0: i32) -> (i32, i32) {
    %c0_i32 = arith.constant 0 : i32
    %c0_i32_0 = arith.constant 0 : i32
    %c0_i32_1 = arith.constant 0 : i32
    return %c0_i32, %c0_i32_0 : i32, i32
  }
  func.func @transform_16(%arg0: i32) -> (i32, i32) {
    %c0_i32 = arith.constant 0 : i32
    %c0_i32_0 = arith.constant 0 : i32
    %c0_i32_1 = arith.constant 0 : i32
    return %c0_i32, %c0_i32_0 : i32, i32
  }
  func.func @transform_17(%arg0: i32) -> (i32, i32) {
    %c0_i32 = arith.constant 0 : i32
    %c0_i32_0 = arith.constant 0 : i32
    %c0_i32_1 = arith.constant 0 : i32
    return %c0_i32, %c0_i32_0 : i32, i32
  }
  func.func @transform_18(%arg0: i32) -> (i32, i32) {
    %c0_i32 = arith.constant 0 : i32
    %c0_i32_0 = arith.constant 0 : i32
    %c0_i32_1 = arith.constant 0 : i32
    return %c0_i32, %c0_i32_0 : i32, i32
  }
  func.func @transform_19(%arg0: i32) -> (i32, i32) {
    %c0_i32 = arith.constant 0 : i32
    %c0_i32_0 = arith.constant 0 : i32
    return %arg0, %c0_i32 : i32, i32
  }
}

</mosaic_0001>

<bundles_post_ra>
// kernel: tpu_custom_call.1
= control target key start
LH: loop header
LB: loop body
LE: loop exit
PB: predicated region body
PF: predicated region fallthrough
CT: control target
= control target key end

     0   :  { %s16755_s0 = inlined_call_operand.vmem [shape: f32[256,32], index: 0, kind: input, shape index: {}]   ;;  %s16756_s1 = inlined_call_operand.vmem [shape: f32[256,8,64], index: 1, kind: input, shape index: {}]   ;;  %s16757_s2 = inlined_call_operand.vmem [shape: f32[256,8], index: 2, kind: input, shape index: {}]   ;;  %s16758_s3 = inlined_call_operand.vmem [shape: f32[256,1], index: 3, kind: input, shape index: {}]   ;;  %s16759_s4 = inlined_call_operand.vmem [shape: f32[32,32], index: 4, kind: input, shape index: {}]   ;;  %s16760_s5 = inlined_call_operand.vmem [shape: f32[64,32], index: 5, kind: input, shape index: {}]   ;;  %s16761_s6 = inlined_call_operand.vmem [shape: f32[1,32], index: 6, kind: input, shape index: {}]   ;;  %s16762_s7 = inlined_call_operand.vmem [shape: f32[32,32], index: 7, kind: input, shape index: {}]   ;;  %s16763_s8 = inlined_call_operand.vmem [shape: f32[1,32], index: 8, kind: input, shape index: {}]   ;;  %s16764_s9 = inlined_call_operand.vmem [shape: f32[32,32], index: 9, kind: input, shape index: {}]   ;;  %s16765_s10 = inlined_call_operand.vmem [shape: f32[1,32], index: 10, kind: input, shape index: {}]   ;;  %s16766_s11 = inlined_call_operand.vmem [shape: f32[1,32], index: 11, kind: input, shape index: {}]   ;;  %s16767_s12 = inlined_call_operand.vmem [shape: f32[1,32], index: 12, kind: input, shape index: {}]   ;;  %s16768_s13 = inlined_call_operand.vmem [shape: f32[32,128], index: 13, kind: input, shape index: {}]   ;;  %s16769_s14 = inlined_call_operand.vmem [shape: f32[1,128], index: 14, kind: input, shape index: {}]   ;;  %s16770_s15 = inlined_call_operand.vmem [shape: f32[128,32], index: 15, kind: input, shape index: {}]   ;;  %s16771_s16 = inlined_call_operand.vmem [shape: f32[1,32], index: 16, kind: input, shape index: {}]   ;;  %s16772_s17 = inlined_call_operand.vmem [shape: f32[1,32], index: 17, kind: input, shape index: {}]   ;;  %s16773_s18 = inlined_call_operand.vmem [shape: f32[1,32], index: 18, kind: input, shape index: {}]   ;;  %s16774_s19 = inlined_call_operand.vmem [shape: f32[256,32], index: 19, kind: output, shape index: {}]  }
   0x1   :  { %16778 = sst [smem:[#allocation33_spill]] %s16755_s0  ;;  %s11981_s0 = smov 0  }
   0x2   :  { %16779 = sst [smem:[#allocation34_spill]] %s16756_s1 }
   0x3   :  { %16780 = sst [smem:[#allocation35_spill]] %s16757_s2 }
   0x4   :  { %16781 = sst [smem:[#allocation36_spill]] %s16758_s3 }
   0x5 LB: > { %s9860_s30 = sadd.s32 4294967295, %s11877_s0   ;;  %p9864_p0 = scmp.ge.s32.totalorder %s11877_s0, 1  ;;  %s11877_s0 = sphi %s11981_s0, %s29_s0  }
   0x6   : > { %p571_p1 = scmp.lt.s32.totalorder %s11877_s0, 3 }
   0x8   : > { %p572_p2 = pnand %p9864_p0, %p571_p1 }
   0xa   : > { %575 = sbr.rel (%p572_p2) target bundleno = 2472 (0x9a8), region = 96 }
  0x11   : > { %v816_v0 = vld [vmem:[%s16759_s4] sm:$0xff]  ;;  %v817_v1 = vld [vmem:[%s16759_s4 + $0x8] sm:$0xff]  ;;  %s9865_s24 = sshll.u32 %s9860_s30, 4  ;;  %s9867_s25 = sshll.u32 %s9860_s30, 7  ;;  %v818_v5 = vld [vmem:[%s16759_s4 + $0x10] sm:$0xff]  ;;  %vm820_vm0 = vcmask 261120  }
  0x12   : > { %v1014_v2 = vld [vmem:[%s16760_s5] sm:$0xff]  ;;  %v11110_v3 = vpack.c.bf16 %v817_v1, %v816_v0  ;;  %v1015_v4 = vld [vmem:[%s16760_s5 + $0x8] sm:$0xff]  ;;  %v819_v6 = vld [vmem:[%s16759_s4 + $0x18] sm:$0xff]  ;;  %p643_p3 = scmp.lt.s32.totalorder %s9865_s24, 31  ;;  %p649_p4 = scmp.lt.s32.totalorder %s9867_s25, 255  ;;  %vm1022_vm1 = vcmask 523264  }
  0x13   : > { %v11118_v7 = vpack.c.bf16 %v1015_v4, %v1014_v2  ;;  %v11114_v8 = vpack.c.bf16 %v819_v6, %v818_v5  ;;  %v1016_v9 = vld [vmem:[%s16760_s5 + $0x10] sm:$0xff]  ;;  %v1017_v10 = vld [vmem:[%s16760_s5 + $0x18] sm:$0xff]  ;;  %v1018_v12 = vld [vmem:[%s16760_s5 + $0x20] sm:$0xff]  ;;  %s16782_s20 = sld [smem:[#allocation33_spill]]  ;;  %s16783_s26 = sld [smem:[#allocation34_spill]]  ;;  %vm8335_vm2 = vcmask 1041409  }
  0x14   : > { %11111 = vmatprep.subr.bf16.mxu0 %v11110_v3  ;;  %v11122_v11 = vpack.c.bf16 %v1017_v10, %v1016_v9  ;;  %s17019_s24 = smov (!%p643_p3, %s9865_s24), 31  ;;  %v1019_v13 = vld [vmem:[%s16760_s5 + $0x28] sm:$0xff]  ;;  %s17021_s25 = smov (!%p649_p4, %s9867_s25), 255  ;;  %v1020_v16 = vld [vmem:[%s16760_s5 + $0x30] sm:$0xff]  ;;  %v1021_v17 = vld [vmem:[%s16760_s5 + $0x38] sm:$0xff]  ;;  %vm8337_vm3 = vcmask 1042434  }
  0x15   : > { %11119 = vmatprep.subr.bf16.mxu1 %v11118_v7  ;;  %11113 = vmatpush3.bf16.msra.mxu0 %v11110_v3  ;;  %s12019_s27 = sshll.u32 %s17019_s24, 3  ;;  %v11126_v14 = vpack.c.bf16 %v1019_v13, %v1018_v12  ;;  %s9868_s2 = sshll.u32 %s17021_s25, 3  ;;  %v11130_v21 = vpack.c.bf16 %v1021_v17, %v1020_v16  ;;  %vm8339_vm4 = vcmask 1043459   ;;  %vm8341_vm5 = vcmask 1044484  }
  0x16   : > { %11121 = vmatpush3.bf16.msra.mxu1 %v11118_v7  ;;  %11115 = vmatprep.subr.bf16.mxu0 %v11114_v8  ;;  %v4455_v7 = vld [vmem:[%s16762_s7] sm:$0xff]  ;;  %vm8343_vm6 = vcmask 1045509   ;;  %vm8345_vm7 = vcmask 1046534   ;;  %vm8347_vm8 = vcmask 1047559   ;;  %vm8131_vm9 = vcmask 64512   ;;  %s16646_s29 = scalar_lea.vmem %s16774_s19, %s12019_s27 }
  0x17   : > { %11123 = vmatprep.subr.bf16.mxu1 %v11122_v11 }
  0x19   : > { %s12025_s21 = scalar_lea.vmem %s16782_s20, %s12019_s27  ;;  %11117 = vmatpush3.bf16.msra.mxu0 %v11114_v8  ;;  %s12039_s28 = scalar_lea.vmem %s16783_s26, %s9868_s2  ;;  %v4456_v8 = vld [vmem:[%s16762_s7 + $0x8] sm:$0xff] }
  0x1a   : > { %v672_v15 = vld [vmem:[%s12025_s21] sm:$0xff]  ;;  %v673_v18 = vld [vmem:[%s12025_s21 + $0x8] sm:$0xff]  ;;  %11125 = vmatpush3.bf16.msra.mxu1 %v11122_v11  ;;  %v674_v20 = vld [vmem:[%s12025_s21 + $0x10] sm:$0xff]  ;;  %v11134_v10 = vpack.c.bf16 %v4456_v8, %v4455_v7  ;;  %v2132_v7 = vlaneseq  ;;  %s16784_s26 = sld [smem:[#allocation35_spill]] }
  0x1b   : > { %10558 = vmatprep.mubr.msk.f32.mxu0 %vm820_vm0, %v672_v15  ;;  %v688_v19 = vld [vmem:[%s12039_s28] sm:$0xff]  ;;  %11127 = vmatprep.subr.bf16.mxu1 %v11126_v14  ;;  %v675_v22 = vld [vmem:[%s12025_s21 + $0x18] sm:$0xff]  ;;  %v677_v24 = vld [vmem:[%s12025_s21 + $0x28] sm:$0xff] }
  0x1c   : > { %10598 = vmatprep.mubr.msk.f32.mxu1 %vm1022_vm1, %v688_v19  ;;  %10559 = vmatmul.mubr.msk.f32.vlgmr.msra.gmra.mrb[0].mxu0 %vm820_vm0, %v673_v18  ;;  %v676_v23 = vld [vmem:[%s12025_s21 + $0x20] sm:$0xff]  ;;  %v689_v25 = vld [vmem:[%s12039_s28 + $0x8] sm:$0xff]  ;;  %v690_v26 = vld [vmem:[%s12039_s28 + $0x10] sm:$0xff] }
  0x1d   : > { %10561 = vmatprep.mubr.msk.f32.mxu0 %vm820_vm0, %v674_v20  ;;  %v691_v27 = vld [vmem:[%s12039_s28 + $0x18] sm:$0xff]  ;;  %v692_v28 = vld [vmem:[%s12039_s28 + $0x20] sm:$0xff]  ;;  %v678_v29 = vld [vmem:[%s12025_s21 + $0x30] sm:$0xff]  ;;  %11135 = vmatprep.subr.bf16.mxu0 %v11134_v10 }
  0x1e   : > { %11129 = vmatpush3.bf16.msra.mxu1 %v11126_v14  ;;  %v679_v30 = vld [vmem:[%s12025_s21 + $0x38] sm:$0xff]  ;;  %v693_v31 = vld [vmem:[%s12039_s28 + $0x28] sm:$0xff]  ;;  %v694_v32 = vld [vmem:[%s12039_s28 + $0x30] sm:$0xff]  ;;  %11137 = vmatpush3.bf16.msra.mxu0 %v11134_v10  ;;  %v12281_v10 = vshrl.u32 %v2132_v7, 7 }
  0x1f   : > { %11131 = vmatprep.subr.bf16.mxu1 %v11130_v21  ;;  %v695_v33 = vld [vmem:[%s12039_s28 + $0x38] sm:$0xff]  ;;  %v680_v34 = vld [vmem:[%s12025_s21 + $0x40] sm:$0xff]  ;;  %v681_v36 = vld [vmem:[%s12025_s21 + $0x48] sm:$0xff] }
  0x20   : > { %10562 = vmatmul.mubr.msk.f32.gmra.mrb[2].mxu0 %vm820_vm0, %v675_v22  ;;  %v696_v35 = vld [vmem:[%s12039_s28 + $0x40] sm:$0xff]  ;;  %v697_v37 = vld [vmem:[%s12039_s28 + $0x48] sm:$0xff]  ;;  %v698_v38 = vld [vmem:[%s12039_s28 + $0x50] sm:$0xff]  ;;  %s12278_s25 = scalar_lea.vmem %s16784_s26, %s12019_s27 }
  0x21   : > { %10564 = vmatprep.mubr.msk.f32.mxu0 %vm820_vm0, %v676_v23  ;;  %v699_v39 = vld [vmem:[%s12039_s28 + $0x58] sm:$0xff]  ;;  %v700_v40 = vld [vmem:[%s12039_s28 + $0x60] sm:$0xff]  ;;  %v682_v41 = vld [vmem:[%s12025_s21 + $0x50] sm:$0xff] }
  0x22   : > { %11133 = vmatpush3.bf16.msra.mxu1 %v11130_v21  ;;  %v683_v42 = vld [vmem:[%s12025_s21 + $0x58] sm:$0xff]  ;;  %v701_v43 = vld [vmem:[%s12039_s28 + $0x68] sm:$0xff]  ;;  %v702_v44 = vld [vmem:[%s12039_s28 + $0x70] sm:$0xff] }
  0x23   : > { %v703_v45 = vld [vmem:[%s12039_s28 + $0x78] sm:$0xff]  ;;  %v704_v46 = vld [vmem:[%s12039_s28 + $0x80] sm:$0xff]  ;;  %v705_v47 = vld [vmem:[%s12039_s28 + $0x88] sm:$0xff] }
  0x24   : > { %10565 = vmatmul.mubr.msk.f32.gmra.mrb[4].mxu0 %vm820_vm0, %v677_v24  ;;  %v706_v48 = vld [vmem:[%s12039_s28 + $0x90] sm:$0xff]  ;;  %v707_v49 = vld [vmem:[%s12039_s28 + $0x98] sm:$0xff]  ;;  %v708_v50 = vld [vmem:[%s12039_s28 + $0xa0] sm:$0xff] }
  0x25   : > { %10599 = vmatmul.mubr.msk.f32.vlgmr.msra.gmra.mrb[0].mxu1 %vm1022_vm1, %v689_v25  ;;  %10567 = vmatprep.mubr.msk.f32.mxu0 %vm820_vm0, %v678_v29  ;;  %v709_v51 = vld [vmem:[%s12039_s28 + $0xa8] sm:$0xff]  ;;  %v710_v52 = vld [vmem:[%s12039_s28 + $0xb0] sm:$0xff]  ;;  %v711_v53 = vld [vmem:[%s12039_s28 + $0xb8] sm:$0xff] }
  0x26   : > { %10601 = vmatprep.mubr.msk.f32.mxu1 %vm1022_vm1, %v690_v26  ;;  %v712_v54 = vld [vmem:[%s12039_s28 + $0xc0] sm:$0xff]  ;;  %v713_v55 = vld [vmem:[%s12039_s28 + $0xc8] sm:$0xff]  ;;  %v714_v56 = vld [vmem:[%s12039_s28 + $0xd0] sm:$0xff] }
  0x27   : > { %v715_v57 = vld [vmem:[%s12039_s28 + $0xd8] sm:$0xff]  ;;  %v716_v58 = vld [vmem:[%s12039_s28 + $0xe0] sm:$0xff]  ;;  %v685_v60 = vld [vmem:[%s12025_s21 + $0x68] sm:$0xff] }
  0x28   : > { %10568 = vmatmul.mubr.msk.f32.gmra.mrb[6].mxu0 %vm820_vm0, %v679_v30  ;;  %v684_v59 = vld [vmem:[%s12025_s21 + $0x60] sm:$0xff]  ;;  %v717_v61 = vld [vmem:[%s12039_s28 + $0xe8] sm:$0xff]  ;;  %v718_v62 = vld [vmem:[%s12039_s28 + $0xf0] sm:$0xff] }
  0x29   : > { %10602 = vmatmul.mubr.msk.f32.gmra.mrb[2].mxu1 %vm1022_vm1, %v691_v27  ;;  %10570 = vmatprep.mubr.msk.f32.mxu0 %vm820_vm0, %v680_v34  ;;  %v719_v63 = vld [vmem:[%s12039_s28 + $0xf8] sm:$0xff]  ;;  %v720_v0 = vld [vmem:[%s12039_s28 + $0x100] sm:$0xff]  ;;  %v721_v1 = vld [vmem:[%s12039_s28 + $0x108] sm:$0xff] }
  0x2a   : > { %10604 = vmatprep.mubr.msk.f32.mxu1 %vm1022_vm1, %v692_v28  ;;  %v722_v2 = vld [vmem:[%s12039_s28 + $0x110] sm:$0xff]  ;;  %v723_v3 = vld [vmem:[%s12039_s28 + $0x118] sm:$0xff]  ;;  %v724_v4 = vld [vmem:[%s12039_s28 + $0x120] sm:$0xff] }
  0x2b   : > { %v725_v5 = vld [vmem:[%s12039_s28 + $0x128] sm:$0xff]  ;;  %v726_v6 = vld [vmem:[%s12039_s28 + $0x130] sm:$0xff]  ;;  %v727_v9 = vld [vmem:[%s12039_s28 + $0x138] sm:$0xff] }
  0x2c   : > { %10571 = vmatmul.mubr.msk.f32.gmra.mrb[8].mxu0 %vm820_vm0, %v681_v36  ;;  %v728_v11 = vld [vmem:[%s12039_s28 + $0x140] sm:$0xff]  ;;  %v729_v12 = vld [vmem:[%s12039_s28 + $0x148] sm:$0xff]  ;;  %v730_v13 = vld [vmem:[%s12039_s28 + $0x150] sm:$0xff] }
  0x2d   : > { %10605 = vmatmul.mubr.msk.f32.gmra.mrb[4].mxu1 %vm1022_vm1, %v693_v31  ;;  %10573 = vmatprep.mubr.msk.f32.mxu0 %vm820_vm0, %v682_v41  ;;  %v731_v14 = vld [vmem:[%s12039_s28 + $0x158] sm:$0xff]  ;;  %v732_v15 = vld [vmem:[%s12039_s28 + $0x160] sm:$0xff]  ;;  %v733_v16 = vld [vmem:[%s12039_s28 + $0x168] sm:$0xff] }
  0x2e   : > { %10607 = vmatprep.mubr.msk.f32.mxu1 %vm1022_vm1, %v694_v32  ;;  %v686_v17 = vld [vmem:[%s12025_s21 + $0x70] sm:$0xff]  ;;  %v687_v19 = vld [vmem:[%s12025_s21 + $0x78] sm:$0xff]  ;;  %v736_v21 = vld [vmem:[%s12039_s28 + $0x180] sm:$0xff] }
  0x2f   : > { %v734_v18 = vld [vmem:[%s12039_s28 + $0x170] sm:$0xff]  ;;  %v735_v20 = vld [vmem:[%s12039_s28 + $0x178] sm:$0xff]  ;;  %v737_v22 = vld [vmem:[%s12039_s28 + $0x188] sm:$0xff] }
  0x30   : > { %10574 = vmatmul.mubr.msk.f32.gmra.mrb[10].mxu0 %vm820_vm0, %v683_v42  ;;  %v738_v23 = vld [vmem:[%s12039_s28 + $0x190] sm:$0xff]  ;;  %v739_v24 = vld [vmem:[%s12039_s28 + $0x198] sm:$0xff]  ;;  %v740_v25 = vld [vmem:[%s12039_s28 + $0x1a0] sm:$0xff] }
  0x31   : > { %10608 = vmatmul.mubr.msk.f32.gmra.mrb[6].mxu1 %vm1022_vm1, %v695_v33  ;;  %10576 = vmatprep.mubr.msk.f32.mxu0 %vm820_vm0, %v684_v59  ;;  %v4457_v26 = vld [vmem:[%s16762_s7 + $0x10] sm:$0xff]  ;;  %v4458_v27 = vld [vmem:[%s16762_s7 + $0x18] sm:$0xff]  ;;  %v741_v28 = vld [vmem:[%s12039_s28 + $0x1a8] sm:$0xff] }
  0x32   : > { %10610 = vmatprep.mubr.msk.f32.mxu1 %vm1022_vm1, %v696_v35  ;;  %v11138_v29 = vpack.c.bf16 %v4458_v27, %v4457_v26  ;;  %v742_v30 = vld [vmem:[%s12039_s28 + $0x1b0] sm:$0xff]  ;;  %v743_v31 = vld [vmem:[%s12039_s28 + $0x1b8] sm:$0xff]  ;;  %v744_v32 = vld [vmem:[%s12039_s28 + $0x1c0] sm:$0xff] }
  0x33   : > { %v745_v33 = vld [vmem:[%s12039_s28 + $0x1c8] sm:$0xff]  ;;  %v746_v34 = vld [vmem:[%s12039_s28 + $0x1d0] sm:$0xff]  ;;  %v747_v35 = vld [vmem:[%s12039_s28 + $0x1d8] sm:$0xff] }
  0x34   : > { %10577 = vmatmul.mubr.msk.f32.gmra.mrb[12].mxu0 %vm820_vm0, %v685_v60  ;;  %11139 = vmatprep.subr.bf16.mxu0 %v11138_v29  ;;  %v748_v36 = vld [vmem:[%s12039_s28 + $0x1e0] sm:$0xff]  ;;  %v753_v41 = vld [vmem:[%s12039_s28 + $0x208] sm:$0xff]  ;;  %v754_v42 = vld [vmem:[%s12039_s28 + $0x210] sm:$0xff] }
  0x35   : > { %10611 = vmatmul.mubr.msk.f32.gmra.mrb[8].mxu1 %vm1022_vm1, %v697_v37  ;;  %10579 = vmatprep.mubr.msk.f32.mxu0 %vm820_vm0, %v686_v17  ;;  %v749_v37 = vld [vmem:[%s12039_s28 + $0x1e8] sm:$0xff]  ;;  %v771_v59 = vld [vmem:[%s12039_s28 + $0x298] sm:$0xff]  ;;  %v772_v60 = vld [vmem:[%s12039_s28 + $0x2a0] sm:$0xff] }
  0x36   : > { %10613 = vmatprep.mubr.msk.f32.mxu1 %vm1022_vm1, %v698_v38  ;;  %11141 = vmatpush3.bf16.msra.mxu0 %v11138_v29  ;;  %v750_v38 = vld [vmem:[%s12039_s28 + $0x1f0] sm:$0xff]  ;;  %v783_v8 = vld [vmem:[%s12039_s28 + $0x2f8] sm:$0xff] }
  0x37   : > { %v790_v26 = vld [vmem:[%s12039_s28 + $0x330] sm:$0xff] }
  0x38   : > { %10580 = vmatmul.mubr.msk.f32.gmra.mrb[14].mxu0 %vm820_vm0, %v687_v19  ;;  %v788_v19 = vld [vmem:[%s12039_s28 + $0x320] sm:$0xff] }
  0x39   : > { %10614 = vmatmul.mubr.msk.f32.gmra.mrb[10].mxu1 %vm1022_vm1, %v699_v39  ;;  %v751_v39 = vld [vmem:[%s12039_s28 + $0x1f8] sm:$0xff] }
  0x3a   : > { %10616 = vmatprep.mubr.msk.f32.mxu1 %vm1022_vm1, %v700_v40  ;;  %v752_v40 = vld [vmem:[%s12039_s28 + $0x200] sm:$0xff] }
  0x3d   : > { %10617 = vmatmul.mubr.msk.f32.gmra.mrb[12].mxu1 %vm1022_vm1, %v701_v43  ;;  %v755_v43 = vld [vmem:[%s12039_s28 + $0x218] sm:$0xff] }
  0x3e   : > { %10619 = vmatprep.mubr.msk.f32.mxu1 %vm1022_vm1, %v702_v44  ;;  %v756_v44 = vld [vmem:[%s12039_s28 + $0x220] sm:$0xff] }
  0x41   : > { %10620 = vmatmul.mubr.msk.f32.gmra.mrb[14].mxu1 %vm1022_vm1, %v703_v45  ;;  %v757_v45 = vld [vmem:[%s12039_s28 + $0x228] sm:$0xff] }
  0x42   : > { %10622 = vmatprep.mubr.msk.f32.mxu1 %vm1022_vm1, %v704_v46  ;;  %v758_v46 = vld [vmem:[%s12039_s28 + $0x230] sm:$0xff] }
  0x45   : > { %10623 = vmatmul.mubr.msk.f32.gmra.mrb[16].mxu1 %vm1022_vm1, %v705_v47  ;;  %v759_v47 = vld [vmem:[%s12039_s28 + $0x238] sm:$0xff] }
  0x46   : > { %10625 = vmatprep.mubr.msk.f32.mxu1 %vm1022_vm1, %v706_v48  ;;  %v760_v48 = vld [vmem:[%s12039_s28 + $0x240] sm:$0xff] }
  0x49   : > { %10626 = vmatmul.mubr.msk.f32.gmra.mrb[18].mxu1 %vm1022_vm1, %v707_v49  ;;  %v761_v49 = vld [vmem:[%s12039_s28 + $0x248] sm:$0xff] }
  0x4a   : > { %10628 = vmatprep.mubr.msk.f32.mxu1 %vm1022_vm1, %v708_v50  ;;  %v762_v50 = vld [vmem:[%s12039_s28 + $0x250] sm:$0xff] }
  0x4d   : > { %10629 = vmatmul.mubr.msk.f32.gmra.mrb[20].mxu1 %vm1022_vm1, %v709_v51  ;;  %v763_v51 = vld [vmem:[%s12039_s28 + $0x258] sm:$0xff] }
  0x4e   : > { %10631 = vmatprep.mubr.msk.f32.mxu1 %vm1022_vm1, %v710_v52  ;;  %v764_v52 = vld [vmem:[%s12039_s28 + $0x260] sm:$0xff] }
  0x51   : > { %10632 = vmatmul.mubr.msk.f32.gmra.mrb[22].mxu1 %vm1022_vm1, %v711_v53  ;;  %v765_v53 = vld [vmem:[%s12039_s28 + $0x268] sm:$0xff] }
  0x52   : > { %10634 = vmatprep.mubr.msk.f32.mxu1 %vm1022_vm1, %v712_v54  ;;  %v766_v54 = vld [vmem:[%s12039_s28 + $0x270] sm:$0xff] }
  0x55   : > { %10635 = vmatmul.mubr.msk.f32.gmra.mrb[24].mxu1 %vm1022_vm1, %v713_v55  ;;  %v767_v55 = vld [vmem:[%s12039_s28 + $0x278] sm:$0xff] }
  0x56   : > { %10637 = vmatprep.mubr.msk.f32.mxu1 %vm1022_vm1, %v714_v56  ;;  %v768_v56 = vld [vmem:[%s12039_s28 + $0x280] sm:$0xff] }
  0x59   : > { %10638 = vmatmul.mubr.msk.f32.gmra.mrb[26].mxu1 %vm1022_vm1, %v715_v57  ;;  %v769_v57 = vld [vmem:[%s12039_s28 + $0x288] sm:$0xff] }
  0x5a   : > { %10640 = vmatprep.mubr.msk.f32.mxu1 %vm1022_vm1, %v716_v58  ;;  %v770_v58 = vld [vmem:[%s12039_s28 + $0x290] sm:$0xff] }
  0x5d   : > { %10641 = vmatmul.mubr.msk.f32.gmra.mrb[28].mxu1 %vm1022_vm1, %v717_v61  ;;  %v773_v61 = vld [vmem:[%s12039_s28 + $0x2a8] sm:$0xff] }
  0x5e   : > { %10643 = vmatprep.mubr.msk.f32.mxu1 %vm1022_vm1, %v718_v62  ;;  %v774_v62 = vld [vmem:[%s12039_s28 + $0x2b0] sm:$0xff] }
  0x61   : > { %10644 = vmatmul.mubr.msk.f32.gmra.mrb[30].mxu1 %vm1022_vm1, %v719_v63  ;;  %v775_v63 = vld [vmem:[%s12039_s28 + $0x2b8] sm:$0xff] }
  0x62   : > { %10646 = vmatprep.mubr.msk.f32.mxu1 %vm1022_vm1, %v720_v0  ;;  %v776_v0 = vld [vmem:[%s12039_s28 + $0x2c0] sm:$0xff] }
  0x65   : > { %10647 = vmatmul.mubr.msk.f32.gmra.mrb[32].mxu1 %vm1022_vm1, %v721_v1  ;;  %v777_v1 = vld [vmem:[%s12039_s28 + $0x2c8] sm:$0xff] }
  0x66   : > { %10649 = vmatprep.mubr.msk.f32.mxu1 %vm1022_vm1, %v722_v2  ;;  %v778_v2 = vld [vmem:[%s12039_s28 + $0x2d0] sm:$0xff] }
  0x69   : > { %10650 = vmatmul.mubr.msk.f32.gmra.mrb[34].mxu1 %vm1022_vm1, %v723_v3  ;;  %v779_v3 = vld [vmem:[%s12039_s28 + $0x2d8] sm:$0xff] }
  0x6a   : > { %10652 = vmatprep.mubr.msk.f32.mxu1 %vm1022_vm1, %v724_v4  ;;  %v780_v4 = vld [vmem:[%s12039_s28 + $0x2e0] sm:$0xff] }
  0x6d   : > { %10653 = vmatmul.mubr.msk.f32.gmra.mrb[36].mxu1 %vm1022_vm1, %v725_v5  ;;  %v781_v5 = vld [vmem:[%s12039_s28 + $0x2e8] sm:$0xff] }
  0x6e   : > { %10655 = vmatprep.mubr.msk.f32.mxu1 %vm1022_vm1, %v726_v6  ;;  %v782_v6 = vld [vmem:[%s12039_s28 + $0x2f0] sm:$0xff] }
  0x71   : > { %10656 = vmatmul.mubr.msk.f32.gmra.mrb[38].mxu1 %vm1022_vm1, %v727_v9  ;;  %v784_v9 = vld [vmem:[%s12039_s28 + $0x300] sm:$0xff] }
  0x72   : > { %10658 = vmatprep.mubr.msk.f32.mxu1 %vm1022_vm1, %v728_v11  ;;  %v785_v11 = vld [vmem:[%s12039_s28 + $0x308] sm:$0xff] }
  0x75   : > { %10659 = vmatmul.mubr.msk.f32.gmra.mrb[40].mxu1 %vm1022_vm1, %v729_v12  ;;  %v786_v12 = vld [vmem:[%s12039_s28 + $0x310] sm:$0xff] }
  0x76   : > { %10661 = vmatprep.mubr.msk.f32.mxu1 %vm1022_vm1, %v730_v13  ;;  %v6195_v13 = vld [vmem:[%s12278_s25] sm:$0xff] }
  0x79   : > { %10662 = vmatmul.mubr.msk.f32.gmra.mrb[42].mxu1 %vm1022_vm1, %v731_v14  ;;  %v12288_v14 = vsub.s32 2, %v12281_v10 }
  0x7a   : > { %10664 = vmatprep.mubr.msk.f32.mxu1 %vm1022_vm1, %v732_v15  ;;  %v11879_v15 = vmov 1966171168  }
  0x7b   : > { %v6228_v17 = vrot.slane %v6195_v13, %v12288_v14 }
  0x7d   : > { %10665 = vmatmul.mubr.msk.f32.gmra.mrb[44].mxu1 %vm1022_vm1, %v733_v16  ;;  %v2130_v16 = vunpack.c.l.s4 %v11879_v15  ;;  %6230 = vbcast.lane.b32.xlu1 %v6228_v17, 256  ;;  %v798_v17 = vld [vmem:[%s12039_s28 + $0x370] sm:$0xff] }
  0x7e   : > { %10667 = vmatprep.mubr.msk.f32.mxu1 %vm1022_vm1, %v734_v18  ;;  %v787_v18 = vld [vmem:[%s12039_s28 + $0x318] sm:$0xff] }
  0x81   : > { %10668 = vmatmul.mubr.msk.f32.gmra.mrb[46].mxu1 %vm1022_vm1, %v735_v20  ;;  %v2131_v20 = vunpack.c.0.s8 %v2130_v16 }
  0x82   : > { %10670 = vmatprep.mubr.msk.f32.mxu1 %vm1022_vm1, %v736_v21  ;;  %v12296_v21 = vsub.s32 0, %v12281_v10 }
  0x83   : > { %v12306_v27 = vsub.s32 %v2131_v20, %v12281_v10 }
  0x85   : > { %10671 = vmatmul.mubr.msk.f32.gmra.mrb[48].mxu1 %vm1022_vm1, %v737_v22  ;;  %v6196_v22 = vld [vmem:[%s12278_s25 + $0x8] sm:$0xff] }
  0x86   : > { %10673 = vmatprep.mubr.msk.f32.mxu1 %vm1022_vm1, %v738_v23  ;;  %v789_v23 = vld [vmem:[%s12039_s28 + $0x328] sm:$0xff] }
  0x89   : > { %10674 = vmatmul.mubr.msk.f32.gmra.mrb[50].mxu1 %vm1022_vm1, %v739_v24  ;;  %v6270_v24 = vrot.slane %v6196_v22, %v12296_v21 }
  0x8a   : > { %10676 = vmatprep.mubr.msk.f32.mxu1 %vm1022_vm1, %v740_v25  ;;  %v6214_v25 = vrot.slane %v6195_v13, %v12296_v21 }
  0x8b   : > { %6272 = vbcast.lane.b32.xlu1 %v6270_v24, 256 }
  0x8c   : > { %6216 = vbcast.lane.b32.xlu0 %v6214_v25, 256 }
  0x8d   : > { %10677 = vmatmul.mubr.msk.f32.gmra.mrb[52].mxu1 %vm1022_vm1, %v741_v28  ;;  %v791_v28 = vld [vmem:[%s12039_s28 + $0x338] sm:$0xff] }
  0x8e   : > { %10679 = vmatprep.mubr.msk.f32.mxu1 %vm1022_vm1, %v742_v30  ;;  %v792_v30 = vld [vmem:[%s12039_s28 + $0x340] sm:$0xff] }
  0x91   : > { %10680 = vmatmul.mubr.msk.f32.gmra.mrb[54].mxu1 %vm1022_vm1, %v743_v31 }
  0x92   : > { %10682 = vmatprep.mubr.msk.f32.mxu1 %vm1022_vm1, %v744_v32 }
  0x95   : > { %10683 = vmatmul.mubr.msk.f32.gmra.mrb[56].mxu1 %vm1022_vm1, %v745_v33 }
  0x96   : > { %10685 = vmatprep.mubr.msk.f32.mxu1 %vm1022_vm1, %v746_v34 }
  0x99   : > { %10686 = vmatmul.mubr.msk.f32.gmra.mrb[58].mxu1 %vm1022_vm1, %v747_v35 }
  0x9a   : > { %10688 = vmatprep.mubr.msk.f32.mxu1 %vm1022_vm1, %v748_v36 }
  0x9d   : > { %10689 = vmatmul.mubr.msk.f32.gmra.mrb[60].mxu1 %vm1022_vm1, %v749_v37 }
  0x9e   : > { %10691 = vmatprep.mubr.msk.f32.mxu1 %vm1022_vm1, %v750_v38 }
  0xa1   : > { %10692 = vmatmul.mubr.msk.f32.gmra.mrb[62].mxu1 %vm1022_vm1, %v751_v39  ;;  %v793_v39 = vld [vmem:[%s12039_s28 + $0x348] sm:$0xff] }
  0xa2   : > { %10694 = vmatprep.mubr.msk.f32.mxu1 %vm1022_vm1, %v752_v40 }
  0xa5   : > { %10695 = vmatmul.mubr.msk.f32.gmra.mrb[64].mxu1 %vm1022_vm1, %v753_v41 }
  0xa6   : > { %10697 = vmatprep.mubr.msk.f32.mxu1 %vm1022_vm1, %v754_v42 }
  0xa9   : > { %10698 = vmatmul.mubr.msk.f32.gmra.mrb[66].mxu1 %vm1022_vm1, %v755_v43  ;;  %v794_v43 = vld [vmem:[%s12039_s28 + $0x350] sm:$0xff] }
  0xaa   : > { %10700 = vmatprep.mubr.msk.f32.mxu1 %vm1022_vm1, %v756_v44 }
  0xad   : > { %10701 = vmatmul.mubr.msk.f32.gmra.mrb[68].mxu1 %vm1022_vm1, %v757_v45 }
  0xae   : > { %10703 = vmatprep.mubr.msk.f32.mxu1 %vm1022_vm1, %v758_v46 }
  0xb1   : > { %10704 = vmatmul.mubr.msk.f32.gmra.mrb[70].mxu1 %vm1022_vm1, %v759_v47 }
  0xb2   : > { %10706 = vmatprep.mubr.msk.f32.mxu1 %vm1022_vm1, %v760_v48 }
  0xb5   : > { %10707 = vmatmul.mubr.msk.f32.gmra.mrb[72].mxu1 %vm1022_vm1, %v761_v49 }
  0xb6   : > { %10709 = vmatprep.mubr.msk.f32.mxu1 %vm1022_vm1, %v762_v50  ;;  %v795_v50 = vld [vmem:[%s12039_s28 + $0x358] sm:$0xff] }
  0xb9   : > { %10710 = vmatmul.mubr.msk.f32.gmra.mrb[74].mxu1 %vm1022_vm1, %v763_v51 }
  0xba   : > { %10712 = vmatprep.mubr.msk.f32.mxu1 %vm1022_vm1, %v764_v52 }
  0xbd   : > { %10713 = vmatmul.mubr.msk.f32.gmra.mrb[76].mxu1 %vm1022_vm1, %v765_v53  ;;  %v12343_v53 = vsub.s32 3, %v12281_v10 }
  0xbe   : > { %10715 = vmatprep.mubr.msk.f32.mxu1 %vm1022_vm1, %v766_v54 }
  0xc1   : > { %10716 = vmatmul.mubr.msk.f32.gmra.mrb[78].mxu1 %vm1022_vm1, %v767_v55 }
  0xc2   : > { %10718 = vmatprep.mubr.msk.f32.mxu1 %vm1022_vm1, %v768_v56  ;;  %v796_v56 = vld [vmem:[%s12039_s28 + $0x360] sm:$0xff] }
  0xc5   : > { %10719 = vmatmul.mubr.msk.f32.gmra.mrb[80].mxu1 %vm1022_vm1, %v769_v57 }
  0xc6   : > { %10721 = vmatprep.mubr.msk.f32.mxu1 %vm1022_vm1, %v770_v58 }
  0xc9   : > { %10722 = vmatmul.mubr.msk.f32.gmra.mrb[82].mxu1 %vm1022_vm1, %v771_v59 }
  0xca   : > { %10724 = vmatprep.mubr.msk.f32.mxu1 %vm1022_vm1, %v772_v60 }
  0xcd   : > { %10725 = vmatmul.mubr.msk.f32.gmra.mrb[84].mxu1 %vm1022_vm1, %v773_v61  ;;  %v12353_v61 = vld [vmem:[%s16761_s6] ss:$0 sm:$0xff] }
  0xce   : > { %10727 = vmatprep.mubr.msk.f32.mxu1 %vm1022_vm1, %v774_v62 }
  0xd1   : > { %10728 = vmatmul.mubr.msk.f32.gmra.mrb[86].mxu1 %vm1022_vm1, %v775_v63 }
  0xd2   : > { %10730 = vmatprep.mubr.msk.f32.mxu1 %vm1022_vm1, %v776_v0 }
  0xd5   : > { %10731 = vmatmul.mubr.msk.f32.gmra.mrb[88].mxu1 %vm1022_vm1, %v777_v1 }
  0xd6   : > { %10733 = vmatprep.mubr.msk.f32.mxu1 %vm1022_vm1, %v778_v2 }
  0xd9   : > { %10734 = vmatmul.mubr.msk.f32.gmra.mrb[90].mxu1 %vm1022_vm1, %v779_v3 }
  0xda   : > { %10736 = vmatprep.mubr.msk.f32.mxu1 %vm1022_vm1, %v780_v4 }
  0xdd   : > { %10737 = vmatmul.mubr.msk.f32.gmra.mrb[92].mxu1 %vm1022_vm1, %v781_v5 }
  0xde   : > { %10739 = vmatprep.mubr.msk.f32.mxu1 %vm1022_vm1, %v782_v6 }
  0xe1   : > { %10740 = vmatmul.mubr.msk.f32.gmra.mrb[94].mxu1 %vm1022_vm1, %v783_v8 }
  0xe2   : > { %10742 = vmatprep.mubr.msk.f32.mxu1 %vm1022_vm1, %v784_v9  ;;  %v797_v9 = vld [vmem:[%s12039_s28 + $0x368] sm:$0xff] }
  0xe5   : > { %10743 = vmatmul.mubr.msk.f32.gmra.mrb[96].mxu1 %vm1022_vm1, %v785_v11 }
  0xe6   : > { %10745 = vmatprep.mubr.msk.f32.mxu1 %vm1022_vm1, %v786_v12 }
  0xe9   : > { %10746 = vmatmul.mubr.msk.f32.gmra.mrb[98].mxu1 %vm1022_vm1, %v787_v18 }
  0xea   : > { %10748 = vmatprep.mubr.msk.f32.mxu1 %vm1022_vm1, %v788_v19 }
  0xed   : > { %10749 = vmatmul.mubr.msk.f32.gmra.mrb[100].mxu1 %vm1022_vm1, %v789_v23 }
  0xee   : > { %10751 = vmatprep.mubr.msk.f32.mxu1 %vm1022_vm1, %v790_v26 }
  0xef   : > { %v10560_v29 = vpop.f32.mrb[0].mxu0 }
  0xf0   : > { %v2177_v31 = vcombine.high %v10560_v29, %v10560_v29  ;;  %v2184_v32 = vrot.slane %v10560_v29, %v12306_v27  ;;  %v935_v33 = vpop.f32.mrb[1].mxu0 }
  0xf1   : > { %v2128_v34 = vcombine.high %v935_v33, %v935_v33  ;;  %v2135_v35 = vrot.slane %v935_v33, %v12306_v27  ;;  %10752 = vmatmul.mubr.msk.f32.gmra.mrb[102].mxu1 %vm1022_vm1, %v791_v28 }
  0xf2   : > { %v12316_v36 = vrot.slane %v2177_v31, %v12306_v27  ;;  %v2192_v37 = vcombine.high %v2184_v32, %v2184_v32  ;;  %v12319_v38 = vrot.slane %v2184_v32, %v12306_v27  ;;  %10754 = vmatprep.mubr.msk.f32.mxu1 %vm1022_vm1, %v792_v30 }
  0xf3   : > { %v2142_v40 = vrot.slane %v2128_v34, %v12306_v27  ;;  %v2143_v41 = vcombine.high %v2135_v35, %v2135_v35  ;;  %v2151_v42 = vrot.slane %v2135_v35, %v12306_v27  ;;  %v10563_v44 = vpop.f32.mrb[2].mxu0  ;;  %v799_v35 = vld [vmem:[%s12039_s28 + $0x378] sm:$0xff] }
  0xf4   : > { %v12327_v45 = vrot.slane %v2192_v37, %v12306_v27  ;;  %v12329_v46 = vpop.f32.mrb[3].mxu0  ;;  %v2193_v49 = vcombine.high %v12316_v36, %v12316_v36  ;;  %v2222_v52 = vcombine.high %v12319_v38, %v12319_v38  ;;  %v2947_v63 = vrot.slane %v12319_v38, %v12296_v21 }
  0xf5   : > { %v2144_v47 = vcombine.high %v2142_v40, %v2142_v40  ;;  %10755 = vmatmul.mubr.msk.f32.gmra.mrb[104].mxu1 %vm1022_vm1, %v793_v39  ;;  %v2165_v48 = vrot.slane %v2143_v41, %v12306_v27  ;;  %v12338_v51 = vrot.slane %v2142_v40, %v12306_v27  ;;  %v2173_v57 = vcombine.high %v2151_v42, %v2151_v42 }
  0xf6   : > { %10757 = vmatprep.mubr.msk.f32.mxu1 %vm1022_vm1, %v794_v43  ;;  %v2915_v62 = vrot.slane %v2151_v42, %v12296_v21  ;;  %v2224_v0 = vcombine.high %v12327_v45, %v12327_v45  ;;  %v2275_v1 = vcombine.high %v10563_v44, %v10563_v44  ;;  %v2951_v7 = vrot.slane %v12327_v45, %v12296_v21  ;;  %v800_v42 = vld [vmem:[%s12039_s28 + $0x380] sm:$0xff] }
  0xf7   : > { %v2919_v54 = vrot.slane %v2165_v48, %v12296_v21  ;;  %v2175_v55 = vcombine.high %v2165_v48, %v2165_v48  ;;  %v2172_v58 = vrot.slane %v2144_v47, %v12306_v27  ;;  %v12348_v59 = vpop.f32.mrb[4].mxu0  ;;  %v2174_v6 = vcombine.high %v12338_v51, %v12338_v51 }
  0xf8   : > { %v10600_v60 = vpop.f32.mrb[0].mxu1  ;;  %v12360_v2 = vpop.f32.mrb[5].mxu0  ;;  %v12371_v12 = vrot.slane %v2222_v52, %v12296_v21  ;;  %v12374_v13 = vrot.slane %v10563_v44, %v12306_v27  ;;  %v2923_v16 = vrot.slane %v2173_v57, %v12296_v21  ;;  %v2226_v18 = vcombine.high %v12329_v46, %v12329_v46 }
  0xf9   : > { %v3553_v3 = vadd.f32 %v10600_v60, %v2919_v54  ;;  %v1473_v4 = vpop.f32.mrb[1].mxu1  ;;  %10758 = vmatmul.mubr.msk.f32.gmra.mrb[106].mxu1 %vm1022_vm1, %v795_v50  ;;  %v2927_v5 = vrot.slane %v2175_v55, %v12296_v21  ;;  %v2176_v11 = vcombine.high %v2172_v58, %v2172_v58  ;;  %v2233_v19 = vrot.slane %v12329_v46, %v12306_v27 }
  0xfa   : > { %v3552_v8 = vadd.f32 %v2915_v62, %v1473_v4  ;;  %10760 = vmatprep.mubr.msk.f32.mxu1 %vm1022_vm1, %v796_v56  ;;  %v2931_v23 = vrot.slane %v12338_v51, %v12296_v21  ;;  %v12387_v24 = vrot.slane %v2224_v0, %v12296_v21  ;;  %v12390_v25 = vrot.slane %v2275_v1, %v12306_v27  ;;  %v802_v1 = vld [vmem:[%s12039_s28 + $0x390] sm:$0xff] }
  0xfb   : > { %v3688_v15 = vadd.f32 %v12353_v61, %v3553_v3  ;;  %v2935_v30 = vrot.slane %v2172_v58, %v12296_v21  ;;  %v2939_v31 = vrot.slane %v2174_v6, %v12296_v21  ;;  %v12395_v32 = vpop.f32.mrb[6].mxu0  ;;  %v2943_v37 = vrot.slane %v2176_v11, %v12296_v21 }
  0xfc   : > { %v3687_v20 = vadd.f32 %v12353_v61, %v3552_v8  ;;  %v10603_v22 = vpop.f32.mrb[2].mxu1  ;;  %v2290_v39 = vcombine.high %v12374_v13, %v12374_v13  ;;  %v12402_v40 = vpop.f32.mrb[7].mxu0  ;;  %v12407_v43 = vrot.slane %v2226_v18, %v12306_v27  ;;  %v2241_v44 = vcombine.high %v2233_v19, %v2233_v19 }
  0xfd   : > { %v3944_v26 = vmul.f32 0.70710677, %v3688_v15  ;;  %v3555_v28 = vadd.f32 %v10603_v22, %v2927_v5  ;;  %v1483_v29 = vpop.f32.mrb[3].mxu1  ;;  %10761 = vmatmul.mubr.msk.f32.gmra.mrb[108].mxu1 %vm1022_vm1, %v797_v9  ;;  %v2291_v48 = vcombine.high %v12390_v25, %v12390_v25  ;;  %v12416_v50 = vrot.slane %v2193_v49, %v12306_v27  ;;  %v801_v49 = vld [vmem:[%s12039_s28 + $0x388] sm:$0xff] }
  0xfe   : > { %v3943_v33 = vmul.f32 0.70710677, %v3687_v20  ;;  %v3554_v34 = vadd.f32 %v2923_v16, %v1483_v29  ;;  %10763 = vmatprep.mubr.msk.f32.mxu1 %vm1022_vm1, %v798_v17  ;;  %v12421_v55 = vrot.slane %v12374_v13, %v12306_v27  ;;  %v12425_v56 = vrot.slane %v12316_v36, %v12306_v27 }
  0xff   : > { %11218 = verf.f32 %v3944_v26  ;;  %v3690_v41 = vadd.f32 %v12353_v61, %v3555_v28  ;;  %v3816_v57 = vmul.f32 0.5, %v3688_v15  ;;  %v3815_v58 = vmul.f32 0.5, %v3687_v20  ;;  %v804_v28 = vld [vmem:[%s12039_s28 + $0x3a0] sm:$0xff] }
 0x100   : > { %11220 = verf.f32 %v3943_v33  ;;  %v3689_v46 = vadd.f32 %v12353_v61, %v3554_v34  ;;  %v10606_v47 = vpop.f32.mrb[4].mxu1  ;;  %v2242_v3 = vcombine.high %v12407_v43, %v12407_v43  ;;  %v12434_v4 = vrot.slane %v2241_v44, %v12306_v27 }
 0x101   : > { %v3946_v51 = vmul.f32 0.70710677, %v3690_v41  ;;  %v3557_v52 = vadd.f32 %v10606_v47, %v2935_v30  ;;  %v1493_v54 = vpop.f32.mrb[5].mxu1  ;;  %10764 = vmatmul.mubr.msk.f32.gmra.mrb[110].mxu1 %vm1022_vm1, %v799_v35  ;;  %v12438_v6 = vrot.slane %v2233_v19, %v12306_v27  ;;  %v2225_v8 = vcombine.high %v12416_v50, %v12416_v50  ;;  %v803_v19 = vld [vmem:[%s12039_s28 + $0x398] sm:$0xff] }
 0x102   : > { %v3945_v60 = vmul.f32 0.70710677, %v3689_v46  ;;  %v3556_v62 = vadd.f32 %v2931_v23, %v1493_v54  ;;  %10766 = vmatprep.mubr.msk.f32.mxu1 %vm1022_vm1, %v800_v42  ;;  %v12442_v9 = vmul.f32 0.5, %v3690_v41  ;;  %v2223_v17 = vcombine.high %v12425_v56, %v12425_v56 }
 0x103   : > { %11222 = verf.f32 %v3946_v51  ;;  %v3692_v0 = vadd.f32 %v12353_v61, %v3557_v52  ;;  %v12447_v18 = vmul.f32 0.5, %v3689_v46  ;;  %v2967_v23 = vrot.slane %v12416_v50, %v12296_v21  ;;  %v809_v50 = vld [vmem:[%s12039_s28 + $0x3c8] sm:$0xff] }
 0x104   : > { %11224 = verf.f32 %v3945_v60  ;;  %v3691_v36 = vadd.f32 %v12353_v61, %v3556_v62  ;;  %v10609_v5 = vpop.f32.mrb[6].mxu1  ;;  %v2963_v29 = vrot.slane %v12425_v56, %v12296_v21  ;;  %v2983_v30 = vrot.slane %v12434_v4, %v12296_v21  ;;  %v805_v62 = vld [vmem:[%s12039_s28 + $0x3a8] sm:$0xff] }
 0x105   : > { %v3948_v11 = vmul.f32 0.70710677, %v3692_v0  ;;  %v3559_v15 = vadd.f32 %v10609_v5, %v2943_v37  ;;  %v1503_v16 = vpop.f32.mrb[7].mxu1  ;;  %10767 = vmatmul.mubr.msk.f32.gmra.mrb[112].mxu1 %vm1022_vm1, %v801_v49  ;;  %v12459_v33 = vmul.f32 0.5, %v3692_v0  ;;  %v12463_v35 = vrot.slane %v2225_v8, %v12296_v21  ;;  %v806_v0 = vld [vmem:[%s12039_s28 + $0x3b0] sm:$0xff] }
 0x106   : > { %v3947_v20 = vmul.f32 0.70710677, %v3691_v36  ;;  %v3558_v22 = vadd.f32 %v2939_v31, %v1503_v16  ;;  %10769 = vmatprep.mubr.msk.f32.mxu1 %vm1022_vm1, %v802_v1  ;;  %v12465_v41 = vmul.f32 0.5, %v3691_v36  ;;  %v12472_v47 = vrot.slane %v2223_v17, %v12296_v21 }
 0x107   : > { %11226 = verf.f32 %v3948_v11  ;;  %v3694_v26 = vadd.f32 %v12353_v61, %v3559_v15  ;;  %v2979_v45 = vrot.slane %v12438_v6, %v12296_v21  ;;  %v2273_v1 = vcombine.high %v12434_v4, %v12434_v4  ;;  %v813_v4 = vld [vmem:[%s12039_s28 + $0x3e8] sm:$0xff] }
 0x108   : > { %11228 = verf.f32 %v3947_v20  ;;  %v3693_v31 = vadd.f32 %v12353_v61, %v3558_v22  ;;  %v10612_v34 = vpop.f32.mrb[8].mxu1  ;;  %v12491_v20 = vrot.slane %v2242_v3, %v12306_v27  ;;  %v12531_v56 = vrot.slane %v12407_v43, %v12306_v27 }
 0x109   : > { %v11219_v37 = vpop.eup %11218  ;;  %v3950_v42 = vmul.f32 0.70710677, %v3694_v26  ;;  %v3561_v44 = vadd.f32 %v10612_v34, %v2951_v7  ;;  %v1513_v46 = vpop.f32.mrb[9].mxu1  ;;  %10770 = vmatmul.mubr.msk.f32.gmra.mrb[114].mxu1 %vm1022_vm1, %v803_v19  ;;  %v12493_v19 = vmul.f32 0.5, %v3694_v26  ;;  %v12502_v3 = vrot.slane %v2273_v1, %v12296_v21 }
 0x10a   : > { %v11221_v51 = vpop.eup %11220  ;;  %v4200_v52 = vadd.f32 1.0, %v11219_v37  ;;  %v3949_v54 = vmul.f32 0.70710677, %v3693_v31  ;;  %v3560_v60 = vadd.f32 %v2947_v63, %v1513_v46  ;;  %10772 = vmatprep.mubr.msk.f32.mxu1 %vm1022_vm1, %v804_v28  ;;  %v2271_v63 = vcombine.high %v12438_v6, %v12438_v6 }
 0x10b   : > { %v4199_v7 = vadd.f32 1.0, %v11221_v51  ;;  %11230 = verf.f32 %v3950_v42  ;;  %v3696_v49 = vadd.f32 %v12353_v61, %v3561_v44  ;;  %v808_v42 = vld [vmem:[%s12039_s28 + $0x3c0] sm:$0xff]  ;;  %v3821_v44 = vmul.f32 0.5, %v3693_v31 }
 0x10c   : > { %v4328_v36 = vmul.f32 %v4200_v52, %v3816_v57  ;;  %11232 = verf.f32 %v3949_v54  ;;  %v3695_v5 = vadd.f32 %v12353_v61, %v3560_v60  ;;  %v10615_v38 = vpop.f32.mrb[10].mxu1  ;;  %v2272_v6 = vcombine.high %v12531_v56, %v12531_v56 }
 0x10d   : > { %v11223_v8 = vpop.eup %11222  ;;  %v4327_v11 = vmul.f32 %v4199_v7, %v3815_v58  ;;  %v3952_v15 = vmul.f32 0.70710677, %v3696_v49  ;;  %v3563_v16 = vadd.f32 %v10615_v38, %v12387_v24  ;;  %v1523_v17 = vpop.f32.mrb[11].mxu1  ;;  %10773 = vmatmul.mubr.msk.f32.gmra.mrb[116].mxu1 %vm1022_vm1, %v805_v62  ;;  %v807_v58 = vld [vmem:[%s12039_s28 + $0x3b8] sm:$0xff]  ;;  %v2999_v62 = vrot.slane %v12491_v20, %v12296_v21 }
 0x10e   : > { %v11225_v57 = vpop.eup %11224  ;;  %v4202_v22 = vadd.f32 1.0, %v11223_v8  ;;  %v3951_v28 = vmul.f32 0.70710677, %v3695_v5  ;;  %v3562_v34 = vadd.f32 %v12371_v12, %v1523_v17  ;;  %10775 = vmatprep.mubr.msk.f32.mxu1 %vm1022_vm1, %v806_v0  ;;  %v12507_v12 = vrot.slane %v2271_v63, %v12296_v21  ;;  %v810_v8 = vld [vmem:[%s12039_s28 + $0x3d0] sm:$0xff] }
 0x10f   : > { %v4201_v37 = vadd.f32 1.0, %v11225_v57  ;;  %11234 = verf.f32 %v3952_v15  ;;  %v3698_v24 = vadd.f32 %v12353_v61, %v3563_v16  ;;  %10798 = vmatprep.mubr.msk.f32.mxu0 %vm820_vm0, %v4327_v11  ;;  %v12522_v38 = vmul.f32 0.5, %v3696_v49 }
 0x110   : > { %11236 = verf.f32 %v3951_v28  ;;  %v3697_v26 = vadd.f32 %v12353_v61, %v3562_v34  ;;  %v10618_v46 = vpop.f32.mrb[12].mxu1  ;;  %10799 = vmatmul.mubr.msk.f32.vlgmr.msra.gmra.mrb[16].mxu0 %vm820_vm0, %v4328_v36  ;;  %v4330_v0 = vmul.f32 %v4202_v22, %v12442_v9  ;;  %v3823_v11 = vmul.f32 0.5, %v3695_v5 }
 0x111   : > { %v11227_v51 = vpop.eup %11226  ;;  %v4329_v52 = vmul.f32 %v4201_v37, %v12447_v18  ;;  %v3954_v54 = vmul.f32 0.70710677, %v3698_v24  ;;  %v3565_v60 = vadd.f32 %v10618_v46, %v2967_v23  ;;  %v1533_v31 = vpop.f32.mrb[13].mxu1  ;;  %10776 = vmatmul.mubr.msk.f32.gmra.mrb[118].mxu1 %vm1022_vm1, %v807_v58  ;;  %v2274_v22 = vcombine.high %v12491_v20, %v12491_v20 }
 0x112   : > { %v11229_v7 = vpop.eup %11228  ;;  %v4204_v1 = vadd.f32 1.0, %v11227_v51  ;;  %v3953_v36 = vmul.f32 0.70710677, %v3697_v26  ;;  %v3564_v18 = vadd.f32 %v2963_v29, %v1533_v31  ;;  %10778 = vmatprep.mubr.msk.f32.mxu1 %vm1022_vm1, %v808_v42  ;;  %v12533_v29 = vpop.f32.mrb[8].mxu0  ;;  %v12546_v46 = vmul.f32 0.5, %v3698_v24 }
 0x113   : > { %v4203_v23 = vadd.f32 1.0, %v11229_v7  ;;  %11238 = verf.f32 %v3954_v54  ;;  %v3700_v63 = vadd.f32 %v12353_v61, %v3565_v60  ;;  %10801 = vmatprep.mubr.msk.f32.mxu0 %vm820_vm0, %v4329_v52  ;;  %v12540_v28 = vpop.f32.mrb[9].mxu0  ;;  %v812_v52 = vld [vmem:[%s12039_s28 + $0x3e0] sm:$0xff]  ;;  %v3825_v54 = vmul.f32 0.5, %v3697_v26 }
 0x114   : > { %11240 = verf.f32 %v3953_v36  ;;  %v3699_v9 = vadd.f32 %v12353_v61, %v3564_v18  ;;  %v10621_v15 = vpop.f32.mrb[14].mxu1  ;;  %10802 = vmatmul.mubr.msk.f32.gmra.mrb[18].mxu0 %vm820_vm0, %v4330_v0  ;;  %v4332_v34 = vmul.f32 %v4204_v1, %v12459_v33  ;;  %v12560_v26 = vrot.slane %v2274_v22, %v12296_v21 }
 0x115   : > { %v11231_v49 = vpop.eup %11230  ;;  %v4331_v16 = vmul.f32 %v4203_v23, %v12465_v41  ;;  %v3956_v17 = vmul.f32 0.70710677, %v3700_v63  ;;  %v3567_v57 = vadd.f32 %v10621_v15, %v12463_v35  ;;  %v1543_v5 = vpop.f32.mrb[15].mxu1  ;;  %10779 = vmatmul.mubr.msk.f32.gmra.mrb[120].mxu1 %vm1022_vm1, %v809_v50  ;;  %v811_v41 = vld [vmem:[%s12039_s28 + $0x3d8] sm:$0xff] }
 0x116   : > { %v11233_v43 = vpop.eup %11232  ;;  %v4206_v58 = vadd.f32 1.0, %v11231_v49  ;;  %v3955_v37 = vmul.f32 0.70710677, %v3699_v9  ;;  %v3566_v42 = vadd.f32 %v12472_v47, %v1543_v5  ;;  %10781 = vmatprep.mubr.msk.f32.mxu1 %vm1022_vm1, %v810_v8  ;;  %v2995_v47 = vrot.slane %v12531_v56, %v12296_v21  ;;  %v814_v49 = vld [vmem:[%s12039_s28 + $0x3f0] sm:$0xff] }
 0x117   : > { %v4205_v35 = vadd.f32 1.0, %v11233_v43  ;;  %11242 = verf.f32 %v3956_v17  ;;  %v3702_v51 = vadd.f32 %v12353_v61, %v3567_v57  ;;  %10804 = vmatprep.mubr.msk.f32.mxu0 %vm820_vm0, %v4331_v16  ;;  %v12568_v8 = vmul.f32 0.5, %v3700_v63 }
 0x118   : > { %11244 = verf.f32 %v3955_v37  ;;  %v3701_v33 = vadd.f32 %v12353_v61, %v3566_v42  ;;  %v10624_v60 = vpop.f32.mrb[16].mxu1  ;;  %10805 = vmatmul.mubr.msk.f32.gmra.mrb[20].mxu0 %vm820_vm0, %v4332_v34  ;;  %v4334_v18 = vmul.f32 %v4206_v58, %v12493_v19  ;;  %v3827_v16 = vmul.f32 0.5, %v3699_v9 }
 0x119   : > { %v11235_v31 = vpop.eup %11234  ;;  %v4333_v24 = vmul.f32 %v4205_v35, %v3821_v44  ;;  %v3958_v7 = vmul.f32 0.70710677, %v3702_v51  ;;  %v3569_v0 = vadd.f32 %v10624_v60, %v2983_v30  ;;  %v1553_v1 = vpop.f32.mrb[17].mxu1  ;;  %10782 = vmatmul.mubr.msk.f32.gmra.mrb[122].mxu1 %vm1022_vm1, %v811_v41  ;;  %v12583_v9 = vrot.slane %v2290_v39, %v12306_v27 }
 0x11a   : > { %v11237_v36 = vpop.eup %11236  ;;  %v4208_v50 = vadd.f32 1.0, %v11235_v31  ;;  %v3957_v23 = vmul.f32 0.70710677, %v3701_v33  ;;  %v3568_v44 = vadd.f32 %v2979_v45, %v1553_v1  ;;  %10784 = vmatprep.mubr.msk.f32.mxu1 %vm1022_vm1, %v812_v52  ;;  %v3830_v41 = vmul.f32 0.5, %v3702_v51 }
 0x11b   : > { %v4207_v30 = vadd.f32 1.0, %v11237_v36  ;;  %11246 = verf.f32 %v3958_v7  ;;  %v3704_v15 = vadd.f32 %v12353_v61, %v3569_v0  ;;  %10807 = vmatprep.mubr.msk.f32.mxu0 %vm820_vm0, %v4333_v24  ;;  %v3829_v13 = vmul.f32 0.5, %v3701_v33 }
 0x11c   : > { %11248 = verf.f32 %v3957_v23  ;;  %v3703_v19 = vadd.f32 %v12353_v61, %v3568_v44  ;;  %v10627_v17 = vpop.f32.mrb[18].mxu1  ;;  %10808 = vmatmul.mubr.msk.f32.gmra.mrb[22].mxu0 %vm820_vm0, %v4334_v18  ;;  %v4336_v34 = vmul.f32 %v4208_v50, %v12522_v38  ;;  %v3003_v38 = vrot.slane %v2272_v6, %v12296_v21 }
 0x11d   : > { %v11239_v45 = vpop.eup %11238  ;;  %v4335_v63 = vmul.f32 %v4207_v30, %v3823_v11  ;;  %v3960_v57 = vmul.f32 0.70710677, %v3704_v15  ;;  %v3571_v5 = vadd.f32 %v10627_v17, %v12502_v3  ;;  %v1563_v22 = vpop.f32.mrb[19].mxu1  ;;  %10785 = vmatmul.mubr.msk.f32.gmra.mrb[124].mxu1 %vm1022_vm1, %v813_v4  ;;  %v815_v11 = vld [vmem:[%s12039_s28 + $0x3f8] sm:$0xff]  ;;  %v3015_v33 = vrot.slane %v12583_v9, %v12296_v21  ;;  %s17017_s28 = sld [smem:[#allocation36_spill]] }
 0x11e   : > { %v11241_v43 = vpop.eup %11240  ;;  %v4210_v58 = vadd.f32 1.0, %v11239_v45  ;;  %v3959_v37 = vmul.f32 0.70710677, %v3703_v19  ;;  %v3570_v42 = vadd.f32 %v12507_v12, %v1563_v22  ;;  %10787 = vmatprep.mubr.msk.f32.mxu1 %vm1022_vm1, %v814_v49  ;;  %v3832_v50 = vmul.f32 0.5, %v3704_v15 }
 0x11f   : > { %v4209_v3 = vadd.f32 1.0, %v11241_v43  ;;  %11250 = verf.f32 %v3960_v57  ;;  %v3706_v35 = vadd.f32 %v12353_v61, %v3571_v5  ;;  %10810 = vmatprep.mubr.msk.f32.mxu0 %vm820_vm0, %v4335_v63  ;;  %v2322_v49 = vcombine.high %v12583_v9, %v12583_v9 }
 0x120   : > { %11252 = verf.f32 %v3959_v37  ;;  %v3705_v39 = vadd.f32 %v12353_v61, %v3570_v42  ;;  %v10630_v52 = vpop.f32.mrb[20].mxu1  ;;  %10811 = vmatmul.mubr.msk.f32.gmra.mrb[24].mxu0 %vm820_vm0, %v4336_v34  ;;  %v4338_v0 = vmul.f32 %v4210_v58, %v12546_v46  ;;  %v3011_v46 = vrot.slane %v12421_v55, %v12296_v21 }
 0x121   : > { %v11243_v12 = vpop.eup %11242  ;;  %v4337_v60 = vmul.f32 %v4209_v3, %v3825_v54  ;;  %v3962_v31 = vmul.f32 0.70710677, %v3706_v35  ;;  %v3573_v51 = vadd.f32 %v10630_v52, %v2999_v62  ;;  %v1573_v24 = vpop.f32.mrb[21].mxu1  ;;  %10788 = vmatmul.mubr.msk.f32.gmra.mrb[126].mxu1 %vm1022_vm1, %v815_v11  ;;  %v3831_v62 = vmul.f32 0.5, %v3703_v19 }
 0x122   : > { %v11245_v7 = vpop.eup %11244  ;;  %v4212_v1 = vadd.f32 1.0, %v11243_v12  ;;  %v3961_v36 = vmul.f32 0.70710677, %v3705_v39  ;;  %v3572_v54 = vadd.f32 %v2995_v47, %v1573_v24  ;;  %v3834_v5 = vmul.f32 0.5, %v3706_v35 }
 0x123   : > { %v4211_v18 = vadd.f32 1.0, %v11245_v7  ;;  %11254 = verf.f32 %v3962_v31  ;;  %v3708_v20 = vadd.f32 %v12353_v61, %v3573_v51  ;;  %10813 = vmatprep.mubr.msk.f32.mxu0 %vm820_vm0, %v4337_v60  ;;  %v3023_v11 = vrot.slane %v2322_v49, %v12296_v21  ;;  %s16431_s1 = scalar_lea.vmem %s17017_s28, %s12019_s27 }
 0x124   : > { %11256 = verf.f32 %v3961_v36  ;;  %v3707_v23 = vadd.f32 %v12353_v61, %v3572_v54  ;;  %v10633_v44 = vpop.f32.mrb[22].mxu1  ;;  %10814 = vmatmul.mubr.msk.f32.gmra.mrb[26].mxu0 %vm820_vm0, %v4338_v0  ;;  %v4340_v19 = vmul.f32 %v4212_v1, %v12568_v8  ;;  %v2320_v8 = vcombine.high %v12421_v55, %v12421_v55 }
 0x125   : > { %v11247_v4 = vpop.eup %11246  ;;  %v4339_v56 = vmul.f32 %v4211_v18, %v3827_v16  ;;  %v3964_v47 = vmul.f32 0.70710677, %v3708_v20  ;;  %v3575_v30 = vadd.f32 %v10633_v44, %v12560_v26  ;;  %v1583_v15 = vpop.f32.mrb[23].mxu1  ;;  %v3833_v16 = vmul.f32 0.5, %v3705_v39 }
 0x126   : > { %v11249_v17 = vpop.eup %11248  ;;  %v4214_v6 = vadd.f32 1.0, %v11247_v4  ;;  %v3963_v45 = vmul.f32 0.70710677, %v3707_v23  ;;  %v3574_v63 = vadd.f32 %v3003_v38, %v1583_v15  ;;  %v3836_v60 = vmul.f32 0.5, %v3708_v20 }
 0x127   : > { %v4213_v57 = vadd.f32 1.0, %v11249_v17  ;;  %11258 = verf.f32 %v3964_v47  ;;  %v3710_v22 = vadd.f32 %v12353_v61, %v3575_v30  ;;  %10816 = vmatprep.mubr.msk.f32.mxu0 %vm820_vm0, %v4339_v56  ;;  %v3835_v55 = vmul.f32 0.5, %v3707_v23 }
 0x128   : > { %11260 = verf.f32 %v3963_v45  ;;  %v3709_v26 = vadd.f32 %v12353_v61, %v3574_v63  ;;  %v10636_v43 = vpop.f32.mrb[24].mxu1  ;;  %10817 = vmatmul.mubr.msk.f32.gmra.mrb[28].mxu0 %vm820_vm0, %v4340_v19  ;;  %v4342_v35 = vmul.f32 %v4214_v6, %v3830_v41  ;;  %v3019_v24 = vrot.slane %v2320_v8, %v12296_v21 }
 0x129   : > { %v11251_v9 = vpop.eup %11250  ;;  %v4341_v34 = vmul.f32 %v4213_v57, %v3829_v13  ;;  %v3966_v58 = vmul.f32 0.70710677, %v3710_v22  ;;  %v3577_v37 = vadd.f32 %v10636_v43, %v3015_v33  ;;  %v1593_v42 = vpop.f32.mrb[25].mxu1  ;;  %v2373_v36 = vcombine.high %v12348_v59, %v12348_v59 }
 0x12a   : > { %v11253_v3 = vpop.eup %11252  ;;  %v4216_v52 = vadd.f32 1.0, %v11251_v9  ;;  %v3965_v39 = vmul.f32 0.70710677, %v3709_v26  ;;  %v3576_v38 = vadd.f32 %v3011_v46, %v1593_v42  ;;  %v3838_v4 = vmul.f32 0.5, %v3710_v22 }
 0x12b   : > { %v4215_v12 = vadd.f32 1.0, %v11253_v3  ;;  %11262 = verf.f32 %v3966_v58  ;;  %v3712_v31 = vadd.f32 %v12353_v61, %v3577_v37  ;;  %10819 = vmatprep.mubr.msk.f32.mxu0 %vm820_vm0, %v4341_v34  ;;  %v12637_v30 = vrot.slane %v12348_v59, %v12306_v27 }
 0x12c   : > { %11264 = verf.f32 %v3965_v39  ;;  %v3711_v13 = vadd.f32 %v12353_v61, %v3576_v38  ;;  %v10639_v51 = vpop.f32.mrb[26].mxu1  ;;  %10820 = vmatmul.mubr.msk.f32.gmra.mrb[30].mxu0 %vm820_vm0, %v4342_v35  ;;  %v4344_v18 = vmul.f32 %v4216_v52, %v3832_v50  ;;  %v12644_v6 = vrot.slane %v2373_v36, %v12306_v27 }
 0x12d   : > { %v11255_v41 = vpop.eup %11254  ;;  %v4343_v33 = vmul.f32 %v4215_v12, %v3831_v62  ;;  %v3968_v7 = vmul.f32 0.70710677, %v3712_v31  ;;  %v3579_v0 = vadd.f32 %v10639_v51, %v3023_v11  ;;  %v1603_v1 = vpop.f32.mrb[27].mxu1  ;;  %v3837_v62 = vmul.f32 0.5, %v3709_v26 }
 0x12e   : > { %v11257_v54 = vpop.eup %11256  ;;  %v4218_v20 = vadd.f32 1.0, %v11255_v41  ;;  %v3967_v23 = vmul.f32 0.70710677, %v3711_v13  ;;  %v3578_v44 = vadd.f32 %v3019_v24, %v1603_v1  ;;  %v12640_v17 = vmul.f32 0.5, %v3712_v31 }
 0x12f   : > { %v4217_v46 = vadd.f32 1.0, %v11257_v54  ;;  %11266 = verf.f32 %v3968_v7  ;;  %v12629_v56 = vadd.f32 %v12353_v61, %v3579_v0  ;;  %10822 = vmatprep.mubr.msk.f32.mxu0 %vm820_vm0, %v4343_v33  ;;  %v3839_v26 = vmul.f32 0.5, %v3711_v13 }
 0x130   : > { %11268 = verf.f32 %v3967_v23  ;;  %v12633_v47 = vadd.f32 %v12353_v61, %v3578_v44  ;;  %v10642_v50 = vpop.f32.mrb[28].mxu1  ;;  %10823 = vmatmul.mubr.msk.f32.gmra.mrb[32].mxu0 %vm820_vm0, %v4344_v18  ;;  %v4346_v57 = vmul.f32 %v4218_v20, %v3834_v5  ;;  %v2331_v8 = vrot.slane %v12360_v2, %v12306_v27 }
 0x131   : > { %v11259_v15 = vpop.eup %11258  ;;  %v4345_v49 = vmul.f32 %v4217_v46, %v3833_v16  ;;  %v3970_v19 = vmul.f32 0.70710677, %v12629_v56  ;;  %v1613_v45 = vpop.f32.mrb[29].mxu1  ;;  %v2319_v16 = vrot.slane %v2291_v48, %v12306_v27  ;;  %v2388_v5 = vcombine.high %v12637_v30, %v12637_v30 }
 0x132   : > { %v11261_v63 = vpop.eup %11260  ;;  %v4220_v22 = vadd.f32 1.0, %v11259_v15  ;;  %v3969_v59 = vmul.f32 0.70710677, %v12633_v47  ;;  %v2324_v9 = vcombine.high %v12360_v2, %v12360_v2  ;;  %v2305_v34 = vrot.slane %v12390_v25, %v12306_v27 }
 0x133   : > { %v4219_v43 = vadd.f32 1.0, %v11261_v63  ;;  %11270 = verf.f32 %v3970_v19  ;;  %10825 = vmatprep.mubr.msk.f32.mxu0 %vm820_vm0, %v4345_v49  ;;  %v2339_v11 = vcombine.high %v2331_v8, %v2331_v8  ;;  %v12662_v48 = vrot.slane %v2331_v8, %v12306_v27 }
 0x134   : > { %11272 = verf.f32 %v3969_v59  ;;  %v10645_v58 = vpop.f32.mrb[30].mxu1  ;;  %10826 = vmatmul.mubr.msk.f32.gmra.mrb[34].mxu0 %vm820_vm0, %v4346_v57  ;;  %v3031_v3 = vrot.slane %v2319_v16, %v12296_v21  ;;  %v4348_v39 = vmul.f32 %v4220_v22, %v3836_v60  ;;  %v3027_v2 = vrot.slane %v2305_v34, %v12296_v21 }
 0x135   : > { %v11263_v37 = vpop.eup %11262  ;;  %v4347_v42 = vmul.f32 %v4219_v43, %v3835_v55  ;;  %v1623_v35 = vpop.f32.mrb[31].mxu1  ;;  %v2323_v12 = vcombine.high %v2319_v16, %v2319_v16  ;;  %v2321_v13 = vcombine.high %v2305_v34, %v2305_v34  ;;  %v2361_v55 = vrot.slane %v2339_v11, %v12306_v27 }
 0x136   : > { %v11265_v52 = vpop.eup %11264  ;;  %v4222_v38 = vadd.f32 1.0, %v11263_v37  ;;  %v3581_v25 = vadd.f32 %v10642_v50, %v3031_v3  ;;  %v3580_v24 = vadd.f32 %v3027_v2, %v1613_v45  ;;  %v3043_v60 = vrot.slane %v12662_v48, %v12296_v21 }
 0x137   : > { %v4221_v31 = vadd.f32 1.0, %v11265_v52  ;;  %10828 = vmatprep.mubr.msk.f32.mxu0 %vm820_vm0, %v4347_v42  ;;  %v3039_v41 = vrot.slane %v2323_v12, %v12296_v21  ;;  %v3035_v36 = vrot.slane %v2321_v13, %v12296_v21  ;;  %v3047_v54 = vrot.slane %v2361_v55, %v12296_v21 }
 0x138   : > { %v4350_v51 = vmul.f32 %v4222_v38, %v3838_v4  ;;  %v10648_v33 = vpop.f32.mrb[32].mxu1  ;;  %10829 = vmatmul.mubr.msk.f32.gmra.mrb[36].mxu0 %vm820_vm0, %v4348_v39  ;;  %v3716_v1 = vadd.f32 %v12353_v61, %v3581_v25  ;;  %v3715_v44 = vadd.f32 %v12353_v61, %v3580_v24  ;;  %v2338_v15 = vrot.slane %v2324_v9, %v12306_v27 }
 0x139   : > { %v11267_v7 = vpop.eup %11266  ;;  %v4349_v0 = vmul.f32 %v4221_v31, %v3837_v62  ;;  %v1633_v18 = vpop.f32.mrb[33].mxu1  ;;  %v3583_v46 = vadd.f32 %v10645_v58, %v3039_v41  ;;  %v3582_v19 = vadd.f32 %v3035_v36, %v1623_v35  ;;  %v3841_v62 = vmul.f32 0.5, %v12633_v47 }
 0x13a   : > { %v11269_v20 = vpop.eup %11268  ;;  %v4224_v23 = vadd.f32 1.0, %v11267_v7  ;;  %v3584_v4 = vadd.f32 %v3043_v60, %v1633_v18  ;;  %v3972_v49 = vmul.f32 0.70710677, %v3716_v1  ;;  %v2389_v45 = vcombine.high %v12644_v6, %v12644_v6 }
 0x13b   : > { %v4223_v50 = vadd.f32 1.0, %v11269_v20  ;;  %10831 = vmatprep.mubr.msk.f32.mxu0 %vm820_vm0, %v4349_v0  ;;  %v3971_v63 = vmul.f32 0.70710677, %v3715_v44  ;;  %v3718_v57 = vadd.f32 %v12353_v61, %v3583_v46  ;;  %v3717_v8 = vadd.f32 %v12353_v61, %v3582_v19 }
 0x13c   : > { %v10651_v22 = vpop.f32.mrb[34].mxu1  ;;  %10832 = vmatmul.mubr.msk.f32.gmra.mrb[38].mxu0 %vm820_vm0, %v4350_v51  ;;  %11274 = verf.f32 %v3972_v49  ;;  %v3585_v16 = vadd.f32 %v10648_v33, %v3047_v54  ;;  %v4352_v58 = vmul.f32 %v4224_v23, %v12640_v17  ;;  %v2340_v11 = vcombine.high %v2338_v15, %v2338_v15  ;;  %v12692_v17 = vpop.f32.mrb[10].mxu0 }
 0x13d   : > { %v11271_v59 = vpop.eup %11270  ;;  %v4351_v43 = vmul.f32 %v4223_v50, %v3839_v26  ;;  %v1643_v9 = vpop.f32.mrb[35].mxu1  ;;  %11276 = verf.f32 %v3971_v63  ;;  %v3974_v37 = vmul.f32 0.70710677, %v3718_v57  ;;  %v3973_v3 = vmul.f32 0.70710677, %v3717_v8 }
 0x13e   : > { %v11273_v34 = vpop.eup %11272  ;;  %v4226_v47 = vadd.f32 1.0, %v11271_v59  ;;  %v3720_v35 = vadd.f32 %v12353_v61, %v3585_v16  ;;  %v3842_v26 = vmul.f32 0.5, %v12629_v56  ;;  %v12689_v52 = vadd.f32 %v12353_v61, %v3584_v4  ;;  %v12698_v13 = vpop.f32.mrb[11].mxu0 }
 0x13f   : > { %v4225_v42 = vadd.f32 1.0, %v11273_v34  ;;  %10834 = vmatprep.mubr.msk.f32.mxu0 %vm820_vm0, %v4351_v43  ;;  %11278 = verf.f32 %v3974_v37  ;;  %v2371_v39 = vcombine.high %v2361_v55, %v2361_v55  ;;  %v12696_v12 = vrot.slane %v12637_v30, %v12306_v27 }
 0x140   : > { %v10654_v38 = vpop.f32.mrb[36].mxu1  ;;  %10835 = vmatmul.mubr.msk.f32.gmra.mrb[40].mxu0 %vm820_vm0, %v4352_v58  ;;  %11280 = verf.f32 %v3973_v3  ;;  %v3976_v31 = vmul.f32 0.70710677, %v3720_v35  ;;  %v4354_v56 = vmul.f32 %v4226_v47, %v3842_v26  ;;  %v3975_v51 = vmul.f32 0.70710677, %v12689_v52 }
 0x141   : > { %v4353_v2 = vmul.f32 %v4225_v42, %v3841_v62  ;;  %v1653_v25 = vpop.f32.mrb[37].mxu1  ;;  %v3055_v55 = vrot.slane %v2371_v39, %v12296_v21  ;;  %v2369_v24 = vcombine.high %v12662_v48, %v12662_v48  ;;  %v3844_v41 = vmul.f32 0.5, %v3716_v1 }
 0x142   : > { %11282 = verf.f32 %v3976_v31  ;;  %v2368_v33 = vrot.slane %v2340_v11, %v12306_v27  ;;  %v2354_v60 = vrot.slane %v2338_v15, %v12306_v27  ;;  %v3843_v7 = vmul.f32 0.5, %v3715_v44 }
 0x143   : > { %10837 = vmatprep.mubr.msk.f32.mxu0 %vm820_vm0, %v4353_v2  ;;  %11284 = verf.f32 %v3975_v51  ;;  %v3587_v0 = vadd.f32 %v10651_v22, %v3055_v55  ;;  %v3051_v36 = vrot.slane %v2369_v24, %v12296_v21  ;;  %v3846_v18 = vmul.f32 0.5, %v3718_v57 }
 0x144   : > { %v10657_v54 = vpop.f32.mrb[38].mxu1  ;;  %10838 = vmatmul.mubr.msk.f32.gmra.mrb[42].mxu0 %vm820_vm0, %v4354_v56  ;;  %v3063_v20 = vrot.slane %v2368_v33, %v12296_v21  ;;  %v3059_v48 = vrot.slane %v2354_v60, %v12296_v21  ;;  %v2372_v1 = vcombine.high %v2368_v33, %v2368_v33  ;;  %v3845_v46 = vmul.f32 0.5, %v3717_v8 }
 0x145   : > { %v1663_v23 = vpop.f32.mrb[39].mxu1  ;;  %v3722_v4 = vadd.f32 %v12353_v61, %v3587_v0  ;;  %v3586_v50 = vadd.f32 %v3051_v36, %v1643_v9  ;;  %v2410_v44 = vrot.slane %v2388_v5, %v12306_v27  ;;  %v2370_v63 = vcombine.high %v2354_v60, %v2354_v60 }
 0x146   : > { %v11275_v15 = vpop.eup %11274  ;;  %v3589_v49 = vadd.f32 %v10654_v38, %v3063_v20  ;;  %v3588_v19 = vadd.f32 %v3059_v48, %v1653_v25  ;;  %v3071_v62 = vrot.slane %v2372_v1, %v12296_v21  ;;  %v3848_v59 = vmul.f32 0.5, %v3720_v35 }
 0x147   : > { %v11277_v57 = vpop.eup %11276  ;;  %v4228_v22 = vadd.f32 1.0, %v11275_v15  ;;  %v3978_v43 = vmul.f32 0.70710677, %v3722_v4  ;;  %v3721_v8 = vadd.f32 %v12353_v61, %v3586_v50  ;;  %v3079_v42 = vrot.slane %v2410_v44, %v12296_v21 }
 0x148   : > { %v10660_v16 = vpop.f32.mrb[40].mxu1  ;;  %v4227_v34 = vadd.f32 1.0, %v11277_v57  ;;  %v3724_v9 = vadd.f32 %v12353_v61, %v3589_v49  ;;  %v3723_v58 = vadd.f32 %v12353_v61, %v3588_v19  ;;  %v3591_v30 = vadd.f32 %v10657_v54, %v3071_v62 }
 0x149   : > { %v1673_v5 = vpop.f32.mrb[41].mxu1  ;;  %v11279_v47 = vpop.eup %11278  ;;  %11286 = verf.f32 %v3978_v43  ;;  %v3977_v37 = vmul.f32 0.70710677, %v3721_v8  ;;  %v2420_v11 = vcombine.high %v2410_v44, %v2410_v44  ;;  %v4356_v26 = vmul.f32 %v4228_v22, %v3844_v41 }
 0x14a   : > { %v11281_v3 = vpop.eup %11280  ;;  %v4355_v35 = vmul.f32 %v4227_v34, %v3843_v7  ;;  %v3980_v39 = vmul.f32 0.70710677, %v3724_v9  ;;  %v3067_v38 = vrot.slane %v2370_v63, %v12296_v21  ;;  %v4230_v2 = vadd.f32 1.0, %v11279_v47 }
 0x14b   : > { %v4229_v31 = vadd.f32 1.0, %v11281_v3  ;;  %11288 = verf.f32 %v3977_v37  ;;  %v3979_v25 = vmul.f32 0.70710677, %v3723_v58  ;;  %v3847_v55 = vmul.f32 0.5, %v12689_v52 }
 0x14c   : > { %v10663_v56 = vpop.f32.mrb[42].mxu1  ;;  %v11283_v51 = vpop.eup %11282  ;;  %11290 = verf.f32 %v3980_v39  ;;  %v3726_v24 = vadd.f32 %v12353_v61, %v3591_v30  ;;  %v3590_v33 = vadd.f32 %v3067_v38, %v1663_v23  ;;  %10840 = vmatprep.mubr.msk.f32.mxu0 %vm820_vm0, %v4355_v35  ;;  %v3593_v0 = vadd.f32 %v10660_v16, %v3079_v42 }
 0x14d   : > { %v1683_v60 = vpop.f32.mrb[43].mxu1  ;;  %v11285_v41 = vpop.eup %11284  ;;  %v4357_v7 = vmul.f32 %v4229_v31, %v3845_v46  ;;  %11292 = verf.f32 %v3979_v25  ;;  %10841 = vmatmul.mubr.msk.f32.gmra.mrb[44].mxu0 %vm820_vm0, %v4356_v26  ;;  %v3075_v36 = vrot.slane %v12696_v12, %v12296_v21  ;;  %v4232_v54 = vadd.f32 1.0, %v11283_v51 }
 0x14e   : > { %v4231_v20 = vadd.f32 1.0, %v11285_v41  ;;  %v3982_v48 = vmul.f32 0.70710677, %v3726_v24  ;;  %v3725_v52 = vadd.f32 %v12353_v61, %v3590_v33  ;;  %v4358_v1 = vmul.f32 %v4230_v2, %v3846_v18  ;;  %v12739_v18 = vld [vmem:[%s16761_s6] ss:$0 sm:$0xff] }
 0x14f   : > { %v3728_v23 = vadd.f32 %v12353_v61, %v3593_v0  ;;  %v3592_v50 = vadd.f32 %v3075_v36, %v1673_v5  ;;  %10843 = vmatprep.mubr.msk.f32.mxu0 %vm820_vm0, %v4357_v7  ;;  %v3087_v46 = vrot.slane %v2420_v11, %v12296_v21  ;;  %v3850_v49 = vmul.f32 0.5, %v3722_v4 }
 0x150   : > { %v12732_v44 = vpop.f32.mrb[44].mxu1  ;;  %v4359_v15 = vmul.f32 %v4231_v20, %v3847_v55  ;;  %11294 = verf.f32 %v3982_v48  ;;  %v3981_v19 = vmul.f32 0.70710677, %v3725_v52  ;;  %v3849_v63 = vmul.f32 0.5, %v3721_v8 }
 0x151   : > { %v12734_v62 = vpop.f32.mrb[45].mxu1  ;;  %v3984_v57 = vmul.f32 0.70710677, %v3728_v23  ;;  %v3727_v61 = vadd.f32 %v12739_v18, %v3592_v50  ;;  %v3595_v22 = vadd.f32 %v10663_v56, %v3087_v46  ;;  %10844 = vmatmul.mubr.msk.f32.gmra.mrb[46].mxu0 %vm820_vm0, %v4358_v1  ;;  %v4360_v43 = vmul.f32 %v4232_v54, %v3848_v59 }
 0x152   : > { %v3852_v16 = vmul.f32 0.5, %v3724_v9  ;;  %11296 = verf.f32 %v3981_v19  ;;  %v2418_v4 = vcombine.high %v12696_v12, %v12696_v12  ;;  %10846 = vmatprep.mubr.msk.f32.mxu0 %vm820_vm0, %v4359_v15  ;;  %v2471_v5 = vcombine.high %v12395_v32, %v12395_v32 }
 0x153   : > { %v11287_v8 = vpop.eup %11286  ;;  %11298 = verf.f32 %v3984_v57  ;;  %v3983_v34 = vmul.f32 0.70710677, %v3727_v61  ;;  %v3730_v30 = vadd.f32 %v12739_v18, %v3595_v22  ;;  %v3851_v37 = vmul.f32 0.5, %v3723_v58 }
 0x154   : > { %v12749_v47 = vpop.f32.mrb[46].mxu1  ;;  %v12751_v42 = vmul.f32 0.5, %v3726_v24  ;;  %v3853_v59 = vmul.f32 0.5, %v3725_v52  ;;  %v3083_v9 = vrot.slane %v2418_v4, %v12296_v21  ;;  %v4234_v3 = vadd.f32 1.0, %v11287_v8 }
 0x155   : > { %v12754_v11 = vpop.f32.mrb[47].mxu1  ;;  %v11289_v12 = vpop.eup %11288  ;;  %11300 = verf.f32 %v3983_v34  ;;  %v3986_v26 = vmul.f32 0.70710677, %v3730_v30  ;;  %v12758_v35 = vrot.slane %v12395_v32, %v12306_v27  ;;  %10847 = vmatmul.mubr.msk.f32.gmra.mrb[48].mxu0 %vm820_vm0, %v4360_v43  ;;  %v12761_v58 = vmul.f32 0.5, %v3728_v23 }
 0x156   : > { %v11291_v39 = vpop.eup %11290  ;;  %v4233_v38 = vadd.f32 1.0, %v11289_v12  ;;  %v12763_v2 = vmul.f32 0.5, %v3727_v61  ;;  %v3594_v31 = vadd.f32 %v3083_v9, %v1683_v60  ;;  %v12766_v51 = vrot.slane %v2471_v5, %v12306_v27 }
 0x157   : > { %v11293_v25 = vpop.eup %11292  ;;  %v4236_v56 = vadd.f32 1.0, %v11291_v39  ;;  %11302 = verf.f32 %v3986_v26  ;;  %v2422_v55 = vcombine.high %v12402_v40, %v12402_v40  ;;  %v2417_v60 = vrot.slane %v2389_v45, %v12306_v27 }
 0x158   : > { %v12770_v32 = vpop.f32.mrb[48].mxu1  ;;  %v4361_v24 = vmul.f32 %v4233_v38, %v3849_v63  ;;  %v4235_v33 = vadd.f32 1.0, %v11293_v25  ;;  %v3729_v41 = vadd.f32 %v12739_v18, %v3594_v31  ;;  %v4362_v0 = vmul.f32 %v4234_v3, %v3850_v49  ;;  %v12795_v49 = vld [vmem:[%s12278_s25] sm:$0xff] }
 0x159   : > { %v12777_v7 = vpop.f32.mrb[49].mxu1  ;;  %v12779_v36 = vmul.f32 0.5, %v3730_v30  ;;  %v2486_v54 = vcombine.high %v12758_v35, %v12758_v35  ;;  %v12785_v20 = vrot.slane %v12402_v40, %v12306_v27  ;;  %v4364_v52 = vmul.f32 %v4236_v56, %v3852_v16 }
 0x15a   : > { %v11295_v48 = vpop.eup %11294  ;;  %v4363_v1 = vmul.f32 %v4235_v33, %v3851_v37  ;;  %v3985_v23 = vmul.f32 0.70710677, %v3729_v41  ;;  %v3095_v50 = vrot.slane %v2417_v60, %v12296_v21  ;;  %10849 = vmatprep.mubr.msk.f32.mxu0 %vm820_vm0, %v4361_v24  ;;  %v12790_v46 = vrot.slane %v2422_v55, %v12306_v27 }
 0x15b   : > { %v4238_v45 = vadd.f32 1.0, %v11295_v48  ;;  %v2403_v15 = vrot.slane %v12644_v6, %v12306_v27  ;;  %v6235_v40 = vrot.slane %v12795_v49, %v12343_v53  ;;  %10850 = vmatmul.mubr.msk.f32.gmra.mrb[50].mxu0 %vm820_vm0, %v4362_v0  ;;  %v12804_v61 = vsub.s32 1, %v12281_v10  ;;  %v12848_v48 = vld [vmem:[%s12278_s25 + $0x8] sm:$0xff] }
 0x15c   : > { %v12800_v19 = vpop.f32.mrb[50].mxu1  ;;  %v11297_v63 = vpop.eup %11296  ;;  %11304 = verf.f32 %v3985_v23  ;;  %v3597_v57 = vadd.f32 %v12732_v44, %v3095_v50  ;;  %v2421_v22 = vcombine.high %v2417_v60, %v2417_v60  ;;  %10852 = vmatprep.mubr.msk.f32.mxu0 %vm820_vm0, %v4363_v1  ;;  %v2437_v4 = vcombine.high %v12785_v20, %v12785_v20 }
 0x15d   : > { %v12807_v6 = vpop.f32.mrb[51].mxu1  ;;  %v11299_v43 = vpop.eup %11298  ;;  %v4237_v16 = vadd.f32 1.0, %v11297_v63  ;;  %v3091_v8 = vrot.slane %v2403_v15, %v12296_v21  ;;  %6237 = vbcast.lane.b32.xlu1 %v6235_v40, 256  ;;  %v2419_v34 = vcombine.high %v2403_v15, %v2403_v15  ;;  %v12814_v44 = vrot.slane %v12785_v20, %v12306_v27 }
 0x15e   : > { %v12817_v30 = vadd.f32 %v12739_v18, %v3597_v57  ;;  %v6221_v5 = vrot.slane %v12795_v49, %v12804_v61  ;;  %v3103_v37 = vrot.slane %v2421_v22, %v12296_v21  ;;  %v12825_v39 = vsub.s32 4, %v12281_v10 }
 0x15f   : > { %v11301_v9 = vpop.eup %11300  ;;  %v4365_v12 = vmul.f32 %v4237_v16, %v3853_v59  ;;  %v3596_v3 = vadd.f32 %v3091_v8, %v12734_v62  ;;  %v3099_v26 = vrot.slane %v2419_v34, %v12296_v21  ;;  %10853 = vmatmul.mubr.msk.f32.gmra.mrb[52].mxu0 %vm820_vm0, %v4364_v52  ;;  %v4366_v31 = vmul.f32 %v4238_v45, %v12751_v42 }
 0x160   : > { %v12828_v38 = vpop.f32.mrb[52].mxu1  ;;  %v4240_v25 = vadd.f32 1.0, %v11299_v43  ;;  %v4239_v56 = vadd.f32 1.0, %v11301_v9  ;;  %v3988_v55 = vmul.f32 0.70710677, %v12817_v30  ;;  %6223 = vbcast.lane.b32.xlu0 %v6221_v5, 256  ;;  %v3599_v33 = vadd.f32 %v12749_v47, %v3103_v37 }
 0x161   : > { %v12832_v59 = vpop.f32.mrb[53].mxu1  ;;  %v11303_v62 = vpop.eup %11302  ;;  %v12835_v24 = vadd.f32 %v12739_v18, %v3596_v3  ;;  %v3598_v60 = vadd.f32 %v3099_v26, %v12754_v11  ;;  %v6242_v0 = vrot.slane %v12795_v49, %v12825_v39  ;;  %10855 = vmatprep.mubr.msk.f32.mxu0 %vm820_vm0, %v4365_v12  ;;  %v12845_v20 = vrot.slane %v12758_v35, %v12306_v27  ;;  %v12881_v5 = vld [vmem:[%s12278_s25 + $0x10] sm:$0xff] }
 0x162   : > { %v4367_v42 = vmul.f32 %v4239_v56, %v12763_v2  ;;  %11306 = verf.f32 %v3988_v55  ;;  %v6277_v52 = vrot.slane %v12848_v48, %v12804_v61  ;;  %v3857_v47 = vmul.f32 0.5, %v3729_v41 }
 0x163   : > { %v3987_v11 = vmul.f32 0.70710677, %v12835_v24  ;;  %v12854_v1 = vadd.f32 %v12739_v18, %v3599_v33  ;;  %v12857_v23 = vadd.f32 %v12739_v18, %v3598_v60  ;;  %6244 = vbcast.lane.b32.xlu1 %v6242_v0, 256  ;;  %10856 = vmatmul.mubr.msk.f32.gmra.mrb[54].mxu0 %vm820_vm0, %v4366_v31  ;;  %v2438_v50 = vcombine.high %v12790_v46, %v12790_v46 }
 0x164   : > { %v12860_v2 = vpop.f32.mrb[54].mxu1  ;;  %6279 = vbcast.lane.b32.xlu0 %v6277_v52, 256  ;;  %v2459_v41 = vrot.slane %v2437_v4, %v12306_v27  ;;  %v3107_v45 = vrot.slane %v12814_v44, %v12296_v21  ;;  %v12868_v15 = vsub.s32 5, %v12281_v10  ;;  %10858 = vmatprep.mubr.msk.f32.mxu0 %vm820_vm0, %v4367_v42  ;;  %v4368_v63 = vmul.f32 %v4240_v25, %v12761_v58 }
 0x165   : > { %v12871_v40 = vpop.f32.mrb[55].mxu1  ;;  %v4242_v57 = vadd.f32 1.0, %v11303_v62  ;;  %11308 = verf.f32 %v3987_v11  ;;  %v3990_v22 = vmul.f32 0.70710677, %v12854_v1  ;;  %v3989_v16 = vmul.f32 0.70710677, %v12857_v23 }
 0x166   : > { %v11305_v43 = vpop.eup %11304  ;;  %v3111_v4 = vrot.slane %v2459_v41, %v12296_v21  ;;  %v3600_v8 = vadd.f32 %v3107_v45, %v12777_v7  ;;  %v6249_v34 = vrot.slane %v12795_v49, %v12868_v15  ;;  %v6284_v58 = vrot.slane %v12848_v48, %v12288_v14 }
 0x167   : > { %v4241_v37 = vadd.f32 1.0, %v11305_v43  ;;  %11310 = verf.f32 %v3990_v22  ;;  %v2469_v9 = vcombine.high %v2459_v41, %v2459_v41  ;;  %10859 = vmatmul.mubr.msk.f32.gmra.mrb[56].mxu0 %vm820_vm0, %v4368_v63  ;;  %v2467_v26 = vcombine.high %v12814_v44, %v12814_v44 }
 0x168   : > { %v12886_v12 = vpop.f32.mrb[56].mxu1  ;;  %11312 = verf.f32 %v3989_v16  ;;  %v3601_v3 = vadd.f32 %v12770_v32, %v3111_v4  ;;  %v12890_v7 = vadd.f32 %v12739_v18, %v3600_v8  ;;  %6251 = vbcast.lane.b32.xlu1 %v6249_v34, 256  ;;  %6286 = vbcast.lane.b32.xlu0 %v6284_v58, 256  ;;  %v6326_v55 = vrot.slane %v12881_v5, %v12296_v21  ;;  %v12901_v32 = vpop.f32.mrb[12].mxu0 }
 0x169   : > { %v12894_v31 = vpop.f32.mrb[57].mxu1  ;;  %v4369_v25 = vmul.f32 %v4241_v37, %v3857_v47  ;;  %v3119_v56 = vrot.slane %v2469_v9, %v12296_v21  ;;  %v6291_v62 = vrot.slane %v12848_v48, %v12343_v53  ;;  %v4370_v33 = vmul.f32 %v4242_v57, %v12779_v36  ;;  %v12909_v42 = vpop.f32.mrb[13].mxu0 }
 0x16a   : > { %v12905_v60 = vadd.f32 %v12739_v18, %v3601_v3  ;;  %v3991_v44 = vmul.f32 0.70710677, %v12890_v7  ;;  %v3115_v0 = vrot.slane %v2467_v26, %v12296_v21  ;;  %16785 = vst [vmem:[#allocation2_spill] sm:$0xff] %v12909_v42  ;;  %v2466_v47 = vrot.slane %v2438_v50, %v12306_v27 }
 0x16b   : > { %v3603_v52 = vadd.f32 %v12800_v19, %v3119_v56  ;;  %v2452_v11 = vrot.slane %v12790_v46, %v12306_v27  ;;  %v12916_v41 = vsub.s32 6, %v12281_v10  ;;  %10861 = vmatprep.mubr.msk.f32.mxu0 %vm820_vm0, %v4369_v25  ;;  %v3860_v63 = vmul.f32 0.5, %v12817_v30 }
 0x16c   : > { %v12919_v36 = vpop.f32.mrb[58].mxu1  ;;  %v11307_v45 = vpop.eup %11306  ;;  %v3992_v57 = vmul.f32 0.70710677, %v12905_v60  ;;  %11314 = verf.f32 %v3991_v44  ;;  %v3602_v19 = vadd.f32 %v3115_v0, %v12807_v6  ;;  %6328 = vbcast.lane.b32.xlu1 %v6326_v55, 256  ;;  %10862 = vmatmul.mubr.msk.f32.gmra.mrb[58].mxu0 %vm820_vm0, %v4370_v33  ;;  %v3859_v46 = vmul.f32 0.5, %v12835_v24 }
 0x16d   : > { %v12925_v50 = vpop.f32.mrb[59].mxu1  ;;  %v12929_v22 = vadd.f32 %v12739_v18, %v3603_v52  ;;  %6293 = vbcast.lane.b32.xlu0 %v6291_v62, 256  ;;  %v3127_v43 = vrot.slane %v2466_v47, %v12296_v21  ;;  %v3123_v30 = vrot.slane %v2452_v11, %v12296_v21  ;;  %v6256_v6 = vrot.slane %v12795_v49, %v12916_v41 }
 0x16e   : > { %11316 = verf.f32 %v3992_v57  ;;  %v12934_v16 = vadd.f32 %v12739_v18, %v3602_v19  ;;  %v6298_v4 = vrot.slane %v12848_v48, %v12825_v39  ;;  %v4244_v24 = vadd.f32 1.0, %v11307_v45 }
 0x16f   : > { %v11309_v8 = vpop.eup %11308  ;;  %v3862_v34 = vmul.f32 0.5, %v12854_v1  ;;  %v3994_v37 = vmul.f32 0.70710677, %v12929_v22  ;;  %v3605_v58 = vadd.f32 %v12828_v38, %v3127_v43  ;;  %v3861_v26 = vmul.f32 0.5, %v12857_v23 }
 0x170   : > { %v12943_v9 = vpop.f32.mrb[60].mxu1  ;;  %v4243_v3 = vadd.f32 1.0, %v11309_v8  ;;  %v3993_v25 = vmul.f32 0.70710677, %v12934_v16  ;;  %v3604_v56 = vadd.f32 %v3123_v30, %v12832_v59  ;;  %6258 = vbcast.lane.b32.xlu1 %v6256_v6, 256  ;;  %v2470_v33 = vcombine.high %v2466_v47, %v2466_v47  ;;  %v12965_v6 = vld [vmem:[%s12278_s25 + $0x18] sm:$0xff] }
 0x171   : > { %v12948_v55 = vpop.f32.mrb[61].mxu1  ;;  %v11311_v62 = vpop.eup %11310  ;;  %11318 = verf.f32 %v3994_v37  ;;  %v12951_v1 = vadd.f32 %v12739_v18, %v3605_v58  ;;  %6300 = vbcast.lane.b32.xlu0 %v6298_v4, 256  ;;  %v2468_v38 = vcombine.high %v2452_v11, %v2452_v11  ;;  %v4372_v59 = vmul.f32 %v4244_v24, %v3860_v63 }
 0x172   : > { %v11313_v44 = vpop.eup %11312  ;;  %v4371_v0 = vmul.f32 %v4243_v3, %v3859_v46  ;;  %v4246_v52 = vadd.f32 1.0, %v11311_v62  ;;  %11320 = verf.f32 %v3993_v25  ;;  %v12954_v23 = vadd.f32 %v12739_v18, %v3604_v56 }
 0x173   : > { %v4245_v45 = vadd.f32 1.0, %v11313_v44  ;;  %v3996_v57 = vmul.f32 0.70710677, %v12951_v1  ;;  %v3135_v19 = vrot.slane %v2470_v33, %v12296_v21  ;;  %v3863_v47 = vmul.f32 0.5, %v12890_v7 }
 0x174   : > { %v12958_v43 = vpop.f32.mrb[62].mxu1  ;;  %v4374_v30 = vmul.f32 %v4246_v52, %v3862_v34  ;;  %v3995_v11 = vmul.f32 0.70710677, %v12954_v23  ;;  %v3131_v46 = vrot.slane %v2468_v38, %v12296_v21  ;;  %10864 = vmatprep.mubr.msk.f32.mxu0 %vm820_vm0, %v4371_v0  ;;  %v6340_v24 = vrot.slane %v12881_v5, %v12288_v14 }
 0x175   : > { %v12967_v4 = vpop.f32.mrb[63].mxu1  ;;  %v4373_v63 = vmul.f32 %v4245_v45, %v3861_v26  ;;  %11322 = verf.f32 %v3996_v57  ;;  %v3607_v8 = vadd.f32 %v12860_v2, %v3135_v19  ;;  %10865 = vmatmul.mubr.msk.f32.gmra.mrb[60].mxu0 %vm820_vm0, %v4372_v59  ;;  %v6333_v37 = vrot.slane %v12881_v5, %v12804_v61 }
 0x176   : > { %v11315_v7 = vpop.eup %11314  ;;  %11324 = verf.f32 %v3995_v11  ;;  %v3606_v34 = vadd.f32 %v3131_v46, %v12871_v40  ;;  %v2508_v58 = vrot.slane %v2486_v54, %v12306_v27  ;;  %6342 = vbcast.lane.b32.xlu1 %v6340_v24, 256  ;;  %v3139_v26 = vrot.slane %v12845_v20, %v12296_v21 }
 0x177   : > { %v4247_v3 = vadd.f32 1.0, %v11315_v7  ;;  %v12981_v2 = vadd.f32 %v12739_v18, %v3607_v8  ;;  %v6389_v25 = vrot.slane %v12965_v6, %v12804_v61  ;;  %10867 = vmatprep.mubr.msk.f32.mxu0 %vm820_vm0, %v4373_v63  ;;  %6335 = vbcast.lane.b32.xlu0 %v6333_v37, 256  ;;  %v6305_v54 = vrot.slane %v12848_v48, %v12868_v15 }
 0x178   : > { %v12988_v40 = vpop.f32.mrb[64].mxu1  ;;  %v11317_v56 = vpop.eup %11316  ;;  %v3741_v62 = vadd.f32 %v12739_v18, %v3606_v34  ;;  %v3143_v35 = vrot.slane %v2508_v58, %v12296_v21  ;;  %v2518_v33 = vcombine.high %v2508_v58, %v2508_v58  ;;  %v3864_v44 = vmul.f32 0.5, %v12905_v60 }
 0x179   : > { %v12994_v38 = vpop.f32.mrb[65].mxu1  ;;  %v4248_v0 = vadd.f32 1.0, %v11317_v56  ;;  %v4375_v52 = vmul.f32 %v4247_v3, %v3863_v47  ;;  %v3998_v59 = vmul.f32 0.70710677, %v12981_v2  ;;  %10868 = vmatmul.mubr.msk.f32.gmra.mrb[62].mxu0 %vm820_vm0, %v4374_v30  ;;  %v3865_v45 = vmul.f32 0.5, %v12934_v16 }
 0x17a   : > { %v3997_v57 = vmul.f32 0.70710677, %v3741_v62  ;;  %v3609_v19 = vadd.f32 %v12886_v12, %v3143_v35  ;;  %v3608_v11 = vadd.f32 %v3139_v26, %v12894_v31  ;;  %6391 = vbcast.lane.b32.xlu1 %v6389_v25, 256  ;;  %v3151_v8 = vrot.slane %v2518_v33, %v12296_v21 }
 0x17b   : > { %v11319_v46 = vpop.eup %11318  ;;  %v4376_v63 = vmul.f32 %v4248_v0, %v3864_v44  ;;  %11326 = verf.f32 %v3998_v59  ;;  %v2516_v60 = vcombine.high %v12845_v20, %v12845_v20  ;;  %10870 = vmatprep.mubr.msk.f32.mxu0 %vm820_vm0, %v4375_v52  ;;  %6307 = vbcast.lane.b32.xlu0 %v6305_v54, 256  ;;  %v6312_v20 = vrot.slane %v12848_v48, %v12916_v41 }
 0x17c   : > { %v13006_v47 = vpop.f32.mrb[66].mxu1  ;;  %v11321_v30 = vpop.eup %11320  ;;  %v4250_v16 = vadd.f32 1.0, %v11319_v46  ;;  %11328 = verf.f32 %v3997_v57  ;;  %v3744_v12 = vadd.f32 %v12739_v18, %v3609_v19  ;;  %v3743_v31 = vadd.f32 %v12739_v18, %v3608_v11 }
 0x17d   : > { %v13010_v24 = vpop.f32.mrb[67].mxu1  ;;  %v4249_v7 = vadd.f32 1.0, %v11321_v30  ;;  %v3611_v34 = vadd.f32 %v12919_v36, %v3151_v8  ;;  %v3147_v37 = vrot.slane %v2516_v60, %v12296_v21  ;;  %10871 = vmatmul.mubr.msk.f32.gmra.mrb[64].mxu0 %vm820_vm0, %v4376_v63  ;;  %v2487_v58 = vcombine.high %v12766_v51, %v12766_v51 }
 0x17e   : > { %v3866_v3 = vmul.f32 0.5, %v12929_v22  ;;  %v3867_v26 = vmul.f32 0.5, %v12954_v23  ;;  %v4000_v25 = vmul.f32 0.70710677, %v3744_v12  ;;  %v3999_v54 = vmul.f32 0.70710677, %v3743_v31 }
 0x17f   : > { %v11323_v56 = vpop.eup %11322  ;;  %v4377_v35 = vmul.f32 %v4249_v7, %v3865_v45  ;;  %v3746_v36 = vadd.f32 %v12739_v18, %v3611_v34  ;;  %v3610_v33 = vadd.f32 %v3147_v37, %v12925_v50  ;;  %6314 = vbcast.lane.b32.xlu1 %v6312_v20, 256  ;;  %v6382_v22 = vrot.slane %v12965_v6, %v12296_v21 }
 0x180   : > { %v13023_v44 = vpop.f32.mrb[68].mxu1  ;;  %v11325_v0 = vpop.eup %11324  ;;  %v4378_v52 = vmul.f32 %v4250_v16, %v3866_v3  ;;  %v4252_v59 = vadd.f32 1.0, %v11323_v56  ;;  %11330 = verf.f32 %v4000_v25  ;;  %v2569_v19 = vcombine.high %v12533_v29, %v12533_v29  ;;  %v8180_v16 = vld [vmem:[%s16764_s9] sm:$0xff] }
 0x181   : > { %v13027_v57 = vpop.f32.mrb[69].mxu1  ;;  %v4251_v23 = vadd.f32 1.0, %v11325_v0  ;;  %11332 = verf.f32 %v3999_v54  ;;  %v4002_v45 = vmul.f32 0.70710677, %v3746_v36  ;;  %10873 = vmatprep.mubr.msk.f32.mxu0 %vm820_vm0, %v4377_v35  ;;  %v3868_v50 = vmul.f32 0.5, %v12951_v1  ;;  %6384 = vbcast.lane.b32.xlu0 %v6382_v22, 256 }
 0x182   : > { %v3870_v11 = vmul.f32 0.5, %v12981_v2  ;;  %v3869_v46 = vmul.f32 0.5, %v3741_v62  ;;  %v3745_v63 = vadd.f32 %v12739_v18, %v3610_v33  ;;  %v13035_v60 = vmul.f32 0.5, %v3744_v12  ;;  %10874 = vmatmul.mubr.msk.f32.gmra.mrb[66].mxu0 %vm820_vm0, %v4378_v52  ;;  %v8181_v12 = vld [vmem:[%s16764_s9 + $0x8] sm:$0xff] }
 0x183   : > { %v4379_v8 = vmul.f32 %v4251_v23, %v3867_v26  ;;  %11334 = verf.f32 %v4002_v45  ;;  %v2527_v30 = vrot.slane %v12540_v28, %v12306_v27  ;;  %v4380_v2 = vmul.f32 %v4252_v59, %v3868_v50 }
 0x184   : > { %v13043_v1 = vpop.f32.mrb[70].mxu1  ;;  %v3871_v62 = vmul.f32 0.5, %v3743_v31  ;;  %v13045_v7 = vmul.f32 0.5, %v3746_v36  ;;  %v4001_v34 = vmul.f32 0.70710677, %v3745_v63  ;;  %v13054_v3 = vrot.slane %v12533_v29, %v12306_v27 }
 0x185   : > { %v13050_v37 = vpop.f32.mrb[71].mxu1  ;;  %v11327_v20 = vpop.eup %11326  ;;  %v13057_v26 = vrot.slane %v2569_v19, %v12306_v27  ;;  %v2520_v31 = vcombine.high %v12540_v28, %v12540_v28  ;;  %v2535_v25 = vcombine.high %v2527_v30, %v2527_v30  ;;  %10876 = vmatprep.mubr.msk.f32.mxu0 %vm820_vm0, %v4379_v8  ;;  %v2515_v54 = vrot.slane %v2487_v58, %v12306_v27 }
 0x186   : > { %v11329_v56 = vpop.eup %11328  ;;  %v4254_v35 = vadd.f32 1.0, %v11327_v20  ;;  %11336 = verf.f32 %v4001_v34  ;;  %v2501_v36 = vrot.slane %v12766_v51, %v12306_v27  ;;  %v13066_v29 = vrot.slane %v2527_v30, %v12306_v27  ;;  %10877 = vmatmul.mubr.msk.f32.gmra.mrb[68].mxu0 %vm820_vm0, %v4380_v2 }
 0x187   : > { %v4253_v33 = vadd.f32 1.0, %v11329_v56  ;;  %v6396_v0 = vrot.slane %v12965_v6, %v12288_v14  ;;  %v11142_v52 = vpack.c.bf16 %v8181_v12, %v8180_v16  ;;  %v3159_v22 = vrot.slane %v2515_v54, %v12296_v21 }
 0x188   : > { %v13071_v28 = vpop.f32.mrb[72].mxu1  ;;  %v4382_v59 = vmul.f32 %v4254_v35, %v3870_v11  ;;  %v3155_v58 = vrot.slane %v2501_v36, %v12296_v21  ;;  %v13076_v23 = vsub.s32 7, %v12281_v10  ;;  %v3873_v19 = vmul.f32 0.5, %v3745_v63 }
 0x189   : > { %v13078_v51 = vpop.f32.mrb[73].mxu1  ;;  %v4381_v45 = vmul.f32 %v4253_v33, %v3869_v46  ;;  %6398 = vbcast.lane.b32.xlu1 %v6396_v0, 256  ;;  %11143 = vmatprep.subr.bf16.mxu1 %v11142_v52  ;;  %v2519_v50 = vcombine.high %v2515_v54, %v2515_v54  ;;  %v2517_v8 = vcombine.high %v2501_v36, %v2501_v36 }
 0x18a   : > { %v11331_v30 = vpop.eup %11330  ;;  %v3613_v16 = vadd.f32 %v12943_v9, %v3159_v22  ;;  %v3612_v11 = vadd.f32 %v3155_v58, %v12948_v55  ;;  %v6263_v2 = vrot.slane %v12795_v49, %v13076_v23  ;;  %11145 = vmatpush3.bf16.msra.mxu1 %v11142_v52  ;;  %v6354_v10 = vrot.slane %v12881_v5, %v12825_v39 }
 0x18b   : > { %v11333_v34 = vpop.eup %11332  ;;  %v4256_v12 = vadd.f32 1.0, %v11331_v30  ;;  %v3167_v46 = vrot.slane %v2519_v50, %v12296_v21  ;;  %v3163_v63 = vrot.slane %v2517_v8, %v12296_v21  ;;  %v6347_v20 = vrot.slane %v12881_v5, %v12343_v53  ;;  %10879 = vmatprep.mubr.msk.f32.mxu0 %vm820_vm0, %v4381_v45 }
 0x18c   : > { %v13091_v9 = vpop.f32.mrb[74].mxu1  ;;  %v4255_v55 = vadd.f32 1.0, %v11333_v34  ;;  %v3748_v49 = vadd.f32 %v12739_v18, %v3613_v16  ;;  %v13095_v56 = vadd.f32 %v12739_v18, %v3612_v11  ;;  %6265 = vbcast.lane.b32.xlu0 %v6263_v2, 256  ;;  %v2557_v35 = vrot.slane %v2535_v25, %v12306_v27  ;;  %10880 = vmatmul.mubr.msk.f32.gmra.mrb[70].mxu0 %vm820_vm0, %v4382_v59 }
 0x18d   : > { %v13099_v54 = vpop.f32.mrb[75].mxu1  ;;  %v11335_v36 = vpop.eup %11334  ;;  %v3615_v52 = vadd.f32 %v12958_v43, %v3167_v46  ;;  %v3614_v22 = vadd.f32 %v3163_v63, %v12967_v4  ;;  %6356 = vbcast.lane.b32.xlu1 %v6354_v10, 256  ;;  %v2534_v45 = vrot.slane %v2520_v31, %v12306_v27  ;;  %v3171_v59 = vrot.slane %v13066_v29, %v12296_v21 }
 0x18e   : > { %v4383_v58 = vmul.f32 %v4255_v55, %v3871_v62  ;;  %v4004_v25 = vmul.f32 0.70710677, %v3748_v49  ;;  %v4384_v50 = vmul.f32 %v4256_v12, %v13035_v60  ;;  %v4003_v8 = vmul.f32 0.70710677, %v13095_v56 }
 0x18f   : > { %v3750_v30 = vadd.f32 %v12739_v18, %v3615_v52  ;;  %v3749_v16 = vadd.f32 %v12739_v18, %v3614_v22  ;;  %v4258_v4 = vadd.f32 1.0, %v11335_v36  ;;  %v3175_v62 = vrot.slane %v2557_v35, %v12296_v21 }
 0x190   : > { %v13114_v11 = vpop.f32.mrb[76].mxu1  ;;  %v11337_v43 = vpop.eup %11336  ;;  %11338 = verf.f32 %v4004_v25  ;;  %6349 = vbcast.lane.b32.xlu0 %v6347_v20, 256  ;;  %v3616_v31 = vadd.f32 %v3171_v59, %v12994_v38  ;;  %10882 = vmatprep.mubr.msk.f32.mxu0 %vm820_vm0, %v4383_v58  ;;  %v13123_v10 = vrot.slane %v13054_v3, %v12306_v27  ;;  %v2536_v12 = vcombine.high %v2534_v45, %v2534_v45  ;;  %v13129_v38 = vld [vmem:[%s12278_s25 + $0x20] sm:$0xff] }
 0x191   : > { %v13119_v60 = vpop.f32.mrb[77].mxu1  ;;  %v4257_v2 = vadd.f32 1.0, %v11337_v43  ;;  %11340 = verf.f32 %v4003_v8  ;;  %v4006_v34 = vmul.f32 0.70710677, %v3750_v30  ;;  %10883 = vmatmul.mubr.msk.f32.gmra.mrb[72].mxu0 %vm820_vm0, %v4384_v50  ;;  %v4005_v46 = vmul.f32 0.70710677, %v3749_v16 }
 0x192   : > { %v3617_v63 = vadd.f32 %v12988_v40, %v3175_v62  ;;  %v3751_v20 = vadd.f32 %v12739_v18, %v3616_v31  ;;  %v6361_v36 = vrot.slane %v12881_v5, %v12868_v15  ;;  %v6319_v52 = vrot.slane %v12848_v48, %v13076_v23  ;;  %v13145_v48 = vpop.f32.mrb[14].mxu0 }
 0x193   : > { %v4385_v55 = vmul.f32 %v4257_v2, %v3873_v19  ;;  %11342 = verf.f32 %v4006_v34  ;;  %v4386_v58 = vmul.f32 %v4258_v4, %v13045_v7  ;;  %v2567_v19 = vcombine.high %v2557_v35, %v2557_v35  ;;  %16786 = vst [vmem:[#allocation3_spill] sm:$0xff] %v13145_v48  ;;  %v13150_v4 = vpop.f32.mrb[15].mxu0 }
 0x194   : > { %v13135_v22 = vpop.f32.mrb[78].mxu1  ;;  %11344 = verf.f32 %v4005_v46  ;;  %v3752_v25 = vadd.f32 %v12739_v18, %v3617_v63  ;;  %v4007_v40 = vmul.f32 0.70710677, %v3751_v20  ;;  %6363 = vbcast.lane.b32.xlu1 %v6361_v36, 256  ;;  %6321 = vbcast.lane.b32.xlu0 %v6319_v52, 256  ;;  %v2565_v50 = vcombine.high %v13066_v29, %v13066_v29  ;;  %16787 = vst [vmem:[#allocation4_spill] sm:$0xff] %v13150_v4 }
 0x195   : > { %v13139_v59 = vpop.f32.mrb[79].mxu1  ;;  %v6438_v8 = vrot.slane %v13129_v38, %v12296_v21  ;;  %v3876_v43 = vmul.f32 0.5, %v3748_v49  ;;  %v6403_v7 = vrot.slane %v12965_v6, %v12343_v53  ;;  %10885 = vmatprep.mubr.msk.f32.mxu0 %vm820_vm0, %v4385_v55  ;;  %v3183_v35 = vrot.slane %v2567_v19, %v12296_v21 }
 0x196   : > { %v4008_v62 = vmul.f32 0.70710677, %v3752_v25  ;;  %11346 = verf.f32 %v4007_v40  ;;  %v3179_v31 = vrot.slane %v2565_v50, %v12296_v21  ;;  %v2564_v29 = vrot.slane %v2536_v12, %v12306_v27  ;;  %10886 = vmatmul.mubr.msk.f32.gmra.mrb[74].mxu0 %vm820_vm0, %v4386_v58 }
 0x197   : > { %v2550_v2 = vrot.slane %v2534_v45, %v12306_v27  ;;  %v3875_v34 = vmul.f32 0.5, %v13095_v56  ;;  %v6368_v46 = vrot.slane %v12881_v5, %v12916_v41  ;;  %v6410_v63 = vrot.slane %v12965_v6, %v12825_v39 }
 0x198   : > { %v13157_v49 = vpop.f32.mrb[80].mxu1  ;;  %11348 = verf.f32 %v4008_v62  ;;  %v3878_v36 = vmul.f32 0.5, %v3750_v30  ;;  %v3619_v12 = vadd.f32 %v13006_v47, %v3183_v35  ;;  %v3618_v45 = vadd.f32 %v3179_v31, %v13010_v24  ;;  %6440 = vbcast.lane.b32.xlu1 %v6438_v8, 256  ;;  %6405 = vbcast.lane.b32.xlu0 %v6403_v7, 256 }
 0x199   : > { %v13164_v55 = vpop.f32.mrb[81].mxu1  ;;  %v3191_v52 = vrot.slane %v2564_v29, %v12296_v21  ;;  %v3877_v56 = vmul.f32 0.5, %v3749_v16  ;;  %v3879_v40 = vmul.f32 0.5, %v3751_v20  ;;  %v3187_v19 = vrot.slane %v2550_v2, %v12296_v21 }
 0x19a   : > { %v11339_v58 = vpop.eup %11338  ;;  %v2568_v50 = vcombine.high %v2564_v29, %v2564_v29  ;;  %v3880_v0 = vmul.f32 0.5, %v3752_v25  ;;  %v3754_v33 = vadd.f32 %v12739_v18, %v3619_v12  ;;  %v3753_v30 = vadd.f32 %v12739_v18, %v3618_v45 }
 0x19b   : > { %v11341_v62 = vpop.eup %11340  ;;  %v3621_v47 = vadd.f32 %v13023_v44, %v3191_v52  ;;  %v4260_v24 = vadd.f32 1.0, %v11339_v58  ;;  %v3620_v7 = vadd.f32 %v3187_v19, %v13027_v57  ;;  %v2566_v31 = vcombine.high %v2550_v2, %v2550_v2 }
 0x19c   : > { %v13173_v35 = vpop.f32.mrb[82].mxu1  ;;  %v4259_v8 = vadd.f32 1.0, %v11341_v62  ;;  %v4010_v4 = vmul.f32 0.70710677, %v3754_v33  ;;  %6370 = vbcast.lane.b32.xlu1 %v6368_v46, 256  ;;  %6412 = vbcast.lane.b32.xlu0 %v6410_v63, 256  ;;  %v3199_v25 = vrot.slane %v2568_v50, %v12296_v21  ;;  %v6452_v29 = vrot.slane %v13129_v38, %v12288_v14 }
 0x19d   : > { %v13176_v16 = vpop.f32.mrb[83].mxu1  ;;  %v11343_v20 = vpop.eup %11342  ;;  %v6445_v44 = vrot.slane %v13129_v38, %v12804_v61  ;;  %v4009_v58 = vmul.f32 0.70710677, %v3753_v30  ;;  %v3756_v57 = vadd.f32 %v12739_v18, %v3621_v47  ;;  %v3755_v19 = vadd.f32 %v12739_v18, %v3620_v7 }
 0x19e   : > { %v11345_v12 = vpop.eup %11344  ;;  %v4387_v45 = vmul.f32 %v4259_v8, %v3875_v34  ;;  %v4262_v52 = vadd.f32 1.0, %v11343_v20  ;;  %11350 = verf.f32 %v4010_v4  ;;  %v3623_v46 = vadd.f32 %v13043_v1, %v3199_v25 }
 0x19f   : > { %v4261_v2 = vadd.f32 1.0, %v11345_v12  ;;  %v4388_v62 = vmul.f32 %v4260_v24, %v3876_v43  ;;  %11352 = verf.f32 %v4009_v58  ;;  %v4012_v48 = vmul.f32 0.70710677, %v3756_v57 }
 0x1a0   : > { %v13186_v63 = vpop.f32.mrb[84].mxu1  ;;  %v11347_v50 = vpop.eup %11346  ;;  %v3195_v42 = vrot.slane %v2566_v31, %v12296_v21  ;;  %10888 = vmatprep.mubr.msk.f32.mxu0 %vm820_vm0, %v4387_v45  ;;  %v13192_v4 = vmul.f32 0.5, %v3754_v33  ;;  %v4011_v7 = vmul.f32 0.70710677, %v3755_v19  ;;  %6454 = vbcast.lane.b32.xlu1 %v6452_v29, 256  ;;  %v3758_v43 = vadd.f32 %v12739_v18, %v3623_v46 }
 0x1a1   : > { %v13190_v34 = vpop.f32.mrb[85].mxu1  ;;  %v4389_v47 = vmul.f32 %v4261_v2, %v3877_v56  ;;  %v4263_v8 = vadd.f32 1.0, %v11347_v50  ;;  %6447 = vbcast.lane.b32.xlu0 %v6445_v44, 256  ;;  %11354 = verf.f32 %v4012_v48  ;;  %v16788_v31 = vcombine.high %v13054_v3, %v13054_v3  ;;  %10889 = vmatmul.mubr.msk.f32.gmra.mrb[76].mxu0 %vm820_vm0, %v4388_v62  ;;  %v13202_v56 = vld [vmem:[%s12278_s25 + $0x28] sm:$0xff] }
 0x1a2   : > { %v11349_v1 = vpop.eup %11348  ;;  %v3622_v24 = vadd.f32 %v3195_v42, %v13050_v37  ;;  %v4390_v33 = vmul.f32 %v4262_v52, %v3878_v36  ;;  %11356 = verf.f32 %v4011_v7  ;;  %v3203_v29 = vrot.slane %v13123_v10, %v12296_v21 }
 0x1a3   : > { %v2606_v20 = vrot.slane %v16788_v31, %v12306_v27  ;;  %v4264_v25 = vadd.f32 1.0, %v11349_v1  ;;  %10891 = vmatprep.mubr.msk.f32.mxu0 %vm820_vm0, %v4389_v47  ;;  %v4391_v42 = vmul.f32 %v4263_v8, %v3879_v40  ;;  %v4014_v37 = vmul.f32 0.70710677, %v3758_v43 }
 0x1a4   : > { %v13207_v48 = vpop.f32.mrb[86].mxu1  ;;  %v3757_v44 = vadd.f32 %v12739_v18, %v3622_v24  ;;  %v3881_v45 = vmul.f32 0.5, %v3753_v30  ;;  %v3624_v36 = vadd.f32 %v3203_v29, %v13078_v51  ;;  %v6501_v52 = vrot.slane %v13202_v56, %v12804_v61 }
 0x1a5   : > { %v3207_v3 = vrot.slane %v2606_v20, %v12296_v21  ;;  %v13211_v12 = vpop.f32.mrb[87].mxu1  ;;  %v6417_v58 = vrot.slane %v12965_v6, %v12868_v15  ;;  %v4392_v2 = vmul.f32 %v4264_v25, %v3880_v0  ;;  %11358 = verf.f32 %v4014_v37  ;;  %10892 = vmatmul.mubr.msk.f32.gmra.mrb[78].mxu0 %vm820_vm0, %v4390_v33 }
 0x1a6   : > { %v4013_v46 = vmul.f32 0.70710677, %v3757_v44  ;;  %v3884_v50 = vmul.f32 0.5, %v3756_v57  ;;  %v3759_v62 = vadd.f32 %v12739_v18, %v3624_v36  ;;  %6503 = vbcast.lane.b32.xlu1 %v6501_v52, 256  ;;  %v2616_v30 = vcombine.high %v2606_v20, %v2606_v20  ;;  %10894 = vmatprep.mubr.msk.f32.mxu0 %vm820_vm0, %v4391_v42 }
 0x1a7   : > { %v3625_v40 = vadd.f32 %v13071_v28, %v3207_v3  ;;  %6419 = vbcast.lane.b32.xlu0 %v6417_v58, 256  ;;  %v2614_v51 = vcombine.high %v13123_v10, %v13123_v10  ;;  %v6424_v8 = vrot.slane %v12965_v6, %v12916_v41  ;;  %v6494_v28 = vrot.slane %v13202_v56, %v12296_v21 }
 0x1a8   : > { %v13223_v47 = vpop.f32.mrb[88].mxu1  ;;  %11360 = verf.f32 %v4013_v46  ;;  %v11351_v7 = vpop.eup %11350  ;;  %v3883_v1 = vmul.f32 0.5, %v3755_v19  ;;  %v4015_v24 = vmul.f32 0.70710677, %v3759_v62  ;;  %v3215_v10 = vrot.slane %v2616_v30, %v12296_v21 }
 0x1a9   : > { %v3760_v0 = vadd.f32 %v12739_v18, %v3625_v40  ;;  %v13231_v57 = vpop.f32.mrb[89].mxu1  ;;  %v3211_v31 = vrot.slane %v2614_v51, %v12296_v21  ;;  %v11353_v20 = vpop.eup %11352  ;;  %v4266_v33 = vadd.f32 1.0, %v11351_v7  ;;  %v3886_v18 = vmul.f32 0.5, %v3758_v43  ;;  %10895 = vmatmul.mubr.msk.f32.gmra.mrb[80].mxu0 %vm820_vm0, %v4392_v2 }
 0x1aa   : > { %v2667_v29 = vcombine.high %v12692_v17, %v12692_v17  ;;  %v4265_v37 = vadd.f32 1.0, %v11353_v20  ;;  %11362 = verf.f32 %v4015_v24  ;;  %v3627_v42 = vadd.f32 %v13091_v9, %v3215_v10  ;;  %6426 = vbcast.lane.b32.xlu1 %v6424_v8, 256 }
 0x1ab   : > { %v4016_v25 = vmul.f32 0.70710677, %v3760_v0  ;;  %v3626_v19 = vadd.f32 %v3211_v31, %v13099_v54  ;;  %6496 = vbcast.lane.b32.xlu0 %v6494_v28, 256  ;;  %v11355_v36 = vpop.eup %11354  ;;  %v3885_v52 = vmul.f32 0.5, %v3757_v44  ;;  %v13244_v43 = vrot.slane %v12692_v17, %v12306_v27  ;;  %v13254_v54 = vld [vmem:[%s16761_s6] ss:$0 sm:$0xff] }
 0x1ac   : > { %v13240_v3 = vpop.f32.mrb[90].mxu1  ;;  %v13247_v58 = vrot.slane %v2667_v29, %v12306_v27  ;;  %v11357_v46 = vpop.eup %11356  ;;  %v4393_v9 = vmul.f32 %v4265_v37, %v3881_v45  ;;  %v4268_v40 = vadd.f32 1.0, %v11355_v36  ;;  %v3762_v44 = vadd.f32 %v13254_v54, %v3627_v42 }
 0x1ad   : > { %11364 = verf.f32 %v4016_v25  ;;  %v13249_v2 = vpop.f32.mrb[91].mxu1  ;;  %v13258_v30 = vadd.f32 %v13254_v54, %v3626_v19  ;;  %v4394_v17 = vmul.f32 %v4266_v33, %v13192_v4  ;;  %v4267_v51 = vadd.f32 1.0, %v11357_v46 }
 0x1ae   : > { %v3888_v8 = vmul.f32 0.5, %v3760_v0  ;;  %v3887_v28 = vmul.f32 0.5, %v3759_v62  ;;  %v4018_v7 = vmul.f32 0.70710677, %v3762_v44  ;;  %v13267_v10 = vrot.slane %v13244_v43, %v12306_v27  ;;  %10897 = vmatprep.mubr.msk.f32.mxu0 %vm820_vm0, %v4393_v9 }
 0x1af   : > { %v11359_v20 = vpop.eup %11358  ;;  %v4396_v4 = vmul.f32 %v4268_v40, %v3884_v50  ;;  %v4395_v33 = vmul.f32 %v4267_v51, %v3883_v1  ;;  %v4017_v62 = vmul.f32 0.70710677, %v13258_v30  ;;  %v2625_v0 = vrot.slane %v12698_v13, %v12306_v27  ;;  %10898 = vmatmul.mubr.msk.f32.gmra.mrb[82].mxu0 %vm820_vm0, %v4394_v17 }
 0x1b0   : > { %v13270_v31 = vpop.f32.mrb[92].mxu1  ;;  %v4270_v29 = vadd.f32 1.0, %v11359_v20  ;;  %11366 = verf.f32 %v4018_v7  ;;  %v16789_v37 = vcombine.high %v13057_v26, %v13057_v26  ;;  %v2599_v50 = vrot.slane %v13057_v26, %v12306_v27 }
 0x1b1   : > { %v13276_v25 = vpop.f32.mrb[93].mxu1  ;;  %v13284_v19 = vmul.f32 0.5, %v3762_v44  ;;  %11368 = verf.f32 %v4017_v62  ;;  %v2618_v36 = vcombine.high %v12698_v13, %v12698_v13  ;;  %v2633_v46 = vcombine.high %v2625_v0, %v2625_v0  ;;  %10900 = vmatprep.mubr.msk.f32.mxu0 %vm820_vm0, %v4395_v33 }
 0x1b2   : > { %v2613_v42 = vrot.slane %v16789_v37, %v12306_v27  ;;  %v11361_v1 = vpop.eup %11360  ;;  %v13290_v40 = vrot.slane %v2625_v0, %v12306_v27  ;;  %v3219_v51 = vrot.slane %v2599_v50, %v12296_v21  ;;  %v4398_v26 = vmul.f32 %v4270_v29, %v3886_v18 }
 0x1b3   : > { %v4269_v9 = vadd.f32 1.0, %v11361_v1  ;;  %v6508_v44 = vrot.slane %v13202_v56, %v12288_v14  ;;  %v6375_v13 = vrot.slane %v12881_v5, %v13076_v23  ;;  %10901 = vmatmul.mubr.msk.f32.gmra.mrb[84].mxu0 %vm820_vm0, %v4396_v4  ;;  %v2615_v24 = vcombine.high %v2599_v50, %v2599_v50 }
 0x1b4   : > { %v3223_v17 = vrot.slane %v2613_v42, %v12296_v21  ;;  %v13294_v7 = vpop.f32.mrb[94].mxu1  ;;  %v2617_v20 = vcombine.high %v2613_v42, %v2613_v42  ;;  %v11363_v62 = vpop.eup %11362  ;;  %v3628_v1 = vadd.f32 %v3219_v51, %v13119_v60  ;;  %v6466_v5 = vrot.slane %v13129_v38, %v12825_v39 }
 0x1b5   : > { %v13301_v33 = vpop.f32.mrb[95].mxu1  ;;  %v4397_v0 = vmul.f32 %v4269_v9, %v3885_v52  ;;  %v4271_v18 = vadd.f32 1.0, %v11363_v62  ;;  %6510 = vbcast.lane.b32.xlu1 %v6508_v44, 256  ;;  %6377 = vbcast.lane.b32.xlu0 %v6375_v13, 256  ;;  %v6459_v4 = vrot.slane %v13129_v38, %v12343_v53  ;;  %v13311_v52 = vrot.slane %v2618_v36, %v12306_v27 }
 0x1b6   : > { %v3629_v37 = vadd.f32 %v13114_v11, %v3223_v17  ;;  %v3231_v29 = vrot.slane %v2617_v20, %v12296_v21  ;;  %v3763_v60 = vadd.f32 %v13254_v54, %v3628_v1  ;;  %v3227_v51 = vrot.slane %v2615_v24, %v12296_v21 }
 0x1b7   : > { %v11365_v45 = vpop.eup %11364  ;;  %10903 = vmatprep.mubr.msk.f32.mxu0 %vm820_vm0, %v4397_v0  ;;  %v4399_v9 = vmul.f32 %v4271_v18, %v3887_v28  ;;  %v2655_v44 = vrot.slane %v2633_v46, %v12306_v27  ;;  %v3889_v13 = vmul.f32 0.5, %v13258_v30  ;;  %v3235_v62 = vrot.slane %v13290_v40, %v12296_v21 }
 0x1b8   : > { %v4272_v42 = vadd.f32 1.0, %v11365_v45  ;;  %v3764_v11 = vadd.f32 %v13254_v54, %v3629_v37  ;;  %v13316_v50 = vpop.f32.mrb[96].mxu1  ;;  %v3631_v17 = vadd.f32 %v13135_v22, %v3231_v29  ;;  %10904 = vmatmul.mubr.msk.f32.gmra.mrb[86].mxu0 %vm820_vm0, %v4398_v26  ;;  %v4019_v0 = vmul.f32 0.70710677, %v3763_v60 }
 0x1b9   : > { %v13322_v45 = vpop.f32.mrb[97].mxu1  ;;  %v3630_v22 = vadd.f32 %v3227_v51, %v13139_v59  ;;  %6468 = vbcast.lane.b32.xlu1 %v6466_v5, 256  ;;  %6461 = vbcast.lane.b32.xlu0 %v6459_v4, 256  ;;  %v3239_v24 = vrot.slane %v2655_v44, %v12296_v21  ;;  %v3632_v26 = vadd.f32 %v3235_v62, %v13164_v55  ;;  %v3891_v62 = vmul.f32 0.5, %v3763_v60 }
 0x1ba   : > { %v4400_v36 = vmul.f32 %v4272_v42, %v3888_v8  ;;  %v4020_v20 = vmul.f32 0.70710677, %v3764_v11  ;;  %v3766_v28 = vadd.f32 %v13254_v54, %v3631_v17  ;;  %v11367_v46 = vpop.eup %11366  ;;  %v6473_v30 = vrot.slane %v13129_v38, %v12868_v15  ;;  %10906 = vmatprep.mubr.msk.f32.mxu0 %vm820_vm0, %v4399_v9 }
 0x1bb   : > { %v6431_v8 = vrot.slane %v12965_v6, %v13076_v23  ;;  %v11369_v1 = vpop.eup %11368  ;;  %v4274_v59 = vadd.f32 1.0, %v11367_v46  ;;  %v2634_v18 = vcombine.high %v13311_v52, %v13311_v52  ;;  %v3765_v4 = vadd.f32 %v13254_v54, %v3630_v22 }
 0x1bc   : > { %11370 = verf.f32 %v4020_v20  ;;  %v13336_v37 = vpop.f32.mrb[98].mxu1  ;;  %v4022_v29 = vmul.f32 0.70710677, %v3766_v28  ;;  %10907 = vmatmul.mubr.msk.f32.gmra.mrb[88].mxu0 %vm820_vm0, %v4400_v36  ;;  %v4273_v5 = vadd.f32 1.0, %v11369_v1  ;;  %v3633_v6 = vadd.f32 %v13157_v49, %v3239_v24  ;;  %v13349_v20 = vld [vmem:[%s12278_s25 + $0x30] sm:$0xff] }
 0x1bd   : > { %11372 = verf.f32 %v4019_v0  ;;  %v13341_v55 = vpop.f32.mrb[99].mxu1  ;;  %v3767_v42 = vadd.f32 %v13254_v54, %v3632_v26  ;;  %v3892_v9 = vmul.f32 0.5, %v3764_v11  ;;  %6475 = vbcast.lane.b32.xlu1 %v6473_v30, 256  ;;  %6433 = vbcast.lane.b32.xlu0 %v6431_v8, 256  ;;  %v2665_v17 = vcombine.high %v2655_v44, %v2655_v44 }
 0x1be   : > { %11374 = verf.f32 %v4022_v29  ;;  %v2663_v51 = vcombine.high %v13290_v40, %v13290_v40  ;;  %v4401_v36 = vmul.f32 %v4273_v5, %v3889_v13  ;;  %v4021_v0 = vmul.f32 0.70710677, %v3765_v4 }
 0x1bf   : > { %v3768_v46 = vadd.f32 %v13254_v54, %v3633_v6  ;;  %v4402_v49 = vmul.f32 %v4274_v59, %v13284_v19  ;;  %v4023_v24 = vmul.f32 0.70710677, %v3767_v42  ;;  %v3247_v11 = vrot.slane %v2665_v17, %v12296_v21 }
 0x1c0   : > { %v13352_v22 = vpop.f32.mrb[100].mxu1  ;;  %v3243_v26 = vrot.slane %v2663_v51, %v12296_v21  ;;  %v13359_v30 = vmul.f32 0.5, %v3766_v28  ;;  %11376 = verf.f32 %v4021_v0  ;;  %v6550_v60 = vrot.slane %v13349_v20, %v12296_v21  ;;  %10909 = vmatprep.mubr.msk.f32.mxu0 %vm820_vm0, %v4401_v36 }
 0x1c1   : > { %v13357_v44 = vpop.f32.mrb[101].mxu1  ;;  %v4024_v40 = vmul.f32 0.70710677, %v3768_v46  ;;  %11378 = verf.f32 %v4023_v24  ;;  %v3635_v13 = vadd.f32 %v13173_v35, %v3247_v11  ;;  %v6515_v8 = vrot.slane %v13202_v56, %v12343_v53  ;;  %10910 = vmatmul.mubr.msk.f32.gmra.mrb[90].mxu0 %vm820_vm0, %v4402_v49 }
 0x1c2   : > { %v3634_v19 = vadd.f32 %v3243_v26, %v13176_v16  ;;  %6552 = vbcast.lane.b32.xlu1 %v6550_v60, 256  ;;  %v2662_v28 = vrot.slane %v2634_v18, %v12306_v27  ;;  %v2648_v1 = vrot.slane %v13311_v52, %v12306_v27  ;;  %v6480_v59 = vrot.slane %v13129_v38, %v12916_v41 }
 0x1c3   : > { %11380 = verf.f32 %v4024_v40  ;;  %v3893_v35 = vmul.f32 0.5, %v3765_v4  ;;  %v3770_v16 = vadd.f32 %v13254_v54, %v3635_v13  ;;  %6517 = vbcast.lane.b32.xlu0 %v6515_v8, 256  ;;  %v6522_v6 = vrot.slane %v13202_v56, %v12825_v39 }
 0x1c4   : > { %v13374_v29 = vpop.f32.mrb[102].mxu1  ;;  %v3769_v5 = vadd.f32 %v13254_v54, %v3634_v19  ;;  %v3255_v51 = vrot.slane %v2662_v28, %v12296_v21  ;;  %v3251_v52 = vrot.slane %v2648_v1, %v12296_v21  ;;  %v2666_v36 = vcombine.high %v2662_v28, %v2662_v28 }
 0x1c5   : > { %16790 = vst [vmem:[#allocation5_spill] sm:$0xff] %v13374_v29  ;;  %v13380_v17 = vpop.f32.mrb[103].mxu1  ;;  %v2664_v0 = vcombine.high %v2648_v1, %v2648_v1  ;;  %v3895_v4 = vmul.f32 0.5, %v3767_v42  ;;  %v4026_v11 = vmul.f32 0.70710677, %v3770_v16  ;;  %v6564_v26 = vrot.slane %v13349_v20, %v12288_v14 }
 0x1c6   : > { %16791 = vst [vmem:[#allocation6_spill] sm:$0xff] %v13380_v17  ;;  %v11371_v18 = vpop.eup %11370  ;;  %v4025_v60 = vmul.f32 0.70710677, %v3769_v5  ;;  %v3637_v13 = vadd.f32 %v13186_v63, %v3255_v51  ;;  %v3636_v19 = vadd.f32 %v3251_v52, %v13190_v34  ;;  %6482 = vbcast.lane.b32.xlu1 %v6480_v59, 256  ;;  %v3263_v28 = vrot.slane %v2666_v36, %v12296_v21 }
 0x1c7   : > { %v11373_v49 = vpop.eup %11372  ;;  %v4276_v24 = vadd.f32 1.0, %v11371_v18  ;;  %11382 = verf.f32 %v4026_v11  ;;  %6524 = vbcast.lane.b32.xlu0 %v6522_v6, 256  ;;  %v3259_v42 = vrot.slane %v2664_v0, %v12296_v21  ;;  %v3896_v52 = vmul.f32 0.5, %v3768_v46 }
 0x1c8   : > { %v4275_v40 = vadd.f32 1.0, %v11373_v49  ;;  %v13388_v8 = vpop.f32.mrb[104].mxu1  ;;  %v11375_v17 = vpop.eup %11374  ;;  %11384 = verf.f32 %v4025_v60  ;;  %v3772_v63 = vadd.f32 %v13254_v54, %v3637_v13  ;;  %v3771_v34 = vadd.f32 %v13254_v54, %v3636_v19  ;;  %v13418_v19 = vld [vmem:[%s12278_s25 + $0x38] sm:$0xff] }
 0x1c9   : > { %v4404_v29 = vmul.f32 %v4276_v24, %v3892_v9  ;;  %v13392_v1 = vpop.f32.mrb[105].mxu1  ;;  %v4278_v49 = vadd.f32 1.0, %v11375_v17  ;;  %v3639_v59 = vadd.f32 %v13207_v48, %v3263_v28  ;;  %v3638_v51 = vadd.f32 %v3259_v42, %v13211_v12 }
 0x1ca   : > { %v4403_v18 = vmul.f32 %v4275_v40, %v3891_v62  ;;  %v6557_v9 = vrot.slane %v13349_v20, %v12804_v61  ;;  %v11377_v6 = vpop.eup %11376  ;;  %v13400_v36 = vmul.f32 0.5, %v3770_v16  ;;  %v4028_v0 = vmul.f32 0.70710677, %v3772_v63  ;;  %6566 = vbcast.lane.b32.xlu1 %v6564_v26, 256 }
 0x1cb   : > { %v16792_v62 = vcombine.high %v13244_v43, %v13244_v43  ;;  %v11379_v12 = vpop.eup %11378  ;;  %v4277_v24 = vadd.f32 1.0, %v11377_v6  ;;  %v3897_v11 = vmul.f32 0.5, %v3769_v5  ;;  %v4027_v40 = vmul.f32 0.70710677, %v3771_v34 }
 0x1cc   : > { %10912 = vmatprep.mubr.msk.f32.mxu0 %vm820_vm0, %v4403_v18  ;;  %v13407_v48 = vpop.f32.mrb[106].mxu1  ;;  %v3774_v46 = vadd.f32 %v13254_v54, %v3639_v59  ;;  %6559 = vbcast.lane.b32.xlu0 %v6557_v9, 256  ;;  %v4406_v60 = vmul.f32 %v4278_v49, %v13359_v30  ;;  %v4279_v13 = vadd.f32 1.0, %v11379_v12  ;;  %11386 = verf.f32 %v4028_v0 }
 0x1cd   : > { %v2704_v17 = vrot.slane %v16792_v62, %v12306_v27  ;;  %10913 = vmatmul.mubr.msk.f32.gmra.mrb[92].mxu0 %vm820_vm0, %v4404_v29  ;;  %v13411_v16 = vpop.f32.mrb[107].mxu1  ;;  %v11381_v26 = vpop.eup %11380  ;;  %v13415_v43 = vadd.f32 %v13254_v54, %v3638_v51  ;;  %v4405_v28 = vmul.f32 %v4277_v24, %v3893_v35  ;;  %11388 = verf.f32 %v4027_v40 }
 0x1ce   : > { %v4280_v5 = vadd.f32 1.0, %v11381_v26  ;;  %v4407_v18 = vmul.f32 %v4279_v13, %v3895_v4  ;;  %v13421_v59 = vmul.f32 0.5, %v3772_v63  ;;  %v4030_v29 = vmul.f32 0.70710677, %v3774_v46 }
 0x1cf   : > { %v3271_v42 = vrot.slane %v2704_v17, %v12296_v21  ;;  %v4029_v9 = vmul.f32 0.70710677, %v13415_v43  ;;  %v3267_v51 = vrot.slane %v13267_v10, %v12296_v21  ;;  %v6613_v35 = vrot.slane %v13418_v19, %v12804_v61  ;;  %10915 = vmatprep.mubr.msk.f32.mxu0 %vm820_vm0, %v4405_v28 }
 0x1d0   : > { %v13424_v6 = vpop.f32.mrb[108].mxu1  ;;  %v4408_v30 = vmul.f32 %v4280_v5, %v3896_v52  ;;  %11390 = verf.f32 %v4030_v29  ;;  %v6529_v4 = vrot.slane %v13202_v56, %v12868_v15  ;;  %v2714_v63 = vcombine.high %v2704_v17, %v2704_v17 }
 0x1d1   : > { %v3641_v49 = vadd.f32 %v13223_v47, %v3271_v42  ;;  %v13432_v0 = vpop.f32.mrb[109].mxu1  ;;  %10916 = vmatmul.mubr.msk.f32.gmra.mrb[94].mxu0 %vm820_vm0, %v4406_v60  ;;  %v2712_v47 = vcombine.high %v13267_v10, %v13267_v10  ;;  %v11383_v52 = vpop.eup %11382  ;;  %11392 = verf.f32 %v4029_v9  ;;  %v3640_v12 = vadd.f32 %v3267_v51, %v13231_v57  ;;  %6615 = vbcast.lane.b32.xlu1 %v6613_v35, 256 }
 0x1d2   : > { %v6536_v24 = vrot.slane %v13202_v56, %v12916_v41  ;;  %10918 = vmatprep.mubr.msk.f32.mxu0 %vm820_vm0, %v4407_v18  ;;  %v11385_v40 = vpop.eup %11384  ;;  %v4282_v26 = vadd.f32 1.0, %v11383_v52  ;;  %6531 = vbcast.lane.b32.xlu0 %v6529_v4, 256  ;;  %v3279_v17 = vrot.slane %v2714_v63, %v12296_v21  ;;  %v6606_v10 = vrot.slane %v13418_v19, %v12296_v21  ;;  %v16793_v52 = vld [vmem:[#allocation2_spill] sm:$0xff] }
 0x1d3   : > { %v3776_v62 = vadd.f32 %v13254_v54, %v3641_v49  ;;  %v3275_v60 = vrot.slane %v2712_v47, %v12296_v21  ;;  %v4281_v28 = vadd.f32 1.0, %v11385_v40  ;;  %v3899_v57 = vmul.f32 0.5, %v3771_v34 }
 0x1d4   : > { %v13448_v13 = vpop.f32.mrb[110].mxu1  ;;  %v3775_v42 = vadd.f32 %v13254_v54, %v3640_v12  ;;  %v3902_v18 = vmul.f32 0.5, %v3774_v46  ;;  %v3643_v9 = vadd.f32 %v13240_v3, %v3279_v17  ;;  %v2765_v51 = vcombine.high %v12901_v32, %v12901_v32 }
 0x1d5   : > { %v4032_v5 = vmul.f32 0.70710677, %v3776_v62  ;;  %v13451_v29 = vpop.f32.mrb[111].mxu1  ;;  %v3642_v49 = vadd.f32 %v3275_v60, %v13249_v2  ;;  %10919 = vmatmul.mubr.msk.f32.gmra.mrb[96].mxu0 %vm820_vm0, %v4408_v30  ;;  %v4410_v35 = vmul.f32 %v4282_v26, %v13400_v36  ;;  %v4409_v4 = vmul.f32 %v4281_v28, %v3897_v11  ;;  %6538 = vbcast.lane.b32.xlu1 %v6536_v24, 256 }
 0x1d6   : > { %v4031_v34 = vmul.f32 0.70710677, %v3775_v42  ;;  %v11387_v63 = vpop.eup %11386  ;;  %v3778_v47 = vadd.f32 %v13254_v54, %v3643_v9  ;;  %6608 = vbcast.lane.b32.xlu0 %v6606_v10, 256  ;;  %v13465_v3 = vrot.slane %v12901_v32, %v12306_v27  ;;  %v13468_v2 = vrot.slane %v2765_v51, %v12306_v27 }
 0x1d7   : > { %11394 = verf.f32 %v4032_v5  ;;  %v13461_v46 = vadd.f32 %v13254_v54, %v3642_v49  ;;  %v11389_v36 = vpop.eup %11388  ;;  %v4284_v11 = vadd.f32 1.0, %v11387_v63  ;;  %v2716_v12 = vcombine.high %v16793_v52, %v16793_v52  ;;  %10921 = vmatprep.mubr.msk.f32.mxu0 %vm820_vm0, %v4409_v4 }
 0x1d8   : > { %v13470_v30 = vpop.f32.mrb[112].mxu1  ;;  %11396 = verf.f32 %v4031_v34  ;;  %v2723_v24 = vrot.slane %v16793_v52, %v12306_v27  ;;  %v4283_v32 = vadd.f32 1.0, %v11389_v36  ;;  %v3901_v26 = vmul.f32 0.5, %v13415_v43 }
 0x1d9   : > { %v13477_v40 = vpop.f32.mrb[113].mxu1  ;;  %v13480_v17 = vmul.f32 0.5, %v3776_v62  ;;  %v4034_v60 = vmul.f32 0.70710677, %v3778_v47  ;;  %10922 = vmatmul.mubr.msk.f32.gmra.mrb[98].mxu0 %vm820_vm0, %v4410_v35  ;;  %v4412_v10 = vmul.f32 %v4284_v11, %v13421_v59  ;;  %v13484_v28 = vmul.f32 0.5, %v3775_v42 }
 0x1da   : > { %v4033_v5 = vmul.f32 0.70710677, %v13461_v46  ;;  %v11391_v49 = vpop.eup %11390  ;;  %v4411_v51 = vmul.f32 %v4283_v32, %v3899_v57  ;;  %v13493_v62 = vrot.slane %v13465_v3, %v12306_v27  ;;  %v13498_v4 = vrot.slane %v2716_v12, %v12306_v27 }
 0x1db   : > { %11398 = verf.f32 %v4034_v60  ;;  %v11393_v59 = vpop.eup %11392  ;;  %v4286_v42 = vadd.f32 1.0, %v11391_v49  ;;  %v2731_v34 = vcombine.high %v2723_v24, %v2723_v24  ;;  %v13503_v36 = vrot.slane %v2723_v24, %v12306_v27 }
 0x1dc   : > { %v13495_v35 = vpop.f32.mrb[114].mxu1  ;;  %11400 = verf.f32 %v4033_v5  ;;  %v4285_v57 = vadd.f32 1.0, %v11393_v59  ;;  %v16796_v11 = vcombine.high %v13247_v58, %v13247_v58  ;;  %v2697_v32 = vrot.slane %v13247_v58, %v12306_v27  ;;  %10924 = vmatprep.mubr.msk.f32.mxu0 %vm820_vm0, %v4411_v51 }
 0x1dd   : > { %16794 = vst [vmem:[#allocation2_spill] sm:$0xff] %v13495_v35  ;;  %v13500_v63 = vpop.f32.mrb[115].mxu1  ;;  %v4414_v60 = vmul.f32 %v4286_v42, %v3902_v18  ;;  %v6620_v12 = vrot.slane %v13418_v19, %v12288_v14  ;;  %v6487_v5 = vrot.slane %v13129_v38, %v13076_v23  ;;  %v6578_v24 = vrot.slane %v13349_v20, %v12825_v39 }
 0x1de   : > { %16795 = vst [vmem:[#allocation7_spill] sm:$0xff] %v13500_v63  ;;  %v2711_v52 = vrot.slane %v16796_v11, %v12306_v27  ;;  %10925 = vmatmul.mubr.msk.f32.gmra.mrb[100].mxu0 %vm820_vm0, %v4412_v10  ;;  %v4413_v49 = vmul.f32 %v4285_v57, %v3901_v26  ;;  %v3283_v11 = vrot.slane %v2697_v32, %v12296_v21  ;;  %v3906_v51 = vmul.f32 0.5, %v3778_v47 }
 0x1df   : > { %6622 = vbcast.lane.b32.xlu1 %v6620_v12, 256  ;;  %6489 = vbcast.lane.b32.xlu0 %v6487_v5, 256  ;;  %v2713_v42 = vcombine.high %v2697_v32, %v2697_v32  ;;  %v6571_v38 = vrot.slane %v13349_v20, %v12343_v53  ;;  %v13526_v9 = vrot.slane %v2731_v34, %v12306_v27 }
 0x1e0   : > { %v3287_v59 = vrot.slane %v2711_v52, %v12296_v21  ;;  %v2715_v58 = vcombine.high %v2711_v52, %v2711_v52  ;;  %v13521_v43 = vpop.f32.mrb[116].mxu1  ;;  %10927 = vmatprep.mubr.msk.f32.mxu0 %vm820_vm0, %v4413_v49  ;;  %v3299_v5 = vrot.slane %v13503_v36, %v12296_v21 }
 0x1e1   : > { %16797 = vst [vmem:[#allocation8_spill] sm:$0xff] %v13521_v43  ;;  %v11395_v18 = vpop.eup %11394  ;;  %v13528_v10 = vpop.f32.mrb[117].mxu1  ;;  %v3644_v43 = vadd.f32 %v3283_v11, %v13276_v25  ;;  %v3291_v12 = vrot.slane %v2713_v42, %v12296_v21  ;;  %v3303_v34 = vrot.slane %v13526_v9, %v12296_v21  ;;  %v3905_v42 = vmul.f32 0.5, %v13461_v46 }
 0x1e2   : > { %16798 = vst [vmem:[#allocation9_spill] sm:$0xff] %v13528_v10  ;;  %v4288_v26 = vadd.f32 1.0, %v11395_v18  ;;  %v3645_v52 = vadd.f32 %v13270_v31, %v3287_v59  ;;  %v11397_v47 = vpop.eup %11396  ;;  %v3295_v32 = vrot.slane %v2715_v58, %v12296_v21  ;;  %10928 = vmatmul.mubr.msk.f32.gmra.mrb[102].mxu0 %vm820_vm0, %v4414_v60  ;;  %v6585_v59 = vrot.slane %v13349_v20, %v12868_v15 }
 0x1e3   : > { %v13542_v18 = vpop.f32.mrb[16].mxu0  ;;  %v4287_v31 = vadd.f32 1.0, %v11397_v47  ;;  %v3779_v49 = vadd.f32 %v13254_v54, %v3644_v43  ;;  %v3646_v60 = vadd.f32 %v3291_v12, %v13301_v33  ;;  %6580 = vbcast.lane.b32.xlu1 %v6578_v24, 256  ;;  %6573 = vbcast.lane.b32.xlu0 %v6571_v38, 256  ;;  %v3649_v47 = vadd.f32 %v13316_v50, %v3303_v34  ;;  %v13576_v34 = vld [vmem:[%s12278_s25 + $0x40] sm:$0xff] }
 0x1e4   : > { %16799 = vst [vmem:[#allocation10_spill] sm:$0xff] %v13542_v18  ;;  %v3780_v25 = vadd.f32 %v13254_v54, %v3645_v52  ;;  %v13548_v11 = vpop.f32.mrb[118].mxu1  ;;  %v13550_v58 = vpop.f32.mrb[17].mxu0  ;;  %v3647_v57 = vadd.f32 %v13294_v7, %v3295_v32  ;;  %v4416_v10 = vmul.f32 %v4288_v26, %v13480_v17  ;;  %v3648_v17 = vadd.f32 %v3299_v5, %v13322_v45 }
 0x1e5   : > { %16800 = vst [vmem:[#allocation11_spill] sm:$0xff] %v13548_v11  ;;  %16801 = vst [vmem:[#allocation12_spill] sm:$0xff] %v13550_v58  ;;  %v13556_v52 = vpop.f32.mrb[119].mxu1  ;;  %v11399_v43 = vpop.eup %11398  ;;  %v4415_v18 = vmul.f32 %v4287_v31, %v13484_v28  ;;  %v4035_v35 = vmul.f32 0.70710677, %v3779_v49  ;;  %v3781_v33 = vadd.f32 %v13254_v54, %v3646_v60  ;;  %v3784_v38 = vadd.f32 %v13254_v54, %v3649_v47 }
 0x1e6   : > { %v13560_v11 = vmul.f32 0.5, %v3780_v25  ;;  %v4036_v58 = vmul.f32 0.70710677, %v3780_v25  ;;  %v11401_v63 = vpop.eup %11400  ;;  %v4290_v46 = vadd.f32 1.0, %v11399_v43  ;;  %v3782_v7 = vadd.f32 %v13254_v54, %v3647_v57 }
 0x1e7   : > { %v13564_v24 = vpop.f32.mrb[18].mxu0  ;;  %v4289_v50 = vadd.f32 1.0, %v11401_v63  ;;  %10930 = vmatprep.mubr.msk.f32.mxu0 %vm820_vm0, %v4415_v18  ;;  %v13573_v12 = vmul.f32 0.5, %v3779_v49  ;;  %6587 = vbcast.lane.b32.xlu1 %v6585_v59, 256  ;;  %v13583_v5 = vmul.f32 0.5, %v3781_v33  ;;  %v2761_v59 = vcombine.high %v13503_v36, %v13503_v36 }
 0x1e8   : > { %11402 = verf.f32 %v4036_v58  ;;  %v13569_v28 = vpop.f32.mrb[120].mxu1  ;;  %v13571_v26 = vpop.f32.mrb[19].mxu0  ;;  %v4418_v32 = vmul.f32 %v4290_v46, %v3906_v51  ;;  %v4038_v57 = vmul.f32 0.70710677, %v3782_v7  ;;  %10931 = vmatmul.mubr.msk.f32.gmra.mrb[104].mxu0 %vm820_vm0, %v4416_v10  ;;  %v13581_v45 = vmul.f32 0.5, %v3782_v7 }
 0x1e9   : > { %11404 = verf.f32 %v4035_v35  ;;  %v13579_v63 = vpop.f32.mrb[121].mxu1  ;;  %v4417_v31 = vmul.f32 %v4289_v50, %v3905_v42  ;;  %v4037_v18 = vmul.f32 0.70710677, %v3781_v33  ;;  %v4040_v25 = vmul.f32 0.70710677, %v3784_v38 }
 0x1ea   : > { %11406 = verf.f32 %v4038_v57  ;;  %v3783_v51 = vadd.f32 %v13254_v54, %v3648_v17  ;;  %v6543_v35 = vrot.slane %v13202_v56, %v13076_v23  ;;  %v2763_v10 = vcombine.high %v13526_v9, %v13526_v9 }
 0x1eb   : > { %v13588_v49 = vpop.f32.mrb[20].mxu0  ;;  %11408 = verf.f32 %v4037_v18  ;;  %v6662_v58 = vrot.slane %v13576_v34, %v12296_v21  ;;  %10933 = vmatprep.mubr.msk.f32.mxu0 %vm820_vm0, %v4417_v31  ;;  %v13601_v47 = vmul.f32 0.5, %v3784_v38  ;;  %v6627_v9 = vrot.slane %v13418_v19, %v12343_v53 }
 0x1ec   : > { %16802 = vst [vmem:[#allocation13_spill] sm:$0xff] %v13588_v49  ;;  %v13597_v42 = vpop.f32.mrb[122].mxu1  ;;  %v13599_v60 = vpop.f32.mrb[21].mxu0  ;;  %11410 = verf.f32 %v4040_v25  ;;  %v4039_v56 = vmul.f32 0.70710677, %v3783_v51  ;;  %6545 = vbcast.lane.b32.xlu0 %v6543_v35, 256  ;;  %10934 = vmatmul.mubr.msk.f32.gmra.mrb[106].mxu0 %vm820_vm0, %v4418_v32  ;;  %v3311_v43 = vrot.slane %v2763_v10, %v12296_v21  ;;  %v3307_v46 = vrot.slane %v2761_v59, %v12296_v21 }
 0x1ed   : > { %16803 = vst [vmem:[#allocation14_spill] sm:$0xff] %v13597_v42  ;;  %16804 = vst [vmem:[#allocation15_spill] sm:$0xff] %v13599_v60  ;;  %v13606_v36 = vpop.f32.mrb[123].mxu1  ;;  %6664 = vbcast.lane.b32.xlu1 %v6662_v58, 256  ;;  %v16806_v7 = vcombine.high %v13498_v4, %v13498_v4  ;;  %v2746_v50 = vrot.slane %v13498_v4, %v12306_v27  ;;  %v13616_v38 = vmul.f32 0.5, %v3783_v51  ;;  %v16816_v42 = vld [vmem:[#allocation5_spill] sm:$0xff] }
 0x1ee   : > { %16805 = vst [vmem:[#allocation16_spill] sm:$0xff] %v13606_v36  ;;  %11412 = verf.f32 %v4039_v56  ;;  %v6592_v17 = vrot.slane %v13349_v20, %v12916_v41  ;;  %v6634_v32 = vrot.slane %v13418_v19, %v12825_v39  ;;  %v3651_v31 = vadd.f32 %v13336_v37, %v3311_v43 }
 0x1ef   : > { %v2760_v33 = vrot.slane %v16806_v7, %v12306_v27  ;;  %v13622_v57 = vpop.f32.mrb[22].mxu0  ;;  %v3650_v18 = vadd.f32 %v3307_v46, %v13341_v55  ;;  %v3315_v35 = vrot.slane %v2746_v50, %v12296_v21  ;;  %v2762_v59 = vcombine.high %v2746_v50, %v2746_v50 }
 0x1f0   : > { %16807 = vst [vmem:[#allocation17_spill] sm:$0xff] %v13622_v57  ;;  %v13628_v4 = vpop.f32.mrb[124].mxu1  ;;  %v13630_v51 = vpop.f32.mrb[23].mxu0  ;;  %6629 = vbcast.lane.b32.xlu0 %v6627_v9, 256  ;;  %v6676_v58 = vrot.slane %v13576_v34, %v12288_v14  ;;  %v16810_v37 = vcombine.high %v13465_v3, %v13465_v3  ;;  %v3786_v46 = vadd.f32 %v13254_v54, %v3651_v31 }
 0x1f1   : > { %v3319_v25 = vrot.slane %v2760_v33, %v12296_v21  ;;  %16808 = vst [vmem:[#allocation18_spill] sm:$0xff] %v13628_v4  ;;  %16809 = vst [vmem:[#allocation19_spill] sm:$0xff] %v13630_v51  ;;  %v2764_v10 = vcombine.high %v2760_v33, %v2760_v33  ;;  %v13640_v55 = vpop.f32.mrb[125].mxu1  ;;  %v3785_v7 = vadd.f32 %v13254_v54, %v3650_v18  ;;  %6594 = vbcast.lane.b32.xlu1 %v6592_v17, 256 }
 0x1f2   : > { %v13638_v56 = vrot.slane %v16810_v37, %v12306_v27  ;;  %16811 = vst [vmem:[#allocation20_spill] sm:$0xff] %v13640_v55  ;;  %v11403_v43 = vpop.eup %11402  ;;  %v3652_v33 = vadd.f32 %v3315_v35, %v13357_v44  ;;  %v3323_v3 = vrot.slane %v2762_v59, %v12296_v21  ;;  %v6669_v37 = vrot.slane %v13576_v34, %v12804_v61 }
 0x1f3   : > { %v3653_v9 = vadd.f32 %v13352_v22, %v3319_v25  ;;  %v11405_v50 = vpop.eup %11404  ;;  %v4292_v4 = vadd.f32 1.0, %v11403_v43  ;;  %v3327_v51 = vrot.slane %v2764_v10, %v12296_v21  ;;  %v13650_v55 = vpop.f32.mrb[24].mxu0  ;;  %v13652_v31 = vmul.f32 0.5, %v3786_v46 }
 0x1f4   : > { %16812 = vst [vmem:[#allocation21_spill] sm:$0xff] %v13650_v55  ;;  %v4291_v57 = vadd.f32 1.0, %v11405_v50  ;;  %v4042_v18 = vmul.f32 0.70710677, %v3786_v46  ;;  %v3335_v22 = vrot.slane %v13638_v56, %v12296_v21  ;;  %v13656_v44 = vpop.f32.mrb[126].mxu1  ;;  %v11407_v17 = vpop.eup %11406  ;;  %v13658_v25 = vmul.f32 0.5, %v3785_v7 }
 0x1f5   : > { %16813 = vst [vmem:[#allocation22_spill] sm:$0xff] %v13656_v44  ;;  %v4041_v35 = vmul.f32 0.70710677, %v3785_v7  ;;  %v3788_v10 = vadd.f32 %v13254_v54, %v3653_v9  ;;  %v3787_v59 = vadd.f32 %v13254_v54, %v3652_v33  ;;  %6636 = vbcast.lane.b32.xlu0 %v6634_v32, 256  ;;  %v13662_v43 = vpop.f32.mrb[25].mxu0  ;;  %v13664_v50 = vpop.f32.mrb[127].mxu1  ;;  %v3655_v44 = vadd.f32 %v16816_v42, %v3327_v51 }
 0x1f6   : > { %16814 = vst [vmem:[#allocation23_spill] sm:$0xff] %v13662_v43  ;;  %16815 = vst [vmem:[#allocation24_spill] sm:$0xff] %v13664_v50  ;;  %v11409_v55 = vpop.eup %11408  ;;  %v4419_v46 = vmul.f32 %v4291_v57, %v13573_v12  ;;  %v4294_v36 = vadd.f32 1.0, %v11407_v17  ;;  %11414 = verf.f32 %v4042_v18  ;;  %6678 = vbcast.lane.b32.xlu1 %v6676_v58, 256  ;;  %v4420_v7 = vmul.f32 %v4292_v4, %v13560_v11  ;;  %v16817_v4 = vld [vmem:[#allocation6_spill] sm:$0xff] }
 0x1f7   : > { %v11411_v60 = vpop.eup %11410  ;;  %v4293_v49 = vadd.f32 1.0, %v11409_v55  ;;  %11416 = verf.f32 %v4041_v35  ;;  %v4044_v9 = vmul.f32 0.70710677, %v3788_v10  ;;  %v13669_v32 = vpop.f32.mrb[26].mxu0  ;;  %v13672_v43 = vmul.f32 0.5, %v3788_v10 }
 0x1f8   : > { %v4422_v33 = vmul.f32 %v4294_v36, %v13581_v45  ;;  %v4296_v50 = vadd.f32 1.0, %v11411_v60  ;;  %v4043_v12 = vmul.f32 0.70710677, %v3787_v59  ;;  %10936 = vmatprep.mubr.msk.f32.mxu0 %vm820_vm0, %v4419_v46  ;;  %v13675_v57 = vpop.f32.mrb[27].mxu0  ;;  %v11413_v42 = vpop.eup %11412  ;;  %v3790_v11 = vadd.f32 %v13254_v54, %v3655_v44  ;;  %v13682_v45 = vld [vmem:[%s12278_s25 + $0x48] sm:$0xff] }
 0x1f9   : > { %v4421_v51 = vmul.f32 %v4293_v49, %v13583_v5  ;;  %11418 = verf.f32 %v4044_v9  ;;  %v3654_v58 = vadd.f32 %v3323_v3, %v16817_v4  ;;  %6671 = vbcast.lane.b32.xlu0 %v6669_v37, 256  ;;  %10937 = vmatmul.mubr.msk.f32.gmra.mrb[108].mxu0 %vm820_vm0, %v4420_v7  ;;  %v4295_v60 = vadd.f32 1.0, %v11413_v42 }
 0x1fa   : > { %v13684_v36 = vmul.f32 0.5, %v3787_v59  ;;  %11420 = verf.f32 %v4043_v12  ;;  %v3657_v55 = vadd.f32 %v13388_v8, %v3335_v22  ;;  %v4424_v18 = vmul.f32 %v4296_v50, %v13601_v47 }
 0x1fb   : > { %v4046_v17 = vmul.f32 0.70710677, %v3790_v11  ;;  %v3789_v5 = vadd.f32 %v13254_v54, %v3654_v58  ;;  %v3331_v49 = vrot.slane %v13493_v62, %v12296_v21  ;;  %10939 = vmatprep.mubr.msk.f32.mxu0 %vm820_vm0, %v4421_v51  ;;  %v13692_v3 = vpop.f32.mrb[28].mxu0  ;;  %v4423_v37 = vmul.f32 %v4295_v60, %v13616_v38 }
 0x1fc   : > { %v3792_v44 = vadd.f32 %v13254_v54, %v3657_v55  ;;  %v6725_v35 = vrot.slane %v13682_v45, %v12804_v61  ;;  %v6641_v8 = vrot.slane %v13418_v19, %v12868_v15  ;;  %v13700_v47 = vpop.f32.mrb[29].mxu0  ;;  %v13702_v22 = vmul.f32 0.5, %v3790_v11 }
 0x1fd   : > { %11422 = verf.f32 %v4046_v17  ;;  %v4045_v10 = vmul.f32 0.70710677, %v3789_v5  ;;  %v3656_v59 = vadd.f32 %v3331_v49, %v13392_v1  ;;  %10940 = vmatmul.mubr.msk.f32.gmra.mrb[110].mxu0 %vm820_vm0, %v4422_v33  ;;  %v13706_v50 = vmul.f32 0.5, %v3789_v5 }
 0x1fe   : > { %v4048_v38 = vmul.f32 0.70710677, %v3792_v44  ;;  %6727 = vbcast.lane.b32.xlu1 %v6725_v35, 256  ;;  %6643 = vbcast.lane.b32.xlu0 %v6641_v8, 256  ;;  %v2812_v46 = vcombine.high %v13638_v56, %v13638_v56  ;;  %v2810_v7 = vcombine.high %v13493_v62, %v13493_v62  ;;  %v6648_v12 = vrot.slane %v13418_v19, %v12916_v41  ;;  %v16818_v62 = vld [vmem:[#allocation3_spill] sm:$0xff] }
 0x1ff   : > { %11424 = verf.f32 %v4045_v10  ;;  %v3791_v9 = vadd.f32 %v13254_v54, %v3656_v59  ;;  %v6718_v1 = vrot.slane %v13682_v45, %v12296_v21  ;;  %10942 = vmatprep.mubr.msk.f32.mxu0 %vm820_vm0, %v4423_v37  ;;  %v13718_v33 = vpop.f32.mrb[30].mxu0  ;;  %v2863_v11 = vcombine.high %v16818_v62, %v16818_v62 }
 0x200   : > { %v11415_v42 = vpop.eup %11414  ;;  %11426 = verf.f32 %v4048_v38  ;;  %v3343_v56 = vrot.slane %v2812_v46, %v12296_v21  ;;  %v3339_v51 = vrot.slane %v2810_v7, %v12296_v21  ;;  %v13724_v4 = vpop.f32.mrb[31].mxu0  ;;  %v13726_v55 = vmul.f32 0.5, %v3792_v44 }
 0x201   : > { %v11417_v58 = vpop.eup %11416  ;;  %v4298_v60 = vadd.f32 1.0, %v11415_v42  ;;  %v4047_v17 = vmul.f32 0.70710677, %v3791_v9  ;;  %v13730_v5 = vrot.slane %v16818_v62, %v12306_v27  ;;  %10943 = vmatmul.mubr.msk.f32.gmra.mrb[112].mxu0 %vm820_vm0, %v4424_v18  ;;  %v13736_v8 = vrot.slane %v2863_v11, %v12306_v27 }
 0x202   : > { %v4297_v49 = vadd.f32 1.0, %v11417_v58  ;;  %v3659_v37 = vadd.f32 %v13407_v48, %v3343_v56  ;;  %v3658_v35 = vadd.f32 %v3339_v51, %v13411_v16  ;;  %6650 = vbcast.lane.b32.xlu1 %v6648_v12, 256  ;;  %6720 = vbcast.lane.b32.xlu0 %v6718_v1, 256  ;;  %v13739_v59 = vmul.f32 0.5, %v3791_v9  ;;  %v16819_v9 = vld [vmem:[#allocation4_spill] sm:$0xff] }
 0x203   : > { %v11419_v10 = vpop.eup %11418  ;;  %v4426_v44 = vmul.f32 %v4298_v60, %v13652_v31  ;;  %11428 = verf.f32 %v4047_v17  ;;  %v13743_v18 = vpop.f32.mrb[32].mxu0  ;;  %v13752_v31 = vrot.slane %v13730_v5, %v12306_v27  ;;  %v2814_v56 = vcombine.high %v16819_v9, %v16819_v9 }
 0x204   : > { %v11421_v46 = vpop.eup %11420  ;;  %v4425_v48 = vmul.f32 %v4297_v49, %v13658_v25  ;;  %v4300_v16 = vadd.f32 1.0, %v11419_v10  ;;  %v3794_v7 = vadd.f32 %v13254_v54, %v3659_v37  ;;  %v3793_v12 = vadd.f32 %v13254_v54, %v3658_v35  ;;  %v13748_v1 = vpop.f32.mrb[33].mxu0 }
 0x205   : > { %v4299_v42 = vadd.f32 1.0, %v11421_v46  ;;  %v2821_v51 = vrot.slane %v16819_v9, %v12306_v27  ;;  %v13768_v37 = vrot.slane %v2814_v56, %v12306_v27  ;;  %v16820_v46 = vcombine.high %v13468_v2, %v13468_v2 }
 0x206   : > { %v4428_v25 = vmul.f32 %v4300_v16, %v13672_v43  ;;  %v13759_v62 = vmul.f32 0.5, %v3794_v7  ;;  %v4050_v11 = vmul.f32 0.70710677, %v3794_v7  ;;  %10945 = vmatprep.mubr.msk.f32.mxu0 %vm820_vm0, %v4425_v48  ;;  %v13765_v17 = vmul.f32 0.5, %v3793_v12 }
 0x207   : > { %v11423_v58 = vpop.eup %11422  ;;  %v4427_v60 = vmul.f32 %v4299_v42, %v13684_v36  ;;  %v4049_v49 = vmul.f32 0.70710677, %v3793_v12  ;;  %10946 = vmatmul.mubr.msk.f32.gmra.mrb[114].mxu0 %vm820_vm0, %v4426_v44  ;;  %v13771_v43 = vpop.f32.mrb[34].mxu0  ;;  %v2829_v10 = vcombine.high %v2821_v51, %v2821_v51  ;;  %v2809_v48 = vrot.slane %v16820_v46, %v12306_v27 }
 0x208   : > { %v4302_v35 = vadd.f32 1.0, %v11423_v58  ;;  %11430 = verf.f32 %v4050_v11  ;;  %v13777_v16 = vpop.f32.mrb[35].mxu0  ;;  %v13780_v7 = vrot.slane %v2821_v51, %v12306_v27  ;;  %v2795_v44 = vrot.slane %v13468_v2, %v12306_v27 }
 0x209   : > { %v11425_v36 = vpop.eup %11424  ;;  %11432 = verf.f32 %v4049_v49  ;;  %v6732_v12 = vrot.slane %v13682_v45, %v12288_v14  ;;  %10948 = vmatprep.mubr.msk.f32.mxu0 %vm820_vm0, %v4427_v60  ;;  %v3351_v11 = vrot.slane %v2809_v48, %v12296_v21  ;;  %v6599_v58 = vrot.slane %v13349_v20, %v13076_v23 }
 0x20a   : > { %v11427_v42 = vpop.eup %11426  ;;  %v4301_v9 = vadd.f32 1.0, %v11425_v36  ;;  %v3347_v49 = vrot.slane %v2795_v44, %v12296_v21  ;;  %v2813_v2 = vcombine.high %v2809_v48, %v2809_v48  ;;  %v2811_v46 = vcombine.high %v2795_v44, %v2795_v44 }
 0x20b   : > { %v4304_v51 = vadd.f32 1.0, %v11427_v42  ;;  %6734 = vbcast.lane.b32.xlu1 %v6732_v12, 256  ;;  %10949 = vmatmul.mubr.msk.f32.gmra.mrb[116].mxu0 %vm820_vm0, %v4428_v25  ;;  %v13794_v54 = vpop.f32.mrb[36].mxu0  ;;  %v3661_v36 = vadd.f32 %v13424_v6, %v3351_v11  ;;  %v6690_v38 = vrot.slane %v13576_v34, %v12825_v39  ;;  %v6683_v20 = vrot.slane %v13576_v34, %v12343_v53  ;;  %v13812_v11 = vld [vmem:[%s16761_s6] ss:$0 sm:$0xff] }
 0x20c   : > { %v4429_v60 = vmul.f32 %v4301_v9, %v13706_v50  ;;  %6601 = vbcast.lane.b32.xlu0 %v6599_v58, 256  ;;  %v13802_v42 = vpop.f32.mrb[37].mxu0  ;;  %v4430_v48 = vmul.f32 %v4302_v35, %v13702_v22  ;;  %v3660_v25 = vadd.f32 %v3347_v49, %v13432_v0  ;;  %v3359_v44 = vrot.slane %v2813_v2, %v12296_v21 }
 0x20d   : > { %16821 = vst [vmem:[#allocation5_spill] sm:$0xff] %v13802_v42  ;;  %v11429_v12 = vpop.eup %11428  ;;  %v3355_v50 = vrot.slane %v2811_v46, %v12296_v21  ;;  %v4432_v6 = vmul.f32 %v4304_v51, %v13726_v55  ;;  %v3796_v58 = vadd.f32 %v13812_v11, %v3661_v36  ;;  %v2851_v56 = vrot.slane %v2829_v10, %v12306_v27 }
 0x20e   : > { %v4303_v9 = vadd.f32 1.0, %v11429_v12  ;;  %10951 = vmatprep.mubr.msk.f32.mxu0 %vm820_vm0, %v4429_v60  ;;  %v3795_v0 = vadd.f32 %v13812_v11, %v3660_v25  ;;  %v3663_v22 = vadd.f32 %v13448_v13, %v3359_v44  ;;  %v6697_v55 = vrot.slane %v13576_v34, %v12868_v15 }
 0x20f   : > { %v3662_v35 = vadd.f32 %v3355_v50, %v13451_v29  ;;  %6692 = vbcast.lane.b32.xlu1 %v6690_v38, 256  ;;  %v13822_v51 = vpop.f32.mrb[38].mxu0  ;;  %v4052_v2 = vmul.f32 0.70710677, %v3796_v58  ;;  %v3367_v10 = vrot.slane %v2851_v56, %v12296_v21  ;;  %v3363_v46 = vrot.slane %v13780_v7, %v12296_v21  ;;  %10952 = vmatmul.mubr.msk.f32.gmra.mrb[118].mxu0 %vm820_vm0, %v4430_v48 }
 0x210   : > { %16822 = vst [vmem:[#allocation6_spill] sm:$0xff] %v13822_v51  ;;  %v4431_v49 = vmul.f32 %v4303_v9, %v13739_v59  ;;  %6685 = vbcast.lane.b32.xlu0 %v6683_v20, 256  ;;  %v13829_v13 = vpop.f32.mrb[39].mxu0  ;;  %v13831_v29 = vmul.f32 0.5, %v3796_v58  ;;  %v4051_v38 = vmul.f32 0.70710677, %v3795_v0  ;;  %v3798_v60 = vadd.f32 %v13812_v11, %v3663_v22 }
 0x211   : > { %16823 = vst [vmem:[#allocation3_spill] sm:$0xff] %v13829_v13  ;;  %v3797_v36 = vadd.f32 %v13812_v11, %v3662_v35  ;;  %11434 = verf.f32 %v4052_v2  ;;  %v3665_v59 = vadd.f32 %v13470_v30, %v3367_v10  ;;  %v3664_v20 = vadd.f32 %v3363_v46, %v13477_v40  ;;  %v16834_v13 = vld [vmem:[#allocation9_spill] sm:$0xff] }
 0x212   : > { %v11431_v12 = vpop.eup %11430  ;;  %v6655_v25 = vrot.slane %v13418_v19, %v13076_v23  ;;  %10954 = vmatprep.mubr.msk.f32.mxu0 %vm820_vm0, %v4431_v49  ;;  %v13840_v50 = vmul.f32 0.5, %v3795_v0  ;;  %11436 = verf.f32 %v4051_v38  ;;  %v4054_v9 = vmul.f32 0.70710677, %v3798_v60 }
 0x213   : > { %v11433_v48 = vpop.eup %11432  ;;  %v4306_v44 = vadd.f32 1.0, %v11431_v12  ;;  %6699 = vbcast.lane.b32.xlu1 %v6697_v55, 256  ;;  %v13842_v58 = vpop.f32.mrb[40].mxu0  ;;  %v13844_v35 = vmul.f32 0.5, %v3798_v60  ;;  %v4053_v30 = vmul.f32 0.70710677, %v3797_v36  ;;  %v3800_v40 = vadd.f32 %v13812_v11, %v3665_v59  ;;  %10955 = vmatmul.mubr.msk.f32.gmra.mrb[120].mxu0 %vm820_vm0, %v4432_v6 }
 0x214   : > { %16824 = vst [vmem:[#allocation4_spill] sm:$0xff] %v13842_v58  ;;  %v4305_v22 = vadd.f32 1.0, %v11433_v48  ;;  %6657 = vbcast.lane.b32.xlu0 %v6655_v25, 256  ;;  %v13848_v19 = vpop.f32.mrb[41].mxu0  ;;  %11438 = verf.f32 %v4054_v9  ;;  %v13850_v0 = vmul.f32 0.5, %v3797_v36  ;;  %v3799_v49 = vadd.f32 %v13812_v11, %v3664_v20  ;;  %v13854_v55 = vld [vmem:[%s12278_s25 + $0x50] sm:$0xff] }
 0x215   : > { %16825 = vst [vmem:[#allocation25_spill] sm:$0xff] %v13848_v19  ;;  %v2861_v2 = vcombine.high %v2851_v56, %v2851_v56  ;;  %v4434_v10 = vmul.f32 %v4306_v44, %v13759_v62  ;;  %11440 = verf.f32 %v4053_v30  ;;  %v4056_v38 = vmul.f32 0.70710677, %v3800_v40  ;;  %v13876_v25 = vld [vmem:[%s16763_s8] ss:$0 sm:$0xff] }
 0x216   : > { %v4433_v46 = vmul.f32 %v4305_v22, %v13765_v17  ;;  %v13858_v60 = vmul.f32 0.5, %v3800_v40  ;;  %v4055_v12 = vmul.f32 0.70710677, %v3799_v49  ;;  %v2859_v36 = vcombine.high %v13780_v7, %v13780_v7  ;;  %v16829_v48 = vld [vmem:[#allocation2_spill] sm:$0xff] }
 0x217   : > { %v3375_v6 = vrot.slane %v2861_v2, %v12296_v21  ;;  %v13863_v59 = vpop.f32.mrb[42].mxu0  ;;  %11442 = verf.f32 %v4056_v38  ;;  %v6774_v56 = vrot.slane %v13854_v55, %v12296_v21  ;;  %v6739_v62 = vrot.slane %v13682_v45, %v12343_v53 }
 0x218   : > { %16826 = vst [vmem:[#allocation26_spill] sm:$0xff] %v13863_v59  ;;  %v16827_v17 = vcombine.high %v13768_v37, %v13768_v37  ;;  %10957 = vmatprep.mubr.msk.f32.mxu0 %vm820_vm0, %v4433_v46  ;;  %v13879_v7 = vpop.f32.mrb[43].mxu0  ;;  %11444 = verf.f32 %v4055_v12  ;;  %v3371_v9 = vrot.slane %v2859_v36, %v12296_v21  ;;  %v13885_v22 = vrot.slane %v13768_v37, %v12306_v27  ;;  %v16830_v12 = vld [vmem:[#allocation7_spill] sm:$0xff] }
 0x219   : > { %16828 = vst [vmem:[#allocation27_spill] sm:$0xff] %v13879_v7  ;;  %v3667_v44 = vadd.f32 %v16829_v48, %v3375_v6  ;;  %10958 = vmatmul.mubr.msk.f32.gmra.mrb[122].mxu0 %vm820_vm0, %v4434_v10  ;;  %v13888_v30 = vmul.f32 0.5, %v3799_v49  ;;  %6776 = vbcast.lane.b32.xlu1 %v6774_v56, 256  ;;  %v6704_v2 = vrot.slane %v13576_v34, %v12916_v41  ;;  %v16831_v49 = vld [vmem:[#allocation10_spill] sm:$0xff]  ;;  %v16832_v56 = vld [vmem:[#allocation8_spill] sm:$0xff] }
 0x21a   : > { %v2858_v20 = vrot.slane %v16827_v17, %v12306_v27  ;;  %6741 = vbcast.lane.b32.xlu0 %v6739_v62, 256  ;;  %v6746_v46 = vrot.slane %v13682_v45, %v12825_v39  ;;  %v3666_v6 = vadd.f32 %v3371_v9, %v16830_v12  ;;  %v3379_v37 = vrot.slane %v13885_v22, %v12296_v21  ;;  %v16833_v48 = vld [vmem:[#allocation12_spill] sm:$0xff] }
 0x21b   : > { %v3802_v38 = vadd.f32 %v13812_v11, %v3667_v44  ;;  %v4922_v10 = vadd.f32 %v16831_v49, %v13876_v25  ;;  %v11435_v36 = vpop.eup %11434  ;;  %v4917_v34 = vadd.f32 %v13876_v25, %v16833_v48  ;;  %v2860_v7 = vcombine.high %v13885_v22, %v13885_v22 }
 0x21c   : > { %v3383_v40 = vrot.slane %v2858_v20, %v12296_v21  ;;  %v2862_v17 = vcombine.high %v2858_v20, %v2858_v20  ;;  %v11437_v59 = vpop.eup %11436  ;;  %v4308_v44 = vadd.f32 1.0, %v11435_v36  ;;  %v3801_v12 = vadd.f32 %v13812_v11, %v3666_v6 }
 0x21d   : > { %v13906_v19 = vmul.f32 0.5, %v3802_v38  ;;  %v4058_v9 = vmul.f32 0.70710677, %v3802_v38  ;;  %v4307_v58 = vadd.f32 1.0, %v11437_v59  ;;  %v3668_v51 = vadd.f32 %v3379_v37, %v16834_v13  ;;  %6706 = vbcast.lane.b32.xlu1 %v6704_v2, 256 }
 0x21e   : > { %v3669_v62 = vadd.f32 %v16832_v56, %v3383_v40  ;;  %6748 = vbcast.lane.b32.xlu0 %v6746_v46, 256  ;;  %v13911_v20 = vmul.f32 0.5, %v4922_v10  ;;  %v11439_v40 = vpop.eup %11438  ;;  %v4436_v56 = vmul.f32 %v4308_v44, %v13831_v29  ;;  %v13914_v22 = vmul.f32 0.5, %v3801_v12 }
 0x21f   : > { %11446 = verf.f32 %v4058_v9  ;;  %v4057_v36 = vmul.f32 0.70710677, %v3801_v12  ;;  %v11441_v48 = vpop.eup %11440  ;;  %v4435_v38 = vmul.f32 %v4307_v58, %v13840_v50  ;;  %v4310_v6 = vadd.f32 1.0, %v11439_v40  ;;  %v16835_v40 = vld [vmem:[#allocation11_spill] sm:$0xff] }
 0x220   : > { %v3804_v49 = vadd.f32 %v13812_v11, %v3669_v62  ;;  %v4309_v42 = vadd.f32 1.0, %v11441_v48  ;;  %v3803_v13 = vadd.f32 %v13812_v11, %v3668_v51  ;;  %v5684_v2 = vmul.f32 0.70710677, %v4922_v10  ;;  %v13920_v46 = vpop.f32.mrb[44].mxu0 }
 0x221   : > { %11448 = verf.f32 %v4057_v36  ;;  %v11443_v37 = vpop.eup %11442  ;;  %v4438_v29 = vmul.f32 %v4310_v6, %v13844_v35  ;;  %v3391_v44 = vrot.slane %v2862_v17, %v12296_v21  ;;  %v13924_v9 = vmul.f32 0.5, %v4917_v34  ;;  %10960 = vmatprep.mubr.msk.f32.mxu0 %vm820_vm0, %v4435_v38  ;;  %v13927_v50 = vpop.f32.mrb[45].mxu0 }
 0x222   : > { %v13917_v59 = vmul.f32 0.5, %v3804_v49  ;;  %v4060_v62 = vmul.f32 0.70710677, %v3804_v49  ;;  %v11445_v58 = vpop.eup %11444  ;;  %v4437_v12 = vmul.f32 %v4309_v42, %v13850_v0  ;;  %v4312_v51 = vadd.f32 1.0, %v11443_v37  ;;  %10961 = vmatmul.mubr.msk.f32.gmra.mrb[124].mxu0 %vm820_vm0, %v4436_v56  ;;  %v13939_v42 = vld [vmem:[%s12278_s25 + $0x58] sm:$0xff] }
 0x223   : > { %v13930_v10 = vmul.f32 0.5, %v3803_v13  ;;  %v4059_v49 = vmul.f32 0.70710677, %v3803_v13  ;;  %v4311_v35 = vadd.f32 1.0, %v11445_v58  ;;  %v3671_v17 = vadd.f32 %v16835_v40, %v3391_v44 }
 0x224   : > { %11450 = verf.f32 %v4060_v62  ;;  %v5683_v36 = vmul.f32 0.70710677, %v4917_v34  ;;  %v4440_v48 = vmul.f32 %v4312_v51, %v13858_v60  ;;  %v3387_v38 = vrot.slane %v2860_v7, %v12296_v21  ;;  %10963 = vmatprep.mubr.msk.f32.mxu0 %vm820_vm0, %v4437_v12  ;;  %v13942_v0 = vpop.f32.mrb[46].mxu0 }
 0x225   : > { %11452 = verf.f32 %v5684_v2  ;;  %v6788_v6 = vrot.slane %v13854_v55, %v12288_v14  ;;  %16836 = vst [vmem:[#allocation2_spill] sm:$0xff] %v13942_v0  ;;  %v4439_v56 = vmul.f32 %v4311_v35, %v13888_v30  ;;  %v3806_v62 = vadd.f32 %v13812_v11, %v3671_v17  ;;  %v13948_v34 = vpop.f32.mrb[47].mxu0 }
 0x226   : > { %11454 = verf.f32 %v4059_v49  ;;  %v6781_v60 = vrot.slane %v13854_v55, %v12804_v61  ;;  %16837 = vst [vmem:[#allocation7_spill] sm:$0xff] %v13948_v34  ;;  %v3670_v7 = vadd.f32 %v3387_v38, %v13556_v52  ;;  %v4932_v13 = vadd.f32 %v13564_v24, %v13876_v25  ;;  %10964 = vmatmul.mubr.msk.f32.gmra.mrb[126].mxu0 %vm820_vm0, %v4438_v29 }
 0x227   : > { %11456 = verf.f32 %v5683_v36  ;;  %6790 = vbcast.lane.b32.xlu1 %v6788_v6, 256  ;;  %v16838_v2 = vcombine.high %v13730_v5, %v13730_v5  ;;  %v4927_v30 = vadd.f32 %v13876_v25, %v13571_v26  ;;  %v13961_v44 = vmul.f32 0.5, %v3806_v62  ;;  %10966 = vmatprep.mubr.msk.f32.mxu0 %vm820_vm0, %v4439_v56 }
 0x228   : > { %v4062_v58 = vmul.f32 0.70710677, %v3806_v62  ;;  %6783 = vbcast.lane.b32.xlu0 %v6781_v60, 256  ;;  %v3395_v52 = vrot.slane %v13752_v31, %v12296_v21  ;;  %v6837_v12 = vrot.slane %v13939_v42, %v12804_v61  ;;  %v3805_v5 = vadd.f32 %v13812_v11, %v3670_v7  ;;  %v13974_v35 = vpop.f32.mrb[48].mxu0 }
 0x229   : > { %v13957_v37 = vrot.slane %v16838_v2, %v12306_v27  ;;  %v11447_v24 = vpop.eup %11446  ;;  %v13969_v51 = vmul.f32 0.5, %v4932_v13  ;;  %v5686_v49 = vmul.f32 0.70710677, %v4932_v13  ;;  %16839 = vst [vmem:[#allocation10_spill] sm:$0xff] %v13974_v35  ;;  %v13976_v17 = vmul.f32 0.5, %v4927_v30  ;;  %v13978_v38 = vpop.f32.mrb[49].mxu0 }
 0x22a   : > { %v4314_v40 = vadd.f32 1.0, %v11447_v24  ;;  %11458 = verf.f32 %v4062_v58  ;;  %v5685_v36 = vmul.f32 0.70710677, %v4927_v30  ;;  %16840 = vst [vmem:[#allocation8_spill] sm:$0xff] %v13978_v38  ;;  %v13980_v6 = vmul.f32 0.5, %v3805_v5  ;;  %v6217_v2 = vpop.permute.xlu0 %6216  ;;  %10967 = vmatmul.mubr.msk.f32.gmra.mrb[128].mxu0 %vm820_vm0, %v4440_v48 }
 0x22b   : > { %v3399_v26 = vrot.slane %v13957_v37, %v12296_v21  ;;  %v11449_v29 = vpop.eup %11448  ;;  %v4061_v62 = vmul.f32 0.70710677, %v3805_v5  ;;  %11460 = verf.f32 %v5686_v49  ;;  %6839 = vbcast.lane.b32.xlu1 %v6837_v12, 256  ;;  %v3672_v58 = vadd.f32 %v3395_v52, %v13579_v63 }
 0x22c   : > { %v4442_v56 = vmul.f32 %v4314_v40, %v13906_v19  ;;  %v4313_v13 = vadd.f32 1.0, %v11449_v29  ;;  %11462 = verf.f32 %v5685_v36  ;;  %v6753_v5 = vrot.slane %v13682_v45, %v12868_v15  ;;  %v16841_v19 = vld [vmem:[#allocation13_spill] sm:$0xff] }
 0x22d   : > { %v3673_v60 = vadd.f32 %v13569_v28, %v3399_v26  ;;  %11464 = verf.f32 %v4061_v62  ;;  %v3807_v12 = vadd.f32 %v13812_v11, %v3672_v58  ;;  %v4942_v26 = vadd.f32 %v16841_v19, %v13876_v25 }
 0x22e   : > { %v11451_v7 = vpop.eup %11450  ;;  %v4441_v28 = vmul.f32 %v4313_v13, %v13914_v22  ;;  %v2910_v63 = vcombine.high %v13957_v37, %v13957_v37  ;;  %6755 = vbcast.lane.b32.xlu0 %v6753_v5, 256  ;;  %v16842_v5 = vld [vmem:[#allocation15_spill] sm:$0xff] }
 0x22f   : > { %v4316_v30 = vadd.f32 1.0, %v11451_v7  ;;  %v3808_v24 = vadd.f32 %v13812_v11, %v3673_v60  ;;  %v11453_v49 = vpop.eup %11452  ;;  %v13998_v7 = vmul.f32 0.5, %v3807_v12  ;;  %v4063_v22 = vmul.f32 0.70710677, %v3807_v12 }
 0x230   : > { %v11455_v52 = vpop.eup %11454  ;;  %v5940_v40 = vadd.f32 1.0, %v11453_v49  ;;  %v14000_v13 = vmul.f32 0.5, %v4942_v26  ;;  %10969 = vmatprep.mubr.msk.f32.mxu0 %vm820_vm0, %v4441_v28  ;;  %v5688_v19 = vmul.f32 0.70710677, %v4942_v26  ;;  %v4937_v49 = vadd.f32 %v13876_v25, %v16842_v5  ;;  %v16843_v26 = vld [vmem:[#allocation14_spill] sm:$0xff] }
 0x231   : > { %v4444_v48 = vmul.f32 %v4316_v30, %v13917_v59  ;;  %v13996_v36 = vmul.f32 0.5, %v3808_v24  ;;  %v4064_v29 = vmul.f32 0.70710677, %v3808_v24  ;;  %v11457_v62 = vpop.eup %11456  ;;  %v4315_v60 = vadd.f32 1.0, %v11455_v52  ;;  %10970 = vmatmul.mubr.msk.f32.gmra.mrb[130].mxu0 %vm820_vm0, %v4442_v56  ;;  %v6224_v30 = vpop.permute.xlu0 %6223 }
 0x232   : > { %v6068_v58 = vmul.f32 %v5940_v40, %v13911_v20  ;;  %v5939_v37 = vadd.f32 1.0, %v11457_v62  ;;  %v3407_v24 = vrot.slane %v2910_v63, %v12296_v21  ;;  %v2908_v20 = vcombine.high %v13752_v31, %v13752_v31 }
 0x233   : > { %11466 = verf.f32 %v4064_v29  ;;  %v4443_v59 = vmul.f32 %v4315_v60, %v13930_v10  ;;  %v14013_v56 = vmul.f32 0.5, %v4937_v49  ;;  %v5687_v10 = vmul.f32 0.70710677, %v4937_v49 }
 0x234   : > { %11468 = verf.f32 %v4063_v22  ;;  %v7108_v12 = vmul.f32 %v6224_v30, %v6068_v58  ;;  %v6067_v52 = vmul.f32 %v5939_v37, %v13924_v9  ;;  %v11459_v28 = vpop.eup %11458  ;;  %v3675_v40 = vadd.f32 %v16843_v26, %v3407_v24 }
 0x235   : > { %11470 = verf.f32 %v5688_v19  ;;  %v6760_v29 = vrot.slane %v13682_v45, %v12916_v41  ;;  %10972 = vmatprep.mubr.msk.f32.mxu0 %vm820_vm0, %v4443_v59  ;;  %v14018_v63 = vpop.eup %11460  ;;  %v4318_v9 = vadd.f32 1.0, %v11459_v28  ;;  %v3403_v22 = vrot.slane %v2908_v20, %v12296_v21  ;;  %v6231_v28 = vpop.permute.xlu1 %6230 }
 0x236   : > { %v7242_v62 = vsel %vm820_vm0, %v7108_v12, 0.0  ;;  %v7107_v60 = vmul.f32 %v6217_v2, %v6067_v52  ;;  %10973 = vmatmul.mubr.msk.f32.gmra.mrb[132].mxu0 %vm820_vm0, %v4444_v48  ;;  %v11463_v31 = vpop.eup %11462  ;;  %v3810_v37 = vadd.f32 %v13812_v11, %v3675_v40  ;;  %11472 = verf.f32 %v5687_v10  ;;  %v16844_v2 = vld [vmem:[#allocation16_spill] sm:$0xff] }
 0x237   : > { %v7243_v58 = vrot.slane %v7242_v62, 4  ;;  %6762 = vbcast.lane.b32.xlu1 %v6760_v29, 256  ;;  %v6830_v19 = vrot.slane %v13939_v42, %v12296_v21  ;;  %v11465_v59 = vpop.eup %11464  ;;  %v4446_v30 = vmul.f32 %v4318_v9, %v13961_v44  ;;  %v5941_v5 = vadd.f32 1.0, %v11463_v31  ;;  %v16845_v44 = vld [vmem:[#allocation17_spill] sm:$0xff] }
 0x238   : > { %v7235_v24 = vsel %vm820_vm0, %v7107_v60, 0.0  ;;  %v3674_v49 = vadd.f32 %v3403_v22, %v16844_v2  ;;  %v4317_v48 = vadd.f32 1.0, %v11465_v59  ;;  %v14029_v20 = vmul.f32 0.5, %v3810_v37 }
 0x239   : > { %v7244_v12 = vadd.f32 %v7243_v58, %v7242_v62  ;;  %v7236_v52 = vrot.slane %v7235_v24, 4  ;;  %6832 = vbcast.lane.b32.xlu0 %v6830_v19, 256  ;;  %v6069_v26 = vmul.f32 %v5941_v5, %v13976_v17  ;;  %v4066_v40 = vmul.f32 0.70710677, %v3810_v37 }
 0x23a   : > { %v3809_v10 = vadd.f32 %v13812_v11, %v3674_v49  ;;  %v4952_v29 = vadd.f32 %v16845_v44, %v13876_v25  ;;  %v4445_v22 = vmul.f32 %v4317_v48, %v13980_v6  ;;  %v16846_v62 = vcombine.high %v13736_v8, %v13736_v8  ;;  %v14047_v6 = vpop.f32.mrb[50].mxu0 }
 0x23b   : > { %v7245_v9 = vrot.slane %v7244_v12, 2  ;;  %v7237_v60 = vadd.f32 %v7236_v52, %v7235_v24  ;;  %v7109_v19 = vmul.f32 %v6231_v28, %v6069_v26  ;;  %11474 = verf.f32 %v4066_v40  ;;  %16847 = vst [vmem:[#allocation12_spill] sm:$0xff] %v14047_v6  ;;  %v14051_v52 = vpop.permute.xlu0 %6279  ;;  %v11831_v6 = vld [vmem:[%s12278_s25 + $0x40] sm:$0xff] }
 0x23c   : > { %v14040_v31 = vrot.slane %v16846_v62, %v12306_v27  ;;  %v14042_v17 = vmul.f32 0.5, %v3809_v10  ;;  %v4065_v37 = vmul.f32 0.70710677, %v3809_v10  ;;  %v14044_v44 = vmul.f32 0.5, %v4952_v29  ;;  %10975 = vmatprep.mubr.msk.f32.mxu0 %vm820_vm0, %v4445_v22 }
 0x23d   : > { %v11467_v58 = vpop.eup %11466  ;;  %v7246_v5 = vadd.f32 %v7245_v9, %v7244_v12  ;;  %v7238_v2 = vrot.slane %v7237_v60, 2  ;;  %v7249_v28 = vsel %vm820_vm0, %v7109_v19, 0.0  ;;  %v5690_v26 = vmul.f32 0.70710677, %v4952_v29  ;;  %10976 = vmatmul.mubr.msk.f32.gmra.mrb[134].mxu0 %vm820_vm0, %v4446_v30  ;;  %v14055_v12 = vpop.f32.mrb[51].mxu0 }
 0x23e   : > { %v11469_v59 = vpop.eup %11468  ;;  %v4320_v49 = vadd.f32 1.0, %v11467_v58  ;;  %11476 = verf.f32 %v4065_v37  ;;  %16848 = vst [vmem:[#allocation9_spill] sm:$0xff] %v14055_v12  ;;  %v7250_v22 = vrot.slane %v7249_v28, 4  ;;  %v14059_v58 = vpop.permute.xlu1 %6272  ;;  %v3415_v19 = vrot.slane %v14040_v31, %v12296_v21  ;;  %v16849_v37 = vld [vmem:[#allocation19_spill] sm:$0xff] }
 0x23f   : > { %v14049_v24 = vpop.eup %11470  ;;  %v4319_v48 = vadd.f32 1.0, %v11469_v59  ;;  %v7247_v40 = vrot.slane %v7246_v5, 1  ;;  %v7239_v10 = vadd.f32 %v7238_v2, %v7237_v60  ;;  %11478 = verf.f32 %v5690_v26  ;;  %v8183_v2 = vld [vmem:[%s16764_s9 + $0x18] sm:$0xff] }
 0x240   : > { %v4448_v9 = vmul.f32 %v4320_v49, %v13996_v36  ;;  %v4947_v29 = vadd.f32 %v13876_v25, %v16849_v37  ;;  %v14065_v30 = vpop.eup %11472  ;;  %v7251_v60 = vadd.f32 %v7250_v22, %v7249_v28  ;;  %v14069_v36 = vrot.slane %v13736_v8, %v12306_v27  ;;  %v14077_v49 = vpop.f32.mrb[52].mxu0 }
 0x241   : > { %v4447_v62 = vmul.f32 %v4319_v48, %v13998_v7  ;;  %v7248_v59 = vadd.f32 %v7247_v40, %v7246_v5  ;;  %v7240_v12 = vrot.slane %v7239_v10, 1  ;;  %v8182_v7 = vld [vmem:[%s16764_s9 + $0x10] sm:$0xff]  ;;  %16850 = vst [vmem:[#allocation11_spill] sm:$0xff] %v14077_v49  ;;  %v16851_v48 = vld [vmem:[#allocation18_spill] sm:$0xff]  ;;  %v6844_v27 = vrot.slane %v13939_v42, %v12288_v14  ;;  %v14085_v8 = vpop.f32.mrb[53].mxu0 }
 0x242   : > { %v3677_v26 = vadd.f32 %v16851_v48, %v3415_v19  ;;  %v14080_v5 = vmul.f32 0.5, %v4947_v29  ;;  %v5689_v28 = vmul.f32 0.70710677, %v4947_v29  ;;  %16852 = vst [vmem:[#allocation13_spill] sm:$0xff] %v14085_v8  ;;  %v7252_v22 = vrot.slane %v7251_v60, 2  ;;  %v14091_v19 = vpop.permute.xlu0 %6286 }
 0x243   : > { %10978 = vmatprep.mubr.msk.f32.mxu0 %vm820_vm0, %v4447_v62  ;;  %v7241_v40 = vadd.f32 %v7240_v12, %v7239_v10  ;;  %v3411_v37 = vrot.slane %v14069_v36, %v12296_v21  ;;  %v5942_v49 = vadd.f32 1.0, %v14018_v63  ;;  %6846 = vbcast.lane.b32.xlu1 %v6844_v27, 256  ;;  %v11146_v48 = vpack.c.bf16 %v8183_v2, %v8182_v7  ;;  %v16853_v10 = vld [vmem:[#allocation20_spill] sm:$0xff]  ;;  %v14099_v63 = vpop.f32.mrb[54].mxu0  ;;  %v16854_v7 = vld [vmem:[#allocation21_spill] sm:$0xff] }
 0x244   : > { %10979 = vmatmul.mubr.msk.f32.gmra.mrb[136].mxu0 %vm820_vm0, %v4448_v9  ;;  %v3812_v29 = vadd.f32 %v13812_v11, %v3677_v26  ;;  %11480 = verf.f32 %v5689_v28  ;;  %v6711_v62 = vrot.slane %v11831_v6, %v13076_v23  ;;  %v7253_v8 = vadd.f32 %v7252_v22, %v7251_v60  ;;  %v6238_v26 = vpop.permute.xlu1 %6237 }
 0x245   : > { %v8336_v12 = vsel %vm8335_vm2, %v7248_v59, %v7241_v40  ;;  %v3676_v38 = vadd.f32 %v3411_v37, %v16853_v10  ;;  %v6070_v35 = vmul.f32 %v5942_v49, %v13969_v51  ;;  %v11475_v9 = vpop.eup %11474  ;;  %11147 = vmatprep.subr.bf16.mxu1 %v11146_v48  ;;  %v4962_v2 = vadd.f32 %v16854_v7, %v13876_v25  ;;  %v14107_v59 = vpop.f32.mrb[55].mxu0 }
 0x246   : > { %v14101_v34 = vmul.f32 0.5, %v3812_v29  ;;  %v4068_v0 = vmul.f32 0.70710677, %v3812_v29  ;;  %6713 = vbcast.lane.b32.xlu0 %v6711_v62, 256  ;;  %v2911_v6 = vcombine.high %v14040_v31, %v14040_v31  ;;  %v7254_v60 = vrot.slane %v7253_v8, 1  ;;  %11149 = vmatpush3.bf16.msra.mxu1 %v11146_v48  ;;  %v14116_v7 = vpop.f32.mrb[56].mxu0 }
 0x247   : > { %v4322_v28 = vadd.f32 1.0, %v11475_v9  ;;  %v3811_v51 = vadd.f32 %v13812_v11, %v3676_v38  ;;  %v7110_v49 = vmul.f32 %v6238_v26, %v6070_v35  ;;  %v14110_v40 = vmul.f32 0.5, %v4962_v2  ;;  %16855 = vst [vmem:[#allocation15_spill] sm:$0xff] %v14116_v7  ;;  %v14120_v38 = vpop.permute.xlu0 %6293  ;;  %v16856_v48 = vld [vmem:[#allocation22_spill] sm:$0xff] }
 0x248   : > { %v11477_v27 = vpop.eup %11476  ;;  %11482 = verf.f32 %v4068_v0  ;;  %v5692_v22 = vmul.f32 0.70710677, %v4962_v2  ;;  %v3423_v37 = vrot.slane %v2911_v6, %v12296_v21  ;;  %v7255_v29 = vadd.f32 %v7254_v60, %v7253_v8  ;;  %v14124_v2 = vpop.f32.mrb[57].mxu0  ;;  %v16858_v60 = vld [vmem:[#allocation23_spill] sm:$0xff] }
 0x249   : > { %v4450_v62 = vmul.f32 %v4322_v28, %v14029_v20  ;;  %v4321_v10 = vadd.f32 1.0, %v11477_v27  ;;  %v14114_v31 = vmul.f32 0.5, %v3811_v51  ;;  %v14118_v9 = vpop.eup %11478  ;;  %v4067_v35 = vmul.f32 0.70710677, %v3811_v51  ;;  %16857 = vst [vmem:[#allocation14_spill] sm:$0xff] %v14124_v2 }
 0x24a   : > { %v7256_v0 = vsel %vm820_vm0, %v7110_v49, 0.0  ;;  %11484 = verf.f32 %v5692_v22  ;;  %v3679_v26 = vadd.f32 %v16856_v48, %v3423_v37  ;;  %v14127_v8 = vsel %vm8337_vm3, %v7255_v29, %v8336_v12 }
 0x24b   : > { %v4449_v20 = vmul.f32 %v4321_v10, %v14042_v17  ;;  %v7257_v6 = vrot.slane %v7256_v0, 4  ;;  %v4957_v28 = vadd.f32 %v13876_v25, %v16858_v60  ;;  %11486 = verf.f32 %v4067_v35 }
 0x24c   : > { %v3814_v27 = vadd.f32 %v13812_v11, %v3679_v26  ;;  %v2909_v51 = vcombine.high %v14069_v36, %v14069_v36  ;;  %v6802_v49 = vrot.slane %v13854_v55, %v12825_v39  ;;  %v5943_v29 = vadd.f32 1.0, %v14065_v30 }
 0x24d   : > { %v7258_v22 = vadd.f32 %v7257_v6, %v7256_v0  ;;  %v14137_v37 = vmul.f32 0.5, %v4957_v28  ;;  %v5691_v12 = vmul.f32 0.70710677, %v4957_v28  ;;  %10981 = vmatprep.mubr.msk.f32.mxu0 %vm820_vm0, %v4449_v20  ;;  %v6795_v36 = vrot.slane %v13854_v55, %v12343_v53  ;;  %v14152_v20 = vpop.permute.xlu0 %6300  ;;  %v16859_v6 = vld [vmem:[#allocation24_spill] sm:$0xff]  ;;  %v6245_v28 = vpop.permute.xlu1 %6244 }
 0x24e   : > { %v14141_v17 = vpop.eup %11480  ;;  %v14143_v10 = vmul.f32 0.5, %v3814_v27  ;;  %v4070_v35 = vmul.f32 0.70710677, %v3814_v27  ;;  %v3419_v48 = vrot.slane %v2909_v51, %v12296_v21  ;;  %6804 = vbcast.lane.b32.xlu1 %v6802_v49, 256  ;;  %10982 = vmatmul.mubr.msk.f32.gmra.mrb[138].mxu0 %vm820_vm0, %v4450_v62  ;;  %v6071_v26 = vmul.f32 %v5943_v29, %v14013_v56 }
 0x24f   : > { %v7259_v0 = vrot.slane %v7258_v22, 2  ;;  %11488 = verf.f32 %v5691_v12  ;;  %v4972_v30 = vadd.f32 %v13669_v32, %v13876_v25  ;;  %6797 = vbcast.lane.b32.xlu0 %v6795_v36, 256  ;;  %v4967_v27 = vadd.f32 %v13876_v25, %v13675_v57 }
 0x250   : > { %11490 = verf.f32 %v4070_v35  ;;  %v3678_v60 = vadd.f32 %v3419_v48, %v16859_v6  ;;  %v6809_v62 = vrot.slane %v13854_v55, %v12868_v15  ;;  %v7111_v49 = vmul.f32 %v6245_v28, %v6071_v26 }
 0x251   : > { %v7260_v51 = vadd.f32 %v7259_v0, %v7258_v22  ;;  %v14159_v12 = vmul.f32 0.5, %v4972_v30  ;;  %v5694_v56 = vmul.f32 0.70710677, %v4972_v30  ;;  %v14162_v2 = vmul.f32 0.5, %v4967_v27 }
 0x252   : > { %v11483_v29 = vpop.eup %11482  ;;  %v3813_v32 = vadd.f32 %v13812_v11, %v3678_v60  ;;  %v5693_v35 = vmul.f32 0.70710677, %v4967_v27  ;;  %6811 = vbcast.lane.b32.xlu1 %v6809_v62, 256  ;;  %v5944_v48 = vadd.f32 1.0, %v14049_v24  ;;  %v7263_v6 = vsel %vm820_vm0, %v7111_v49, 0.0  ;;  %v14173_v62 = vld [vmem:[%s12278_s25 + $0x60] sm:$0xff]  ;;  %v14175_v49 = vpop.permute.xlu0 %6335 }
 0x253   : > { %v4324_v36 = vadd.f32 1.0, %v11483_v29  ;;  %v7261_v57 = vrot.slane %v7260_v51, 1  ;;  %11492 = verf.f32 %v5694_v56  ;;  %v7264_v30 = vrot.slane %v7263_v6, 4  ;;  %v6252_v56 = vpop.permute.xlu1 %6251 }
 0x254   : > { %v11485_v22 = vpop.eup %11484  ;;  %v14166_v0 = vmul.f32 0.5, %v3813_v32  ;;  %v4069_v26 = vmul.f32 0.70710677, %v3813_v32  ;;  %11494 = verf.f32 %v5693_v35  ;;  %v6072_v27 = vmul.f32 %v5944_v48, %v14000_v13 }
 0x255   : > { %v4452_v11 = vmul.f32 %v4324_v36, %v14101_v34  ;;  %v14169_v60 = vadd.f32 %v7261_v57, %v7260_v51  ;;  %v5948_v28 = vadd.f32 1.0, %v11485_v22  ;;  %v11487_v24 = vpop.eup %11486  ;;  %v7265_v29 = vadd.f32 %v7264_v30, %v7263_v6 }
 0x256   : > { %11496 = verf.f32 %v4069_v26  ;;  %v6767_v32 = vrot.slane %v13682_v45, %v13076_v23  ;;  %v4982_v35 = vadd.f32 %v13692_v3, %v13876_v25  ;;  %v4323_v34 = vadd.f32 1.0, %v11487_v24 }
 0x257   : > { %v6076_v51 = vmul.f32 %v5948_v28, %v14110_v40  ;;  %v7112_v36 = vmul.f32 %v6252_v56, %v6072_v27  ;;  %v4977_v13 = vadd.f32 %v13876_v25, %v13700_v47  ;;  %v7266_v48 = vrot.slane %v7265_v29, 2 }
 0x258   : > { %6769 = vbcast.lane.b32.xlu0 %v6767_v32, 256  ;;  %v14184_v57 = vmul.f32 0.5, %v4982_v35  ;;  %v5696_v6 = vmul.f32 0.70710677, %v4982_v35  ;;  %v6886_v22 = vrot.slane %v14173_v62, %v12296_v21  ;;  %v4451_v45 = vmul.f32 %v4323_v34, %v14114_v31 }
 0x259   : > { %v11489_v26 = vpop.eup %11488  ;;  %v7116_v3 = vmul.f32 %v14051_v52, %v6076_v51  ;;  %v7270_v30 = vsel %vm820_vm0, %v7112_v36, 0.0  ;;  %v14191_v40 = vmul.f32 0.5, %v4977_v13  ;;  %v7267_v47 = vadd.f32 %v7266_v48, %v7265_v29  ;;  %v14197_v52 = vpop.f32.mrb[58].mxu0 }
 0x25a   : > { %v11491_v28 = vpop.eup %11490  ;;  %v5947_v27 = vadd.f32 1.0, %v11489_v26  ;;  %v7271_v24 = vrot.slane %v7270_v30, 4  ;;  %11498 = verf.f32 %v5696_v6  ;;  %6888 = vbcast.lane.b32.xlu1 %v6886_v22, 256  ;;  %v5695_v35 = vmul.f32 0.70710677, %v4977_v13  ;;  %10984 = vmatprep.mubr.msk.f32.mxu0 %vm820_vm0, %v4451_v45  ;;  %16860 = vst [vmem:[#allocation16_spill] sm:$0xff] %v14197_v52  ;;  %v14200_v29 = vpop.permute.xlu0 %6307 }
 0x25b   : > { %v7298_v56 = vsel %vm820_vm0, %v7116_v3, 0.0  ;;  %v4326_v32 = vadd.f32 1.0, %v11491_v28  ;;  %v6851_v7 = vrot.slane %v13939_v42, %v12343_v53  ;;  %v7268_v51 = vrot.slane %v7267_v47, 1  ;;  %10985 = vmatmul.mubr.msk.f32.gmra.mrb[140].mxu0 %vm820_vm0, %v4452_v11  ;;  %v14203_v48 = vpop.f32.mrb[59].mxu0 }
 0x25c   : > { %v7299_v31 = vrot.slane %v7298_v56, 4  ;;  %v6075_v34 = vmul.f32 %v5947_v27, %v14137_v37  ;;  %v7272_v36 = vadd.f32 %v7271_v24, %v7270_v30  ;;  %16861 = vst [vmem:[#allocation17_spill] sm:$0xff] %v14203_v48  ;;  %11500 = verf.f32 %v5695_v35 }
 0x25d   : > { %v11493_v6 = vpop.eup %11492  ;;  %v4454_v13 = vmul.f32 %v4326_v32, %v14143_v10  ;;  %6853 = vbcast.lane.b32.xlu0 %v6851_v7, 256  ;;  %v4992_v22 = vadd.f32 %v13718_v33, %v13876_v25  ;;  %v4987_v26 = vadd.f32 %v13876_v25, %v13724_v4  ;;  %v14211_v30 = vadd.f32 %v7268_v51, %v7267_v47  ;;  %v14215_v32 = vpop.f32.mrb[60].mxu0 }
 0x25e   : > { %v11495_v37 = vpop.eup %11494  ;;  %v7300_v45 = vadd.f32 %v7299_v31, %v7298_v56  ;;  %v7115_v3 = vmul.f32 %v14059_v58, %v6075_v34  ;;  %v5950_v11 = vadd.f32 1.0, %v11493_v6  ;;  %v7273_v27 = vrot.slane %v7272_v36, 2  ;;  %16862 = vst [vmem:[#allocation19_spill] sm:$0xff] %v14215_v32  ;;  %v14221_v56 = vpop.f32.mrb[61].mxu0 }
 0x25f   : > { %v5949_v28 = vadd.f32 1.0, %v11495_v37  ;;  %v14213_v24 = vmul.f32 0.5, %v4992_v22  ;;  %v5698_v10 = vmul.f32 0.70710677, %v4992_v22  ;;  %v14219_v48 = vmul.f32 0.5, %v4987_v26  ;;  %16863 = vst [vmem:[#allocation18_spill] sm:$0xff] %v14221_v56  ;;  %v14224_v51 = vpop.permute.xlu1 %6328  ;;  %v14227_v37 = vpop.permute.xlu0 %6384 }
 0x260   : > { %v11497_v7 = vpop.eup %11496  ;;  %v7301_v35 = vrot.slane %v7300_v45, 2  ;;  %v7291_v33 = vsel %vm820_vm0, %v7115_v3, 0.0  ;;  %v6078_v4 = vmul.f32 %v5950_v11, %v14159_v12  ;;  %v7274_v34 = vadd.f32 %v7273_v27, %v7272_v36  ;;  %v14231_v52 = vpop.f32.mrb[62].mxu0 }
 0x261   : > { %v7292_v58 = vrot.slane %v7291_v33, 4  ;;  %v4325_v47 = vadd.f32 1.0, %v11497_v7  ;;  %v6077_v31 = vmul.f32 %v5949_v28, %v14162_v2  ;;  %11502 = verf.f32 %v5698_v10  ;;  %16864 = vst [vmem:[#allocation20_spill] sm:$0xff] %v14231_v52 }
 0x262   : > { %v7302_v6 = vadd.f32 %v7301_v35, %v7300_v45  ;;  %v7118_v22 = vmul.f32 %v14120_v38, %v6078_v4  ;;  %v5697_v3 = vmul.f32 0.70710677, %v4987_v26  ;;  %v7275_v56 = vrot.slane %v7274_v34, 1  ;;  %v14236_v45 = vpop.f32.mrb[63].mxu0 }
 0x263   : > { %v7293_v32 = vadd.f32 %v7292_v58, %v7291_v33  ;;  %v4453_v12 = vmul.f32 %v4325_v47, %v14166_v0  ;;  %v7117_v11 = vmul.f32 %v14091_v19, %v6077_v31  ;;  %v6816_v38 = vrot.slane %v13854_v55, %v12916_v41  ;;  %16865 = vst [vmem:[#allocation21_spill] sm:$0xff] %v14236_v45  ;;  %v6259_v47 = vpop.permute.xlu1 %6258 }
 0x264   : > { %v11499_v7 = vpop.eup %11498  ;;  %v7303_v2 = vrot.slane %v7302_v6, 1  ;;  %v7312_v36 = vsel %vm820_vm0, %v7118_v22, 0.0  ;;  %11504 = verf.f32 %v5697_v3  ;;  %v14239_v0 = vadd.f32 %v7275_v56, %v7274_v34  ;;  %v14247_v34 = vpop.f32.mrb[64].mxu0 }
 0x265   : > { %v7294_v28 = vrot.slane %v7293_v32, 2  ;;  %v7313_v26 = vrot.slane %v7312_v36, 4  ;;  %v7305_v27 = vsel %vm820_vm0, %v7117_v11, 0.0  ;;  %10987 = vmatprep.mubr.msk.f32.mxu0 %vm820_vm0, %v4453_v12  ;;  %v5952_v35 = vadd.f32 1.0, %v11499_v7  ;;  %6818 = vbcast.lane.b32.xlu1 %v6816_v38, 256  ;;  %16866 = vst [vmem:[#allocation22_spill] sm:$0xff] %v14247_v34 }
 0x266   : > { %v7304_v19 = vadd.f32 %v7303_v2, %v7302_v6  ;;  %v7306_v10 = vrot.slane %v7305_v27, 4  ;;  %v5945_v33 = vadd.f32 1.0, %v14141_v17  ;;  %10988 = vmatmul.mubr.msk.f32.gmra.mrb[142].mxu0 %vm820_vm0, %v4454_v13  ;;  %v11501_v4 = vpop.eup %11500  ;;  %v5946_v31 = vadd.f32 1.0, %v14118_v9  ;;  %v6266_v17 = vpop.permute.xlu0 %6265 }
 0x267   : > { %v7295_v55 = vadd.f32 %v7294_v28, %v7293_v32  ;;  %v7314_v58 = vadd.f32 %v7313_v26, %v7312_v36  ;;  %v6858_v56 = vrot.slane %v13939_v42, %v12825_v39  ;;  %v6080_v6 = vmul.f32 %v5952_v35, %v14184_v57  ;;  %v14251_v11 = vpop.f32.mrb[65].mxu0 }
 0x268   : > { %v7307_v22 = vadd.f32 %v7306_v10, %v7305_v27  ;;  %v5951_v3 = vadd.f32 1.0, %v11501_v4  ;;  %v6073_v12 = vmul.f32 %v5945_v33, %v14080_v5  ;;  %16867 = vst [vmem:[#allocation23_spill] sm:$0xff] %v14251_v11  ;;  %v6074_v7 = vmul.f32 %v5946_v31, %v14044_v44 }
 0x269   : > { %v7296_v13 = vrot.slane %v7295_v55, 1  ;;  %v7315_v32 = vrot.slane %v7314_v58, 2  ;;  %6860 = vbcast.lane.b32.xlu0 %v6858_v56, 256  ;;  %v5002_v9 = vadd.f32 %v13743_v18, %v13876_v25  ;;  %v7120_v36 = vmul.f32 %v14200_v29, %v6080_v6 }
 0x26a   : > { %v7308_v2 = vrot.slane %v7307_v22, 2  ;;  %v6079_v38 = vmul.f32 %v5951_v3, %v14191_v40  ;;  %v7113_v57 = vmul.f32 %v6259_v47, %v6073_v12  ;;  %v7114_v5 = vmul.f32 %v6266_v17, %v6074_v7 }
 0x26b   : > { %v7297_v28 = vadd.f32 %v7296_v13, %v7295_v55  ;;  %v7316_v26 = vadd.f32 %v7315_v32, %v7314_v58  ;;  %v14258_v27 = vmul.f32 0.5, %v5002_v9  ;;  %v11503_v10 = vpop.eup %11502  ;;  %v7326_v33 = vsel %vm820_vm0, %v7120_v36, 0.0 }
 0x26c   : > { %v7309_v35 = vadd.f32 %v7308_v2, %v7307_v22  ;;  %v7119_v44 = vmul.f32 %v14152_v20, %v6079_v38  ;;  %v7277_v4 = vsel %vm820_vm0, %v7113_v57, 0.0  ;;  %v7327_v29 = vrot.slane %v7326_v33, 4  ;;  %v14272_v38 = vpop.permute.xlu1 %6342 }
 0x26d   : > { %v8349_v18 = vsel %vm8335_vm2, %v7304_v19, %v7297_v28  ;;  %v7317_v31 = vrot.slane %v7316_v26, 1  ;;  %v7278_v56 = vrot.slane %v7277_v4, 4  ;;  %v7284_v58 = vsel %vm820_vm0, %v7114_v5, 0.0  ;;  %v14280_v5 = vld [vmem:[%s12278_s25 + $0x68] sm:$0xff] }
 0x26e   : > { %v11505_v40 = vpop.eup %11504  ;;  %v7310_v47 = vrot.slane %v7309_v35, 1  ;;  %v7319_v55 = vsel %vm820_vm0, %v7119_v44, 0.0  ;;  %v5700_v6 = vmul.f32 0.70710677, %v5002_v9  ;;  %v7328_v22 = vadd.f32 %v7327_v29, %v7326_v33 }
 0x26f   : > { %v14266_v3 = vadd.f32 %v7317_v31, %v7316_v26  ;;  %v7320_v12 = vrot.slane %v7319_v55, 4  ;;  %v7279_v20 = vadd.f32 %v7278_v56, %v7277_v4  ;;  %v7285_v13 = vrot.slane %v7284_v58, 4 }
 0x270   : > { %v7311_v17 = vadd.f32 %v7310_v47, %v7309_v35  ;;  %11506 = verf.f32 %v5700_v6  ;;  %v4997_v19 = vadd.f32 %v13876_v25, %v13748_v1  ;;  %v7329_v32 = vrot.slane %v7328_v22, 2 }
 0x271   : > { %v7321_v7 = vadd.f32 %v7320_v12, %v7319_v55  ;;  %v7280_v2 = vrot.slane %v7279_v20, 2  ;;  %v6900_v36 = vrot.slane %v14173_v62, %v12288_v14  ;;  %v7286_v57 = vadd.f32 %v7285_v13, %v7284_v58  ;;  %v14288_v55 = vpop.permute.xlu0 %6349  ;;  %v14302_v13 = vpop.permute.xlu1 %6391 }
 0x272   : > { %v14275_v9 = vsel %vm8337_vm3, %v7311_v17, %v8349_v18  ;;  %v14277_v28 = vmul.f32 0.5, %v4997_v19  ;;  %v5699_v26 = vmul.f32 0.70710677, %v4997_v19  ;;  %v7330_v35 = vadd.f32 %v7329_v32, %v7328_v22 }
 0x273   : > { %v7322_v33 = vrot.slane %v7321_v7, 2  ;;  %v7281_v1 = vadd.f32 %v7280_v2, %v7279_v20  ;;  %6902 = vbcast.lane.b32.xlu1 %v6900_v36, 256  ;;  %v6893_v44 = vrot.slane %v14173_v62, %v12804_v61  ;;  %v7287_v4 = vrot.slane %v7286_v57, 2  ;;  %v14312_v36 = vld [vmem:[%s16763_s8] ss:$0 sm:$0xff] }
 0x274   : > { %11508 = verf.f32 %v5699_v26  ;;  %v5012_v31 = vadd.f32 %v13771_v43, %v13876_v25  ;;  %v5007_v18 = vadd.f32 %v13876_v25, %v13777_v16  ;;  %v7331_v29 = vrot.slane %v7330_v35, 1  ;;  %v16868_v26 = vld [vmem:[#allocation5_spill] sm:$0xff] }
 0x275   : > { %v7323_v56 = vadd.f32 %v7322_v33, %v7321_v7  ;;  %v7282_v47 = vrot.slane %v7281_v1, 1  ;;  %6895 = vbcast.lane.b32.xlu0 %v6893_v44, 256  ;;  %v6949_v58 = vrot.slane %v14280_v5, %v12804_v61  ;;  %v14292_v6 = vadd.f32 %v7287_v4, %v7286_v57 }
 0x276   : > { %v14294_v22 = vmul.f32 0.5, %v5012_v31  ;;  %v5702_v12 = vmul.f32 0.70710677, %v5012_v31  ;;  %v14296_v20 = vmul.f32 0.5, %v5007_v18  ;;  %v14298_v43 = vadd.f32 %v7331_v29, %v7330_v35 }
 0x277   : > { %v7324_v17 = vrot.slane %v7323_v56, 1  ;;  %v14300_v16 = vadd.f32 %v7282_v47, %v7281_v1  ;;  %v5701_v25 = vmul.f32 0.70710677, %v5007_v18  ;;  %6951 = vbcast.lane.b32.xlu1 %v6949_v58, 256  ;;  %v5954_v32 = vadd.f32 1.0, %v11503_v10  ;;  %v6322_v18 = vpop.permute.xlu0 %6321 }
 0x278   : > { %11510 = verf.f32 %v5702_v12  ;;  %v6865_v7 = vrot.slane %v13939_v42, %v12868_v15  ;;  %v5022_v57 = vadd.f32 %v14312_v36, %v13794_v54  ;;  %v5017_v35 = vadd.f32 %v14312_v36, %v16868_v26  ;;  %v16869_v12 = vld [vmem:[#allocation6_spill] sm:$0xff] }
 0x279   : > { %v14307_v2 = vadd.f32 %v7324_v17, %v7323_v56  ;;  %11512 = verf.f32 %v5701_v25  ;;  %v6082_v10 = vmul.f32 %v5954_v32, %v14213_v24  ;;  %v6872_v1 = vrot.slane %v13939_v42, %v12916_v41  ;;  %v16870_v25 = vld [vmem:[#allocation3_spill] sm:$0xff] }
 0x27a   : > { %v11507_v33 = vpop.eup %11506  ;;  %6867 = vbcast.lane.b32.xlu0 %v6865_v7, 256  ;;  %v5953_v44 = vadd.f32 1.0, %v11505_v40  ;;  %v6942_v4 = vrot.slane %v14280_v5, %v12296_v21  ;;  %v14323_v29 = vmul.f32 0.5, %v5022_v57  ;;  %v5704_v56 = vmul.f32 0.70710677, %v5022_v57  ;;  %v6315_v40 = vpop.permute.xlu1 %6314 }
 0x27b   : > { %v5956_v31 = vadd.f32 1.0, %v11507_v33  ;;  %v14325_v54 = vmul.f32 0.5, %v5017_v35  ;;  %v7122_v47 = vmul.f32 %v6322_v18, %v6082_v10  ;;  %v5703_v58 = vmul.f32 0.70710677, %v5017_v35  ;;  %6874 = vbcast.lane.b32.xlu1 %v6872_v1, 256 }
 0x27c   : > { %v6081_v24 = vmul.f32 %v5953_v44, %v14219_v48  ;;  %v5032_v17 = vadd.f32 %v14312_v36, %v16869_v12  ;;  %11514 = verf.f32 %v5704_v56  ;;  %v5027_v32 = vadd.f32 %v14312_v36, %v16870_v25  ;;  %v11833_v56 = vld [vmem:[%s12278_s25 + $0x50] sm:$0xff] }
 0x27d   : > { %v6084_v42 = vmul.f32 %v5956_v31, %v14258_v27  ;;  %v6956_v7 = vrot.slane %v14280_v5, %v12288_v14  ;;  %v7340_v26 = vsel %vm820_vm0, %v7122_v47, 0.0  ;;  %11516 = verf.f32 %v5703_v58 }
 0x27e   : > { %v11509_v57 = vpop.eup %11508  ;;  %v7121_v35 = vmul.f32 %v6315_v40, %v6081_v24  ;;  %6944 = vbcast.lane.b32.xlu0 %v6942_v4, 256  ;;  %v14336_v48 = vmul.f32 0.5, %v5032_v17  ;;  %v7341_v10 = vrot.slane %v7340_v26, 4  ;;  %v5706_v1 = vmul.f32 0.70710677, %v5032_v17  ;;  %v14346_v40 = vpop.f32.mrb[66].mxu0 }
 0x27f   : > { %v7124_v33 = vmul.f32 %v14175_v49, %v6084_v42  ;;  %v5955_v27 = vadd.f32 1.0, %v11509_v57  ;;  %v14340_v31 = vmul.f32 0.5, %v5027_v32  ;;  %v5705_v18 = vmul.f32 0.70710677, %v5027_v32  ;;  %6958 = vbcast.lane.b32.xlu1 %v6956_v7, 256  ;;  %16871 = vst [vmem:[#allocation24_spill] sm:$0xff] %v14346_v40 }
 0x280   : > { %v7333_v44 = vsel %vm820_vm0, %v7121_v35, 0.0  ;;  %v6823_v12 = vrot.slane %v11833_v56, %v13076_v23  ;;  %v7342_v58 = vadd.f32 %v7341_v10, %v7340_v26  ;;  %11518 = verf.f32 %v5706_v1  ;;  %v16872_v17 = vld [vmem:[#allocation4_spill] sm:$0xff]  ;;  %v16873_v32 = vld [vmem:[#allocation25_spill] sm:$0xff]  ;;  %v14352_v57 = vpop.f32.mrb[67].mxu0 }
 0x281   : > { %v7354_v47 = vsel %vm820_vm0, %v7124_v33, 0.0  ;;  %v6083_v4 = vmul.f32 %v5955_v27, %v14277_v28  ;;  %v7334_v24 = vrot.slane %v7333_v44, 4  ;;  %v5042_v25 = vadd.f32 %v14312_v36, %v16872_v17  ;;  %16874 = vst [vmem:[#allocation5_spill] sm:$0xff] %v14352_v57  ;;  %v14359_v40 = vpop.f32.mrb[68].mxu0 }
 0x282   : > { %v11511_v49 = vpop.eup %11510  ;;  %v7355_v42 = vrot.slane %v7354_v47, 4  ;;  %6825 = vbcast.lane.b32.xlu0 %v6823_v12, 256  ;;  %v5037_v7 = vadd.f32 %v14312_v36, %v16873_v32  ;;  %v7343_v33 = vrot.slane %v7342_v58, 2  ;;  %11520 = verf.f32 %v5705_v18  ;;  %16875 = vst [vmem:[#allocation6_spill] sm:$0xff] %v14359_v40 }
 0x283   : > { %v11513_v35 = vpop.eup %11512  ;;  %v7123_v28 = vmul.f32 %v14224_v51, %v6083_v4  ;;  %v5958_v26 = vadd.f32 1.0, %v11511_v49  ;;  %v7335_v27 = vadd.f32 %v7334_v24, %v7333_v44  ;;  %v14355_v1 = vmul.f32 0.5, %v5042_v25  ;;  %v14362_v4 = vpop.permute.xlu0 %6405 }
 0x284   : > { %v7356_v10 = vadd.f32 %v7355_v42, %v7354_v47  ;;  %v5957_v56 = vadd.f32 1.0, %v11513_v35  ;;  %v7344_v19 = vadd.f32 %v7343_v33, %v7342_v58  ;;  %v5708_v44 = vmul.f32 0.70710677, %v5042_v25  ;;  %v14364_v47 = vpop.f32.mrb[69].mxu0 }
 0x285   : > { %v7347_v12 = vsel %vm820_vm0, %v7123_v28, 0.0  ;;  %v6086_v17 = vmul.f32 %v5958_v26, %v14294_v22  ;;  %v7336_v32 = vrot.slane %v7335_v27, 2  ;;  %16876 = vst [vmem:[#allocation3_spill] sm:$0xff] %v14364_v47  ;;  %v14369_v22 = vmul.f32 0.5, %v5037_v7  ;;  %v14375_v47 = vpop.f32.mrb[70].mxu0 }
 0x286   : > { %v7357_v57 = vrot.slane %v7356_v10, 2  ;;  %v7348_v11 = vrot.slane %v7347_v12, 4  ;;  %v6085_v51 = vmul.f32 %v5957_v56, %v14296_v20  ;;  %v14366_v18 = vpop.eup %11514  ;;  %v7345_v49 = vrot.slane %v7344_v19, 1  ;;  %16877 = vst [vmem:[#allocation4_spill] sm:$0xff] %v14375_v47 }
 0x287   : > { %v7126_v24 = vmul.f32 %v14288_v55, %v6086_v17  ;;  %v7337_v42 = vadd.f32 %v7336_v32, %v7335_v27  ;;  %v11517_v58 = vpop.eup %11516  ;;  %11522 = verf.f32 %v5708_v44  ;;  %v5707_v56 = vmul.f32 0.70710677, %v5037_v7  ;;  %v14378_v32 = vpop.permute.xlu1 %6398 }
 0x288   : > { %v7358_v35 = vadd.f32 %v7357_v57, %v7356_v10  ;;  %v7349_v28 = vadd.f32 %v7348_v11, %v7347_v12  ;;  %v7125_v26 = vmul.f32 %v14272_v38, %v6085_v51  ;;  %v14373_v33 = vadd.f32 %v7345_v49, %v7344_v19  ;;  %v14380_v57 = vpop.f32.mrb[71].mxu0  ;;  %v14390_v44 = vpop.permute.xlu0 %6412 }
 0x289   : > { %v7368_v20 = vsel %vm820_vm0, %v7126_v24, 0.0  ;;  %v7338_v25 = vrot.slane %v7337_v42, 1  ;;  %16878 = vst [vmem:[#allocation25_spill] sm:$0xff] %v14380_v57  ;;  %11524 = verf.f32 %v5707_v56  ;;  %v6914_v19 = vrot.slane %v14173_v62, %v12825_v39 }
 0x28a   : > { %v7359_v40 = vrot.slane %v7358_v35, 1  ;;  %v7350_v55 = vrot.slane %v7349_v28, 2  ;;  %v7369_v17 = vrot.slane %v7368_v20, 4  ;;  %v7361_v27 = vsel %vm820_vm0, %v7125_v26, 0.0  ;;  %v14386_v10 = vpop.eup %11518 }
 0x28b   : > { %v7362_v11 = vrot.slane %v7361_v27, 4  ;;  %v14382_v38 = vadd.f32 %v7338_v25, %v7337_v42  ;;  %v16879_v24 = vrot.slane %v14292_v6, 1  ;;  %6916 = vbcast.lane.b32.xlu1 %v6914_v19, 256  ;;  %v8340_v42 = vsel %vm8339_vm4, %v14169_v60, %v14127_v8  ;;  %v14398_v25 = vpop.f32.mrb[72].mxu0 }
 0x28c   : > { %v14388_v7 = vadd.f32 %v7359_v40, %v7358_v35  ;;  %v7351_v12 = vadd.f32 %v7350_v55, %v7349_v28  ;;  %v7370_v51 = vadd.f32 %v7369_v17, %v7368_v20  ;;  %16880 = vst [vmem:[#allocation28_spill] sm:$0xff] %v14398_v25  ;;  %v14400_v40 = vpop.eup %11520  ;;  %v8342_v20 = vsel %vm8341_vm5, %v14211_v30, %v8340_v42  ;;  %v14404_v56 = vpop.f32.mrb[73].mxu0 }
 0x28d   : > { %v7290_v49 = vadd.f32 %v16879_v24, %v14292_v6  ;;  %v7363_v26 = vadd.f32 %v7362_v11, %v7361_v27  ;;  %16881 = vst [vmem:[#allocation29_spill] sm:$0xff] %v14404_v56  ;;  %v8344_v55 = vsel %vm8343_vm6, %v14239_v0, %v8342_v20  ;;  %v5959_v8 = vadd.f32 1.0, %v11517_v58  ;;  %v6357_v11 = vpop.permute.xlu1 %6356  ;;  %v16882_v56 = vld [vmem:[#allocation26_spill] sm:$0xff] }
 0x28e   : > { %v7352_v35 = vrot.slane %v7351_v12, 1  ;;  %v7371_v28 = vrot.slane %v7370_v51, 2  ;;  %v8346_v27 = vsel %vm8345_vm7, %v14300_v16, %v8344_v55  ;;  %v6907_v19 = vrot.slane %v14173_v62, %v12343_v53  ;;  %v16883_v16 = vld [vmem:[#allocation27_spill] sm:$0xff] }
 0x28f   : > { %v7364_v6 = vrot.slane %v7363_v26, 2  ;;  %v8348_v24 = vsel %vm8347_vm8, %v7290_v49, %v8346_v27  ;;  %v6087_v42 = vmul.f32 %v5959_v8, %v14325_v54  ;;  %v5052_v0 = vadd.f32 %v14312_v36, %v16882_v56 }
 0x290   : > { %v14408_v60 = vadd.f32 %v7352_v35, %v7351_v12  ;;  %v7372_v17 = vadd.f32 %v7371_v28, %v7370_v51  ;;  %10998 = vmatprep.mubr.msk.f32.mxu1 %vm820_vm0, %v8348_v24  ;;  %v14419_v12 = vpop.permute.xlu0 %6447  ;;  %6909 = vbcast.lane.b32.xlu0 %v6907_v19, 256  ;;  %v5047_v51 = vadd.f32 %v14312_v36, %v16883_v16  ;;  %v5960_v49 = vadd.f32 1.0, %v14366_v18 }
 0x291   : > { %v7365_v30 = vadd.f32 %v7364_v6, %v7363_v26  ;;  %v11523_v20 = vpop.eup %11522  ;;  %v6921_v26 = vrot.slane %v14173_v62, %v12868_v15  ;;  %v7127_v28 = vmul.f32 %v6357_v11, %v6087_v42  ;;  %v14426_v56 = vmul.f32 0.5, %v5052_v0  ;;  %v14438_v11 = vld [vmem:[%s12278_s25 + $0x70] sm:$0xff] }
 0x292   : > { %v7373_v58 = vrot.slane %v7372_v17, 1  ;;  %v5964_v35 = vadd.f32 1.0, %v11523_v20  ;;  %v5710_v55 = vmul.f32 0.70710677, %v5052_v0  ;;  %v14430_v8 = vmul.f32 0.5, %v5047_v51  ;;  %v11834_v0 = vld [vmem:[%s12278_s25 + $0x58] sm:$0xff] }
 0x293   : > { %v7366_v54 = vrot.slane %v7365_v30, 1  ;;  %v5709_v27 = vmul.f32 0.70710677, %v5047_v51  ;;  %6923 = vbcast.lane.b32.xlu1 %v6921_v26, 256  ;;  %v11525_v19 = vpop.eup %11524  ;;  %v7375_v18 = vsel %vm820_vm0, %v7127_v28, 0.0  ;;  %v6088_v20 = vmul.f32 %v5960_v49, %v14323_v29  ;;  %v14445_v26 = vpop.f32.mrb[74].mxu0 }
 0x294   : > { %v14428_v6 = vadd.f32 %v7373_v58, %v7372_v17  ;;  %v6092_v16 = vmul.f32 %v5964_v35, %v14355_v1  ;;  %v5963_v42 = vadd.f32 1.0, %v11525_v19  ;;  %v7376_v25 = vrot.slane %v7375_v18, 4  ;;  %v6364_v17 = vpop.permute.xlu1 %6363  ;;  %16884 = vst [vmem:[#allocation26_spill] sm:$0xff] %v14445_v26 }
 0x295   : > { %v14432_v24 = vadd.f32 %v7366_v54, %v7365_v30  ;;  %11526 = verf.f32 %v5710_v55  ;;  %v6879_v58 = vrot.slane %v11834_v0, %v13076_v23  ;;  %v7128_v30 = vmul.f32 %v6364_v17, %v6088_v20  ;;  %v14448_v54 = vpop.permute.xlu0 %6419 }
 0x296   : > { %v7132_v51 = vmul.f32 %v14302_v13, %v6092_v16  ;;  %11528 = verf.f32 %v5709_v27  ;;  %v5062_v1 = vadd.f32 %v14312_v36, %v13920_v46  ;;  %v6091_v29 = vmul.f32 %v5963_v42, %v14369_v22  ;;  %v14454_v13 = vpop.f32.mrb[75].mxu0 }
 0x297   : > { %v7377_v49 = vadd.f32 %v7376_v25, %v7375_v18  ;;  %6881 = vbcast.lane.b32.xlu0 %v6879_v58, 256  ;;  %v5057_v35 = vadd.f32 %v14312_v36, %v13927_v50  ;;  %v6998_v28 = vrot.slane %v14438_v11, %v12296_v21  ;;  %16885 = vst [vmem:[#allocation27_spill] sm:$0xff] %v14454_v13  ;;  %v7382_v46 = vsel %vm820_vm0, %v7128_v30, 0.0  ;;  %v14465_v17 = vpop.f32.mrb[76].mxu0 }
 0x298   : > { %v7410_v55 = vsel %vm820_vm0, %v7132_v51, 0.0  ;;  %v14458_v27 = vmul.f32 0.5, %v5062_v1  ;;  %v5712_v19 = vmul.f32 0.70710677, %v5062_v1  ;;  %v7131_v25 = vmul.f32 %v14227_v37, %v6091_v29  ;;  %16886 = vst [vmem:[#allocation30_spill] sm:$0xff] %v14465_v17  ;;  %v14468_v1 = vpop.permute.xlu1 %6440  ;;  %v14470_v37 = vpop.f32.mrb[77].mxu0 }
 0x299   : > { %v7411_v22 = vrot.slane %v7410_v55, 4  ;;  %v7378_v16 = vrot.slane %v7377_v49, 2  ;;  %v7383_v18 = vrot.slane %v7382_v46, 4  ;;  %7000 = vbcast.lane.b32.xlu1 %v6998_v28, 256  ;;  %v14461_v50 = vmul.f32 0.5, %v5057_v35  ;;  %16887 = vst [vmem:[#allocation31_spill] sm:$0xff] %v14470_v37 }
 0x29a   : > { %11530 = verf.f32 %v5712_v19  ;;  %v5711_v20 = vmul.f32 0.70710677, %v5057_v35  ;;  %v6963_v42 = vrot.slane %v14280_v5, %v12343_v53  ;;  %v7403_v58 = vsel %vm820_vm0, %v7131_v25, 0.0  ;;  %v16888_v28 = vld [vmem:[#allocation2_spill] sm:$0xff]  ;;  %v16889_v19 = vld [vmem:[#allocation7_spill] sm:$0xff] }
 0x29b   : > { %v7412_v0 = vadd.f32 %v7411_v22, %v7410_v55  ;;  %v7379_v51 = vadd.f32 %v7378_v16, %v7377_v49  ;;  %v7384_v30 = vadd.f32 %v7383_v18, %v7382_v46  ;;  %v7404_v29 = vrot.slane %v7403_v58, 4  ;;  %v14476_v22 = vpop.permute.xlu0 %6496 }
 0x29c   : > { %11532 = verf.f32 %v5711_v20  ;;  %6965 = vbcast.lane.b32.xlu0 %v6963_v42, 256  ;;  %v5072_v35 = vadd.f32 %v14312_v36, %v16888_v28  ;;  %v5067_v13 = vadd.f32 %v14312_v36, %v16889_v19  ;;  %16890 = vst [vmem:[#allocation2_spill] sm:$0xff] %v14476_v22  ;;  %v6928_v49 = vrot.slane %v14173_v62, %v12916_v41  ;;  %v14484_v20 = vpop.f32.mrb[78].mxu0 }
 0x29d   : > { %v7413_v26 = vrot.slane %v7412_v0, 2  ;;  %v7380_v17 = vrot.slane %v7379_v51, 1  ;;  %v7385_v55 = vrot.slane %v7384_v30, 2  ;;  %v7405_v46 = vadd.f32 %v7404_v29, %v7403_v58  ;;  %16891 = vst [vmem:[#allocation7_spill] sm:$0xff] %v14484_v20  ;;  %v14488_v47 = vpop.f32.mrb[79].mxu0  ;;  %v6371_v20 = vpop.permute.xlu1 %6370 }
 0x29e   : > { %v14480_v25 = vmul.f32 0.5, %v5072_v35  ;;  %v5714_v16 = vmul.f32 0.70710677, %v5072_v35  ;;  %v14482_v18 = vmul.f32 0.5, %v5067_v13  ;;  %v5713_v57 = vmul.f32 0.70710677, %v5067_v13 }
 0x29f   : > { %v11527_v42 = vpop.eup %11526  ;;  %v7414_v28 = vadd.f32 %v7413_v26, %v7412_v0  ;;  %v14486_v37 = vadd.f32 %v7380_v17, %v7379_v51  ;;  %v7386_v19 = vadd.f32 %v7385_v55, %v7384_v30  ;;  %6930 = vbcast.lane.b32.xlu1 %v6928_v49, 256  ;;  %v7406_v45 = vrot.slane %v7405_v46, 2  ;;  %v14494_v0 = vpop.f32.mrb[80].mxu0 }
 0x2a0   : > { %v11529_v34 = vpop.eup %11528  ;;  %v5966_v62 = vadd.f32 1.0, %v11527_v42  ;;  %11534 = verf.f32 %v5714_v16  ;;  %v5961_v58 = vadd.f32 1.0, %v14400_v40  ;;  %v5962_v13 = vadd.f32 1.0, %v14386_v10  ;;  %v6378_v40 = vpop.permute.xlu0 %6377  ;;  %v16894_v42 = vld [vmem:[#allocation8_spill] sm:$0xff] }
 0x2a1   : > { %v7415_v29 = vrot.slane %v7414_v28, 1  ;;  %v5965_v35 = vadd.f32 1.0, %v11529_v34  ;;  %v7387_v52 = vrot.slane %v7386_v19, 1  ;;  %11536 = verf.f32 %v5713_v57  ;;  %v14503_v57 = vpop.f32.mrb[81].mxu0 }
 0x2a2   : > { %v7407_v22 = vadd.f32 %v7406_v45, %v7405_v46  ;;  %v6094_v26 = vmul.f32 %v5966_v62, %v14426_v56  ;;  %v6089_v17 = vmul.f32 %v5961_v58, %v14340_v31  ;;  %v6970_v34 = vrot.slane %v14280_v5, %v12825_v39  ;;  %16892 = vst [vmem:[#allocation32_spill] sm:$0xff] %v14503_v57 }
 0x2a3   : > { %v14496_v51 = vadd.f32 %v7415_v29, %v7414_v28  ;;  %v6093_v30 = vmul.f32 %v5965_v35, %v14430_v8  ;;  %v14499_v55 = vadd.f32 %v7387_v52, %v7386_v19  ;;  %v6090_v10 = vmul.f32 %v5962_v13, %v14336_v48  ;;  %v16893_v8 = vld [vmem:[#allocation10_spill] sm:$0xff] }
 0x2a4   : > { %v11531_v45 = vpop.eup %11530  ;;  %v7408_v56 = vrot.slane %v7407_v22, 1  ;;  %v7134_v31 = vmul.f32 %v14362_v4, %v6094_v26  ;;  %v7129_v49 = vmul.f32 %v6371_v20, %v6089_v17  ;;  %6972 = vbcast.lane.b32.xlu0 %v6970_v34, 256  ;;  %v5082_v52 = vadd.f32 %v14312_v36, %v16893_v8 }
 0x2a5   : > { %v7133_v46 = vmul.f32 %v14378_v32, %v6093_v30  ;;  %v5968_v16 = vadd.f32 1.0, %v11531_v45  ;;  %v5077_v28 = vadd.f32 %v14312_v36, %v16894_v42  ;;  %v7130_v20 = vmul.f32 %v6378_v40, %v6090_v10 }
 0x2a6   : > { %v11533_v19 = vpop.eup %11532  ;;  %v14512_v62 = vadd.f32 %v7408_v56, %v7407_v22  ;;  %v7424_v58 = vsel %vm820_vm0, %v7134_v31, 0.0  ;;  %v7389_v4 = vsel %vm820_vm0, %v7129_v49, 0.0  ;;  %v14519_v30 = vmul.f32 0.5, %v5082_v52 }
 0x2a7   : > { %v7425_v29 = vrot.slane %v7424_v58, 4  ;;  %v7417_v48 = vsel %vm820_vm0, %v7133_v46, 0.0  ;;  %v6096_v32 = vmul.f32 %v5968_v16, %v14458_v27  ;;  %v5967_v35 = vadd.f32 1.0, %v11533_v19 }
 0x2a8   : > { %v7418_v26 = vrot.slane %v7417_v48, 4  ;;  %v7390_v17 = vrot.slane %v7389_v4, 4  ;;  %v7396_v13 = vsel %vm820_vm0, %v7130_v20, 0.0  ;;  %v5716_v10 = vmul.f32 0.70710677, %v5082_v52 }
 0x2a9   : > { %v7426_v34 = vadd.f32 %v7425_v29, %v7424_v58  ;;  %v7136_v22 = vmul.f32 %v14448_v54, %v6096_v32  ;;  %v6095_v45 = vmul.f32 %v5967_v35, %v14461_v50  ;;  %v7397_v56 = vrot.slane %v7396_v13, 4 }
 0x2aa   : > { %v11535_v31 = vpop.eup %11534  ;;  %v7419_v40 = vadd.f32 %v7418_v26, %v7417_v48  ;;  %v7391_v49 = vadd.f32 %v7390_v17, %v7389_v4  ;;  %v14523_v46 = vmul.f32 0.5, %v5077_v28  ;;  %11538 = verf.f32 %v5716_v10 }
 0x2ab   : > { %v14525_v27 = vpop.eup %11536  ;;  %v7427_v16 = vrot.slane %v7426_v34, 2  ;;  %v7438_v8 = vsel %vm820_vm0, %v7136_v22, 0.0  ;;  %v7135_v42 = vmul.f32 %v14390_v44, %v6095_v45  ;;  %v7398_v19 = vadd.f32 %v7397_v56, %v7396_v13  ;;  %v14535_v56 = vld [vmem:[%s12278_s25 + $0x78] sm:$0xff] }
 0x2ac   : > { %v7420_v58 = vrot.slane %v7419_v40, 2  ;;  %v7439_v20 = vrot.slane %v7438_v8, 4  ;;  %v7392_v54 = vrot.slane %v7391_v49, 2  ;;  %v5715_v52 = vmul.f32 0.70710677, %v5077_v28 }
 0x2ad   : > { %v7428_v50 = vadd.f32 %v7427_v16, %v7426_v34  ;;  %v7431_v29 = vsel %vm820_vm0, %v7135_v42, 0.0  ;;  %v7399_v4 = vrot.slane %v7398_v19, 2  ;;  %v7012_v44 = vrot.slane %v14438_v11, %v12288_v14 }
 0x2ae   : > { %v7421_v48 = vadd.f32 %v7420_v58, %v7419_v40  ;;  %v7440_v32 = vadd.f32 %v7439_v20, %v7438_v8  ;;  %v7432_v35 = vrot.slane %v7431_v29, 4  ;;  %v7393_v26 = vadd.f32 %v7392_v54, %v7391_v49  ;;  %v14543_v49 = vpop.permute.xlu0 %6461  ;;  %v14553_v20 = vpop.permute.xlu1 %6454 }
 0x2af   : > { %v7429_v17 = vrot.slane %v7428_v50, 1  ;;  %v14530_v57 = vadd.f32 %v7399_v4, %v7398_v19  ;;  %11540 = verf.f32 %v5715_v52  ;;  %7014 = vbcast.lane.b32.xlu1 %v7012_v44, 256  ;;  %v8351_v40 = vsel %vm8339_vm4, %v14266_v3, %v14275_v9  ;;  %v16896_v9 = vld [vmem:[#allocation9_spill] sm:$0xff] }
 0x2b0   : > { %v7422_v13 = vrot.slane %v7421_v48, 1  ;;  %v7441_v22 = vrot.slane %v7440_v32, 2  ;;  %v7433_v45 = vadd.f32 %v7432_v35, %v7431_v29  ;;  %v7394_v34 = vrot.slane %v7393_v26, 1 }
 0x2b1   : > { %v14537_v10 = vadd.f32 %v7429_v17, %v7428_v50  ;;  %v7005_v16 = vrot.slane %v14438_v11, %v12804_v61  ;;  %v8352_v54 = vsel %vm8341_vm5, %v14307_v2, %v8351_v40  ;;  %v16895_v50 = vld [vmem:[#allocation12_spill] sm:$0xff]  ;;  %v5087_v29 = vadd.f32 %v14312_v36, %v16896_v9 }
 0x2b2   : > { %v14547_v8 = vadd.f32 %v7422_v13, %v7421_v48  ;;  %v14549_v42 = vadd.f32 %v7441_v22, %v7440_v32  ;;  %v7434_v19 = vrot.slane %v7433_v45, 2  ;;  %v14551_v58 = vadd.f32 %v7394_v34, %v7393_v26 }
 0x2b3   : > { %7007 = vbcast.lane.b32.xlu0 %v7005_v16, 256  ;;  %v5092_v3 = vadd.f32 %v14312_v36, %v16895_v50  ;;  %v7061_v4 = vrot.slane %v14535_v56, %v12804_v61  ;;  %v8353_v32 = vsel %vm8343_vm6, %v14298_v43, %v8352_v54  ;;  %v5970_v35 = vadd.f32 1.0, %v11535_v31  ;;  %v6434_v43 = vpop.permute.xlu0 %6433  ;;  %v16897_v31 = vld [vmem:[#allocation11_spill] sm:$0xff]  ;;  %v14582_v54 = vpop.permute.xlu1 %6503  ;;  %v16898_v50 = vld [vmem:[#allocation13_spill] sm:$0xff] }
 0x2b4   : > { %v7435_v48 = vadd.f32 %v7434_v19, %v7433_v45  ;;  %v8354_v2 = vsel %vm8345_vm7, %v14382_v38, %v8353_v32  ;;  %v14570_v44 = vmul.f32 0.5, %v5087_v29  ;;  %v11539_v13 = vpop.eup %11538  ;;  %v5717_v34 = vmul.f32 0.70710677, %v5087_v29 }
 0x2b5   : > { %v14568_v26 = vmul.f32 0.5, %v5092_v3  ;;  %v5718_v17 = vmul.f32 0.70710677, %v5092_v3  ;;  %7063 = vbcast.lane.b32.xlu1 %v7061_v4, 256  ;;  %v8355_v61 = vsel %vm8347_vm8, %v14373_v33, %v8354_v2  ;;  %v6098_v45 = vmul.f32 %v5970_v35, %v14480_v25 }
 0x2b6   : > { %v7436_v22 = vrot.slane %v7435_v48, 1  ;;  %v5972_v40 = vadd.f32 1.0, %v11539_v13  ;;  %10999 = vmatmul.mubr.msk.f32.vlgmr.msra.gmra.mrb[128].mxu1 %vm820_vm0, %v8355_v61  ;;  %v6977_v38 = vrot.slane %v14280_v5, %v12868_v15  ;;  %v5102_v16 = vadd.f32 %v14312_v36, %v16897_v31 }
 0x2b7   : > { %11542 = verf.f32 %v5718_v17  ;;  %v7138_v33 = vmul.f32 %v6434_v43, %v6098_v45  ;;  %v5097_v25 = vadd.f32 %v14312_v36, %v16898_v50  ;;  %v6984_v32 = vrot.slane %v14280_v5, %v12916_v41 }
 0x2b8   : > { %v14580_v19 = vadd.f32 %v7436_v22, %v7435_v48  ;;  %11544 = verf.f32 %v5717_v34  ;;  %v6100_v9 = vmul.f32 %v5972_v40, %v14519_v30  ;;  %6979 = vbcast.lane.b32.xlu0 %v6977_v38, 256  ;;  %v14587_v29 = vmul.f32 0.5, %v5102_v16  ;;  %v14601_v40 = vpop.f32.mrb[82].mxu0 }
 0x2b9   : > { %v11541_v3 = vpop.eup %11540  ;;  %v5720_v4 = vmul.f32 0.70710677, %v5102_v16  ;;  %v7452_v48 = vsel %vm820_vm0, %v7138_v33, 0.0  ;;  %v14592_v2 = vmul.f32 0.5, %v5097_v25  ;;  %v5719_v17 = vmul.f32 0.70710677, %v5097_v25  ;;  %v6427_v33 = vpop.permute.xlu1 %6426 }
 0x2ba   : > { %v5971_v35 = vadd.f32 1.0, %v11541_v3  ;;  %v7140_v13 = vmul.f32 %v14419_v12, %v6100_v9  ;;  %v7453_v22 = vrot.slane %v7452_v48, 4  ;;  %6986 = vbcast.lane.b32.xlu1 %v6984_v32, 256  ;;  %v5969_v30 = vadd.f32 1.0, %v14525_v27  ;;  %v14607_v27 = vpop.f32.mrb[83].mxu0 }
 0x2bb   : > { %11546 = verf.f32 %v5720_v4  ;;  %v7054_v34 = vrot.slane %v14535_v56, %v12296_v21  ;;  %v5112_v45 = vadd.f32 %v14312_v36, %v14099_v63  ;;  %v5107_v31 = vadd.f32 %v14312_v36, %v14107_v59  ;;  %v14617_v32 = vpop.f32.mrb[84].mxu0 }
 0x2bc   : > { %v6099_v61 = vmul.f32 %v5971_v35, %v14523_v46  ;;  %11548 = verf.f32 %v5719_v17  ;;  %v7466_v43 = vsel %vm820_vm0, %v7140_v13, 0.0  ;;  %v7454_v38 = vadd.f32 %v7453_v22, %v7452_v48  ;;  %v14622_v13 = vpop.f32.mrb[85].mxu0 }
 0x2bd   : > { %v6097_v12 = vmul.f32 %v5969_v30, %v14482_v18  ;;  %v7467_v46 = vrot.slane %v7466_v43, 4  ;;  %7056 = vbcast.lane.b32.xlu0 %v7054_v34, 256  ;;  %v14610_v21 = vmul.f32 0.5, %v5112_v45  ;;  %v5722_v63 = vmul.f32 0.70710677, %v5112_v45  ;;  %v11835_v45 = vld [vmem:[%s12278_s25 + $0x60] sm:$0xff] }
 0x2be   : > { %v7139_v16 = vmul.f32 %v14468_v1, %v6099_v61  ;;  %v7455_v50 = vrot.slane %v7454_v38, 2  ;;  %v14612_v3 = vmul.f32 0.5, %v5107_v31  ;;  %v5721_v9 = vmul.f32 0.70710677, %v5107_v31 }
 0x2bf   : > { %v7137_v25 = vmul.f32 %v6427_v33, %v6097_v12  ;;  %v7468_v4 = vadd.f32 %v7467_v46, %v7466_v43  ;;  %11550 = verf.f32 %v5722_v63  ;;  %v7068_v59 = vrot.slane %v14535_v56, %v12288_v14  ;;  %v16899_v46 = vld [vmem:[#allocation15_spill] sm:$0xff] }
 0x2c0   : > { %v7459_v18 = vsel %vm820_vm0, %v7139_v16, 0.0  ;;  %v14619_v48 = vadd.f32 %v7455_v50, %v7454_v38  ;;  %11552 = verf.f32 %v5721_v9  ;;  %v6935_v43 = vrot.slane %v11835_v45, %v13076_v23  ;;  %v14630_v50 = vpop.permute.xlu0 %6517 }
 0x2c1   : > { %v11543_v1 = vpop.eup %11542  ;;  %v7460_v35 = vrot.slane %v7459_v18, 4  ;;  %v7445_v17 = vsel %vm820_vm0, %v7137_v25, 0.0  ;;  %v7469_v30 = vrot.slane %v7468_v4, 2  ;;  %7070 = vbcast.lane.b32.xlu1 %v7068_v59, 256  ;;  %v5122_v38 = vadd.f32 %v14312_v36, %v16899_v46  ;;  %v16900_v25 = vld [vmem:[#allocation14_spill] sm:$0xff]  ;;  %v14634_v59 = vpop.f32.mrb[86].mxu0 }
 0x2c2   : > { %v11545_v22 = vpop.eup %11544  ;;  %v5974_v61 = vadd.f32 1.0, %v11543_v1  ;;  %v7446_v34 = vrot.slane %v7445_v17, 4  ;;  %6937 = vbcast.lane.b32.xlu0 %v6935_v43, 256  ;;  %v5117_v9 = vadd.f32 %v14312_v36, %v16900_v25  ;;  %16901 = vst [vmem:[#allocation10_spill] sm:$0xff] %v14634_v59  ;;  %v7026_v52 = vrot.slane %v14438_v11, %v12825_v39 }
 0x2c3   : > { %v7461_v14 = vadd.f32 %v7460_v35, %v7459_v18  ;;  %v5973_v12 = vadd.f32 1.0, %v11545_v22  ;;  %v7470_v16 = vadd.f32 %v7469_v30, %v7468_v4  ;;  %v14639_v22 = vmul.f32 0.5, %v5122_v38  ;;  %v14641_v4 = vpop.f32.mrb[87].mxu0 }
 0x2c4   : > { %v6102_v33 = vmul.f32 %v5974_v61, %v14568_v26  ;;  %v7447_v63 = vadd.f32 %v7446_v34, %v7445_v17  ;;  %v5724_v45 = vmul.f32 0.70710677, %v5122_v38  ;;  %16902 = vst [vmem:[#allocation8_spill] sm:$0xff] %v14641_v4  ;;  %v14644_v34 = vmul.f32 0.5, %v5117_v9  ;;  %v14650_v38 = vpop.permute.xlu1 %6510  ;;  %v14654_v28 = vpop.f32.mrb[88].mxu0 }
 0x2c5   : > { %v14636_v1 = vpop.eup %11546  ;;  %v7462_v18 = vrot.slane %v7461_v14, 2  ;;  %v6101_v35 = vmul.f32 %v5973_v12, %v14570_v44  ;;  %v7471_v17 = vrot.slane %v7470_v16, 1  ;;  %v5723_v25 = vmul.f32 0.70710677, %v5117_v9  ;;  %16903 = vst [vmem:[#allocation12_spill] sm:$0xff] %v14654_v28  ;;  %7028 = vbcast.lane.b32.xlu1 %v7026_v52, 256 }
 0x2c6   : > { %v11549_v26 = vpop.eup %11548  ;;  %v7142_v30 = vmul.f32 %v14543_v49, %v6102_v33  ;;  %v7448_v61 = vrot.slane %v7447_v63, 2  ;;  %11554 = verf.f32 %v5724_v45 }
 0x2c7   : > { %v7463_v43 = vadd.f32 %v7462_v18, %v7461_v14  ;;  %v7141_v46 = vmul.f32 %v14553_v20, %v6101_v35  ;;  %v14647_v31 = vadd.f32 %v7471_v17, %v7470_v16  ;;  %11556 = verf.f32 %v5723_v25  ;;  %v14657_v20 = vpop.f32.mrb[89].mxu0  ;;  %v14661_v35 = vpop.permute.xlu0 %6524 }
 0x2c8   : > { %v7480_v44 = vsel %vm820_vm0, %v7142_v30, 0.0  ;;  %v7449_v12 = vadd.f32 %v7448_v61, %v7447_v63  ;;  %16904 = vst [vmem:[#allocation9_spill] sm:$0xff] %v14657_v20  ;;  %v16905_v63 = vrot.slane %v14530_v57, 1  ;;  %v8356_v17 = vsel %vm8335_vm2, %v14388_v7, %v14408_v60 }
 0x2c9   : > { %v7464_v49 = vrot.slane %v7463_v43, 1  ;;  %v7481_v33 = vrot.slane %v7480_v44, 4  ;;  %v7473_v14 = vsel %vm820_vm0, %v7141_v46, 0.0  ;;  %v14659_v9 = vpop.eup %11550  ;;  %v8357_v25 = vsel %vm8337_vm3, %v14432_v24, %v8356_v17 }
 0x2ca   : > { %v7474_v16 = vrot.slane %v7473_v14, 4  ;;  %v7450_v18 = vrot.slane %v7449_v12, 1  ;;  %v7402_v45 = vadd.f32 %v16905_v63, %v14530_v57  ;;  %v14669_v30 = vpop.eup %11552  ;;  %v5975_v20 = vadd.f32 1.0, %v11549_v26 }
 0x2cb   : > { %v14671_v61 = vadd.f32 %v7464_v49, %v7463_v43  ;;  %v7482_v46 = vadd.f32 %v7481_v33, %v7480_v44  ;;  %v8358_v52 = vsel %vm8339_vm4, %v14428_v6, %v8357_v25  ;;  %v7019_v57 = vrot.slane %v14438_v11, %v12343_v53  ;;  %v16906_v43 = vld [vmem:[#allocation16_spill] sm:$0xff]  ;;  %v16907_v49 = vld [vmem:[#allocation17_spill] sm:$0xff]  ;;  %v14697_v17 = vpop.permute.xlu0 %6559 }
 0x2cc   : > { %v7475_v28 = vadd.f32 %v7474_v16, %v7473_v14  ;;  %v14675_v4 = vadd.f32 %v7450_v18, %v7449_v12  ;;  %v8359_v7 = vsel %vm8341_vm5, %v14486_v37, %v8358_v52  ;;  %v6103_v60 = vmul.f32 %v5975_v20, %v14592_v2  ;;  %v6469_v12 = vpop.permute.xlu1 %6468 }
 0x2cd   : > { %v7483_v63 = vrot.slane %v7482_v46, 2  ;;  %v5132_v44 = vadd.f32 %v14312_v36, %v16906_v43  ;;  %v8360_v26 = vsel %vm8343_vm6, %v14499_v55, %v8359_v7  ;;  %7021 = vbcast.lane.b32.xlu0 %v7019_v57, 256  ;;  %v5127_v6 = vadd.f32 %v14312_v36, %v16907_v49 }
 0x2ce   : > { %v7476_v24 = vrot.slane %v7475_v28, 2  ;;  %v7033_v33 = vrot.slane %v14438_v11, %v12868_v15  ;;  %v8361_v37 = vsel %vm8345_vm7, %v14551_v58, %v8360_v26  ;;  %v7143_v2 = vmul.f32 %v6469_v12, %v6103_v60 }
 0x2cf   : > { %v7484_v14 = vadd.f32 %v7483_v63, %v7482_v46  ;;  %v14694_v20 = vmul.f32 0.5, %v5132_v44  ;;  %v8362_v18 = vsel %vm8347_vm8, %v7402_v45, %v8361_v37  ;;  %v5726_v55 = vmul.f32 0.70710677, %v5132_v44  ;;  %v14704_v45 = vpop.f32.mrb[90].mxu0 }
 0x2d0   : > { %v7477_v16 = vadd.f32 %v7476_v24, %v7475_v28  ;;  %v14699_v25 = vmul.f32 0.5, %v5127_v6  ;;  %7035 = vbcast.lane.b32.xlu1 %v7033_v33, 256  ;;  %v11555_v52 = vpop.eup %11554  ;;  %11001 = vmatprep.mubr.msk.f32.mxu1 %vm820_vm0, %v8362_v18  ;;  %v7487_v46 = vsel %vm820_vm0, %v7143_v2, 0.0  ;;  %v5725_v63 = vmul.f32 0.70710677, %v5127_v6  ;;  %16908 = vst [vmem:[#allocation11_spill] sm:$0xff] %v14704_v45  ;;  %v6476_v37 = vpop.permute.xlu1 %6475 }
 0x2d1   : > { %v7485_v57 = vrot.slane %v7484_v14, 1  ;;  %v5976_v58 = vadd.f32 1.0, %v14636_v1  ;;  %v5980_v60 = vadd.f32 1.0, %v11555_v52  ;;  %v7488_v28 = vrot.slane %v7487_v46, 4  ;;  %v11557_v43 = vpop.eup %11556  ;;  %v14711_v12 = vpop.f32.mrb[91].mxu0  ;;  %v16910_v18 = vld [vmem:[#allocation19_spill] sm:$0xff] }
 0x2d2   : > { %v7478_v7 = vrot.slane %v7477_v16, 1  ;;  %11558 = verf.f32 %v5726_v55  ;;  %v6991_v26 = vrot.slane %v14280_v5, %v13076_v23  ;;  %16909 = vst [vmem:[#allocation13_spill] sm:$0xff] %v14711_v12  ;;  %v5979_v6 = vadd.f32 1.0, %v11557_v43  ;;  %v16911_v55 = vld [vmem:[#allocation18_spill] sm:$0xff] }
 0x2d3   : > { %v14706_v44 = vadd.f32 %v7485_v57, %v7484_v14  ;;  %11560 = verf.f32 %v5725_v63  ;;  %v6104_v24 = vmul.f32 %v5976_v58, %v14587_v29  ;;  %v6108_v1 = vmul.f32 %v5980_v60, %v14639_v22  ;;  %v14724_v22 = vpop.permute.xlu0 %6531  ;;  %v14728_v63 = vpop.f32.mrb[92].mxu0  ;;  %v16913_v43 = vld [vmem:[#allocation2_spill] sm:$0xff] }
 0x2d4   : > { %v14713_v49 = vadd.f32 %v7478_v7, %v7477_v16  ;;  %v7489_v33 = vadd.f32 %v7488_v28, %v7487_v46  ;;  %6993 = vbcast.lane.b32.xlu0 %v6991_v26, 256  ;;  %v5142_v14 = vadd.f32 %v14312_v36, %v16910_v18  ;;  %v5137_v29 = vadd.f32 %v14312_v36, %v16911_v55 }
 0x2d5   : > { %v7144_v2 = vmul.f32 %v6476_v37, %v6104_v24  ;;  %v7040_v5 = vrot.slane %v14438_v11, %v12916_v41  ;;  %v7148_v52 = vmul.f32 %v14582_v54, %v6108_v1  ;;  %v6107_v16 = vmul.f32 %v5979_v6, %v14644_v34  ;;  %16912 = vst [vmem:[#allocation15_spill] sm:$0xff] %v14728_v63  ;;  %v14737_v1 = vpop.f32.mrb[93].mxu0  ;;  %v16915_v37 = vld [vmem:[#allocation20_spill] sm:$0xff] }
 0x2d6   : > { %v7490_v57 = vrot.slane %v7489_v33, 2  ;;  %v7075_v46 = vrot.slane %v14535_v56, %v12343_v53  ;;  %v14731_v7 = vmul.f32 0.5, %v5142_v14  ;;  %v5728_v60 = vmul.f32 0.70710677, %v5142_v14  ;;  %16914 = vst [vmem:[#allocation14_spill] sm:$0xff] %v14737_v1  ;;  %v14744_v63 = vpop.f32.mrb[94].mxu0 }
 0x2d7   : > { %v7494_v58 = vsel %vm820_vm0, %v7144_v2, 0.0  ;;  %v14733_v28 = vmul.f32 0.5, %v5137_v29  ;;  %7042 = vbcast.lane.b32.xlu1 %v7040_v5, 256  ;;  %v7522_v54 = vsel %vm820_vm0, %v7148_v52, 0.0  ;;  %v7147_v34 = vmul.f32 %v16913_v43, %v6107_v16  ;;  %v16916_v5 = vld [vmem:[#allocation21_spill] sm:$0xff]  ;;  %16917 = vst [vmem:[#allocation16_spill] sm:$0xff] %v14744_v63 }
 0x2d8   : > { %v7491_v24 = vadd.f32 %v7490_v57, %v7489_v33  ;;  %v7495_v26 = vrot.slane %v7494_v58, 4  ;;  %v7523_v6 = vrot.slane %v7522_v54, 4  ;;  %11562 = verf.f32 %v5728_v60  ;;  %7077 = vbcast.lane.b32.xlu0 %v7075_v46, 256  ;;  %v14746_v57 = vpop.permute.xlu1 %6552 }
 0x2d9   : > { %v5727_v53 = vmul.f32 0.70710677, %v5137_v29  ;;  %v5152_v2 = vadd.f32 %v14312_v36, %v16915_v37  ;;  %v7515_v18 = vsel %vm820_vm0, %v7147_v34, 0.0  ;;  %v5147_v52 = vadd.f32 %v14312_v36, %v16916_v5  ;;  %v14750_v29 = vpop.f32.mrb[95].mxu0  ;;  %v14754_v37 = vpop.permute.xlu0 %6608 }
 0x2da   : > { %v7492_v14 = vrot.slane %v7491_v24, 1  ;;  %v7496_v55 = vadd.f32 %v7495_v26, %v7494_v58  ;;  %v7524_v33 = vadd.f32 %v7523_v6, %v7522_v54  ;;  %v7516_v16 = vrot.slane %v7515_v18, 4  ;;  %16918 = vst [vmem:[#allocation17_spill] sm:$0xff] %v14750_v29  ;;  %v14760_v12 = vpop.f32.mrb[96].mxu0 }
 0x2db   : > { %11564 = verf.f32 %v5727_v53  ;;  %v14748_v60 = vmul.f32 0.5, %v5152_v2  ;;  %v5730_v58 = vmul.f32 0.70710677, %v5152_v2  ;;  %v14756_v26 = vmul.f32 0.5, %v5147_v52  ;;  %v14763_v2 = vpop.f32.mrb[97].mxu0 }
 0x2dc   : > { %v11559_v46 = vpop.eup %11558  ;;  %v14752_v43 = vadd.f32 %v7492_v14, %v7491_v24  ;;  %v7497_v34 = vrot.slane %v7496_v55, 2  ;;  %v7525_v5 = vrot.slane %v7524_v33, 2  ;;  %v7517_v54 = vadd.f32 %v7516_v16, %v7515_v18 }
 0x2dd   : > { %v11561_v36 = vpop.eup %11560  ;;  %v5982_v6 = vadd.f32 1.0, %v11559_v46  ;;  %v5729_v53 = vmul.f32 0.70710677, %v5147_v52  ;;  %11566 = verf.f32 %v5730_v58  ;;  %v7047_v29 = vrot.slane %v14438_v11, %v13076_v23 }
 0x2de   : > { %v5981_v63 = vadd.f32 1.0, %v11561_v36  ;;  %v7498_v1 = vadd.f32 %v7497_v34, %v7496_v55  ;;  %v7526_v24 = vadd.f32 %v7525_v5, %v7524_v33  ;;  %v7518_v14 = vrot.slane %v7517_v54, 2  ;;  %v6483_v34 = vpop.permute.xlu1 %6482 }
 0x2df   : > { %v6110_v45 = vmul.f32 %v5982_v6, %v14694_v20  ;;  %11568 = verf.f32 %v5729_v53  ;;  %7049 = vbcast.lane.b32.xlu1 %v7047_v29, 256  ;;  %v5977_v52 = vadd.f32 1.0, %v14669_v30  ;;  %v5978_v55 = vadd.f32 1.0, %v14659_v9 }
 0x2e0   : > { %v6109_v59 = vmul.f32 %v5981_v63, %v14699_v25  ;;  %v7499_v18 = vrot.slane %v7498_v1, 1  ;;  %v7527_v16 = vrot.slane %v7526_v24, 1  ;;  %v7519_v46 = vadd.f32 %v7518_v14, %v7517_v54  ;;  %v6490_v63 = vpop.permute.xlu0 %6489 }
 0x2e1   : > { %v7150_v11 = vmul.f32 %v14630_v50, %v6110_v45  ;;  %v7082_v33 = vrot.slane %v14535_v56, %v12825_v39  ;;  %v6105_v25 = vmul.f32 %v5977_v52, %v14612_v3  ;;  %v6106_v29 = vmul.f32 %v5978_v55, %v14610_v21  ;;  %v14782_v39 = vld [vmem:[%s16763_s8] ss:$0 sm:$0xff] }
 0x2e2   : > { %v7149_v20 = vmul.f32 %v14650_v38, %v6109_v59  ;;  %v14772_v58 = vadd.f32 %v7499_v18, %v7498_v1  ;;  %v11563_v30 = vpop.eup %11562  ;;  %v14776_v36 = vadd.f32 %v7527_v16, %v7526_v24  ;;  %v7520_v9 = vrot.slane %v7519_v46, 1  ;;  %v16919_v50 = vld [vmem:[#allocation22_spill] sm:$0xff] }
 0x2e3   : > { %v7536_v5 = vsel %vm820_vm0, %v7150_v11, 0.0  ;;  %7084 = vbcast.lane.b32.xlu0 %v7082_v33, 256  ;;  %v5162_v59 = vadd.f32 %v14782_v39, %v16919_v50  ;;  %v5984_v45 = vadd.f32 1.0, %v11563_v30  ;;  %v7145_v21 = vmul.f32 %v6483_v34, %v6105_v25 }
 0x2e4   : > { %v7537_v38 = vrot.slane %v7536_v5, 4  ;;  %v7529_v3 = vsel %vm820_vm0, %v7149_v20, 0.0  ;;  %v14787_v54 = vadd.f32 %v7520_v9, %v7519_v46  ;;  %v7146_v53 = vmul.f32 %v6490_v63, %v6106_v29 }
 0x2e5   : > { %v11565_v1 = vpop.eup %11564  ;;  %v7530_v6 = vrot.slane %v7529_v3, 4  ;;  %v14789_v24 = vmul.f32 0.5, %v5162_v59  ;;  %v6112_v18 = vmul.f32 %v5984_v45, %v14731_v7  ;;  %v7501_v55 = vsel %vm820_vm0, %v7145_v21, 0.0  ;;  %v16920_v7 = vld [vmem:[#allocation23_spill] sm:$0xff] }
 0x2e6   : > { %v7538_v14 = vadd.f32 %v7537_v38, %v7536_v5  ;;  %v5983_v52 = vadd.f32 1.0, %v11565_v1  ;;  %v7502_v11 = vrot.slane %v7501_v55, 4  ;;  %v7508_v33 = vsel %vm820_vm0, %v7146_v53, 0.0 }
 0x2e7   : > { %v7531_v16 = vadd.f32 %v7530_v6, %v7529_v3  ;;  %v5732_v20 = vmul.f32 0.70710677, %v5162_v59  ;;  %v11567_v30 = vpop.eup %11566  ;;  %v7152_v46 = vmul.f32 %v14724_v22, %v6112_v18  ;;  %v7509_v63 = vrot.slane %v7508_v33, 4 }
 0x2e8   : > { %v7539_v34 = vrot.slane %v7538_v14, 2  ;;  %v6111_v25 = vmul.f32 %v5983_v52, %v14733_v28  ;;  %v7503_v5 = vadd.f32 %v7502_v11, %v7501_v55  ;;  %v5157_v50 = vadd.f32 %v14782_v39, %v16920_v7 }
 0x2e9   : > { %v14796_v29 = vpop.eup %11568  ;;  %v7532_v9 = vrot.slane %v7531_v16, 2  ;;  %11570 = verf.f32 %v5732_v20  ;;  %v7550_v3 = vsel %vm820_vm0, %v7152_v46, 0.0  ;;  %v7510_v45 = vadd.f32 %v7509_v63, %v7508_v33 }
 0x2ea   : > { %v7540_v38 = vadd.f32 %v7539_v34, %v7538_v14  ;;  %v7151_v59 = vmul.f32 %v14661_v35, %v6111_v25  ;;  %v7551_v1 = vrot.slane %v7550_v3, 4  ;;  %v7504_v22 = vrot.slane %v7503_v5, 2 }
 0x2eb   : > { %v7533_v21 = vadd.f32 %v7532_v9, %v7531_v16  ;;  %v14802_v6 = vmul.f32 0.5, %v5157_v50  ;;  %v7511_v18 = vrot.slane %v7510_v45, 2  ;;  %v5731_v52 = vmul.f32 0.70710677, %v5157_v50 }
 0x2ec   : > { %v7541_v28 = vrot.slane %v7540_v38, 1  ;;  %v7543_v53 = vsel %vm820_vm0, %v7151_v59, 0.0  ;;  %v7552_v11 = vadd.f32 %v7551_v1, %v7550_v3  ;;  %v7505_v7 = vadd.f32 %v7504_v22, %v7503_v5  ;;  %v14829_v1 = vpop.permute.xlu1 %6566  ;;  %v14831_v22 = vpop.permute.xlu0 %6573 }
 0x2ed   : > { %v7534_v55 = vrot.slane %v7533_v21, 1  ;;  %v7544_v20 = vrot.slane %v7543_v53, 4  ;;  %v14807_v34 = vadd.f32 %v7511_v18, %v7510_v45  ;;  %11572 = verf.f32 %v5731_v52 }
 0x2ee   : > { %v14805_v14 = vadd.f32 %v7541_v28, %v7540_v38  ;;  %v7103_v35 = vrot.slane %v14535_v56, %v13076_v23  ;;  %v7553_v33 = vrot.slane %v7552_v11, 2  ;;  %v7506_v25 = vrot.slane %v7505_v7, 1  ;;  %v16923_v28 = vld [vmem:[#allocation24_spill] sm:$0xff] }
 0x2ef   : > { %v14811_v16 = vadd.f32 %v7534_v55, %v7533_v21  ;;  %v7545_v46 = vadd.f32 %v7544_v20, %v7543_v53  ;;  %v16921_v9 = vrot.slane %v14549_v42, 1  ;;  %v16922_v50 = vrot.slane %v14619_v48, 1 }
 0x2f0   : > { %7105 = vbcast.lane.b32.xlu1 %v7103_v35, 256  ;;  %v8363_v23 = vsel %vm8335_vm2, %v14496_v51, %v14512_v62  ;;  %v14823_v3 = vadd.f32 %v7553_v33, %v7552_v11  ;;  %v14825_v45 = vadd.f32 %v7506_v25, %v7505_v7  ;;  %v5172_v51 = vadd.f32 %v14782_v39, %v16923_v28  ;;  %v16924_v62 = vld [vmem:[#allocation5_spill] sm:$0xff] }
 0x2f1   : > { %v7444_v5 = vadd.f32 %v16921_v9, %v14549_v42  ;;  %v7458_v38 = vadd.f32 %v16922_v50, %v14619_v48  ;;  %v7546_v59 = vrot.slane %v7545_v46, 2  ;;  %v8364_v21 = vsel %vm8337_vm3, %v14547_v8, %v8363_v23  ;;  %v6546_v23 = vpop.permute.xlu0 %6545 }
 0x2f2   : > { %v8365_v42 = vsel %vm8339_vm4, %v14537_v10, %v8364_v21  ;;  %v7089_v48 = vrot.slane %v14535_v56, %v12868_v15  ;;  %v5167_v53 = vadd.f32 %v14782_v39, %v16924_v62  ;;  %v5986_v11 = vadd.f32 1.0, %v11567_v30 }
 0x2f3   : > { %v11571_v18 = vpop.eup %11570  ;;  %v7547_v8 = vadd.f32 %v7546_v59, %v7545_v46  ;;  %v8366_v55 = vsel %vm8341_vm5, %v14580_v19, %v8365_v42  ;;  %v14845_v7 = vmul.f32 0.5, %v5172_v51  ;;  %v5734_v15 = vmul.f32 0.70710677, %v5172_v51  ;;  %v16925_v59 = vld [vmem:[#allocation6_spill] sm:$0xff] }
 0x2f4   : > { %v5988_v20 = vadd.f32 1.0, %v11571_v18  ;;  %v8367_v10 = vsel %vm8343_vm6, %v7444_v5, %v8366_v55  ;;  %7091 = vbcast.lane.b32.xlu0 %v7089_v48, 256  ;;  %v14849_v25 = vmul.f32 0.5, %v5167_v53  ;;  %v5733_v9 = vmul.f32 0.70710677, %v5167_v53  ;;  %v14857_v5 = vpop.permute.xlu1 %6615  ;;  %v16926_v48 = vld [vmem:[#allocation3_spill] sm:$0xff] }
 0x2f5   : > { %v7548_v35 = vrot.slane %v7547_v8, 1  ;;  %v8368_v33 = vsel %vm8345_vm7, %v14675_v4, %v8367_v10  ;;  %11574 = verf.f32 %v5734_v15  ;;  %v6114_v19 = vmul.f32 %v5986_v11, %v14748_v60  ;;  %v16927_v18 = vld [vmem:[#allocation4_spill] sm:$0xff] }
 0x2f6   : > { %v6116_v46 = vmul.f32 %v5988_v20, %v14789_v24  ;;  %v8369_v50 = vsel %vm8347_vm8, %v7458_v38, %v8368_v33  ;;  %11576 = verf.f32 %v5733_v9  ;;  %v7096_v4 = vrot.slane %v14535_v56, %v12916_v41  ;;  %v14871_v56 = vpop.f32.mrb[98].mxu0 }
 0x2f7   : > { %v14854_v30 = vadd.f32 %v7548_v35, %v7547_v8  ;;  %11002 = vmatmul.mubr.msk.f32.gmra.mrb[130].mxu1 %vm820_vm0, %v8369_v50  ;;  %v5182_v21 = vadd.f32 %v14782_v39, %v16925_v59  ;;  %v11573_v24 = vpop.eup %11572  ;;  %v7154_v42 = vmul.f32 %v6546_v23, %v6114_v19  ;;  %v5177_v60 = vadd.f32 %v14782_v39, %v16926_v48  ;;  %v14877_v20 = vpop.f32.mrb[99].mxu0 }
 0x2f8   : > { %v7156_v38 = vmul.f32 %v14697_v17, %v6116_v46  ;;  %v5985_v28 = vadd.f32 1.0, %v14796_v29  ;;  %v5987_v51 = vadd.f32 1.0, %v11573_v24  ;;  %7098 = vbcast.lane.b32.xlu0 %v7096_v4, 256  ;;  %v5192_v41 = vadd.f32 %v14782_v39, %v16927_v18  ;;  %v6539_v23 = vpop.permute.xlu1 %6538  ;;  %v16928_v4 = vld [vmem:[#allocation25_spill] sm:$0xff] }
 0x2f9   : > { %v14867_v62 = vmul.f32 0.5, %v5182_v21  ;;  %v5736_v53 = vmul.f32 0.70710677, %v5182_v21  ;;  %v7564_v17 = vsel %vm820_vm0, %v7154_v42, 0.0  ;;  %v14875_v55 = vmul.f32 0.5, %v5177_v60  ;;  %v14886_v21 = vpop.f32.mrb[100].mxu0 }
 0x2fa   : > { %v7578_v8 = vsel %vm820_vm0, %v7156_v38, 0.0  ;;  %v5735_v11 = vmul.f32 0.70710677, %v5177_v60  ;;  %v6115_v10 = vmul.f32 %v5987_v51, %v14802_v6  ;;  %v7565_v15 = vrot.slane %v7564_v17, 4  ;;  %v14888_v6 = vpop.permute.xlu0 %6629  ;;  %v16929_v38 = vld [vmem:[#allocation28_spill] sm:$0xff]  ;;  %v16930_v42 = vld [vmem:[#allocation29_spill] sm:$0xff] }
 0x2fb   : > { %v7579_v29 = vrot.slane %v7578_v8, 4  ;;  %11578 = verf.f32 %v5736_v53  ;;  %v6113_v35 = vmul.f32 %v5985_v28, %v14756_v26  ;;  %v14881_v33 = vmul.f32 0.5, %v5192_v41  ;;  %v14894_v60 = vpop.f32.mrb[101].mxu0 }
 0x2fc   : > { %11580 = verf.f32 %v5735_v11  ;;  %v5738_v9 = vmul.f32 0.70710677, %v5192_v41  ;;  %v7155_v50 = vmul.f32 %v14746_v57, %v6115_v10  ;;  %v7566_v19 = vadd.f32 %v7565_v15, %v7564_v17  ;;  %16931 = vst [vmem:[#allocation19_spill] sm:$0xff] %v14894_v60  ;;  %v14910_v60 = vpop.permute.xlu1 %6622 }
 0x2fd   : > { %v7580_v46 = vadd.f32 %v7579_v29, %v7578_v8  ;;  %v5187_v59 = vadd.f32 %v14782_v39, %v16928_v4  ;;  %v7153_v24 = vmul.f32 %v6539_v23, %v6113_v35  ;;  %v5202_v26 = vadd.f32 %v14782_v39, %v16929_v38  ;;  %v14904_v23 = vpop.f32.mrb[102].mxu0 }
 0x2fe   : > { %11582 = verf.f32 %v5738_v9  ;;  %v5197_v48 = vadd.f32 %v14782_v39, %v16930_v42  ;;  %v7571_v28 = vsel %vm820_vm0, %v7155_v50, 0.0  ;;  %v7567_v51 = vrot.slane %v7566_v19, 2  ;;  %v14906_v42 = vpop.f32.mrb[103].mxu0 }
 0x2ff   : > { %v7581_v57 = vrot.slane %v7580_v46, 2  ;;  %v14897_v53 = vmul.f32 0.5, %v5187_v59  ;;  %v11575_v18 = vpop.eup %11574  ;;  %v7572_v41 = vrot.slane %v7571_v28, 4  ;;  %v7557_v8 = vsel %vm820_vm0, %v7153_v24, 0.0  ;;  %16932 = vst [vmem:[#allocation18_spill] sm:$0xff] %v14906_v42 }
 0x300   : > { %v5737_v17 = vmul.f32 0.70710677, %v5187_v59  ;;  %v14900_v11 = vmul.f32 0.5, %v5202_v26  ;;  %v11577_v29 = vpop.eup %11576  ;;  %v5990_v15 = vadd.f32 1.0, %v11575_v18  ;;  %v14902_v35 = vadd.f32 %v7567_v51, %v7566_v19 }
 0x301   : > { %v7582_v10 = vadd.f32 %v7581_v57, %v7580_v46  ;;  %v7558_v9 = vrot.slane %v7557_v8, 4  ;;  %v7573_v4 = vadd.f32 %v7572_v41, %v7571_v28  ;;  %v5989_v50 = vadd.f32 1.0, %v11577_v29  ;;  %v14913_v57 = vpop.permute.xlu0 %6636 }
 0x302   : > { %11584 = verf.f32 %v5737_v17  ;;  %v5740_v38 = vmul.f32 0.70710677, %v5202_v26  ;;  %v6118_v24 = vmul.f32 %v5990_v15, %v14845_v7  ;;  %v14915_v28 = vmul.f32 0.5, %v5197_v48  ;;  %v14920_v17 = vpop.f32.mrb[104].mxu0 }
 0x303   : > { %v7583_v52 = vrot.slane %v7582_v10, 1  ;;  %v7559_v63 = vadd.f32 %v7558_v9, %v7557_v8  ;;  %v7574_v46 = vrot.slane %v7573_v4, 2  ;;  %v6117_v19 = vmul.f32 %v5989_v50, %v14849_v25  ;;  %16933 = vst [vmem:[#allocation2_spill] sm:$0xff] %v14920_v17 }
 0x304   : > { %11586 = verf.f32 %v5740_v38  ;;  %v7158_v18 = vmul.f32 %v14831_v22, %v6118_v24  ;;  %v5739_v7 = vmul.f32 0.70710677, %v5197_v48  ;;  %v16934_v25 = vrot.slane %v14807_v34, 1 }
 0x305   : > { %v11579_v51 = vpop.eup %11578  ;;  %v14917_v26 = vadd.f32 %v7583_v52, %v7582_v10  ;;  %v7560_v41 = vrot.slane %v7559_v63, 2  ;;  %v7575_v29 = vadd.f32 %v7574_v46, %v7573_v4  ;;  %v7157_v15 = vmul.f32 %v14829_v1, %v6117_v19  ;;  %v14929_v52 = vpop.f32.mrb[105].mxu0 }
 0x306   : > { %v11581_v8 = vpop.eup %11580  ;;  %v7514_v9 = vadd.f32 %v16934_v25, %v14807_v34  ;;  %v8370_v50 = vsel %vm8335_vm2, %v14647_v31, %v14671_v61  ;;  %16935 = vst [vmem:[#allocation20_spill] sm:$0xff] %v14929_v52  ;;  %v7592_v22 = vsel %vm820_vm0, %v7158_v18, 0.0  ;;  %11588 = verf.f32 %v5739_v7  ;;  %v6581_v19 = vpop.permute.xlu1 %6580  ;;  %v16936_v25 = vld [vmem:[#allocation26_spill] sm:$0xff] }
 0x307   : > { %v7561_v10 = vadd.f32 %v7560_v41, %v7559_v63  ;;  %v8371_v48 = vsel %vm8337_vm3, %v14713_v49, %v8370_v50  ;;  %v7576_v1 = vrot.slane %v7575_v29, 1  ;;  %v7593_v38 = vrot.slane %v7592_v22, 4  ;;  %v14945_v7 = vpop.permute.xlu0 %6671 }
 0x308   : > { %v14934_v4 = vpop.eup %11582  ;;  %v7585_v24 = vsel %vm820_vm0, %v7157_v15, 0.0  ;;  %v8372_v34 = vsel %vm8339_vm4, %v14706_v44, %v8371_v48  ;;  %v5991_v63 = vadd.f32 1.0, %v11581_v8  ;;  %v5212_v15 = vadd.f32 %v14782_v39, %v16936_v25 }
 0x309   : > { %v7586_v46 = vrot.slane %v7585_v24, 4  ;;  %v7562_v31 = vrot.slane %v7561_v10, 1  ;;  %v8373_v61 = vsel %vm8341_vm5, %v14752_v43, %v8372_v34  ;;  %v14941_v18 = vadd.f32 %v7576_v1, %v7575_v29 }
 0x30a   : > { %v7594_v41 = vadd.f32 %v7593_v38, %v7592_v22  ;;  %v8374_v49 = vsel %vm8343_vm6, %v14772_v58, %v8373_v61  ;;  %v6119_v43 = vmul.f32 %v5991_v63, %v14875_v55  ;;  %v14957_v1 = vmul.f32 0.5, %v5212_v15  ;;  %v16938_v55 = vld [vmem:[#allocation30_spill] sm:$0xff]  ;;  %v16939_v63 = vld [vmem:[#allocation31_spill] sm:$0xff] }
 0x30b   : > { %v7587_v50 = vadd.f32 %v7586_v46, %v7585_v24  ;;  %v14949_v44 = vadd.f32 %v7562_v31, %v7561_v10  ;;  %v8375_v48 = vsel %vm8345_vm7, %v14825_v45, %v8374_v49  ;;  %v5742_v58 = vmul.f32 0.70710677, %v5212_v15  ;;  %v16937_v24 = vld [vmem:[#allocation27_spill] sm:$0xff]  ;;  %v14966_v49 = vpop.f32.mrb[106].mxu0 }
 0x30c   : > { %v14954_v8 = vpop.eup %11584  ;;  %v7595_v29 = vrot.slane %v7594_v41, 2  ;;  %v8376_v22 = vsel %vm8347_vm8, %v7514_v9, %v8375_v48  ;;  %v7159_v34 = vmul.f32 %v6581_v19, %v6119_v43  ;;  %v5207_v10 = vadd.f32 %v14782_v39, %v16937_v24  ;;  %16940 = vst [vmem:[#allocation21_spill] sm:$0xff] %v14966_v49  ;;  %v6588_v43 = vpop.permute.xlu1 %6587 }
 0x30d   : > { %v7588_v38 = vrot.slane %v7587_v50, 2  ;;  %11004 = vmatprep.mubr.msk.f32.mxu1 %vm820_vm0, %v8376_v22  ;;  %v5992_v46 = vadd.f32 1.0, %v11579_v51  ;;  %11590 = verf.f32 %v5742_v58  ;;  %v5222_v61 = vadd.f32 %v14782_v39, %v16938_v55  ;;  %v14971_v22 = vpop.f32.mrb[107].mxu0  ;;  %v14974_v24 = vpop.permute.xlu0 %6643 }
 0x30e   : > { %v11587_v31 = vpop.eup %11586  ;;  %v7596_v45 = vadd.f32 %v7595_v29, %v7594_v41  ;;  %v5217_v9 = vadd.f32 %v14782_v39, %v16939_v63  ;;  %v7599_v48 = vsel %vm820_vm0, %v7159_v34, 0.0  ;;  %v14969_v19 = vmul.f32 0.5, %v5207_v10  ;;  %16941 = vst [vmem:[#allocation22_spill] sm:$0xff] %v14971_v22  ;;  %v14981_v22 = vpop.f32.mrb[108].mxu0 }
 0x30f   : > { %v7589_v25 = vadd.f32 %v7588_v38, %v7587_v50  ;;  %v5996_v15 = vadd.f32 1.0, %v11587_v31  ;;  %v7600_v41 = vrot.slane %v7599_v48, 4  ;;  %v5741_v29 = vmul.f32 0.70710677, %v5207_v10  ;;  %16942 = vst [vmem:[#allocation23_spill] sm:$0xff] %v14981_v22 }
 0x310   : > { %v7597_v51 = vrot.slane %v7596_v45, 1  ;;  %v6120_v58 = vmul.f32 %v5992_v46, %v14867_v62  ;;  %v11589_v55 = vpop.eup %11588  ;;  %v14977_v50 = vmul.f32 0.5, %v5222_v61  ;;  %v5744_v38 = vmul.f32 0.70710677, %v5222_v61  ;;  %v14986_v46 = vpop.f32.mrb[109].mxu0 }
 0x311   : > { %v7590_v63 = vrot.slane %v7589_v25, 1  ;;  %v6124_v59 = vmul.f32 %v5996_v15, %v14900_v11  ;;  %v5995_v31 = vadd.f32 1.0, %v11589_v55  ;;  %v7601_v49 = vadd.f32 %v7600_v41, %v7599_v48  ;;  %16943 = vst [vmem:[#allocation24_spill] sm:$0xff] %v14986_v46 }
 0x312   : > { %v14979_v34 = vadd.f32 %v7597_v51, %v7596_v45  ;;  %11592 = verf.f32 %v5741_v29  ;;  %v7160_v10 = vmul.f32 %v6588_v43, %v6120_v58  ;;  %v14989_v17 = vmul.f32 0.5, %v5217_v9  ;;  %v14993_v51 = vpop.permute.xlu1 %6664  ;;  %v15000_v58 = vpop.permute.xlu0 %6720 }
 0x313   : > { %v14983_v52 = vadd.f32 %v7590_v63, %v7589_v25  ;;  %v7164_v62 = vmul.f32 %v14857_v5, %v6124_v59  ;;  %11594 = verf.f32 %v5744_v38  ;;  %v6123_v11 = vmul.f32 %v5995_v31, %v14915_v28  ;;  %v16944_v25 = vld [vmem:[#allocation7_spill] sm:$0xff] }
 0x314   : > { %v7602_v15 = vrot.slane %v7601_v49, 2  ;;  %v5743_v45 = vmul.f32 0.70710677, %v5217_v9  ;;  %v7606_v48 = vsel %vm820_vm0, %v7160_v10, 0.0  ;;  %v5232_v41 = vadd.f32 %v14782_v39, %v16944_v25  ;;  %v15002_v9 = vpop.f32.mrb[110].mxu0 }
 0x315   : > { %v7634_v61 = vsel %vm820_vm0, %v7164_v62, 0.0  ;;  %v5227_v5 = vadd.f32 %v14782_v39, %v14488_v47  ;;  %v7163_v43 = vmul.f32 %v14754_v37, %v6123_v11  ;;  %v7607_v29 = vrot.slane %v7606_v48, 4  ;;  %16945 = vst [vmem:[#allocation5_spill] sm:$0xff] %v15002_v9  ;;  %v15008_v31 = vpop.f32.mrb[111].mxu0 }
 0x316   : > { %v7635_v59 = vrot.slane %v7634_v61, 4  ;;  %v7603_v28 = vadd.f32 %v7602_v15, %v7601_v49  ;;  %11596 = verf.f32 %v5743_v45  ;;  %v15004_v55 = vmul.f32 0.5, %v5232_v41  ;;  %16946 = vst [vmem:[#allocation6_spill] sm:$0xff] %v15008_v31  ;;  %v15014_v22 = vpop.f32.mrb[112].mxu0 }
 0x317   : > { %v5746_v63 = vmul.f32 0.70710677, %v5232_v41  ;;  %v15006_v38 = vmul.f32 0.5, %v5227_v5  ;;  %v11591_v62 = vpop.eup %11590  ;;  %v7627_v47 = vsel %vm820_vm0, %v7163_v43, 0.0  ;;  %v7608_v37 = vadd.f32 %v7607_v29, %v7606_v48  ;;  %16947 = vst [vmem:[#allocation3_spill] sm:$0xff] %v15014_v22  ;;  %v15018_v48 = vpop.f32.mrb[113].mxu0 }
 0x318   : > { %v7636_v10 = vadd.f32 %v7635_v59, %v7634_v61  ;;  %v7604_v25 = vrot.slane %v7603_v28, 1  ;;  %v7628_v49 = vrot.slane %v7627_v47, 4  ;;  %v5998_v11 = vadd.f32 1.0, %v11591_v62  ;;  %v6595_v61 = vpop.permute.xlu1 %6594  ;;  %16948 = vst [vmem:[#allocation4_spill] sm:$0xff] %v15018_v48 }
 0x319   : > { %11598 = verf.f32 %v5746_v63  ;;  %v5745_v15 = vmul.f32 0.70710677, %v5227_v5  ;;  %v7609_v45 = vrot.slane %v7608_v37, 2  ;;  %v5993_v41 = vadd.f32 1.0, %v14954_v8  ;;  %v6602_v63 = vpop.permute.xlu0 %6601 }
 0x31a   : > { %v7637_v46 = vrot.slane %v7636_v10, 2  ;;  %v15011_v9 = vadd.f32 %v7604_v25, %v7603_v28  ;;  %v7629_v42 = vadd.f32 %v7628_v49, %v7627_v47  ;;  %v6126_v31 = vmul.f32 %v5998_v11, %v14957_v1 }
 0x31b   : > { %11600 = verf.f32 %v5745_v15  ;;  %v5994_v59 = vadd.f32 1.0, %v14934_v4  ;;  %v7610_v5 = vadd.f32 %v7609_v45, %v7608_v37  ;;  %v6121_v28 = vmul.f32 %v5993_v41, %v14897_v53 }
 0x31c   : > { %v11593_v43 = vpop.eup %11592  ;;  %v7638_v29 = vadd.f32 %v7637_v46, %v7636_v10  ;;  %v5242_v8 = vadd.f32 %v14782_v39, %v14494_v0  ;;  %v7630_v25 = vrot.slane %v7629_v42, 2  ;;  %v7166_v47 = vmul.f32 %v14888_v6, %v6126_v31 }
 0x31d   : > { %v11595_v62 = vpop.eup %11594  ;;  %v5997_v1 = vadd.f32 1.0, %v11593_v43  ;;  %v6122_v49 = vmul.f32 %v5994_v59, %v14881_v33  ;;  %v7611_v4 = vrot.slane %v7610_v5, 1  ;;  %v7161_v48 = vmul.f32 %v6595_v61, %v6121_v28 }
 0x31e   : > { %v7639_v11 = vrot.slane %v7638_v29, 1  ;;  %v6000_v15 = vadd.f32 1.0, %v11595_v62  ;;  %v7631_v22 = vadd.f32 %v7630_v25, %v7629_v42  ;;  %v7648_v46 = vsel %vm820_vm0, %v7166_v47, 0.0 }
 0x31f   : > { %v6125_v53 = vmul.f32 %v5997_v1, %v14969_v19  ;;  %v7162_v10 = vmul.f32 %v6602_v63, %v6122_v49  ;;  %v7649_v0 = vrot.slane %v7648_v46, 4  ;;  %v15029_v45 = vadd.f32 %v7611_v4, %v7610_v5 }
 0x320   : > { %v15027_v37 = vadd.f32 %v7639_v11, %v7638_v29  ;;  %v6128_v6 = vmul.f32 %v6000_v15, %v14977_v50  ;;  %v11597_v31 = vpop.eup %11596  ;;  %v7632_v41 = vrot.slane %v7631_v22, 1  ;;  %v7613_v59 = vsel %vm820_vm0, %v7161_v48, 0.0 }
 0x321   : > { %v7165_v33 = vmul.f32 %v14910_v60, %v6125_v53  ;;  %v7620_v42 = vsel %vm820_vm0, %v7162_v10, 0.0  ;;  %v7650_v61 = vadd.f32 %v7649_v0, %v7648_v46  ;;  %v5999_v19 = vadd.f32 1.0, %v11597_v31  ;;  %v16949_v53 = vld [vmem:[#allocation32_spill] sm:$0xff] }
 0x322   : > { %v7168_v43 = vmul.f32 %v14974_v24, %v6128_v6  ;;  %v7614_v28 = vrot.slane %v7613_v59, 4  ;;  %v15036_v63 = vadd.f32 %v7632_v41, %v7631_v22  ;;  %v7621_v62 = vrot.slane %v7620_v42, 4 }
 0x323   : > { %v11599_v29 = vpop.eup %11598  ;;  %v7641_v5 = vsel %vm820_vm0, %v7165_v33, 0.0  ;;  %v15039_v50 = vmul.f32 0.5, %v5242_v8  ;;  %v7651_v25 = vrot.slane %v7650_v61, 2  ;;  %v6127_v48 = vmul.f32 %v5999_v19, %v14989_v17 }
 0x324   : > { %v7642_v47 = vrot.slane %v7641_v5, 4  ;;  %v7662_v60 = vsel %vm820_vm0, %v7168_v43, 0.0  ;;  %v7615_v24 = vadd.f32 %v7614_v28, %v7613_v59  ;;  %v7622_v11 = vadd.f32 %v7621_v62, %v7620_v42 }
 0x325   : > { %v15043_v1 = vpop.eup %11600  ;;  %v7663_v49 = vrot.slane %v7662_v60, 4  ;;  %v5748_v4 = vmul.f32 0.70710677, %v5242_v8  ;;  %v7652_v15 = vadd.f32 %v7651_v25, %v7650_v61  ;;  %v7167_v46 = vmul.f32 %v14913_v57, %v6127_v48 }
 0x326   : > { %v7643_v22 = vadd.f32 %v7642_v47, %v7641_v5  ;;  %v5237_v10 = vadd.f32 %v14782_v39, %v16949_v53  ;;  %v7616_v6 = vrot.slane %v7615_v24, 2  ;;  %v7623_v31 = vrot.slane %v7622_v11, 2 }
 0x327   : > { %v7664_v0 = vadd.f32 %v7663_v49, %v7662_v60  ;;  %11602 = verf.f32 %v5748_v4  ;;  %v7653_v41 = vrot.slane %v7652_v15, 1  ;;  %v7655_v17 = vsel %vm820_vm0, %v7167_v46, 0.0  ;;  %v15061_v49 = vpop.permute.xlu1 %6678 }
 0x328   : > { %v7644_v33 = vrot.slane %v7643_v22, 2  ;;  %v15049_v43 = vmul.f32 0.5, %v5237_v10  ;;  %v7656_v42 = vrot.slane %v7655_v17, 4  ;;  %v7617_v8 = vadd.f32 %v7616_v6, %v7615_v24  ;;  %v15078_v6 = vpop.permute.xlu0 %6685 }
 0x329   : > { %v7665_v59 = vrot.slane %v7664_v0, 2  ;;  %v15051_v61 = vadd.f32 %v7623_v31, %v7622_v11  ;;  %v15053_v19 = vadd.f32 %v7653_v41, %v7652_v15  ;;  %v5747_v28 = vmul.f32 0.70710677, %v5237_v10 }
 0x32a   : > { %v7645_v57 = vadd.f32 %v7644_v33, %v7643_v22  ;;  %v16950_v5 = vrot.slane %v14823_v3, 1  ;;  %v7657_v47 = vadd.f32 %v7656_v42, %v7655_v17  ;;  %v7618_v60 = vrot.slane %v7617_v8, 1 }
 0x32b   : > { %v15058_v25 = vadd.f32 %v7665_v59, %v7664_v0  ;;  %v7625_v48 = vrot.slane %v15051_v61, 1  ;;  %11604 = verf.f32 %v5747_v28  ;;  %v16951_v24 = vrot.slane %v14902_v35, 1 }
 0x32c   : > { %v7556_v62 = vadd.f32 %v16950_v5, %v14823_v3  ;;  %v7646_v4 = vrot.slane %v7645_v57, 1  ;;  %v8377_v15 = vsel %vm8335_vm2, %v14776_v36, %v14787_v54  ;;  %v7658_v22 = vrot.slane %v7657_v47, 2  ;;  %v11838_v5 = vld [vmem:[%s12278_s25] sm:$0xff] }
 0x32d   : > { %v7570_v11 = vadd.f32 %v16951_v24, %v14902_v35  ;;  %v15070_v46 = vadd.f32 %v7618_v60, %v7617_v8  ;;  %v8378_v53 = vsel %vm8337_vm3, %v14811_v16, %v8377_v15  ;;  %v5252_v35 = vadd.f32 %v14782_v39, %v14601_v40  ;;  %v11837_v8 = vld [vmem:[%s12278_s25 + $0x8] sm:$0xff]  ;;  %v6658_v24 = vpop.permute.xlu0 %6657 }
 0x32e   : > { %v15074_v10 = vadd.f32 %v7646_v4, %v7645_v57  ;;  %v8379_v0 = vsel %vm8339_vm4, %v14805_v14, %v8378_v53  ;;  %v5247_v36 = vadd.f32 %v14782_v39, %v14607_v27  ;;  %v7659_v54 = vadd.f32 %v7658_v22, %v7657_v47  ;;  %v16952_v22 = vld [vmem:[#allocation10_spill] sm:$0xff] }
 0x32f   : > { %v8380_v31 = vsel %vm8341_vm5, %v14854_v30, %v8379_v0  ;;  %v6002_v16 = vadd.f32 1.0, %v11599_v29  ;;  %v15087_v33 = vmul.f32 0.5, %v5252_v35  ;;  %v5750_v14 = vmul.f32 0.70710677, %v5252_v35  ;;  %v15095_v30 = vpop.permute.xlu1 %6727  ;;  %v15112_v0 = vpop.f32.mrb[114].mxu0 }
 0x330   : > { %v8381_v41 = vsel %vm8343_vm6, %v7556_v62, %v8380_v31  ;;  %v15089_v17 = vmul.f32 0.5, %v5247_v36  ;;  %v7660_v42 = vrot.slane %v7659_v54, 1  ;;  %v5749_v27 = vmul.f32 0.70710677, %v5247_v36  ;;  %v15118_v31 = vpop.f32.mrb[115].mxu0 }
 0x331   : > { %v11603_v59 = vpop.eup %11602  ;;  %v8382_v40 = vsel %vm8345_vm7, %v14949_v44, %v8381_v41  ;;  %v8135_v57 = vsel %vm8131_vm9, %v11837_v8, 0.0  ;;  %11606 = verf.f32 %v5750_v14  ;;  %v8132_v62 = vsel %vm8131_vm9, %v11838_v5, 0.0 }
 0x332   : > { %v6004_v29 = vadd.f32 1.0, %v11603_v59  ;;  %v8383_v28 = vsel %vm8347_vm8, %v7570_v11, %v8382_v40  ;;  %8136 = vadd.xlane.f32.xlu1 %v8135_v57  ;;  %v15100_v47 = vadd.f32 %v7660_v42, %v7659_v54  ;;  %11608 = verf.f32 %v5749_v27  ;;  %8133 = vadd.xlane.f32.xlu0 %v8132_v62  ;;  %v16953_v54 = vld [vmem:[#allocation8_spill] sm:$0xff] }
 0x333   : > { %11005 = vmatmul.mubr.msk.f32.gmra.mrb[132].mxu1 %vm820_vm0, %v8383_v28  ;;  %v6130_v44 = vmul.f32 %v6002_v16, %v15004_v55  ;;  %v5262_v60 = vadd.f32 %v14782_v39, %v14617_v32  ;;  %v5257_v11 = vadd.f32 %v14782_v39, %v14622_v13  ;;  %v6001_v15 = vadd.f32 1.0, %v15043_v1  ;;  %v6651_v42 = vpop.permute.xlu1 %6650 }
 0x334   : > { %v6132_v4 = vmul.f32 %v6004_v29, %v15039_v50  ;;  %v5272_v53 = vadd.f32 %v14782_v39, %v16952_v22  ;;  %v5267_v32 = vadd.f32 %v14782_v39, %v16953_v54  ;;  %v15128_v29 = vpop.f32.mrb[116].mxu0 }
 0x335   : > { %v7170_v35 = vmul.f32 %v6658_v24, %v6130_v44  ;;  %v15114_v36 = vmul.f32 0.5, %v5262_v60  ;;  %v5752_v55 = vmul.f32 0.70710677, %v5262_v60  ;;  %v11605_v50 = vpop.eup %11604  ;;  %v15121_v13 = vmul.f32 0.5, %v5257_v11 }
 0x336   : > { %v7172_v16 = vmul.f32 %v14945_v7, %v6132_v4  ;;  %v5751_v1 = vmul.f32 0.70710677, %v5257_v11  ;;  %v6129_v41 = vmul.f32 %v6001_v15, %v15006_v38  ;;  %v6003_v14 = vadd.f32 1.0, %v11605_v50  ;;  %v15133_v38 = vpop.f32.mrb[117].mxu0  ;;  %v15136_v4 = vpop.permute.xlu0 %6741  ;;  %v16954_v11 = vld [vmem:[#allocation12_spill] sm:$0xff] }
 0x337   : > { %v7676_v59 = vsel %vm820_vm0, %v7170_v35, 0.0  ;;  %11610 = verf.f32 %v5752_v55  ;;  %v15125_v40 = vmul.f32 0.5, %v5272_v53  ;;  %v5754_v5 = vmul.f32 0.70710677, %v5272_v53 }
 0x338   : > { %v7690_v27 = vsel %vm820_vm0, %v7172_v16, 0.0  ;;  %v7677_v8 = vrot.slane %v7676_v59, 4  ;;  %11612 = verf.f32 %v5751_v1  ;;  %v7169_v57 = vmul.f32 %v6651_v42, %v6129_v41  ;;  %v15143_v16 = vpop.f32.mrb[118].mxu0 }
 0x339   : > { %v7691_v7 = vrot.slane %v7690_v27, 4  ;;  %v6131_v28 = vmul.f32 %v6003_v14, %v15049_v43  ;;  %v15131_v62 = vmul.f32 0.5, %v5267_v32  ;;  %v5753_v24 = vmul.f32 0.70710677, %v5267_v32  ;;  %16955 = vst [vmem:[#allocation25_spill] sm:$0xff] %v15143_v16  ;;  %v15146_v42 = vpop.f32.mrb[119].mxu0 }
 0x33a   : > { %v7678_v44 = vadd.f32 %v7677_v8, %v7676_v59  ;;  %v7669_v60 = vsel %vm820_vm0, %v7169_v57, 0.0  ;;  %v5282_v15 = vadd.f32 %v14782_v39, %v16954_v11  ;;  %11614 = verf.f32 %v5754_v5  ;;  %16956 = vst [vmem:[#allocation28_spill] sm:$0xff] %v15146_v42  ;;  %v15150_v57 = vpop.permute.xlu1 %6734 }
 0x33b   : > { %v7692_v22 = vadd.f32 %v7691_v7, %v7690_v27  ;;  %v7171_v35 = vmul.f32 %v14993_v51, %v6131_v28  ;;  %v7670_v55 = vrot.slane %v7669_v60, 4  ;;  %v11607_v43 = vpop.eup %11606  ;;  %11616 = verf.f32 %v5753_v24  ;;  %v16957_v24 = vld [vmem:[#allocation9_spill] sm:$0xff] }
 0x33c   : > { %v7679_v53 = vrot.slane %v7678_v44, 2  ;;  %v15141_v54 = vmul.f32 0.5, %v5282_v15  ;;  %v5756_v50 = vmul.f32 0.70710677, %v5282_v15  ;;  %v11609_v1 = vpop.eup %11608  ;;  %v6006_v14 = vadd.f32 1.0, %v11607_v43  ;;  %v15162_v43 = vpop.f32.mrb[120].mxu0 }
 0x33d   : > { %v7693_v41 = vrot.slane %v7692_v22, 2  ;;  %v7683_v32 = vsel %vm820_vm0, %v7171_v35, 0.0  ;;  %v7671_v59 = vadd.f32 %v7670_v55, %v7669_v60  ;;  %v6005_v51 = vadd.f32 1.0, %v11609_v1  ;;  %v15157_v55 = vpop.permute.xlu0 %6748  ;;  %16958 = vst [vmem:[#allocation29_spill] sm:$0xff] %v15162_v43 }
 0x33e   : > { %v7684_v27 = vrot.slane %v7683_v32, 4  ;;  %v15148_v8 = vadd.f32 %v7679_v53, %v7678_v44  ;;  %11618 = verf.f32 %v5756_v50  ;;  %v6134_v28 = vmul.f32 %v6006_v14, %v15087_v33  ;;  %v6693_v60 = vpop.permute.xlu1 %6692 }
 0x33f   : > { %v7694_v7 = vadd.f32 %v7693_v41, %v7692_v22  ;;  %v7672_v5 = vrot.slane %v7671_v59, 2  ;;  %v5277_v11 = vadd.f32 %v14782_v39, %v16957_v24  ;;  %v6133_v35 = vmul.f32 %v6005_v51, %v15089_v17  ;;  %v15167_v41 = vpop.f32.mrb[121].mxu0 }
 0x340   : > { %v7685_v15 = vadd.f32 %v7684_v27, %v7683_v32  ;;  %v7626_v44 = vadd.f32 %v7625_v48, %v15051_v61  ;;  %v7174_v33 = vmul.f32 %v15078_v6, %v6134_v28  ;;  %16959 = vst [vmem:[#allocation26_spill] sm:$0xff] %v15167_v41  ;;  %v8384_v61 = vsel %vm8335_vm2, %v14917_v26, %v14941_v18  ;;  %v15210_v3 = vpop.f32.mrb[122].mxu0 }
 0x341   : > { %v11611_v22 = vpop.eup %11610  ;;  %v7695_v53 = vrot.slane %v7694_v7, 1  ;;  %v7673_v50 = vadd.f32 %v7672_v5, %v7671_v59  ;;  %v15165_v1 = vmul.f32 0.5, %v5277_v11  ;;  %v7173_v14 = vmul.f32 %v15061_v49, %v6133_v35  ;;  %16962 = vst [vmem:[#allocation27_spill] sm:$0xff] %v15210_v3 }
 0x342   : > { %v11613_v17 = vpop.eup %11612  ;;  %v7686_v32 = vrot.slane %v7685_v15, 2  ;;  %v5755_v27 = vmul.f32 0.70710677, %v5277_v11  ;;  %v7704_v51 = vsel %vm820_vm0, %v7174_v33, 0.0  ;;  %v8385_v6 = vsel %vm8337_vm3, %v14983_v52, %v8384_v61 }
 0x343   : > { %v15173_v48 = vadd.f32 %v7695_v53, %v7694_v7  ;;  %v7674_v24 = vrot.slane %v7673_v50, 1  ;;  %v7705_v28 = vrot.slane %v7704_v51, 4  ;;  %v7697_v5 = vsel %vm820_vm0, %v7173_v14, 0.0 }
 0x344   : > { %v7687_v59 = vadd.f32 %v7686_v32, %v7685_v15  ;;  %11620 = verf.f32 %v5755_v27  ;;  %v15179_v49 = vpop.eup %11614  ;;  %v7698_v11 = vrot.slane %v7697_v5, 4  ;;  %v8386_v26 = vsel %vm8339_vm4, %v14979_v34, %v8385_v6  ;;  %v15189_v15 = vpop.permute.xlu0 %6783  ;;  %v16960_v32 = vld [vmem:[#allocation11_spill] sm:$0xff]  ;;  %v16961_v34 = vld [vmem:[#allocation13_spill] sm:$0xff] }
 0x345   : > { %v15181_v35 = vadd.f32 %v7674_v24, %v7673_v50  ;;  %v6007_v18 = vadd.f32 1.0, %v11613_v17  ;;  %v15185_v7 = vpop.eup %11616  ;;  %v7706_v33 = vadd.f32 %v7705_v28, %v7704_v51  ;;  %v8387_v52 = vsel %vm8341_vm5, %v15011_v9, %v8386_v26 }
 0x346   : > { %v7688_v53 = vrot.slane %v7687_v59, 1  ;;  %v5292_v14 = vadd.f32 %v14782_v39, %v16960_v32  ;;  %v7699_v27 = vadd.f32 %v7698_v11, %v7697_v5  ;;  %v8388_v50 = vsel %vm8343_vm6, %v15029_v45, %v8387_v52 }
 0x347   : > { %v6135_v61 = vmul.f32 %v6007_v18, %v15121_v13  ;;  %v5287_v17 = vadd.f32 %v14782_v39, %v16961_v34  ;;  %v7707_v51 = vrot.slane %v7706_v33, 2  ;;  %v8389_v9 = vsel %vm8345_vm7, %v15070_v46, %v8388_v50 }
 0x348   : > { %v11619_v24 = vpop.eup %11618  ;;  %v15198_v6 = vadd.f32 %v7688_v53, %v7687_v59  ;;  %v15202_v28 = vmul.f32 0.5, %v5292_v14  ;;  %v7700_v26 = vrot.slane %v7699_v27, 2  ;;  %v8390_v5 = vsel %vm8347_vm8, %v7626_v44, %v8389_v9  ;;  %v6700_v59 = vpop.permute.xlu1 %6699  ;;  %v16963_v44 = vld [vmem:[#allocation15_spill] sm:$0xff] }
 0x349   : > { %v6012_v32 = vadd.f32 1.0, %v11619_v24  ;;  %v7175_v11 = vmul.f32 %v6693_v60, %v6135_v61  ;;  %v7708_v45 = vadd.f32 %v7707_v51, %v7706_v33  ;;  %11007 = vmatprep.mubr.msk.f32.mxu1 %vm820_vm0, %v8390_v5  ;;  %v5758_v13 = vmul.f32 0.70710677, %v5292_v14  ;;  %v15212_v60 = vpop.permute.xlu0 %6755  ;;  %v15216_v14 = vpop.f32.mrb[123].mxu0 }
 0x34a   : > { %v15206_v18 = vmul.f32 0.5, %v5287_v17  ;;  %v5757_v52 = vmul.f32 0.70710677, %v5287_v17  ;;  %v7701_v53 = vadd.f32 %v7700_v26, %v7699_v27  ;;  %v6008_v50 = vadd.f32 1.0, %v11611_v22  ;;  %16964 = vst [vmem:[#allocation30_spill] sm:$0xff] %v15216_v14 }
 0x34b   : > { %v6140_v34 = vmul.f32 %v6012_v32, %v15141_v54  ;;  %v7711_v46 = vsel %vm820_vm0, %v7175_v11, 0.0  ;;  %v7709_v24 = vrot.slane %v7708_v45, 1  ;;  %11622 = verf.f32 %v5758_v13  ;;  %v15227_v13 = vpop.f32.mrb[124].mxu0 }
 0x34c   : > { %v7712_v41 = vrot.slane %v7711_v46, 4  ;;  %v5302_v33 = vadd.f32 %v14782_v39, %v16963_v44  ;;  %v7702_v61 = vrot.slane %v7701_v53, 1  ;;  %11624 = verf.f32 %v5757_v52  ;;  %16965 = vst [vmem:[#allocation31_spill] sm:$0xff] %v15227_v13  ;;  %v15236_v52 = vpop.permute.xlu1 %6776 }
 0x34d   : > { %v7180_v27 = vmul.f32 %v15095_v30, %v6140_v34  ;;  %v6136_v54 = vmul.f32 %v6008_v50, %v15114_v36  ;;  %v15220_v22 = vadd.f32 %v7709_v24, %v7708_v45  ;;  %v15232_v36 = vld [vmem:[%s16763_s8] ss:$0 sm:$0xff]  ;;  %v16969_v24 = vld [vmem:[#allocation17_spill] sm:$0xff] }
 0x34e   : > { %v11621_v17 = vpop.eup %11620  ;;  %v7713_v51 = vadd.f32 %v7712_v41, %v7711_v46  ;;  %v15222_v9 = vmul.f32 0.5, %v5302_v33  ;;  %v5760_v26 = vmul.f32 0.70710677, %v5302_v33  ;;  %v15224_v32 = vadd.f32 %v7702_v61, %v7701_v53  ;;  %v16966_v41 = vld [vmem:[#allocation14_spill] sm:$0xff]  ;;  %v15238_v53 = vpop.f32.mrb[125].mxu0  ;;  %v16968_v46 = vld [vmem:[#allocation16_spill] sm:$0xff] }
 0x34f   : > { %v7746_v5 = vsel %vm820_vm0, %v7180_v27, 0.0  ;;  %v6011_v39 = vadd.f32 1.0, %v11621_v17  ;;  %v7176_v11 = vmul.f32 %v6700_v59, %v6136_v54  ;;  %v5297_v45 = vadd.f32 %v15232_v36, %v16966_v41  ;;  %16967 = vst [vmem:[#allocation7_spill] sm:$0xff] %v15238_v53 }
 0x350   : > { %v7747_v44 = vrot.slane %v7746_v5, 4  ;;  %v7714_v30 = vrot.slane %v7713_v51, 2  ;;  %11626 = verf.f32 %v5760_v26  ;;  %v5312_v50 = vadd.f32 %v15232_v36, %v16968_v46  ;;  %v15248_v26 = vpop.permute.xlu0 %6832 }
 0x351   : > { %v6139_v34 = vmul.f32 %v6011_v39, %v15165_v1  ;;  %v7718_v59 = vsel %vm820_vm0, %v7176_v11, 0.0  ;;  %v5307_v33 = vadd.f32 %v15232_v36, %v16969_v24  ;;  %v15246_v17 = vmul.f32 0.5, %v5297_v45  ;;  %v15253_v39 = vpop.f32.mrb[126].mxu0 }
 0x352   : > { %v7748_v61 = vadd.f32 %v7747_v44, %v7746_v5  ;;  %v7715_v27 = vadd.f32 %v7714_v30, %v7713_v51  ;;  %v7719_v54 = vrot.slane %v7718_v59, 4  ;;  %v5759_v53 = vmul.f32 0.70710677, %v5297_v45  ;;  %16970 = vst [vmem:[#allocation32_spill] sm:$0xff] %v15253_v39  ;;  %v15257_v5 = vpop.f32.mrb[127].mxu0  ;;  %v6707_v39 = vpop.permute.xlu1 %6706 }
 0x353   : > { %v7179_v41 = vmul.f32 %v15000_v58, %v6139_v34  ;;  %v15251_v13 = vmul.f32 0.5, %v5312_v50  ;;  %v5762_v1 = vmul.f32 0.70710677, %v5312_v50  ;;  %v15255_v3 = vmul.f32 0.5, %v5307_v33  ;;  %16971 = vst [vmem:[#allocation10_spill] sm:$0xff] %v15257_v5  ;;  %v15265_v5 = vpop.f32.mrb[128].mxu0 }
 0x354   : > { %v7749_v11 = vrot.slane %v7748_v61, 2  ;;  %v7716_v46 = vrot.slane %v7715_v27, 1  ;;  %v7720_v14 = vadd.f32 %v7719_v54, %v7718_v59  ;;  %11628 = verf.f32 %v5759_v53  ;;  %v6714_v16 = vpop.permute.xlu0 %6713 }
 0x355   : > { %v7739_v51 = vsel %vm820_vm0, %v7179_v41, 0.0  ;;  %v5761_v44 = vmul.f32 0.70710677, %v5307_v33  ;;  %v6009_v30 = vadd.f32 1.0, %v15185_v7  ;;  %v11623_v58 = vpop.eup %11622  ;;  %11630 = verf.f32 %v5762_v1 }
 0x356   : > { %v7750_v45 = vadd.f32 %v7749_v11, %v7748_v61  ;;  %v7740_v34 = vrot.slane %v7739_v51, 4  ;;  %v15261_v24 = vadd.f32 %v7716_v46, %v7715_v27  ;;  %v7721_v50 = vrot.slane %v7720_v14, 2  ;;  %v11625_v43 = vpop.eup %11624  ;;  %v15269_v46 = vpop.f32.mrb[129].mxu0 }
 0x357   : > { %v6014_v42 = vadd.f32 1.0, %v11623_v58  ;;  %v6137_v59 = vmul.f32 %v6009_v30, %v15131_v62  ;;  %v6010_v54 = vadd.f32 1.0, %v15179_v49  ;;  %v6013_v41 = vadd.f32 1.0, %v11625_v43 }
 0x358   : > { %v7751_v53 = vrot.slane %v7750_v45, 1  ;;  %v7741_v33 = vadd.f32 %v7740_v34, %v7739_v51  ;;  %v7722_v7 = vadd.f32 %v7721_v50, %v7720_v14  ;;  %11632 = verf.f32 %v5761_v44 }
 0x359   : > { %v6142_v61 = vmul.f32 %v6014_v42, %v15202_v28  ;;  %v7177_v27 = vmul.f32 %v6707_v39, %v6137_v59  ;;  %v6138_v11 = vmul.f32 %v6010_v54, %v15125_v40  ;;  %v6141_v49 = vmul.f32 %v6013_v41, %v15206_v18 }
 0x35a   : > { %v11627_v1 = vpop.eup %11626  ;;  %v15271_v58 = vadd.f32 %v7751_v53, %v7750_v45  ;;  %v7742_v62 = vrot.slane %v7741_v33, 2  ;;  %v7723_v30 = vrot.slane %v7722_v7, 1  ;;  %v5322_v18 = vadd.f32 %v15232_v36, %v14760_v12 }
 0x35b   : > { %v7182_v51 = vmul.f32 %v15136_v4, %v6142_v61  ;;  %v6016_v43 = vadd.f32 1.0, %v11627_v1  ;;  %v7725_v14 = vsel %vm820_vm0, %v7177_v27, 0.0  ;;  %v7178_v34 = vmul.f32 %v6714_v16, %v6138_v11 }
 0x35c   : > { %v7743_v42 = vadd.f32 %v7742_v62, %v7741_v33  ;;  %v7181_v28 = vmul.f32 %v15150_v57, %v6141_v49  ;;  %v15277_v39 = vadd.f32 %v7723_v30, %v7722_v7  ;;  %v7726_v40 = vrot.slane %v7725_v14, 4 }
 0x35d   : > { %v7760_v44 = vsel %vm820_vm0, %v7182_v51, 0.0  ;;  %v6144_v45 = vmul.f32 %v6016_v43, %v15222_v9  ;;  %v7732_v50 = vsel %vm820_vm0, %v7178_v34, 0.0  ;;  %v15286_v7 = vmul.f32 0.5, %v5322_v18 }
 0x35e   : > { %v7744_v4 = vrot.slane %v7743_v42, 1  ;;  %v7761_v59 = vrot.slane %v7760_v44, 4  ;;  %v7753_v54 = vsel %vm820_vm0, %v7181_v28, 0.0  ;;  %v7727_v16 = vadd.f32 %v7726_v40, %v7725_v14  ;;  %v11629_v53 = vpop.eup %11628 }
 0x35f   : > { %v7754_v33 = vrot.slane %v7753_v54, 4  ;;  %v7184_v57 = vmul.f32 %v15212_v60, %v6144_v45  ;;  %v7733_v41 = vrot.slane %v7732_v50, 4  ;;  %v6015_v27 = vadd.f32 1.0, %v11629_v53  ;;  %v11631_v1 = vpop.eup %11630 }
 0x360   : > { %v15288_v61 = vadd.f32 %v7744_v4, %v7743_v42  ;;  %v7762_v9 = vadd.f32 %v7761_v59, %v7760_v44  ;;  %v7728_v11 = vrot.slane %v7727_v16, 2  ;;  %v5764_v30 = vmul.f32 0.70710677, %v5322_v18 }
 0x361   : > { %v7755_v62 = vadd.f32 %v7754_v33, %v7753_v54  ;;  %v7774_v12 = vsel %vm820_vm0, %v7184_v57, 0.0  ;;  %v7734_v49 = vadd.f32 %v7733_v41, %v7732_v50  ;;  %v6143_v14 = vmul.f32 %v6015_v27, %v15246_v17 }
 0x362   : > { %v7763_v51 = vrot.slane %v7762_v9, 2  ;;  %v7775_v43 = vrot.slane %v7774_v12, 4  ;;  %v7729_v34 = vadd.f32 %v7728_v11, %v7727_v16  ;;  %v15292_v60 = vpop.eup %11632  ;;  %11634 = verf.f32 %v5764_v30  ;;  %v11840_v11 = vld [vmem:[%s12278_s25 + $0x10] sm:$0xff]  ;;  %v15314_v30 = vpop.permute.xlu1 %6790 }
 0x363   : > { %v7756_v28 = vrot.slane %v7755_v62, 2  ;;  %v7735_v40 = vrot.slane %v7734_v49, 2  ;;  %v5317_v42 = vadd.f32 %v15232_v36, %v14763_v2  ;;  %v7183_v4 = vmul.f32 %v15157_v55, %v6143_v14 }
 0x364   : > { %v7764_v44 = vadd.f32 %v7763_v51, %v7762_v9  ;;  %v7776_v45 = vadd.f32 %v7775_v43, %v7774_v12  ;;  %v7730_v50 = vrot.slane %v7729_v34, 1  ;;  %v16972_v12 = vrot.slane %v15058_v25, 1  ;;  %v15316_v51 = vpop.permute.xlu0 %6797 }
 0x365   : > { %v7757_v18 = vadd.f32 %v7756_v28, %v7755_v62  ;;  %v15297_v59 = vadd.f32 %v7735_v40, %v7734_v49  ;;  %v15299_v54 = vmul.f32 0.5, %v5317_v42  ;;  %v5763_v17 = vmul.f32 0.70710677, %v5317_v42 }
 0x366   : > { %v7765_v16 = vrot.slane %v7764_v44, 1  ;;  %v7777_v53 = vrot.slane %v7776_v45, 2  ;;  %v7767_v33 = vsel %vm820_vm0, %v7183_v4, 0.0  ;;  %v15302_v57 = vadd.f32 %v7730_v50, %v7729_v34 }
 0x367   : > { %v7758_v41 = vrot.slane %v7757_v18, 1  ;;  %v7768_v2 = vrot.slane %v7767_v33, 4  ;;  %v7737_v9 = vrot.slane %v15297_v59, 1  ;;  %11636 = verf.f32 %v5763_v17 }
 0x368   : > { %v15305_v55 = vadd.f32 %v7765_v16, %v7764_v44  ;;  %v15307_v27 = vadd.f32 %v7777_v53, %v7776_v45  ;;  %v8138_v62 = vsel %vm8131_vm9, %v11840_v11, 0.0  ;;  %v7668_v49 = vadd.f32 %v16972_v12, %v15058_v25 }
 0x369   : > { %v15318_v43 = vadd.f32 %v7758_v41, %v7757_v18  ;;  %v7769_v14 = vadd.f32 %v7768_v2, %v7767_v33  ;;  %8139 = vadd.xlane.f32.xlu0 %v8138_v62  ;;  %v16973_v34 = vrot.slane %v15148_v8, 1  ;;  %v8391_v40 = vsel %vm8335_vm2, %v15027_v37, %v15036_v63  ;;  %v15347_v2 = vpop.permute.xlu1 %6839 }
 0x36a   : > { %v8392_v25 = vsel %vm8337_vm3, %v15074_v10, %v8391_v40  ;;  %v5332_v44 = vadd.f32 %v15232_v36, %v14871_v56  ;;  %v5327_v45 = vadd.f32 %v15232_v36, %v14877_v20  ;;  %v6018_v17 = vadd.f32 1.0, %v11631_v1 }
 0x36b   : > { %v7682_v28 = vadd.f32 %v16973_v34, %v15148_v8  ;;  %v7770_v4 = vrot.slane %v7769_v14, 2  ;;  %v8393_v50 = vsel %vm8339_vm4, %v15053_v19, %v8392_v25  ;;  %v11841_v8 = vld [vmem:[%s12278_s25 + $0x18] sm:$0xff]  ;;  %v5342_v11 = vadd.f32 %v15232_v36, %v14886_v21 }
 0x36c   : > { %v8141_v18 = vsel %vm8131_vm9, %v11841_v8, 0.0  ;;  %v8394_v37 = vsel %vm8341_vm5, %v15100_v47, %v8393_v50  ;;  %v15339_v63 = vmul.f32 0.5, %v5332_v44  ;;  %v5766_v10 = vmul.f32 0.70710677, %v5332_v44  ;;  %v11635_v56 = vpop.eup %11634  ;;  %v6770_v47 = vpop.permute.xlu0 %6769 }
 0x36d   : > { %v15341_v16 = vmul.f32 0.5, %v5327_v45  ;;  %v7771_v53 = vadd.f32 %v7770_v4, %v7769_v14  ;;  %v8395_v20 = vsel %vm8343_vm6, %v7668_v49, %v8394_v37  ;;  %v5765_v33 = vmul.f32 0.70710677, %v5327_v45  ;;  %8142 = vadd.xlane.f32.xlu0 %v8141_v18  ;;  %v15364_v4 = vpop.f32.mrb[130].mxu0 }
 0x36e   : > { %v6146_v19 = vmul.f32 %v6018_v17, %v15251_v13  ;;  %v6020_v41 = vadd.f32 1.0, %v11635_v56  ;;  %v8396_v1 = vsel %vm8345_vm7, %v15181_v35, %v8395_v20  ;;  %11638 = verf.f32 %v5766_v10  ;;  %v16974_v35 = vld [vmem:[#allocation19_spill] sm:$0xff]  ;;  %v15367_v18 = vpop.f32.mrb[131].mxu0  ;;  %v6763_v20 = vpop.permute.xlu1 %6762 }
 0x36f   : > { %v7772_v62 = vrot.slane %v7771_v53, 1  ;;  %v8397_v12 = vsel %vm8347_vm8, %v7682_v28, %v8396_v1  ;;  %11640 = verf.f32 %v5765_v33  ;;  %v15354_v13 = vmul.f32 0.5, %v5342_v11 }
 0x370   : > { %v7186_v49 = vmul.f32 %v6770_v47, %v6146_v19  ;;  %v6148_v14 = vmul.f32 %v6020_v41, %v15286_v7  ;;  %11008 = vmatmul.mubr.msk.f32.gmra.mrb[134].mxu1 %vm820_vm0, %v8397_v12  ;;  %v5768_v34 = vmul.f32 0.70710677, %v5342_v11  ;;  %v5337_v40 = vadd.f32 %v15232_v36, %v16974_v35  ;;  %v16975_v41 = vld [vmem:[#allocation18_spill] sm:$0xff]  ;;  %v15378_v47 = vpop.f32.mrb[132].mxu0 }
 0x371   : > { %v11637_v25 = vpop.eup %11636  ;;  %v15358_v44 = vadd.f32 %v7772_v62, %v7771_v53  ;;  %v6017_v45 = vadd.f32 1.0, %v15292_v60  ;;  %v5352_v28 = vadd.f32 %v15232_v36, %v14904_v23  ;;  %v5347_v1 = vadd.f32 %v15232_v36, %v16975_v41  ;;  %v16976_v62 = vld [vmem:[#allocation2_spill] sm:$0xff] }
 0x372   : > { %v7788_v21 = vsel %vm820_vm0, %v7186_v49, 0.0  ;;  %v7188_v7 = vmul.f32 %v15189_v15, %v6148_v14  ;;  %v6019_v50 = vadd.f32 1.0, %v11637_v25  ;;  %11642 = verf.f32 %v5768_v34  ;;  %v15383_v49 = vpop.f32.mrb[133].mxu0 }
 0x373   : > { %v7789_v8 = vrot.slane %v7788_v21, 4  ;;  %v15369_v17 = vmul.f32 0.5, %v5337_v40  ;;  %v5767_v37 = vmul.f32 0.70710677, %v5337_v40  ;;  %v6145_v10 = vmul.f32 %v6017_v45, %v15255_v3 }
 0x374   : > { %v15372_v56 = vmul.f32 0.5, %v5352_v28  ;;  %v7802_v60 = vsel %vm820_vm0, %v7188_v7, 0.0  ;;  %v6147_v23 = vmul.f32 %v6019_v50, %v15299_v54  ;;  %v5770_v33 = vmul.f32 0.70710677, %v5352_v28 }
 0x375   : > { %v7790_v53 = vadd.f32 %v7789_v8, %v7788_v21  ;;  %v7803_v15 = vrot.slane %v7802_v60, 4  ;;  %11644 = verf.f32 %v5767_v37  ;;  %v7185_v19 = vmul.f32 %v6763_v20, %v6145_v10  ;;  %v15395_v10 = vpop.f32.mrb[134].mxu0 }
 0x376   : > { %v7187_v11 = vmul.f32 %v15236_v52, %v6147_v23  ;;  %11646 = verf.f32 %v5770_v33  ;;  %v5362_v12 = vadd.f32 %v15232_v36, %v16976_v62  ;;  %v15386_v34 = vmul.f32 0.5, %v5347_v1  ;;  %v15391_v52 = vpop.permute.xlu0 %6853 }
 0x377   : > { %v7791_v3 = vrot.slane %v7790_v53, 2  ;;  %v7804_v54 = vadd.f32 %v7803_v15, %v7802_v60  ;;  %v7781_v14 = vsel %vm820_vm0, %v7185_v19, 0.0  ;;  %v5769_v35 = vmul.f32 0.70710677, %v5347_v1  ;;  %v15398_v15 = vpop.f32.mrb[135].mxu0  ;;  %v16978_v1 = vld [vmem:[#allocation20_spill] sm:$0xff] }
 0x378   : > { %v11639_v40 = vpop.eup %11638  ;;  %v7795_v25 = vsel %vm820_vm0, %v7187_v11, 0.0  ;;  %v7782_v45 = vrot.slane %v7781_v14, 4  ;;  %v15393_v28 = vmul.f32 0.5, %v5362_v12  ;;  %v5772_v33 = vmul.f32 0.70710677, %v5362_v12  ;;  %16977 = vst [vmem:[#allocation8_spill] sm:$0xff] %v15398_v15 }
 0x379   : > { %v15389_v21 = vadd.f32 %v7791_v3, %v7790_v53  ;;  %v11641_v7 = vpop.eup %11640  ;;  %v7805_v50 = vrot.slane %v7804_v54, 2  ;;  %v7796_v8 = vrot.slane %v7795_v25, 4  ;;  %v6022_v37 = vadd.f32 1.0, %v11639_v40  ;;  %v15404_v40 = vpop.permute.xlu1 %6846 }
 0x37a   : > { %11648 = verf.f32 %v5769_v35  ;;  %v6021_v60 = vadd.f32 1.0, %v11641_v7  ;;  %v7783_v20 = vadd.f32 %v7782_v45, %v7781_v14  ;;  %v5357_v11 = vadd.f32 %v15232_v36, %v16978_v1 }
 0x37b   : > { %v7806_v53 = vadd.f32 %v7805_v50, %v7804_v54  ;;  %v7797_v19 = vadd.f32 %v7796_v8, %v7795_v25  ;;  %v6150_v41 = vmul.f32 %v6022_v37, %v15339_v63  ;;  %11650 = verf.f32 %v5772_v33  ;;  %v15412_v63 = vpop.f32.mrb[136].mxu0 }
 0x37c   : > { %v11643_v3 = vpop.eup %11642  ;;  %v6149_v62 = vmul.f32 %v6021_v60, %v15341_v16  ;;  %v7784_v35 = vrot.slane %v7783_v20, 2  ;;  %v7738_v12 = vadd.f32 %v7737_v9, %v15297_v59  ;;  %v15410_v25 = vmul.f32 0.5, %v5357_v11  ;;  %16979 = vst [vmem:[#allocation12_spill] sm:$0xff] %v15412_v63  ;;  %v15415_v16 = vpop.permute.xlu0 %6860 }
 0x37d   : > { %v7807_v14 = vrot.slane %v7806_v53, 1  ;;  %v7798_v45 = vrot.slane %v7797_v19, 2  ;;  %v7190_v54 = vmul.f32 %v15316_v51, %v6150_v41  ;;  %v5771_v8 = vmul.f32 0.70710677, %v5357_v11  ;;  %v15420_v60 = vpop.f32.mrb[137].mxu0 }
 0x37e   : > { %v7189_v7 = vmul.f32 %v15314_v30, %v6149_v62  ;;  %v7785_v50 = vadd.f32 %v7784_v35, %v7783_v20  ;;  %v8398_v37 = vsel %vm8335_vm2, %v15173_v48, %v15198_v6  ;;  %16980 = vst [vmem:[#allocation9_spill] sm:$0xff] %v15420_v60 }
 0x37f   : > { %v11645_v59 = vpop.eup %11644  ;;  %v15422_v9 = vadd.f32 %v7807_v14, %v7806_v53  ;;  %v7799_v51 = vadd.f32 %v7798_v45, %v7797_v19  ;;  %v7816_v33 = vsel %vm820_vm0, %v7190_v54, 0.0  ;;  %v8399_v41 = vsel %vm8337_vm3, %v15224_v32, %v8398_v37  ;;  %v6805_v32 = vpop.permute.xlu1 %6804  ;;  %v16981_v45 = vld [vmem:[#allocation21_spill] sm:$0xff] }
 0x380   : > { %v15427_v30 = vpop.eup %11646  ;;  %v7817_v20 = vrot.slane %v7816_v33, 4  ;;  %v7809_v1 = vsel %vm820_vm0, %v7189_v7, 0.0  ;;  %v7786_v11 = vrot.slane %v7785_v50, 1  ;;  %11652 = verf.f32 %v5771_v8 }
 0x381   : > { %v7800_v62 = vrot.slane %v7799_v51, 1  ;;  %v7810_v48 = vrot.slane %v7809_v1, 4  ;;  %v8400_v6 = vsel %vm8339_vm4, %v15220_v22, %v8399_v41  ;;  %v6023_v53 = vadd.f32 1.0, %v11645_v59 }
 0x382   : > { %v7818_v35 = vadd.f32 %v7817_v20, %v7816_v33  ;;  %v15432_v19 = vadd.f32 %v7786_v11, %v7785_v50  ;;  %v8401_v14 = vsel %vm8341_vm5, %v15261_v24, %v8400_v6  ;;  %v5372_v54 = vadd.f32 %v15232_v36, %v16981_v45  ;;  %v15447_v33 = vpop.permute.xlu0 %6895  ;;  %v15451_v20 = vpop.f32.mrb[138].mxu0 }
 0x383   : > { %v15440_v7 = vadd.f32 %v7800_v62, %v7799_v51  ;;  %v7811_v8 = vadd.f32 %v7810_v48, %v7809_v1  ;;  %v8402_v23 = vsel %vm8343_vm6, %v15277_v39, %v8401_v14  ;;  %v6151_v22 = vmul.f32 %v6023_v53, %v15369_v17  ;;  %16982 = vst [vmem:[#allocation11_spill] sm:$0xff] %v15451_v20  ;;  %v16983_v62 = vld [vmem:[#allocation22_spill] sm:$0xff]  ;;  %v15456_v48 = vpop.f32.mrb[139].mxu0 }
 0x384   : > { %v15438_v37 = vpop.eup %11648  ;;  %v7819_v59 = vrot.slane %v7818_v35, 2  ;;  %v8403_v50 = vsel %vm8345_vm7, %v15302_v57, %v8402_v23  ;;  %v15449_v24 = vmul.f32 0.5, %v5372_v54  ;;  %v5774_v41 = vmul.f32 0.70710677, %v5372_v54  ;;  %16984 = vst [vmem:[#allocation13_spill] sm:$0xff] %v15456_v48  ;;  %v16985_v23 = vld [vmem:[#allocation23_spill] sm:$0xff] }
 0x385   : > { %v7812_v11 = vrot.slane %v7811_v8, 2  ;;  %v8404_v51 = vsel %vm8347_vm8, %v7738_v12, %v8403_v50  ;;  %v7191_v1 = vmul.f32 %v6805_v32, %v6151_v22  ;;  %v5367_v39 = vadd.f32 %v15232_v36, %v16983_v62  ;;  %v11651_v17 = vpop.eup %11650  ;;  %v6812_v62 = vpop.permute.xlu1 %6811 }
 0x386   : > { %v7820_v6 = vadd.f32 %v7819_v59, %v7818_v35  ;;  %11010 = vmatprep.mubr.msk.f32.mxu1 %vm820_vm0, %v8404_v51  ;;  %11654 = verf.f32 %v5774_v41  ;;  %v6024_v57 = vadd.f32 1.0, %v11643_v3  ;;  %v5382_v53 = vadd.f32 %v15232_v36, %v16985_v23  ;;  %v15465_v35 = vpop.f32.mrb[140].mxu0 }
 0x387   : > { %v7813_v14 = vadd.f32 %v7812_v11, %v7811_v8  ;;  %v6028_v45 = vadd.f32 1.0, %v11651_v17  ;;  %v7823_v54 = vsel %vm820_vm0, %v7191_v1, 0.0  ;;  %v15462_v12 = vmul.f32 0.5, %v5367_v39  ;;  %16986 = vst [vmem:[#allocation15_spill] sm:$0xff] %v15465_v35  ;;  %v15470_v8 = vpop.f32.mrb[141].mxu0  ;;  %v16989_v35 = vld [vmem:[#allocation5_spill] sm:$0xff] }
 0x388   : > { %v7821_v32 = vrot.slane %v7820_v6, 1  ;;  %v7824_v22 = vrot.slane %v7823_v54, 4  ;;  %v5773_v50 = vmul.f32 0.70710677, %v5367_v39  ;;  %v6152_v42 = vmul.f32 %v6024_v57, %v15354_v13  ;;  %16987 = vst [vmem:[#allocation14_spill] sm:$0xff] %v15470_v8  ;;  %v15474_v39 = vpop.permute.xlu0 %6867 }
 0x389   : > { %v7814_v59 = vrot.slane %v7813_v14, 1  ;;  %v6156_v3 = vmul.f32 %v6028_v45, %v15393_v28  ;;  %v15468_v41 = vmul.f32 0.5, %v5382_v53  ;;  %v5776_v51 = vmul.f32 0.70710677, %v5382_v53  ;;  %v16988_v53 = vld [vmem:[#allocation24_spill] sm:$0xff] }
 0x38a   : > { %v11653_v11 = vpop.eup %11652  ;;  %v15472_v1 = vadd.f32 %v7821_v32, %v7820_v6  ;;  %v7825_v17 = vadd.f32 %v7824_v22, %v7823_v54  ;;  %11656 = verf.f32 %v5773_v50  ;;  %v7192_v23 = vmul.f32 %v6812_v62, %v6152_v42  ;;  %v15484_v54 = vpop.f32.mrb[142].mxu0  ;;  %v16991_v22 = vld [vmem:[#allocation6_spill] sm:$0xff] }
 0x38b   : > { %v15476_v48 = vadd.f32 %v7814_v59, %v7813_v14  ;;  %v7196_v13 = vmul.f32 %v15347_v2, %v6156_v3  ;;  %v6027_v57 = vadd.f32 1.0, %v11653_v11  ;;  %11658 = verf.f32 %v5776_v51  ;;  %16990 = vst [vmem:[#allocation16_spill] sm:$0xff] %v15484_v54  ;;  %v15490_v50 = vpop.f32.mrb[143].mxu0  ;;  %v15494_v11 = vpop.permute.xlu1 %6888 }
 0x38c   : > { %v7826_v28 = vrot.slane %v7825_v17, 2  ;;  %v7830_v45 = vsel %vm820_vm0, %v7192_v23, 0.0  ;;  %v5377_v8 = vadd.f32 %v15232_v36, %v16988_v53  ;;  %v5392_v6 = vadd.f32 %v15232_v36, %v16989_v35  ;;  %16992 = vst [vmem:[#allocation17_spill] sm:$0xff] %v15490_v50 }
 0x38d   : > { %v7858_v42 = vsel %vm820_vm0, %v7196_v13, 0.0  ;;  %v6155_v14 = vmul.f32 %v6027_v57, %v15410_v25  ;;  %v7831_v32 = vrot.slane %v7830_v45, 4  ;;  %v5387_v2 = vadd.f32 %v15232_v36, %v16991_v22  ;;  %v15499_v22 = vpop.permute.xlu0 %6944 }
 0x38e   : > { %v7859_v62 = vrot.slane %v7858_v42, 4  ;;  %v7827_v59 = vadd.f32 %v7826_v28, %v7825_v17  ;;  %v15492_v3 = vmul.f32 0.5, %v5377_v8  ;;  %v5775_v51 = vmul.f32 0.70710677, %v5377_v8 }
 0x38f   : > { %v7195_v35 = vmul.f32 %v15248_v26, %v6155_v14  ;;  %v7832_v23 = vadd.f32 %v7831_v32, %v7830_v45  ;;  %v15497_v53 = vmul.f32 0.5, %v5392_v6  ;;  %v5778_v13 = vmul.f32 0.70710677, %v5392_v6 }
 0x390   : > { %v11655_v25 = vpop.eup %11654  ;;  %v7860_v57 = vadd.f32 %v7859_v62, %v7858_v42  ;;  %v7828_v54 = vrot.slane %v7827_v59, 1  ;;  %11660 = verf.f32 %v5775_v51  ;;  %v15501_v50 = vmul.f32 0.5, %v5387_v2 }
 0x391   : > { %v7851_v17 = vsel %vm820_vm0, %v7195_v35, 0.0  ;;  %v6030_v28 = vadd.f32 1.0, %v11655_v25  ;;  %v7833_v8 = vrot.slane %v7832_v23, 2  ;;  %11662 = verf.f32 %v5778_v13  ;;  %v6819_v35 = vpop.permute.xlu1 %6818  ;;  %v16993_v25 = vld [vmem:[#allocation3_spill] sm:$0xff] }
 0x392   : > { %v7861_v20 = vrot.slane %v7860_v57, 2  ;;  %v7852_v60 = vrot.slane %v7851_v17, 4  ;;  %v15504_v26 = vadd.f32 %v7828_v54, %v7827_v59  ;;  %v5777_v45 = vmul.f32 0.70710677, %v5387_v2 }
 0x393   : > { %v6158_v6 = vmul.f32 %v6030_v28, %v15449_v24  ;;  %v7834_v14 = vadd.f32 %v7833_v8, %v7832_v23  ;;  %v6025_v42 = vadd.f32 1.0, %v15438_v37  ;;  %v6026_v32 = vadd.f32 1.0, %v15427_v30  ;;  %v6826_v8 = vpop.permute.xlu0 %6825 }
 0x394   : > { %v11657_v62 = vpop.eup %11656  ;;  %v7862_v51 = vadd.f32 %v7861_v20, %v7860_v57  ;;  %v7853_v63 = vadd.f32 %v7852_v60, %v7851_v17  ;;  %11664 = verf.f32 %v5777_v45  ;;  %v5402_v13 = vadd.f32 %v15232_v36, %v16993_v25 }
 0x395   : > { %v11659_v15 = vpop.eup %11658  ;;  %v7198_v54 = vmul.f32 %v15391_v52, %v6158_v6  ;;  %v6029_v59 = vadd.f32 1.0, %v11657_v62  ;;  %v7835_v2 = vrot.slane %v7834_v14, 1  ;;  %v6153_v24 = vmul.f32 %v6025_v42, %v15386_v34 }
 0x396   : > { %v7863_v23 = vrot.slane %v7862_v51, 1  ;;  %v7854_v28 = vrot.slane %v7853_v63, 2  ;;  %v6032_v37 = vadd.f32 1.0, %v11659_v15  ;;  %v6154_v30 = vmul.f32 %v6026_v32, %v15372_v56 }
 0x397   : > { %v7872_v60 = vsel %vm820_vm0, %v7198_v54, 0.0  ;;  %v6157_v20 = vmul.f32 %v6029_v59, %v15462_v12  ;;  %v15516_v57 = vadd.f32 %v7835_v2, %v7834_v14  ;;  %v7193_v17 = vmul.f32 %v6819_v35, %v6153_v24 }
 0x398   : > { %v15518_v45 = vadd.f32 %v7863_v23, %v7862_v51  ;;  %v7855_v52 = vadd.f32 %v7854_v28, %v7853_v63  ;;  %v7873_v6 = vrot.slane %v7872_v60, 4  ;;  %v6160_v62 = vmul.f32 %v6032_v37, %v15468_v41 }
 0x399   : > { %v7197_v34 = vmul.f32 %v15404_v40, %v6157_v20  ;;  %v7837_v15 = vsel %vm820_vm0, %v7193_v17, 0.0  ;;  %v7194_v42 = vmul.f32 %v6826_v8, %v6154_v30  ;;  %v15523_v25 = vmul.f32 0.5, %v5402_v13  ;;  %v16994_v17 = vld [vmem:[#allocation4_spill] sm:$0xff] }
 0x39a   : > { %v11661_v56 = vpop.eup %11660  ;;  %v7856_v32 = vrot.slane %v7855_v52, 1  ;;  %v7874_v54 = vadd.f32 %v7873_v6, %v7872_v60  ;;  %v7200_v12 = vmul.f32 %v15474_v39, %v6160_v62  ;;  %v7838_v14 = vrot.slane %v7837_v15, 4 }
 0x39b   : > { %v15526_v35 = vpop.eup %11662  ;;  %v7865_v63 = vsel %vm820_vm0, %v7197_v34, 0.0  ;;  %v6031_v51 = vadd.f32 1.0, %v11661_v56  ;;  %v7844_v41 = vsel %vm820_vm0, %v7194_v42, 0.0  ;;  %v5780_v59 = vmul.f32 0.70710677, %v5402_v13 }
 0x39c   : > { %v15530_v40 = vadd.f32 %v7856_v32, %v7855_v52  ;;  %v7875_v2 = vrot.slane %v7874_v54, 2  ;;  %v7866_v24 = vrot.slane %v7865_v63, 4  ;;  %v7886_v23 = vsel %vm820_vm0, %v7200_v12, 0.0 }
 0x39d   : > { %v7887_v28 = vrot.slane %v7886_v23, 4  ;;  %v6159_v37 = vmul.f32 %v6031_v51, %v15492_v3  ;;  %v7839_v8 = vadd.f32 %v7838_v14, %v7837_v15  ;;  %v7845_v39 = vrot.slane %v7844_v41, 4 }
 0x39e   : > { %v15534_v30 = vpop.eup %11664  ;;  %v7876_v60 = vadd.f32 %v7875_v2, %v7874_v54  ;;  %v7867_v20 = vadd.f32 %v7866_v24, %v7865_v63  ;;  %11666 = verf.f32 %v5780_v59  ;;  %v5397_v6 = vadd.f32 %v15232_v36, %v16994_v17 }
 0x39f   : > { %v7888_v13 = vadd.f32 %v7887_v28, %v7886_v23  ;;  %v7199_v52 = vmul.f32 %v15415_v16, %v6159_v37  ;;  %v7840_v62 = vrot.slane %v7839_v8, 2  ;;  %v7846_v34 = vadd.f32 %v7845_v39, %v7844_v41  ;;  %v15551_v28 = vpop.permute.xlu1 %6902 }
 0x3a0   : > { %v7877_v42 = vrot.slane %v7876_v60, 1  ;;  %v7868_v56 = vrot.slane %v7867_v20, 2  ;;  %v15539_v32 = vmul.f32 0.5, %v5397_v6  ;;  %v5779_v3 = vmul.f32 0.70710677, %v5397_v6 }
 0x3a1   : > { %v7889_v15 = vrot.slane %v7888_v13, 2  ;;  %v7879_v12 = vsel %vm820_vm0, %v7199_v52, 0.0  ;;  %v7841_v14 = vadd.f32 %v7840_v62, %v7839_v8  ;;  %v7847_v54 = vrot.slane %v7846_v34, 2 }
 0x3a2   : > { %v15542_v63 = vadd.f32 %v7877_v42, %v7876_v60  ;;  %v7869_v51 = vadd.f32 %v7868_v56, %v7867_v20  ;;  %v7880_v59 = vrot.slane %v7879_v12, 4  ;;  %11668 = verf.f32 %v5779_v3  ;;  %v11842_v56 = vld [vmem:[%s12278_s25 + $0x28] sm:$0xff]  ;;  %v11843_v3 = vld [vmem:[%s12278_s25 + $0x20] sm:$0xff] }
 0x3a3   : > { %v15544_v2 = vadd.f32 %v7889_v15, %v7888_v13  ;;  %v7842_v16 = vrot.slane %v7841_v14, 1  ;;  %v15546_v24 = vadd.f32 %v7847_v54, %v7846_v34  ;;  %v16995_v41 = vrot.slane %v15307_v27, 1 }
 0x3a4   : > { %v7870_v37 = vrot.slane %v7869_v51, 1  ;;  %v7881_v8 = vadd.f32 %v7880_v59, %v7879_v12  ;;  %v16996_v39 = vrot.slane %v15389_v21, 1  ;;  %v8405_v20 = vsel %vm8335_vm2, %v15271_v58, %v15288_v61  ;;  %v15573_v61 = vpop.permute.xlu0 %6909 }
 0x3a5   : > { %v7780_v23 = vadd.f32 %v16995_v41, %v15307_v27  ;;  %v7891_v17 = vrot.slane %v15544_v2, 1  ;;  %v15560_v6 = vadd.f32 %v7842_v16, %v7841_v14  ;;  %v7849_v27 = vrot.slane %v15546_v24, 1  ;;  %v15588_v16 = vpop.permute.xlu1 %6951 }
 0x3a6   : > { %v7794_v60 = vadd.f32 %v16996_v39, %v15389_v21  ;;  %v8406_v13 = vsel %vm8337_vm3, %v15318_v43, %v8405_v20  ;;  %v15565_v52 = vadd.f32 %v7870_v37, %v7869_v51  ;;  %v7882_v62 = vrot.slane %v7881_v8, 2  ;;  %v15598_v20 = vpop.f32.mrb[128].mxu1 }
 0x3a7   : > { %v8407_v34 = vsel %vm8339_vm4, %v15305_v55, %v8406_v13  ;;  %v5412_v21 = vadd.f32 %v15232_v36, %v15112_v0  ;;  %v5407_v42 = vadd.f32 %v15232_v36, %v15118_v31  ;;  %v8147_v43 = vsel %vm8131_vm9, %v11842_v56, 0.0 }
 0x3a8   : > { %v8408_v58 = vsel %vm8341_vm5, %v15358_v44, %v8407_v34  ;;  %v8144_v15 = vsel %vm8131_vm9, %v11843_v3, 0.0  ;;  %v11667_v12 = vpop.eup %11666  ;;  %v7883_v14 = vadd.f32 %v7882_v62, %v7881_v8  ;;  %8148 = vadd.xlane.f32.xlu0 %v8147_v43  ;;  %v5422_v39 = vadd.f32 %v15232_v36, %v15128_v29  ;;  %v16997_v34 = vld [vmem:[#allocation25_spill] sm:$0xff] }
 0x3a9   : > { %v8409_v55 = vsel %vm8343_vm6, %v7780_v23, %v8408_v58  ;;  %v15582_v54 = vmul.f32 0.5, %v5412_v21  ;;  %v5782_v0 = vmul.f32 0.70710677, %v5412_v21  ;;  %8145 = vadd.xlane.f32.xlu1 %v8144_v15  ;;  %v6036_v44 = vadd.f32 1.0, %v11667_v12  ;;  %v15606_v21 = vpop.f32.mrb[129].mxu1 }
 0x3aa   : > { %v8410_v51 = vsel %vm8345_vm7, %v15432_v19, %v8409_v55  ;;  %v15586_v31 = vmul.f32 0.5, %v5407_v42  ;;  %v5781_v59 = vmul.f32 0.70710677, %v5407_v42  ;;  %v7884_v41 = vrot.slane %v7883_v14, 1  ;;  %v6882_v42 = vpop.permute.xlu0 %6881 }
 0x3ab   : > { %v8411_v37 = vsel %vm8347_vm8, %v7794_v60, %v8410_v51  ;;  %11670 = verf.f32 %v5782_v0  ;;  %v6034_v23 = vadd.f32 1.0, %v15526_v35  ;;  %v6164_v8 = vmul.f32 %v6036_v44, %v15523_v25 }
 0x3ac   : > { %11011 = vmatmul.mubr.msk.f32.gmra.mrb[136].mxu1 %vm820_vm0, %v8411_v37  ;;  %11672 = verf.f32 %v5781_v59  ;;  %v5417_v19 = vadd.f32 %v15232_v36, %v15133_v38  ;;  %v11669_v13 = vpop.eup %11668  ;;  %v15600_v62 = vadd.f32 %v7884_v41, %v7883_v14  ;;  %v6033_v35 = vadd.f32 1.0, %v15534_v30  ;;  %v6875_v14 = vpop.permute.xlu1 %6874  ;;  %v16998_v37 = vld [vmem:[#allocation28_spill] sm:$0xff] }
 0x3ad   : > { %v6162_v60 = vmul.f32 %v6034_v23, %v15497_v53  ;;  %v5432_v25 = vadd.f32 %v15232_v36, %v16997_v34  ;;  %v7204_v58 = vmul.f32 %v15447_v33, %v6164_v8  ;;  %v6035_v29 = vadd.f32 1.0, %v11669_v13 }
 0x3ae   : > { %v15609_v56 = vmul.f32 0.5, %v5422_v39  ;;  %v5784_v38 = vmul.f32 0.70710677, %v5422_v39  ;;  %v15611_v3 = vmul.f32 0.5, %v5417_v19  ;;  %v5783_v15 = vmul.f32 0.70710677, %v5417_v19 }
 0x3af   : > { %v7202_v43 = vmul.f32 %v6882_v42, %v6162_v60  ;;  %v6161_v53 = vmul.f32 %v6033_v35, %v15501_v50  ;;  %v7914_v30 = vsel %vm820_vm0, %v7204_v58, 0.0  ;;  %v6163_v12 = vmul.f32 %v6035_v29, %v15539_v32  ;;  %v16999_v32 = vld [vmem:[#allocation29_spill] sm:$0xff]  ;;  %v17000_v19 = vld [vmem:[#allocation26_spill] sm:$0xff] }
 0x3b0   : > { %11674 = verf.f32 %v5784_v38  ;;  %v15616_v55 = vmul.f32 0.5, %v5432_v25  ;;  %v7915_v33 = vrot.slane %v7914_v30, 4  ;;  %v5786_v41 = vmul.f32 0.70710677, %v5432_v25 }
 0x3b1   : > { %v7900_v0 = vsel %vm820_vm0, %v7202_v43, 0.0  ;;  %11676 = verf.f32 %v5783_v15  ;;  %v7201_v44 = vmul.f32 %v6875_v14, %v6161_v53  ;;  %v7203_v51 = vmul.f32 %v15494_v11, %v6163_v12 }
 0x3b2   : > { %v7901_v59 = vrot.slane %v7900_v0, 4  ;;  %v5427_v50 = vadd.f32 %v15232_v36, %v16998_v37  ;;  %v7916_v23 = vadd.f32 %v7915_v33, %v7914_v30  ;;  %v5442_v39 = vadd.f32 %v15232_v36, %v16999_v32  ;;  %v15632_v33 = vpop.permute.xlu0 %6965  ;;  %v15638_v32 = vpop.permute.xlu1 %6958 }
 0x3b3   : > { %v7893_v8 = vsel %vm820_vm0, %v7201_v44, 0.0  ;;  %v5437_v13 = vadd.f32 %v15232_v36, %v17000_v19  ;;  %v7907_v60 = vsel %vm820_vm0, %v7203_v51, 0.0  ;;  %11678 = verf.f32 %v5786_v41 }
 0x3b4   : > { %v7902_v35 = vadd.f32 %v7901_v59, %v7900_v0  ;;  %v7894_v34 = vrot.slane %v7893_v8, 4  ;;  %v7917_v58 = vrot.slane %v7916_v23, 2  ;;  %v7908_v25 = vrot.slane %v7907_v60, 4 }
 0x3b5   : > { %v11671_v11 = vpop.eup %11670  ;;  %v15628_v29 = vmul.f32 0.5, %v5427_v50  ;;  %v5785_v42 = vmul.f32 0.70710677, %v5427_v50  ;;  %v15630_v30 = vmul.f32 0.5, %v5442_v39  ;;  %v5788_v59 = vmul.f32 0.70710677, %v5442_v39 }
 0x3b6   : > { %v11673_v38 = vpop.eup %11672  ;;  %v6038_v43 = vadd.f32 1.0, %v11671_v11  ;;  %v7903_v15 = vrot.slane %v7902_v35, 2  ;;  %v7895_v53 = vadd.f32 %v7894_v34, %v7893_v8  ;;  %v7918_v12 = vadd.f32 %v7917_v58, %v7916_v23 }
 0x3b7   : > { %v7909_v14 = vadd.f32 %v7908_v25, %v7907_v60  ;;  %v6037_v36 = vadd.f32 1.0, %v11673_v38  ;;  %11680 = verf.f32 %v5785_v42  ;;  %v15640_v8 = vmul.f32 0.5, %v5437_v13 }
 0x3b8   : > { %v6166_v0 = vmul.f32 %v6038_v43, %v15582_v54  ;;  %v15635_v44 = vadd.f32 %v7903_v15, %v7902_v35  ;;  %v7896_v51 = vrot.slane %v7895_v53, 2  ;;  %v7919_v41 = vrot.slane %v7918_v12, 1 }
 0x3b9   : > { %v7910_v37 = vrot.slane %v7909_v14, 2  ;;  %v6165_v50 = vmul.f32 %v6037_v36, %v15586_v31  ;;  %11682 = verf.f32 %v5788_v59  ;;  %v5787_v58 = vmul.f32 0.70710677, %v5437_v13 }
 0x3ba   : > { %v11675_v23 = vpop.eup %11674  ;;  %v7206_v19 = vmul.f32 %v15573_v61, %v6166_v0  ;;  %v7897_v34 = vadd.f32 %v7896_v51, %v7895_v53  ;;  %v15644_v35 = vadd.f32 %v7919_v41, %v7918_v12  ;;  %v7850_v42 = vadd.f32 %v7849_v27, %v15546_v24  ;;  %v15655_v53 = vpop.permute.xlu0 %6972  ;;  %v15670_v0 = vld [vmem:[%s16763_s8] ss:$0 sm:$0xff]  ;;  %v17001_v51 = vld [vmem:[#allocation27_spill] sm:$0xff] }
 0x3bb   : > { %v11677_v54 = vpop.eup %11676  ;;  %v7911_v11 = vadd.f32 %v7910_v37, %v7909_v14  ;;  %v7205_v39 = vmul.f32 %v15551_v28, %v6165_v50  ;;  %v8412_v61 = vsel %vm8335_vm2, %v15422_v9, %v15440_v7  ;;  %11684 = verf.f32 %v5787_v58  ;;  %v6917_v7 = vpop.permute.xlu1 %6916  ;;  %v17002_v50 = vld [vmem:[#allocation30_spill] sm:$0xff] }
 0x3bc   : > { %v7928_v31 = vsel %vm820_vm0, %v7206_v19, 0.0  ;;  %v7898_v25 = vrot.slane %v7897_v34, 1  ;;  %v8413_v14 = vsel %vm8337_vm3, %v15476_v48, %v8412_v61  ;;  %v6039_v24 = vadd.f32 1.0, %v11677_v54 }
 0x3bd   : > { %v7912_v38 = vrot.slane %v7911_v11, 1  ;;  %v7929_v43 = vrot.slane %v7928_v31, 4  ;;  %v7921_v15 = vsel %vm820_vm0, %v7205_v39, 0.0  ;;  %v15657_v28 = vpop.eup %11678  ;;  %v8414_v9 = vsel %vm8339_vm4, %v15472_v1, %v8413_v14 }
 0x3be   : > { %v7922_v13 = vrot.slane %v7921_v15, 4  ;;  %v15659_v12 = vadd.f32 %v7898_v25, %v7897_v34  ;;  %v5452_v59 = vadd.f32 %v15670_v0, %v17001_v51  ;;  %v8415_v48 = vsel %vm8341_vm5, %v15504_v26, %v8414_v9 }
 0x3bf   : > { %v15663_v27 = vadd.f32 %v7912_v38, %v7911_v11  ;;  %v7930_v36 = vadd.f32 %v7929_v43, %v7928_v31  ;;  %v6167_v37 = vmul.f32 %v6039_v24, %v15611_v3  ;;  %v5447_v19 = vadd.f32 %v15670_v0, %v17002_v50  ;;  %v15690_v38 = vpop.permute.xlu0 %7007  ;;  %v17003_v24 = vld [vmem:[#allocation31_spill] sm:$0xff] }
 0x3c0   : > { %v7923_v41 = vadd.f32 %v7922_v13, %v7921_v15  ;;  %v8416_v54 = vsel %vm8343_vm6, %v15516_v57, %v8415_v48  ;;  %v15683_v11 = vmul.f32 0.5, %v5452_v59  ;;  %v5790_v39 = vmul.f32 0.70710677, %v5452_v59 }
 0x3c1   : > { %v15679_v34 = vpop.eup %11680  ;;  %v7931_v1 = vrot.slane %v7930_v36, 2  ;;  %v8417_v31 = vsel %vm8345_vm7, %v15560_v6, %v8416_v54  ;;  %v7207_v25 = vmul.f32 %v6917_v7, %v6167_v37  ;;  %v15687_v26 = vmul.f32 0.5, %v5447_v19 }
 0x3c2   : > { %v7924_v58 = vrot.slane %v7923_v41, 2  ;;  %v8418_v61 = vsel %vm8347_vm8, %v7850_v42, %v8417_v31  ;;  %11686 = verf.f32 %v5790_v39  ;;  %v5789_v43 = vmul.f32 0.70710677, %v5447_v19 }
 0x3c3   : > { %v7932_v3 = vadd.f32 %v7931_v1, %v7930_v36  ;;  %v11683_v15 = vpop.eup %11682  ;;  %11013 = vmatprep.mubr.msk.f32.mxu1 %vm820_vm0, %v8418_v61  ;;  %v7935_v57 = vsel %vm820_vm0, %v7207_v25, 0.0  ;;  %v6040_v14 = vadd.f32 1.0, %v11675_v23  ;;  %v5462_v6 = vadd.f32 %v15670_v0, %v17003_v24  ;;  %v6924_v36 = vpop.permute.xlu1 %6923  ;;  %v17004_v1 = vld [vmem:[#allocation7_spill] sm:$0xff] }
 0x3c4   : > { %v7925_v13 = vadd.f32 %v7924_v58, %v7923_v41  ;;  %v6044_v7 = vadd.f32 1.0, %v11683_v15  ;;  %v7936_v51 = vrot.slane %v7935_v57, 4  ;;  %11688 = verf.f32 %v5789_v43  ;;  %v15707_v61 = vpop.permute.xlu0 %6979 }
 0x3c5   : > { %v7933_v9 = vrot.slane %v7932_v3, 1  ;;  %v6168_v59 = vmul.f32 %v6040_v14, %v15609_v56  ;;  %v15697_v48 = vmul.f32 0.5, %v5462_v6  ;;  %v5792_v37 = vmul.f32 0.70710677, %v5462_v6  ;;  %v11685_v41 = vpop.eup %11684 }
 0x3c6   : > { %v7926_v42 = vrot.slane %v7925_v13, 1  ;;  %v6172_v19 = vmul.f32 %v6044_v7, %v15630_v30  ;;  %v7937_v23 = vadd.f32 %v7936_v51, %v7935_v57  ;;  %v5457_v54 = vadd.f32 %v15670_v0, %v17004_v1  ;;  %v17005_v57 = vld [vmem:[#allocation32_spill] sm:$0xff] }
 0x3c7   : > { %v15699_v50 = vadd.f32 %v7933_v9, %v7932_v3  ;;  %v6043_v58 = vadd.f32 1.0, %v11685_v41  ;;  %v7208_v31 = vmul.f32 %v6924_v36, %v6168_v59  ;;  %11690 = verf.f32 %v5792_v37  ;;  %v15718_v7 = vpop.permute.xlu1 %7000 }
 0x3c8   : > { %v15704_v39 = vadd.f32 %v7926_v42, %v7925_v13  ;;  %v7212_v25 = vmul.f32 %v15588_v16, %v6172_v19  ;;  %v7938_v56 = vrot.slane %v7937_v23, 2  ;;  %v15709_v43 = vmul.f32 0.5, %v5457_v54  ;;  %v17006_v13 = vld [vmem:[#allocation10_spill] sm:$0xff] }
 0x3c9   : > { %v5791_v3 = vmul.f32 0.70710677, %v5457_v54  ;;  %v6171_v15 = vmul.f32 %v6043_v58, %v15640_v8  ;;  %v7942_v30 = vsel %vm820_vm0, %v7208_v31, 0.0  ;;  %v5472_v14 = vadd.f32 %v15670_v0, %v17005_v57 }
 0x3ca   : > { %v5467_v24 = vadd.f32 %v15670_v0, %v17006_v13  ;;  %v7970_v6 = vsel %vm820_vm0, %v7212_v25, 0.0  ;;  %v7939_v9 = vadd.f32 %v7938_v56, %v7937_v23  ;;  %v7943_v16 = vrot.slane %v7942_v30, 4  ;;  %v15720_v51 = vpop.f32.mrb[130].mxu1 }
 0x3cb   : > { %11692 = verf.f32 %v5791_v3  ;;  %v7971_v36 = vrot.slane %v7970_v6, 4  ;;  %v7211_v8 = vmul.f32 %v15499_v22, %v6171_v15  ;;  %v15723_v42 = vmul.f32 0.5, %v5472_v14  ;;  %v15725_v37 = vpop.f32.mrb[131].mxu1  ;;  %v15732_v15 = vpop.permute.xlu0 %7056 }
 0x3cc   : > { %v5794_v59 = vmul.f32 0.70710677, %v5472_v14  ;;  %v11687_v41 = vpop.eup %11686  ;;  %v7940_v19 = vrot.slane %v7939_v9, 1  ;;  %v7944_v1 = vadd.f32 %v7943_v16, %v7942_v30  ;;  %v15727_v54 = vmul.f32 0.5, %v5467_v24 }
 0x3cd   : > { %v5793_v23 = vmul.f32 0.70710677, %v5467_v24  ;;  %v7972_v58 = vadd.f32 %v7971_v36, %v7970_v6  ;;  %v7963_v31 = vsel %vm820_vm0, %v7211_v8, 0.0  ;;  %v6046_v25 = vadd.f32 1.0, %v11687_v41  ;;  %v6931_v36 = vpop.permute.xlu1 %6930 }
 0x3ce   : > { %11694 = verf.f32 %v5794_v59  ;;  %v11689_v56 = vpop.eup %11688  ;;  %v7964_v3 = vrot.slane %v7963_v31, 4  ;;  %v15730_v57 = vadd.f32 %v7940_v19, %v7939_v9  ;;  %v7945_v22 = vrot.slane %v7944_v1, 2 }
 0x3cf   : > { %11696 = verf.f32 %v5793_v23  ;;  %v7973_v14 = vrot.slane %v7972_v58, 2  ;;  %v6174_v13 = vmul.f32 %v6046_v25, %v15683_v11  ;;  %v6045_v30 = vadd.f32 1.0, %v11689_v56 }
 0x3d0   : > { %v6041_v16 = vadd.f32 1.0, %v15679_v34  ;;  %v7965_v24 = vadd.f32 %v7964_v3, %v7963_v31  ;;  %v7946_v6 = vadd.f32 %v7945_v22, %v7944_v1  ;;  %v6042_v8 = vadd.f32 1.0, %v15657_v28 }
 0x3d1   : > { %v5482_v59 = vadd.f32 %v15670_v0, %v15265_v5  ;;  %v11691_v9 = vpop.eup %11690  ;;  %v7974_v41 = vadd.f32 %v7973_v14, %v7972_v58  ;;  %v7214_v19 = vmul.f32 %v15632_v33, %v6174_v13  ;;  %v6173_v23 = vmul.f32 %v6045_v30, %v15687_v26  ;;  %v6938_v26 = vpop.permute.xlu0 %6937 }
 0x3d2   : > { %v6169_v60 = vmul.f32 %v6041_v16, %v15628_v29  ;;  %v7966_v11 = vrot.slane %v7965_v24, 2  ;;  %v7947_v25 = vrot.slane %v7946_v6, 1  ;;  %v6048_v56 = vadd.f32 1.0, %v11691_v9 }
 0x3d3   : > { %v6170_v34 = vmul.f32 %v6042_v8, %v15616_v55  ;;  %v7975_v1 = vrot.slane %v7974_v41, 1  ;;  %v7984_v31 = vsel %vm820_vm0, %v7214_v19, 0.0  ;;  %v7213_v28 = vmul.f32 %v15638_v32, %v6173_v23 }
 0x3d4   : > { %v7209_v3 = vmul.f32 %v6931_v36, %v6169_v60  ;;  %v7967_v22 = vadd.f32 %v7966_v11, %v7965_v24  ;;  %v7985_v58 = vrot.slane %v7984_v31, 4  ;;  %v15745_v14 = vadd.f32 %v7947_v25, %v7946_v6 }
 0x3d5   : > { %v11693_v5 = vpop.eup %11692  ;;  %v6176_v33 = vmul.f32 %v6048_v56, %v15697_v48  ;;  %v15748_v29 = vadd.f32 %v7975_v1, %v7974_v41  ;;  %v7977_v13 = vsel %vm820_vm0, %v7213_v28, 0.0  ;;  %v7210_v36 = vmul.f32 %v6938_v26, %v6170_v34 }
 0x3d6   : > { %v6047_v30 = vadd.f32 1.0, %v11693_v5  ;;  %v7949_v55 = vsel %vm820_vm0, %v7209_v3, 0.0  ;;  %v7968_v16 = vrot.slane %v7967_v22, 1  ;;  %v7986_v8 = vadd.f32 %v7985_v58, %v7984_v31 }
 0x3d7   : > { %v7978_v9 = vrot.slane %v7977_v13, 4  ;;  %v7216_v32 = vmul.f32 %v15707_v61, %v6176_v33  ;;  %v7950_v6 = vrot.slane %v7949_v55, 4  ;;  %v15756_v48 = vmul.f32 0.5, %v5482_v59 }
 0x3d8   : > { %v15753_v60 = vpop.eup %11694  ;;  %v6175_v24 = vmul.f32 %v6047_v30, %v15709_v43  ;;  %v15760_v19 = vadd.f32 %v7968_v16, %v7967_v22  ;;  %v7987_v23 = vrot.slane %v7986_v8, 2  ;;  %v7956_v31 = vsel %vm820_vm0, %v7210_v36, 0.0 }
 0x3d9   : > { %v15758_v41 = vpop.eup %11696  ;;  %v7979_v11 = vadd.f32 %v7978_v9, %v7977_v13  ;;  %v7998_v25 = vsel %vm820_vm0, %v7216_v32, 0.0  ;;  %v7951_v61 = vadd.f32 %v7950_v6, %v7949_v55  ;;  %v7957_v3 = vrot.slane %v7956_v31, 4 }
 0x3da   : > { %v7999_v56 = vrot.slane %v7998_v25, 4  ;;  %v7215_v1 = vmul.f32 %v15655_v53, %v6175_v24  ;;  %v7988_v28 = vadd.f32 %v7987_v23, %v7986_v8  ;;  %v5796_v34 = vmul.f32 0.70710677, %v5482_v59 }
 0x3db   : > { %v7980_v43 = vrot.slane %v7979_v11, 2  ;;  %v7952_v33 = vrot.slane %v7951_v61, 2  ;;  %v5477_v22 = vadd.f32 %v15670_v0, %v15269_v46  ;;  %v7958_v16 = vadd.f32 %v7957_v3, %v7956_v31 }
 0x3dc   : > { %v8000_v5 = vadd.f32 %v7999_v56, %v7998_v25  ;;  %v7991_v58 = vsel %vm820_vm0, %v7215_v1, 0.0  ;;  %v7989_v26 = vrot.slane %v7988_v28, 1  ;;  %11698 = verf.f32 %v5796_v34 }
 0x3dd   : > { %v7981_v13 = vadd.f32 %v7980_v43, %v7979_v11  ;;  %v7992_v30 = vrot.slane %v7991_v58, 4  ;;  %v7953_v53 = vadd.f32 %v7952_v33, %v7951_v61  ;;  %v15768_v55 = vmul.f32 0.5, %v5477_v22  ;;  %v15777_v11 = vpop.permute.xlu1 %7014  ;;  %v11845_v33 = vld [vmem:[%s12278_s25 + $0x38] sm:$0xff] }
 0x3de   : > { %v8001_v9 = vrot.slane %v8000_v5, 2  ;;  %v15770_v8 = vadd.f32 %v7989_v26, %v7988_v28  ;;  %v7959_v24 = vrot.slane %v7958_v16, 2  ;;  %v5795_v23 = vmul.f32 0.70710677, %v5477_v22  ;;  %v11846_v26 = vld [vmem:[%s12278_s25 + $0x30] sm:$0xff] }
 0x3df   : > { %v7982_v32 = vrot.slane %v7981_v13, 1  ;;  %v7993_v59 = vadd.f32 %v7992_v30, %v7991_v58  ;;  %v7954_v36 = vrot.slane %v7953_v53, 1  ;;  %v7892_v46 = vadd.f32 %v7891_v17, %v15544_v2 }
 0x3e0   : > { %v15772_v6 = vadd.f32 %v8001_v9, %v8000_v5  ;;  %v15781_v1 = vadd.f32 %v7959_v24, %v7958_v16  ;;  %v17007_v61 = vrot.slane %v15635_v44, 1  ;;  %11700 = verf.f32 %v5795_v23 }
 0x3e1   : > { %v15779_v25 = vadd.f32 %v7982_v32, %v7981_v13  ;;  %v7994_v56 = vrot.slane %v7993_v59, 2  ;;  %v15787_v43 = vadd.f32 %v7954_v36, %v7953_v53  ;;  %v8419_v2 = vsel %vm8335_vm2, %v15518_v45, %v15530_v40  ;;  %v15812_v16 = vpop.permute.xlu1 %7063 }
 0x3e2   : > { %v7906_v31 = vadd.f32 %v17007_v61, %v15635_v44  ;;  %v8003_v28 = vrot.slane %v15772_v6, 1  ;;  %v7961_v3 = vrot.slane %v15781_v1, 1  ;;  %v8420_v34 = vsel %vm8337_vm3, %v15565_v52, %v8419_v2  ;;  %v17008_v2 = vld [vmem:[#allocation8_spill] sm:$0xff] }
 0x3e3   : > { %v7995_v17 = vadd.f32 %v7994_v56, %v7993_v59  ;;  %v5492_v5 = vadd.f32 %v15670_v0, %v15364_v4  ;;  %v8421_v44 = vsel %vm8339_vm4, %v15542_v63, %v8420_v34  ;;  %v5487_v58 = vadd.f32 %v15670_v0, %v15367_v18  ;;  %v15822_v59 = vpop.permute.xlu0 %7021 }
 0x3e4   : > { %v8153_v22 = vsel %vm8131_vm9, %v11845_v33, 0.0  ;;  %v8150_v45 = vsel %vm8131_vm9, %v11846_v26, 0.0  ;;  %v8422_v13 = vsel %vm8341_vm5, %v15600_v62, %v8421_v44  ;;  %v5502_v9 = vadd.f32 %v15670_v0, %v15378_v47  ;;  %v17009_v44 = vld [vmem:[#allocation12_spill] sm:$0xff] }
 0x3e5   : > { %v7996_v40 = vrot.slane %v7995_v17, 1  ;;  %v15807_v52 = vmul.f32 0.5, %v5492_v5  ;;  %v5798_v30 = vmul.f32 0.70710677, %v5492_v5  ;;  %8154 = vadd.xlane.f32.xlu0 %v8153_v22  ;;  %8151 = vadd.xlane.f32.xlu1 %v8150_v45  ;;  %v8423_v4 = vsel %vm8343_vm6, %v7892_v46, %v8422_v13  ;;  %v6987_v22 = vpop.permute.xlu1 %6986 }
 0x3e6   : > { %v15810_v63 = vmul.f32 0.5, %v5487_v58  ;;  %v5797_v18 = vmul.f32 0.70710677, %v5487_v58  ;;  %v8424_v62 = vsel %vm8345_vm7, %v15659_v12, %v8423_v4  ;;  %v5497_v32 = vadd.f32 %v15670_v0, %v15383_v49  ;;  %v11699_v24 = vpop.eup %11698 }
 0x3e7   : > { %v15816_v53 = vadd.f32 %v7996_v40, %v7995_v17  ;;  %11702 = verf.f32 %v5798_v30  ;;  %v8425_v36 = vsel %vm8347_vm8, %v7906_v31, %v8424_v62  ;;  %v15825_v23 = vmul.f32 0.5, %v5502_v9  ;;  %v6994_v30 = vpop.permute.xlu0 %6993 }
 0x3e8   : > { %11704 = verf.f32 %v5797_v18  ;;  %v5800_v46 = vmul.f32 0.70710677, %v5502_v9  ;;  %v6052_v56 = vadd.f32 1.0, %v11699_v24  ;;  %11014 = vmatmul.mubr.msk.f32.gmra.mrb[138].mxu1 %vm820_vm0, %v8425_v36  ;;  %v15828_v47 = vmul.f32 0.5, %v5497_v32  ;;  %v17010_v18 = vld [vmem:[#allocation9_spill] sm:$0xff] }
 0x3e9   : > { %v5799_v61 = vmul.f32 0.70710677, %v5497_v32  ;;  %v6049_v12 = vadd.f32 1.0, %v15758_v41  ;;  %v5512_v49 = vadd.f32 %v15670_v0, %v15395_v10  ;;  %v5507_v17 = vadd.f32 %v15670_v0, %v17008_v2 }
 0x3ea   : > { %11706 = verf.f32 %v5800_v46  ;;  %v6050_v31 = vadd.f32 1.0, %v15753_v60  ;;  %v6180_v34 = vmul.f32 %v6052_v56, %v15756_v48  ;;  %v5522_v58 = vadd.f32 %v15670_v0, %v17009_v44  ;;  %v11701_v33 = vpop.eup %11700 }
 0x3eb   : > { %11708 = verf.f32 %v5799_v61  ;;  %v6177_v5 = vmul.f32 %v6049_v12, %v15727_v54  ;;  %v15840_v41 = vmul.f32 0.5, %v5512_v49  ;;  %v5802_v26 = vmul.f32 0.70710677, %v5512_v49 }
 0x3ec   : > { %v15842_v45 = vmul.f32 0.5, %v5507_v17  ;;  %v5801_v10 = vmul.f32 0.70710677, %v5507_v17  ;;  %v7220_v40 = vmul.f32 %v15690_v38, %v6180_v34  ;;  %v6051_v13 = vadd.f32 1.0, %v11701_v33 }
 0x3ed   : > { %v7217_v60 = vmul.f32 %v6987_v22, %v6177_v5  ;;  %v6178_v48 = vmul.f32 %v6050_v31, %v15723_v42  ;;  %11710 = verf.f32 %v5802_v26  ;;  %v15846_v54 = vmul.f32 0.5, %v5522_v58 }
 0x3ee   : > { %v5804_v4 = vmul.f32 0.70710677, %v5522_v58  ;;  %v5517_v9 = vadd.f32 %v15670_v0, %v17010_v18  ;;  %v8026_v62 = vsel %vm820_vm0, %v7220_v40, 0.0  ;;  %v6179_v32 = vmul.f32 %v6051_v13, %v15768_v55 }
 0x3ef   : > { %v8005_v24 = vsel %vm820_vm0, %v7217_v60, 0.0  ;;  %11712 = verf.f32 %v5801_v10  ;;  %v8027_v38 = vrot.slane %v8026_v62, 4  ;;  %v7218_v46 = vmul.f32 %v6994_v30, %v6178_v48  ;;  %v17011_v60 = vld [vmem:[#allocation11_spill] sm:$0xff] }
 0x3f0   : > { %v8006_v36 = vrot.slane %v8005_v24, 4  ;;  %11714 = verf.f32 %v5804_v4  ;;  %v7219_v42 = vmul.f32 %v15718_v7, %v6179_v32  ;;  %v15854_v61 = vmul.f32 0.5, %v5517_v9 }
 0x3f1   : > { %v11703_v56 = vpop.eup %11702  ;;  %v5803_v12 = vmul.f32 0.70710677, %v5517_v9  ;;  %v7962_v49 = vadd.f32 %v7961_v3, %v15781_v1  ;;  %v8028_v17 = vadd.f32 %v8027_v38, %v8026_v62  ;;  %v8012_v34 = vsel %vm820_vm0, %v7218_v46, 0.0  ;;  %v15875_v46 = vpop.permute.xlu1 %7070 }
 0x3f2   : > { %v11705_v2 = vpop.eup %11704  ;;  %v8007_v55 = vadd.f32 %v8006_v36, %v8005_v24  ;;  %v6054_v31 = vadd.f32 1.0, %v11703_v56  ;;  %v8019_v5 = vsel %vm820_vm0, %v7219_v42, 0.0  ;;  %v8013_v58 = vrot.slane %v8012_v34, 4 }
 0x3f3   : > { %v6053_v44 = vadd.f32 1.0, %v11705_v2  ;;  %11716 = verf.f32 %v5803_v12  ;;  %v8029_v7 = vrot.slane %v8028_v17, 2  ;;  %v8020_v22 = vrot.slane %v8019_v5, 4 }
 0x3f4   : > { %v11707_v33 = vpop.eup %11706  ;;  %v8008_v26 = vrot.slane %v8007_v55, 2  ;;  %v6182_v10 = vmul.f32 %v6054_v31, %v15807_v52  ;;  %v8014_v3 = vadd.f32 %v8013_v58, %v8012_v34  ;;  %v8426_v13 = vsel %vm8335_vm2, %v15644_v35, %v15663_v27 }
 0x3f5   : > { %v11709_v40 = vpop.eup %11708  ;;  %v6181_v1 = vmul.f32 %v6053_v44, %v15810_v63  ;;  %v5532_v30 = vadd.f32 %v15670_v0, %v17011_v60  ;;  %v8030_v48 = vadd.f32 %v8029_v7, %v8028_v17  ;;  %v8021_v4 = vadd.f32 %v8020_v22, %v8019_v5 }
 0x3f6   : > { %v8009_v18 = vadd.f32 %v8008_v26, %v8007_v55  ;;  %v7222_v9 = vmul.f32 %v15822_v59, %v6182_v10  ;;  %v8015_v32 = vrot.slane %v8014_v3, 2  ;;  %v8427_v52 = vsel %vm8337_vm3, %v15704_v39, %v8426_v13 }
 0x3f7   : > { %v7221_v62 = vmul.f32 %v15777_v11, %v6181_v1  ;;  %v6055_v63 = vadd.f32 1.0, %v11709_v40  ;;  %v15872_v24 = vpop.eup %11710  ;;  %v8031_v38 = vrot.slane %v8030_v48, 1  ;;  %v8022_v36 = vrot.slane %v8021_v4, 2 }
 0x3f8   : > { %v8010_v35 = vrot.slane %v8009_v18, 1  ;;  %v8040_v27 = vsel %vm820_vm0, %v7222_v9, 0.0  ;;  %v15878_v12 = vadd.f32 %v8015_v32, %v8014_v3  ;;  %v8428_v11 = vsel %vm8339_vm4, %v15699_v50, %v8427_v52 }
 0x3f9   : > { %v11713_v56 = vpop.eup %11712  ;;  %v8033_v42 = vsel %vm820_vm0, %v7221_v62, 0.0  ;;  %v8041_v59 = vrot.slane %v8040_v27, 4  ;;  %v15882_v2 = vadd.f32 %v8031_v38, %v8030_v48  ;;  %v8023_v17 = vadd.f32 %v8022_v36, %v8021_v4 }
 0x3fa   : > { %v11715_v39 = vpop.eup %11714  ;;  %v8034_v55 = vrot.slane %v8033_v42, 4  ;;  %v15884_v31 = vadd.f32 %v8010_v35, %v8009_v18  ;;  %v8017_v5 = vrot.slane %v15878_v12, 1  ;;  %v8429_v58 = vsel %vm8341_vm5, %v15730_v57, %v8428_v11  ;;  %v7029_v18 = vpop.permute.xlu1 %7028 }
 0x3fb   : > { %v8042_v34 = vadd.f32 %v8041_v59, %v8040_v27  ;;  %v6060_v44 = vadd.f32 1.0, %v11715_v39  ;;  %v8024_v7 = vrot.slane %v8023_v17, 1  ;;  %v8430_v26 = vsel %vm8343_vm6, %v15745_v14, %v8429_v58 }
 0x3fc   : > { %v8035_v22 = vadd.f32 %v8034_v55, %v8033_v42  ;;  %v6183_v50 = vmul.f32 %v6055_v63, %v15828_v47  ;;  %v8431_v3 = vsel %vm8345_vm7, %v15787_v43, %v8430_v26  ;;  %v15895_v13 = vmul.f32 0.5, %v5532_v30  ;;  %v17012_v43 = vld [vmem:[#allocation13_spill] sm:$0xff] }
 0x3fd   : > { %v11717_v10 = vpop.eup %11716  ;;  %v8043_v40 = vrot.slane %v8042_v34, 2  ;;  %v6188_v1 = vmul.f32 %v6060_v44, %v15846_v54  ;;  %v15897_v60 = vadd.f32 %v8024_v7, %v8023_v17  ;;  %v8432_v4 = vsel %vm8347_vm8, %v7962_v49, %v8431_v3  ;;  %v17013_v7 = vld [vmem:[#allocation15_spill] sm:$0xff] }
 0x3fe   : > { %v8036_v48 = vrot.slane %v8035_v22, 2  ;;  %v6059_v57 = vadd.f32 1.0, %v11717_v10  ;;  %11016 = vmatprep.mubr.msk.f32.mxu1 %vm820_vm0, %v8432_v4  ;;  %v7223_v47 = vmul.f32 %v7029_v18, %v6183_v50  ;;  %v5806_v62 = vmul.f32 0.70710677, %v5532_v30  ;;  %v17014_v50 = vld [vmem:[#allocation14_spill] sm:$0xff] }
 0x3ff   : > { %v8044_v9 = vadd.f32 %v8043_v40, %v8042_v34  ;;  %v7228_v14 = vmul.f32 %v15812_v16, %v6188_v1  ;;  %v5527_v52 = vadd.f32 %v15670_v0, %v17012_v43  ;;  %v6056_v63 = vadd.f32 1.0, %v11707_v33  ;;  %v7036_v34 = vpop.permute.xlu1 %7035 }
 0x400   : > { %v8037_v54 = vadd.f32 %v8036_v48, %v8035_v22  ;;  %v6187_v32 = vmul.f32 %v6059_v57, %v15854_v61  ;;  %v8047_v49 = vsel %vm820_vm0, %v7223_v47, 0.0  ;;  %11718 = verf.f32 %v5806_v62 }
 0x401   : > { %v8045_v38 = vrot.slane %v8044_v9, 1  ;;  %v8082_v36 = vsel %vm820_vm0, %v7228_v14, 0.0  ;;  %v8048_v42 = vrot.slane %v8047_v49, 4  ;;  %v15910_v30 = vmul.f32 0.5, %v5527_v52 }
 0x402   : > { %v8038_v35 = vrot.slane %v8037_v54, 1  ;;  %v8083_v27 = vrot.slane %v8082_v36, 4  ;;  %v7227_v16 = vmul.f32 %v15732_v15, %v6187_v32  ;;  %v5805_v61 = vmul.f32 0.70710677, %v5527_v52 }
 0x403   : > { %v15908_v59 = vadd.f32 %v8045_v38, %v8044_v9  ;;  %v6184_v11 = vmul.f32 %v6056_v63, %v15825_v23  ;;  %v8049_v55 = vadd.f32 %v8048_v42, %v8047_v49  ;;  %v5542_v15 = vadd.f32 %v15670_v0, %v17013_v7  ;;  %v15920_v23 = vpop.permute.xlu0 %7077  ;;  %v7043_v38 = vpop.permute.xlu1 %7042  ;;  %v17016_v42 = vld [vmem:[#allocation17_spill] sm:$0xff] }
 0x404   : > { %v15913_v39 = vadd.f32 %v8038_v35, %v8037_v54  ;;  %v8084_v33 = vadd.f32 %v8083_v27, %v8082_v36  ;;  %v8075_v17 = vsel %vm820_vm0, %v7227_v16, 0.0  ;;  %11720 = verf.f32 %v5805_v61  ;;  %v17015_v36 = vld [vmem:[#allocation16_spill] sm:$0xff] }
 0x405   : > { %v8076_v44 = vrot.slane %v8075_v17, 4  ;;  %v7224_v58 = vmul.f32 %v7036_v34, %v6184_v11  ;;  %v8050_v26 = vrot.slane %v8049_v55, 2  ;;  %v5537_v10 = vadd.f32 %v15670_v0, %v17014_v50 }
 0x406   : > { %v8085_v22 = vrot.slane %v8084_v33, 2  ;;  %v6057_v40 = vadd.f32 1.0, %v11713_v56  ;;  %v15923_v48 = vmul.f32 0.5, %v5542_v15  ;;  %v5808_v57 = vmul.f32 0.70710677, %v5542_v15  ;;  %v15925_v4 = vpop.f32.mrb[132].mxu1 }
 0x407   : > { %v8077_v1 = vadd.f32 %v8076_v44, %v8075_v17  ;;  %v8054_v3 = vsel %vm820_vm0, %v7224_v58, 0.0  ;;  %v8051_v9 = vadd.f32 %v8050_v26, %v8049_v55  ;;  %v15927_v47 = vmul.f32 0.5, %v5537_v10  ;;  %v15929_v62 = vpop.f32.mrb[133].mxu1 }
 0x408   : > { %v8086_v18 = vadd.f32 %v8085_v22, %v8084_v33  ;;  %v8055_v14 = vrot.slane %v8054_v3, 4  ;;  %11722 = verf.f32 %v5808_v57  ;;  %v5807_v56 = vmul.f32 0.70710677, %v5537_v10 }
 0x409   : > { %v8078_v54 = vrot.slane %v8077_v1, 2  ;;  %v6185_v32 = vmul.f32 %v6057_v40, %v15842_v45  ;;  %v8052_v52 = vrot.slane %v8051_v9, 1  ;;  %v5552_v49 = vadd.f32 %v15670_v0, %v17015_v36  ;;  %v15940_v45 = vpop.permute.xlu0 %7084 }
 0x40a   : > { %v8087_v43 = vrot.slane %v8086_v18, 1  ;;  %v8056_v63 = vadd.f32 %v8055_v14, %v8054_v3  ;;  %v11719_v35 = vpop.eup %11718  ;;  %11724 = verf.f32 %v5807_v56  ;;  %v5547_v61 = vadd.f32 %v15670_v0, %v17016_v42 }
 0x40b   : > { %v8079_v27 = vadd.f32 %v8078_v54, %v8077_v1  ;;  %v7225_v16 = vmul.f32 %v7043_v38, %v6185_v32  ;;  %v15936_v33 = vadd.f32 %v8052_v52, %v8051_v9  ;;  %v15938_v55 = vmul.f32 0.5, %v5552_v49  ;;  %v7050_v9 = vpop.permute.xlu1 %7049 }
 0x40c   : > { %v8088_v11 = vadd.f32 %v8087_v43, %v8086_v18  ;;  %v8057_v17 = vrot.slane %v8056_v63, 2  ;;  %v5810_v58 = vmul.f32 0.70710677, %v5552_v49  ;;  %v15943_v7 = vmul.f32 0.5, %v5547_v61  ;;  %v11848_v49 = vld [vmem:[%s12278_s25 + $0x40] sm:$0xff] }
 0x40d   : > { %v8080_v34 = vrot.slane %v8079_v27, 1  ;;  %v8061_v44 = vsel %vm820_vm0, %v7225_v16, 0.0  ;;  %v5809_v26 = vmul.f32 0.70710677, %v5547_v61  ;;  %v6058_v50 = vadd.f32 1.0, %v15872_v24  ;;  %v7092_v32 = vpop.permute.xlu0 %7091 }
 0x40e   : > { %v8058_v15 = vadd.f32 %v8057_v17, %v8056_v63  ;;  %v8062_v22 = vrot.slane %v8061_v44, 4  ;;  %v11721_v0 = vpop.eup %11720  ;;  %11726 = verf.f32 %v5810_v58  ;;  %v8004_v40 = vadd.f32 %v8003_v28, %v15772_v6 }
 0x40f   : > { %v8081_v10 = vadd.f32 %v8080_v34, %v8079_v27  ;;  %v8018_v1 = vadd.f32 %v8017_v5, %v15878_v12  ;;  %v6061_v3 = vadd.f32 1.0, %v11721_v0  ;;  %11728 = verf.f32 %v5809_v26 }
 0x410   : > { %v8059_v57 = vrot.slane %v8058_v15, 1  ;;  %v8063_v18 = vadd.f32 %v8062_v22, %v8061_v44  ;;  %v6186_v14 = vmul.f32 %v6058_v50, %v15840_v41  ;;  %v8433_v24 = vsel %vm8335_vm2, %v15748_v29, %v15760_v19  ;;  %v11847_v19 = vld [vmem:[%s12278_s25 + $0x48] sm:$0xff] }
 0x411   : > { %v6062_v54 = vadd.f32 1.0, %v11719_v35  ;;  %v15957_v56 = vsel %vm8335_vm2, %v8088_v11, %v8081_v10  ;;  %v6189_v6 = vmul.f32 %v6061_v3, %v15910_v30  ;;  %v8434_v5 = vsel %vm8337_vm3, %v15779_v25, %v8433_v24  ;;  %v7099_v26 = vpop.permute.xlu0 %7098  ;;  %v11849_v10 = vld [vmem:[%s12278_s25 + $0x58] sm:$0xff] }
 0x412   : > { %v15960_v28 = vadd.f32 %v8059_v57, %v8058_v15  ;;  %v8064_v12 = vrot.slane %v8063_v18, 2  ;;  %v11723_v43 = vpop.eup %11722  ;;  %v7226_v41 = vmul.f32 %v7050_v9, %v6186_v14  ;;  %v8435_v52 = vsel %vm8339_vm4, %v15770_v8, %v8434_v5 }
 0x413   : > { %v6190_v29 = vmul.f32 %v6062_v54, %v15895_v13  ;;  %v8159_v63 = vsel %vm8131_vm9, %v11847_v19, 0.0  ;;  %v7229_v38 = vmul.f32 %v15875_v46, %v6189_v6  ;;  %v8436_v36 = vsel %vm8341_vm5, %v15816_v53, %v8435_v52  ;;  %v7106_v6 = vpop.permute.xlu1 %7105 }
 0x414   : > { %v8065_v30 = vadd.f32 %v8064_v12, %v8063_v18  ;;  %8160 = vadd.xlane.f32.xlu0 %v8159_v63  ;;  %v8156_v25 = vsel %vm8131_vm9, %v11848_v49, 0.0  ;;  %v11725_v35 = vpop.eup %11724  ;;  %v8068_v27 = vsel %vm820_vm0, %v7226_v41, 0.0  ;;  %v8437_v8 = vsel %vm8343_vm6, %v8004_v40, %v8436_v36 }
 0x415   : > { %v7230_v13 = vmul.f32 %v15920_v23, %v6190_v29  ;;  %8157 = vadd.xlane.f32.xlu1 %v8156_v25  ;;  %v6064_v16 = vadd.f32 1.0, %v11723_v43  ;;  %v8089_v42 = vsel %vm820_vm0, %v7229_v38, 0.0  ;;  %v8069_v61 = vrot.slane %v8068_v27, 4  ;;  %v8134_v49 = vpop.xlane.xlu0 %8133 }
 0x416   : > { %v8066_v46 = vrot.slane %v8065_v30, 1  ;;  %v8438_v53 = vsel %vm8345_vm7, %v15884_v31, %v8437_v8  ;;  %v8090_v11 = vrot.slane %v8089_v42, 4  ;;  %v6063_v44 = vadd.f32 1.0, %v11725_v35 }
 0x417   : > { %v8439_v17 = vsel %vm8347_vm8, %v8018_v1, %v8438_v53  ;;  %v8096_v34 = vsel %vm820_vm0, %v7230_v13, 0.0  ;;  %v8070_v23 = vadd.f32 %v8069_v61, %v8068_v27  ;;  %v6192_v22 = vmul.f32 %v6064_v16, %v15923_v48  ;;  %v11850_v1 = vld [vmem:[%s12278_s25 + $0x50] sm:$0xff] }
 0x418   : > { %v15982_v58 = vadd.f32 %v8066_v46, %v8065_v30  ;;  %11017 = vmatmul.mubr.msk.f32.gmra.mrb[140].mxu1 %vm820_vm0, %v8439_v17  ;;  %v8097_v15 = vrot.slane %v8096_v34, 4  ;;  %v11727_v50 = vpop.eup %11726  ;;  %v8091_v0 = vadd.f32 %v8090_v11, %v8089_v42  ;;  %v6191_v31 = vmul.f32 %v6063_v44, %v15927_v47 }
 0x419   : > { %v8165_v40 = vsel %vm8131_vm9, %v11849_v10, 0.0  ;;  %v8162_v3 = vsel %vm8131_vm9, %v11850_v1, 0.0  ;;  %v11729_v57 = vpop.eup %11728  ;;  %v8071_v18 = vrot.slane %v8070_v23, 2  ;;  %v7232_v14 = vmul.f32 %v7092_v32, %v6192_v22  ;;  %v8140_v44 = vpop.xlane.xlu0 %8139 }
 0x41a   : > { %v8098_v9 = vadd.f32 %v8097_v15, %v8096_v34  ;;  %v6066_v24 = vadd.f32 1.0, %v11727_v50  ;;  %8166 = vadd.xlane.f32.xlu0 %v8165_v40  ;;  %8163 = vadd.xlane.f32.xlu1 %v8162_v3  ;;  %v8092_v54 = vrot.slane %v8091_v0, 2  ;;  %v7231_v48 = vmul.f32 %v15940_v45, %v6191_v31  ;;  %v8137_v34 = vpop.xlane.xlu1 %8136 }
 0x41b   : > { %v6065_v12 = vadd.f32 1.0, %v11729_v57  ;;  %v8440_v47 = vsel %vm8335_vm2, %v15882_v2, %v15897_v60  ;;  %v8072_v5 = vadd.f32 %v8071_v18, %v8070_v23  ;;  %v8110_v41 = vsel %vm820_vm0, %v7232_v14, 0.0 }
 0x41c   : > { %v8099_v43 = vrot.slane %v8098_v9, 2  ;;  %v6194_v52 = vmul.f32 %v6066_v24, %v15938_v55  ;;  %v8093_v29 = vadd.f32 %v8092_v54, %v8091_v0  ;;  %v8103_v32 = vsel %vm820_vm0, %v7231_v48, 0.0 }
 0x41d   : > { %v8111_v19 = vrot.slane %v8110_v41, 4  ;;  %v6193_v63 = vmul.f32 %v6065_v12, %v15943_v7  ;;  %v8073_v38 = vrot.slane %v8072_v5, 1  ;;  %v8104_v30 = vrot.slane %v8103_v32, 4 }
 0x41e   : > { %v8100_v45 = vadd.f32 %v8099_v43, %v8098_v9  ;;  %v7234_v36 = vmul.f32 %v7106_v6, %v6194_v52  ;;  %v8094_v25 = vrot.slane %v8093_v29, 1  ;;  %v8441_v60 = vsel %vm8337_vm3, %v15913_v39, %v8440_v47  ;;  %v16008_v39 = vld [vmem:[%s16765_s10] ss:$0 sm:$0xff]  ;;  %v11853_v52 = vld [vmem:[%s12278_s25 + $0x78] sm:$0xff] }
 0x41f   : > { %v8112_v35 = vadd.f32 %v8111_v19, %v8110_v41  ;;  %v7233_v2 = vmul.f32 %v7099_v26, %v6193_v63  ;;  %v8105_v8 = vadd.f32 %v8104_v30, %v8103_v32  ;;  %v8074_v13 = vadd.f32 %v8073_v38, %v8072_v5  ;;  %v11852_v6 = vld [vmem:[%s12278_s25 + $0x60] sm:$0xff]  ;;  %v8143_v5 = vpop.xlane.xlu0 %8142  ;;  %v11854_v32 = vld [vmem:[%s12278_s25 + $0x70] sm:$0xff]  ;;  %v11855_v30 = vld [vmem:[%s12025_s21 + $0x8] sm:$0xff] }
 0x420   : > { %v8101_v27 = vrot.slane %v8100_v45, 1  ;;  %v8124_v55 = vsel %vm820_vm0, %v7234_v36, 0.0  ;;  %v8095_v16 = vadd.f32 %v8094_v25, %v8093_v29  ;;  %v8442_v17 = vsel %vm8339_vm4, %v15908_v59, %v8441_v60 }
 0x421   : > { %v8113_v42 = vrot.slane %v8112_v35, 2  ;;  %v8125_v46 = vrot.slane %v8124_v55, 4  ;;  %v8117_v7 = vsel %vm820_vm0, %v7233_v2, 0.0  ;;  %v8106_v53 = vrot.slane %v8105_v8, 2 }
 0x422   : > { %v8102_v61 = vadd.f32 %v8101_v27, %v8100_v45  ;;  %v8118_v11 = vrot.slane %v8117_v7, 4  ;;  %v8448_v23 = vsel %vm8337_vm3, %v8095_v16, %v15957_v56  ;;  %v8443_v26 = vsel %vm8341_vm5, %v15936_v33, %v8442_v17 }
 0x423   : > { %v8114_v15 = vadd.f32 %v8113_v42, %v8112_v35  ;;  %v8126_v22 = vadd.f32 %v8125_v46, %v8124_v55  ;;  %v8107_v0 = vadd.f32 %v8106_v53, %v8105_v8  ;;  %v8444_v31 = vsel %vm8343_vm6, %v15960_v28, %v8443_v26  ;;  %v11851_v28 = vld [vmem:[%s12278_s25 + $0x68] sm:$0xff]  ;;  %v11856_v35 = vld [vmem:[%s12025_s21] sm:$0xff]  ;;  %v11858_v53 = vld [vmem:[%s12025_s21 + $0x18] sm:$0xff] }
 0x424   : > { %v8449_v50 = vsel %vm8339_vm4, %v8102_v61, %v8448_v23  ;;  %v8119_v59 = vadd.f32 %v8118_v11, %v8117_v7  ;;  %v8445_v1 = vsel %vm8345_vm7, %v15982_v58, %v8444_v31  ;;  %v8192_v56 = vmul.f32 %v16008_v39, %v8137_v34  ;;  %v8919_v26 = vld [vmem:[%s16768_s13 + $0x8] sm:$0xff] }
 0x425   : > { %v8115_v10 = vrot.slane %v8114_v15, 1  ;;  %v8127_v40 = vrot.slane %v8126_v22, 2  ;;  %v8108_v3 = vrot.slane %v8107_v0, 1  ;;  %v8446_v33 = vsel %vm8347_vm8, %v8074_v13, %v8445_v1 }
 0x426   : > { %v8120_v57 = vrot.slane %v8119_v59, 2  ;;  %v8191_v18 = vmul.f32 %v16008_v39, %v8134_v49  ;;  %11019 = vmatprep.mubr.msk.f32.mxu1 %vm820_vm0, %v8446_v33  ;;  %v8171_v24 = vsel %vm8131_vm9, %v11851_v28, 0.0  ;;  %v8558_v54 = vadd.f32 %v15598_v20, %v8192_v56  ;;  %v11860_v56 = vld [vmem:[%s12025_s21 + $0x20] sm:$0xff] }
 0x427   : > { %v8116_v9 = vadd.f32 %v8115_v10, %v8114_v15  ;;  %v8128_v14 = vadd.f32 %v8127_v40, %v8126_v22  ;;  %v8109_v58 = vadd.f32 %v8108_v3, %v8107_v0  ;;  %8172 = vadd.xlane.f32.xlu0 %v8171_v24  ;;  %v8168_v12 = vsel %vm8131_vm9, %v11852_v6, 0.0  ;;  %v8918_v22 = vld [vmem:[%s16768_s13] sm:$0xff]  ;;  %v11859_v40 = vld [vmem:[%s12025_s21 + $0x28] sm:$0xff]  ;;  %v11861_v6 = vld [vmem:[%s12025_s21 + $0x38] sm:$0xff] }
 0x428   : > { %v8121_v48 = vadd.f32 %v8120_v57, %v8119_v59  ;;  %v8553_v47 = vadd.f32 %v15606_v21, %v8191_v18  ;;  %v8632_v41 = vmul.f32 0.033333335, %v8558_v54  ;;  %8169 = vadd.xlane.f32.xlu1 %v8168_v12  ;;  %v8177_v29 = vsel %vm8131_vm9, %v11853_v52, 0.0 }
 0x429   : > { %v8129_v43 = vrot.slane %v8128_v14, 1  ;;  %v8174_v20 = vsel %vm8131_vm9, %v11854_v32, 0.0  ;;  %v8450_v38 = vsel %vm8341_vm5, %v8109_v58, %v8449_v50  ;;  %v8193_v45 = vmul.f32 %v16008_v39, %v8140_v44  ;;  %v8920_v32 = vld [vmem:[%s16768_s13 + $0x10] sm:$0xff] }
 0x42a   : > { %v8122_v19 = vrot.slane %v8121_v48, 1  ;;  %v8631_v63 = vmul.f32 0.033333335, %v8553_v47  ;;  %v16036_v36 = vadd.f32 %v11855_v30, %v8632_v41  ;;  %v8451_v21 = vsel %vm8343_vm6, %v8116_v9, %v8450_v38  ;;  %v11862_v47 = vld [vmem:[%s12025_s21 + $0x30] sm:$0xff] }
 0x42b   : > { %v8194_v49 = vmul.f32 %v16008_v39, %v8143_v5  ;;  %8178 = vadd.xlane.f32.xlu0 %v8177_v29  ;;  %v8563_v60 = vadd.f32 %v15725_v37, %v8193_v45  ;;  %v8130_v8 = vadd.f32 %v8129_v43, %v8128_v14  ;;  %v11857_v37 = vld [vmem:[%s12025_s21 + $0x10] sm:$0xff]  ;;  %v11150_v50 = vpack.c.bf16 %v8919_v26, %v8918_v22 }
 0x42c   : > { %v8123_v25 = vadd.f32 %v8122_v19, %v8121_v48  ;;  %v16041_v2 = vadd.f32 %v11856_v35, %v8631_v63  ;;  %8175 = vadd.xlane.f32.xlu1 %v8174_v20  ;;  %v8668_v27 = vsel %vm820_vm0, %v16036_v36, 0.0  ;;  %v8921_v20 = vld [vmem:[%s16768_s13 + $0x18] sm:$0xff]  ;;  %v11866_v26 = vld [vmem:[%s12025_s21 + $0x50] sm:$0xff] }
 0x42d   : > { %v8568_v55 = vadd.f32 %v15720_v51, %v8194_v49  ;;  %v8633_v42 = vmul.f32 0.033333335, %v8563_v60  ;;  %11151 = vmatprep.subr.bf16.mxu0 %v11150_v50  ;;  %v11154_v19 = vpack.c.bf16 %v8921_v20, %v8920_v32  ;;  %v11863_v60 = vld [vmem:[%s12025_s21 + $0x48] sm:$0xff] }
 0x42e   : > { %v8665_v13 = vsel %vm820_vm0, %v16041_v2, 0.0  ;;  %v8452_v16 = vsel %vm8345_vm7, %v8123_v25, %v8451_v21  ;;  %11153 = vmatpush3.bf16.msra.mxu0 %v11150_v50 }
 0x42f   : > { %v8453_v46 = vsel %vm8347_vm8, %v8130_v8, %v8452_v16  ;;  %v8634_v7 = vmul.f32 0.033333335, %v8568_v55  ;;  %8669 = vadd.xlane.f32.xlu0 %v8668_v27  ;;  %v16053_v61 = vadd.f32 %v11857_v37, %v8633_v42  ;;  %11155 = vmatprep.subr.bf16.mxu0 %v11154_v19  ;;  %v11864_v8 = vld [vmem:[%s12025_s21 + $0x40] sm:$0xff] }
 0x430   : > { %11020 = vmatmul.mubr.msk.f32.gmra.mrb[142].mxu1 %vm820_vm0, %v8453_v46  ;;  %8666 = vadd.xlane.f32.xlu1 %v8665_v13 }
 0x431   : > { %v16056_v11 = vadd.f32 %v11858_v53, %v8634_v7  ;;  %v8671_v51 = vsel %vm820_vm0, %v16053_v61, 0.0 }
 0x432   : > { %11157 = vmatpush3.bf16.msra.mxu0 %v11154_v19 }
 0x433   : > { %v8674_v17 = vsel %vm820_vm0, %v16056_v11, 0.0 }
 0x434   : > { %8675 = vadd.xlane.f32.xlu0 %v8674_v17  ;;  %8672 = vadd.xlane.f32.xlu1 %v8671_v51 }
 0x435   : > { %v8149_v34 = vpop.xlane.xlu0 %8148 }
 0x436   : > { %v8146_v44 = vpop.xlane.xlu1 %8145  ;;  %v8196_v23 = vmul.f32 %v16008_v39, %v8149_v34 }
 0x437   : > { %v8195_v15 = vmul.f32 %v16008_v39, %v8146_v44 }
 0x438   : > { %v8578_v0 = vadd.f32 %v15925_v4, %v8196_v23 }
 0x439   : > { %v8573_v59 = vadd.f32 %v15929_v62, %v8195_v15  ;;  %v11865_v15 = vld [vmem:[%s12025_s21 + $0x58] sm:$0xff] }
 0x43a   : > { %v8636_v31 = vmul.f32 0.033333335, %v8578_v0 }
 0x43b   : > { %v8635_v10 = vmul.f32 0.033333335, %v8573_v59 }
 0x43c   : > { %v16073_v1 = vadd.f32 %v11859_v40, %v8636_v31 }
 0x43d   : > { %v16076_v3 = vadd.f32 %v11860_v56, %v8635_v10 }
 0x43e   : > { %v8680_v57 = vsel %vm820_vm0, %v16073_v1, 0.0 }
 0x43f   : > { %v8677_v4 = vsel %vm820_vm0, %v16076_v3, 0.0  ;;  %8681 = vadd.xlane.f32.xlu0 %v8680_v57 }
 0x440   : > { %8678 = vadd.xlane.f32.xlu1 %v8677_v4 }
 0x443   : > { %v11009_v62 = vpop.f32.mrb[134].mxu1 }
 0x444   : > { %v8582_v33 = vpop.f32.mrb[135].mxu1 }
 0x472   : > { %v8155_v18 = vpop.xlane.xlu0 %8154  ;;  %v8152_v9 = vpop.xlane.xlu1 %8151 }
 0x473   : > { %v8198_v14 = vmul.f32 %v16008_v39, %v8155_v18  ;;  %v8197_v28 = vmul.f32 %v16008_v39, %v8152_v9 }
 0x475   : > { %v8588_v24 = vadd.f32 %v11009_v62, %v8198_v14  ;;  %v8583_v54 = vadd.f32 %v8582_v33, %v8197_v28  ;;  %v11867_v14 = vld [vmem:[%s12025_s21 + $0x68] sm:$0xff] }
 0x477   : > { %v8638_v58 = vmul.f32 0.033333335, %v8588_v24  ;;  %v8637_v48 = vmul.f32 0.033333335, %v8583_v54  ;;  %v11868_v24 = vld [vmem:[%s12025_s21 + $0x60] sm:$0xff] }
 0x479   : > { %v16085_v12 = vadd.f32 %v11861_v6, %v8638_v58  ;;  %v16088_v5 = vadd.f32 %v11862_v47, %v8637_v48 }
 0x47b   : > { %v8686_v43 = vsel %vm820_vm0, %v16085_v12, 0.0  ;;  %v8683_v41 = vsel %vm820_vm0, %v16088_v5, 0.0 }
 0x47c   : > { %8687 = vadd.xlane.f32.xlu0 %v8686_v43  ;;  %8684 = vadd.xlane.f32.xlu1 %v8683_v41 }
 0x47f   : > { %v11012_v52 = vpop.f32.mrb[136].mxu1 }
 0x480   : > { %v8592_v29 = vpop.f32.mrb[137].mxu1 }
 0x4a1   : > { %v8161_v63 = vpop.xlane.xlu0 %8160 }
 0x4a2   : > { %v8200_v38 = vmul.f32 %v16008_v39, %v8161_v63  ;;  %v8158_v45 = vpop.xlane.xlu1 %8157 }
 0x4a3   : > { %v8199_v30 = vmul.f32 %v16008_v39, %v8158_v45 }
 0x4a4   : > { %v8598_v21 = vadd.f32 %v11012_v52, %v8200_v38 }
 0x4a5   : > { %v8593_v49 = vadd.f32 %v8592_v29, %v8199_v30 }
 0x4a6   : > { %v8640_v25 = vmul.f32 0.033333335, %v8598_v21 }
 0x4a7   : > { %v8639_v35 = vmul.f32 0.033333335, %v8593_v49  ;;  %v8167_v42 = vpop.xlane.xlu0 %8166  ;;  %v8164_v7 = vpop.xlane.xlu1 %8163 }
 0x4a8   : > { %v16103_v27 = vadd.f32 %v11863_v60, %v8640_v25  ;;  %v8202_v46 = vmul.f32 %v16008_v39, %v8167_v42  ;;  %v8201_v37 = vmul.f32 %v16008_v39, %v8164_v7  ;;  %v11869_v42 = vld [vmem:[%s12025_s21 + $0x78] sm:$0xff]  ;;  %v11870_v7 = vld [vmem:[%s12025_s21 + $0x70] sm:$0xff] }
 0x4a9   : > { %v16106_v55 = vadd.f32 %v11864_v8, %v8639_v35 }
 0x4aa   : > { %v8692_v13 = vsel %vm820_vm0, %v16103_v27, 0.0 }
 0x4ab   : > { %8693 = vadd.xlane.f32.xlu0 %v8692_v13  ;;  %v8689_v16 = vsel %vm820_vm0, %v16106_v55, 0.0 }
 0x4ac   : > { %8690 = vadd.xlane.f32.xlu1 %v8689_v16 }
 0x4b4   : > { %v8173_v31 = vpop.xlane.xlu0 %8172 }
 0x4b5   : > { %v8204_v10 = vmul.f32 %v16008_v39, %v8173_v31  ;;  %v8170_v40 = vpop.xlane.xlu1 %8169 }
 0x4b6   : > { %v8203_v56 = vmul.f32 %v16008_v39, %v8170_v40 }
 0x4b8   : > { %v8179_v6 = vpop.xlane.xlu0 %8178 }
 0x4b9   : > { %v8176_v47 = vpop.xlane.xlu1 %8175  ;;  %v8206_v52 = vmul.f32 %v16008_v39, %v8179_v6 }
 0x4ba   : > { %v8205_v29 = vmul.f32 %v16008_v39, %v8176_v47 }
 0x4bb   : > { %v11015_v53 = vpop.f32.mrb[138].mxu1 }
 0x4bc   : > { %v8608_v51 = vadd.f32 %v11015_v53, %v8202_v46  ;;  %v8602_v17 = vpop.f32.mrb[139].mxu1  ;;  %v8670_v43 = vpop.xlane.xlu0 %8669 }
 0x4bd   : > { %v8603_v34 = vadd.f32 %v8602_v17, %v8201_v37  ;;  %v8667_v41 = vpop.xlane.xlu1 %8666  ;;  %v8715_v20 = vmul.f32 0.03125, %v8670_v43 }
 0x4be   : > { %v8642_v44 = vmul.f32 0.033333335, %v8608_v51  ;;  %v8714_v63 = vmul.f32 0.03125, %v8667_v41 }
 0x4bf   : > { %v8641_v23 = vmul.f32 0.033333335, %v8603_v34  ;;  %v16139_v25 = vsub.f32 %v16036_v36, %v8715_v20 }
 0x4c0   : > { %v16115_v22 = vadd.f32 %v11865_v15, %v8642_v44  ;;  %v16142_v13 = vsub.f32 %v16041_v2, %v8714_v63 }
 0x4c1   : > { %v16118_v50 = vadd.f32 %v11866_v26, %v8641_v23  ;;  %v8676_v32 = vpop.xlane.xlu0 %8675  ;;  %v8673_v19 = vpop.xlane.xlu1 %8672  ;;  %v8747_v2 = vmul.f32 %v16139_v25, %v16139_v25 }
 0x4c2   : > { %v8698_v0 = vsel %vm820_vm0, %v16115_v22, 0.0  ;;  %v8717_v35 = vmul.f32 0.03125, %v8676_v32  ;;  %v8716_v39 = vmul.f32 0.03125, %v8673_v19 }
 0x4c3   : > { %8699 = vadd.xlane.f32.xlu0 %v8698_v0  ;;  %v8695_v59 = vsel %vm820_vm0, %v16118_v50, 0.0  ;;  %v8765_v31 = vsel %vm820_vm0, %v8747_v2, 0.0 }
 0x4c4   : > { %8696 = vadd.xlane.f32.xlu1 %v8695_v59  ;;  %v16151_v51 = vsub.f32 %v16056_v11, %v8717_v35  ;;  %v16158_v44 = vsub.f32 %v16053_v61, %v8716_v39  ;;  %v8746_v11 = vmul.f32 %v16142_v13, %v16142_v13 }
 0x4c6   : > { %v8749_v61 = vmul.f32 %v16151_v51, %v16151_v51  ;;  %v8762_v40 = vsel %vm820_vm0, %v8746_v11, 0.0 }
 0x4cc   : > { %v8682_v21 = vpop.xlane.xlu0 %8681 }
 0x4cd   : > { %v8679_v60 = vpop.xlane.xlu1 %8678  ;;  %v8719_v36 = vmul.f32 0.03125, %v8682_v21 }
 0x4ce   : > { %v8718_v23 = vmul.f32 0.03125, %v8679_v60 }
 0x4cf   : > { %v16165_v59 = vsub.f32 %v16073_v1, %v8719_v36 }
 0x4eb   : > { %v11018_v57 = vpop.f32.mrb[140].mxu1 }
 0x4ec   : > { %v8618_v4 = vadd.f32 %v11018_v57, %v8204_v10  ;;  %v8612_v62 = vpop.f32.mrb[141].mxu1  ;;  %v16171_v10 = vsub.f32 %v16076_v3, %v8718_v23 }
 0x4ed   : > { %v8613_v33 = vadd.f32 %v8612_v62, %v8203_v56  ;;  %v8748_v56 = vmul.f32 %v16158_v44, %v16158_v44  ;;  %v8751_v62 = vmul.f32 %v16165_v59, %v16165_v59 }
 0x4ee   : > { %v8644_v18 = vmul.f32 0.033333335, %v8618_v4  ;;  %v8771_v4 = vsel %vm820_vm0, %v8749_v61, 0.0 }
 0x4ef   : > { %v8643_v9 = vmul.f32 0.033333335, %v8613_v33  ;;  %v8768_v3 = vsel %vm820_vm0, %v8748_v56, 0.0  ;;  %v8750_v33 = vmul.f32 %v16171_v10, %v16171_v10 }
 0x4f0   : > { %v16127_v28 = vadd.f32 %v11867_v14, %v8644_v18 }
 0x4f1   : > { %v16130_v54 = vadd.f32 %v11868_v24, %v8643_v9  ;;  %v8774_v9 = vsel %vm820_vm0, %v8750_v33, 0.0 }
 0x4f2   : > { %v8704_v58 = vsel %vm820_vm0, %v16127_v28, 0.0 }
 0x4f3   : > { %8705 = vadd.xlane.f32.xlu0 %v8704_v58  ;;  %v8701_v48 = vsel %vm820_vm0, %v16130_v54, 0.0 }
 0x4f4   : > { %8702 = vadd.xlane.f32.xlu1 %v8701_v48 }
 0x503   : > { %v11021_v38 = vpop.f32.mrb[142].mxu1 }
 0x504   : > { %v8628_v45 = vadd.f32 %v11021_v38, %v8206_v52  ;;  %v8622_v30 = vpop.f32.mrb[143].mxu1 }
 0x505   : > { %v8623_v49 = vadd.f32 %v8622_v30, %v8205_v29 }
 0x506   : > { %v8646_v8 = vmul.f32 0.033333335, %v8628_v45 }
 0x507   : > { %v8645_v16 = vmul.f32 0.033333335, %v8623_v49 }
 0x508   : > { %v16145_v46 = vadd.f32 %v11869_v42, %v8646_v8 }
 0x509   : > { %v16148_v37 = vadd.f32 %v11870_v7, %v8645_v16  ;;  %v8688_v53 = vpop.xlane.xlu0 %8687  ;;  %v8685_v34 = vpop.xlane.xlu1 %8684 }
 0x50a   : > { %v8710_v17 = vsel %vm820_vm0, %v16145_v46, 0.0  ;;  %v8721_v26 = vmul.f32 0.03125, %v8688_v53  ;;  %v8720_v0 = vmul.f32 0.03125, %v8685_v34 }
 0x50b   : > { %8711 = vadd.xlane.f32.xlu0 %v8710_v17  ;;  %v8707_v15 = vsel %vm820_vm0, %v16148_v37, 0.0 }
 0x50c   : > { %8708 = vadd.xlane.f32.xlu1 %v8707_v15  ;;  %v16177_v57 = vsub.f32 %v16085_v12, %v8721_v26  ;;  %v16180_v1 = vsub.f32 %v16088_v5, %v8720_v0  ;;  %v8777_v5 = vsel %vm820_vm0, %v8751_v62, 0.0 }
 0x50e   : > { %v8753_v18 = vmul.f32 %v16177_v57, %v16177_v57  ;;  %v8752_v12 = vmul.f32 %v16180_v1, %v16180_v1 }
 0x50f   : > { %8766 = vadd.xlane.f32.xlu0 %v8765_v31 }
 0x510   : > { %8763 = vadd.xlane.f32.xlu1 %v8762_v40  ;;  %v8783_v14 = vsel %vm820_vm0, %v8753_v18, 0.0  ;;  %v8780_v24 = vsel %vm820_vm0, %v8752_v12, 0.0 }
 0x513   : > { %8772 = vadd.xlane.f32.xlu0 %v8771_v4 }
 0x514   : > { %8769 = vadd.xlane.f32.xlu1 %v8768_v3 }
 0x517   : > { %8778 = vadd.xlane.f32.xlu0 %v8777_v5 }
 0x518   : > { %8775 = vadd.xlane.f32.xlu1 %v8774_v9 }
 0x51b   : > { %8784 = vadd.xlane.f32.xlu0 %v8783_v14 }
 0x51c   : > { %8781 = vadd.xlane.f32.xlu1 %v8780_v24 }
 0x538   : > { %v8694_v58 = vpop.xlane.xlu0 %8693 }
 0x539   : > { %v8723_v48 = vmul.f32 0.03125, %v8694_v58  ;;  %v8691_v6 = vpop.xlane.xlu1 %8690 }
 0x53a   : > { %v8722_v47 = vmul.f32 0.03125, %v8691_v6 }
 0x53b   : > { %v16197_v43 = vsub.f32 %v16103_v27, %v8723_v48 }
 0x53c   : > { %v16200_v41 = vsub.f32 %v16106_v55, %v8722_v47 }
 0x53d   : > { %v8755_v52 = vmul.f32 %v16197_v43, %v16197_v43 }
 0x53e   : > { %v8754_v29 = vmul.f32 %v16200_v41, %v16200_v41 }
 0x53f   : > { %v8789_v32 = vsel %vm820_vm0, %v8755_v52, 0.0 }
 0x540   : > { %8790 = vadd.xlane.f32.xlu0 %v8789_v32  ;;  %v8786_v20 = vsel %vm820_vm0, %v8754_v29, 0.0 }
 0x541   : > { %8787 = vadd.xlane.f32.xlu1 %v8786_v20  ;;  %v16247_v20 = vld [vmem:[%s16766_s11] ss:$0 sm:$0xff] }
 0x550   : > { %v8700_v19 = vpop.xlane.xlu0 %8699 }
 0x551   : > { %v8725_v63 = vmul.f32 0.03125, %v8700_v19  ;;  %v8697_v38 = vpop.xlane.xlu1 %8696 }
 0x552   : > { %v8724_v27 = vmul.f32 0.03125, %v8697_v38 }
 0x553   : > { %v16209_v45 = vsub.f32 %v16115_v22, %v8725_v63 }
 0x554   : > { %v16212_v55 = vsub.f32 %v16118_v50, %v8724_v27 }
 0x555   : > { %v8757_v30 = vmul.f32 %v16209_v45, %v16209_v45 }
 0x556   : > { %v8756_v21 = vmul.f32 %v16212_v55, %v16212_v55 }
 0x557   : > { %v8795_v49 = vsel %vm820_vm0, %v8757_v30, 0.0 }
 0x558   : > { %8796 = vadd.xlane.f32.xlu0 %v8795_v49  ;;  %v8792_v35 = vsel %vm820_vm0, %v8756_v21, 0.0  ;;  %v16254_v21 = vld [vmem:[%s16767_s12] ss:$0 sm:$0xff] }
 0x559   : > { %8793 = vadd.xlane.f32.xlu1 %v8792_v35 }
 0x580   : > { %v8706_v60 = vpop.xlane.xlu0 %8705 }
 0x581   : > { %v8727_v8 = vmul.f32 0.03125, %v8706_v60  ;;  %v8703_v39 = vpop.xlane.xlu1 %8702 }
 0x582   : > { %v8726_v22 = vmul.f32 0.03125, %v8703_v39 }
 0x583   : > { %v16221_v16 = vsub.f32 %v16127_v28, %v8727_v8 }
 0x584   : > { %v16224_v50 = vsub.f32 %v16130_v54, %v8726_v22 }
 0x585   : > { %v8759_v42 = vmul.f32 %v16221_v16, %v16221_v16 }
 0x586   : > { %v8758_v7 = vmul.f32 %v16224_v50, %v16224_v50 }
 0x587   : > { %v8801_v53 = vsel %vm820_vm0, %v8759_v42, 0.0 }
 0x588   : > { %8802 = vadd.xlane.f32.xlu0 %v8801_v53  ;;  %v8798_v36 = vsel %vm820_vm0, %v8758_v7, 0.0 }
 0x589   : > { %8799 = vadd.xlane.f32.xlu1 %v8798_v36 }
 0x598   : > { %v8712_v17 = vpop.xlane.xlu0 %8711 }
 0x599   : > { %v8729_v2 = vmul.f32 0.03125, %v8712_v17  ;;  %v8709_v34 = vpop.xlane.xlu1 %8708 }
 0x59a   : > { %v8728_v28 = vmul.f32 0.03125, %v8709_v34 }
 0x59b   : > { %v16233_v23 = vsub.f32 %v16145_v46, %v8729_v2 }
 0x59c   : > { %v16236_v54 = vsub.f32 %v16148_v37, %v8728_v28  ;;  %v8767_v15 = vpop.xlane.xlu0 %8766 }
 0x59d   : > { %v8811_v11 = vmul.f32 0.03125, %v8767_v15  ;;  %v8764_v26 = vpop.xlane.xlu1 %8763  ;;  %v8761_v0 = vmul.f32 %v16233_v23, %v16233_v23 }
 0x59e   : > { %v8810_v31 = vmul.f32 0.03125, %v8764_v26  ;;  %v8760_v61 = vmul.f32 %v16236_v54, %v16236_v54 }
 0x59f   : > { %v8827_v40 = vadd.f32 1e-05, %v8811_v11  ;;  %v8807_v56 = vsel %vm820_vm0, %v8761_v0, 0.0 }
 0x5a0   : > { %v8826_v4 = vadd.f32 1e-05, %v8810_v31  ;;  %8808 = vadd.xlane.f32.xlu0 %v8807_v56  ;;  %v8773_v46 = vpop.xlane.xlu0 %8772  ;;  %v8804_v62 = vsel %vm820_vm0, %v8760_v61, 0.0  ;;  %v9203_v56 = vld [vmem:[%s16770_s15 + $0x8] sm:$0xff] }
 0x5a1   : > { %11730 = vrsqrt.f32 %v8827_v40  ;;  %v8813_v37 = vmul.f32 0.03125, %v8773_v46  ;;  %8805 = vadd.xlane.f32.xlu1 %v8804_v62  ;;  %v8770_v3 = vpop.xlane.xlu1 %8769  ;;  %v9205_v62 = vld [vmem:[%s16770_s15 + $0x18] sm:$0xff] }
 0x5a2   : > { %11732 = vrsqrt.f32 %v8826_v4  ;;  %v8812_v33 = vmul.f32 0.03125, %v8770_v3  ;;  %v9204_v4 = vld [vmem:[%s16770_s15 + $0x10] sm:$0xff]  ;;  %v9206_v3 = vld [vmem:[%s16770_s15 + $0x20] sm:$0xff] }
 0x5a3   : > { %v8829_v18 = vadd.f32 1e-05, %v8813_v37  ;;  %v11162_v37 = vpack.c.bf16 %v9205_v62, %v9204_v4  ;;  %v9214_v4 = vld [vmem:[%s16770_s15 + $0x60] sm:$0xff] }
 0x5a4   : > { %v8828_v12 = vadd.f32 1e-05, %v8812_v33  ;;  %v8779_v5 = vpop.xlane.xlu0 %8778  ;;  %v9207_v33 = vld [vmem:[%s16770_s15 + $0x28] sm:$0xff] }
 0x5a5   : > { %11734 = vrsqrt.f32 %v8829_v18  ;;  %v8815_v9 = vmul.f32 0.03125, %v8779_v5  ;;  %v8776_v14 = vpop.xlane.xlu1 %8775  ;;  %v11166_v18 = vpack.c.bf16 %v9207_v33, %v9206_v3  ;;  %v9217_v3 = vld [vmem:[%s16770_s15 + $0x78] sm:$0xff] }
 0x5a6   : > { %11736 = vrsqrt.f32 %v8828_v12  ;;  %v8814_v24 = vmul.f32 0.03125, %v8776_v14 }
 0x5a7   : > { %v8831_v58 = vadd.f32 1e-05, %v8815_v9 }
 0x5a8   : > { %v8830_v48 = vadd.f32 1e-05, %v8814_v24  ;;  %v8785_v6 = vpop.xlane.xlu0 %8784 }
 0x5a9   : > { %11738 = vrsqrt.f32 %v8831_v58  ;;  %v8817_v47 = vmul.f32 0.03125, %v8785_v6  ;;  %v8782_v52 = vpop.xlane.xlu1 %8781 }
 0x5aa   : > { %11740 = vrsqrt.f32 %v8830_v48  ;;  %v8816_v29 = vmul.f32 0.03125, %v8782_v52 }
 0x5ab   : > { %v11731_v32 = vpop.eup %11730  ;;  %v8833_v19 = vadd.f32 1e-05, %v8817_v47 }
 0x5ac   : > { %v11733_v63 = vpop.eup %11732  ;;  %v8859_v38 = vmul.f32 %v11731_v32, %v16139_v25  ;;  %v8832_v27 = vadd.f32 1e-05, %v8816_v29 }
 0x5ad   : > { %11742 = vrsqrt.f32 %v8833_v19  ;;  %v8858_v30 = vmul.f32 %v11733_v63, %v16142_v13 }
 0x5ae   : > { %v8881_v49 = vmul.f32 %v16247_v20, %v8859_v38  ;;  %11744 = vrsqrt.f32 %v8832_v27 }
 0x5af   : > { %v11735_v35 = vpop.eup %11734  ;;  %v8880_v60 = vmul.f32 %v16247_v20, %v8858_v30 }
 0x5b0   : > { %v11737_v8 = vpop.eup %11736  ;;  %v8861_v39 = vmul.f32 %v11735_v35, %v16151_v51  ;;  %v16264_v13 = vadd.f32 %v16254_v21, %v8881_v49 }
 0x5b1   : > { %v16260_v25 = vadd.f32 %v16254_v21, %v8880_v60  ;;  %v8860_v22 = vmul.f32 %v11737_v8, %v16158_v44 }
 0x5b2   : > { %v8883_v42 = vmul.f32 %v16247_v20, %v8861_v39 }
 0x5b3   : > { %v11739_v7 = vpop.eup %11738  ;;  %11030 = vmatprep.mubr.msk.f32.mxu0 %vm820_vm0, %v16260_v25  ;;  %v8882_v53 = vmul.f32 %v16247_v20, %v8860_v22 }
 0x5b4   : > { %v11741_v36 = vpop.eup %11740  ;;  %11031 = vmatmul.mubr.msk.f32.vlgmr.msra.gmra.mrb[144].mxu0 %vm820_vm0, %v16264_v13  ;;  %v8863_v51 = vmul.f32 %v11739_v7, %v16165_v59  ;;  %v16278_v2 = vadd.f32 %v16254_v21, %v8883_v42 }
 0x5b5   : > { %v16274_v17 = vadd.f32 %v16254_v21, %v8882_v53  ;;  %v8862_v44 = vmul.f32 %v11741_v36, %v16171_v10 }
 0x5b6   : > { %v8885_v34 = vmul.f32 %v16247_v20, %v8863_v51 }
 0x5b7   : > { %v11743_v28 = vpop.eup %11742  ;;  %11033 = vmatprep.mubr.msk.f32.mxu0 %vm820_vm0, %v16274_v17  ;;  %v8884_v15 = vmul.f32 %v16247_v20, %v8862_v44 }
 0x5b8   : > { %v11745_v11 = vpop.eup %11744  ;;  %11034 = vmatmul.mubr.msk.f32.gmra.mrb[146].mxu0 %vm820_vm0, %v16278_v2  ;;  %v8865_v59 = vmul.f32 %v11743_v28, %v16177_v57  ;;  %v16292_v0 = vadd.f32 %v16254_v21, %v8885_v34 }
 0x5b9   : > { %v16288_v26 = vadd.f32 %v16254_v21, %v8884_v15  ;;  %v8864_v10 = vmul.f32 %v11745_v11, %v16180_v1  ;;  %v9202_v1 = vld [vmem:[%s16770_s15] sm:$0xff] }
 0x5ba   : > { %v8887_v31 = vmul.f32 %v16247_v20, %v8865_v59  ;;  %v11158_v46 = vpack.c.bf16 %v9203_v56, %v9202_v1  ;;  %v9210_v59 = vld [vmem:[%s16770_s15 + $0x40] sm:$0xff]  ;;  %v9213_v1 = vld [vmem:[%s16770_s15 + $0x58] sm:$0xff] }
 0x5bb   : > { %11036 = vmatprep.mubr.msk.f32.mxu0 %vm820_vm0, %v16288_v26  ;;  %v8886_v61 = vmul.f32 %v16247_v20, %v8864_v10  ;;  %v9211_v10 = vld [vmem:[%s16770_s15 + $0x48] sm:$0xff] }
 0x5bc   : > { %11037 = vmatmul.mubr.msk.f32.gmra.mrb[148].mxu0 %vm820_vm0, %v16292_v0  ;;  %v16304_v40 = vadd.f32 %v16254_v21, %v8887_v31  ;;  %11159 = vmatprep.subr.bf16.mxu0 %v11158_v46  ;;  %v11174_v31 = vpack.c.bf16 %v9211_v10, %v9210_v59 }
 0x5bd   : > { %v16301_v57 = vadd.f32 %v16254_v21, %v8886_v61  ;;  %11190 = vmatprep.subr.bf16.mxu1 %v11158_v46  ;;  %11161 = vmatpush3.bf16.msra.mxu0 %v11158_v46  ;;  %v9212_v61 = vld [vmem:[%s16770_s15 + $0x50] sm:$0xff] }
 0x5be   : > { %11198 = vmatpush3.bf16.msra.mxu1 %v11158_v46  ;;  %11163 = vmatprep.subr.bf16.mxu0 %v11162_v37  ;;  %v11178_v56 = vpack.c.bf16 %v9213_v1, %v9212_v61  ;;  %v9215_v46 = vld [vmem:[%s16770_s15 + $0x68] sm:$0xff] }
 0x5bf   : > { %11039 = vmatprep.mubr.msk.f32.mxu0 %vm820_vm0, %v16301_v57  ;;  %11191 = vmatprep.subr.bf16.mxu1 %v11162_v37  ;;  %v11182_v62 = vpack.c.bf16 %v9215_v46, %v9214_v4 }
 0x5c0   : > { %11040 = vmatmul.mubr.msk.f32.gmra.mrb[150].mxu0 %vm820_vm0, %v16304_v40 }
 0x5c1   : > { %11165 = vmatpush3.bf16.msra.mxu0 %v11162_v37 }
 0x5c2   : > { %11199 = vmatpush3.bf16.msra.mxu1 %v11162_v37  ;;  %11167 = vmatprep.subr.bf16.mxu0 %v11166_v18  ;;  %v9216_v37 = vld [vmem:[%s16770_s15 + $0x70] sm:$0xff] }
 0x5c3   : > { %11192 = vmatprep.subr.bf16.mxu1 %v11166_v18 }
 0x5c5   : > { %11169 = vmatpush3.bf16.msra.mxu0 %v11166_v18 }
 0x5c6   : > { %11200 = vmatpush3.bf16.msra.mxu1 %v11166_v18  ;;  %v11186_v18 = vpack.c.bf16 %v9217_v3, %v9216_v37 }
 0x5cd   : > { %v8791_v12 = vpop.xlane.xlu0 %8790 }
 0x5ce   : > { %v8819_v5 = vmul.f32 0.03125, %v8791_v12  ;;  %v8788_v9 = vpop.xlane.xlu1 %8787 }
 0x5cf   : > { %v8818_v14 = vmul.f32 0.03125, %v8788_v9 }
 0x5d0   : > { %v8835_v24 = vadd.f32 1e-05, %v8819_v5 }
 0x5d1   : > { %v8834_v58 = vadd.f32 1e-05, %v8818_v14 }
 0x5d2   : > { %11746 = vrsqrt.f32 %v8835_v24 }
 0x5d3   : > { %11748 = vrsqrt.f32 %v8834_v58 }
 0x5dc   : > { %v11747_v48 = vpop.eup %11746 }
 0x5dd   : > { %v11749_v6 = vpop.eup %11748  ;;  %v8867_v47 = vmul.f32 %v11747_v48, %v16197_v43 }
 0x5de   : > { %v8866_v52 = vmul.f32 %v11749_v6, %v16200_v41 }
 0x5df   : > { %v8889_v29 = vmul.f32 %v16247_v20, %v8867_v47 }
 0x5e0   : > { %v8888_v32 = vmul.f32 %v16247_v20, %v8866_v52 }
 0x5e1   : > { %v16336_v63 = vadd.f32 %v16254_v21, %v8889_v29 }
 0x5e2   : > { %v16333_v19 = vadd.f32 %v16254_v21, %v8888_v32 }
 0x5e4   : > { %11042 = vmatprep.mubr.msk.f32.mxu0 %vm820_vm0, %v16333_v19 }
 0x5e5   : > { %11043 = vmatmul.mubr.msk.f32.gmra.mrb[152].mxu0 %vm820_vm0, %v16336_v63  ;;  %v8797_v38 = vpop.xlane.xlu0 %8796 }
 0x5e6   : > { %v8821_v43 = vmul.f32 0.03125, %v8797_v38  ;;  %v8794_v27 = vpop.xlane.xlu1 %8793 }
 0x5e7   : > { %v8820_v41 = vmul.f32 0.03125, %v8794_v27 }
 0x5e8   : > { %v8837_v30 = vadd.f32 1e-05, %v8821_v43 }
 0x5e9   : > { %v8836_v49 = vadd.f32 1e-05, %v8820_v41 }
 0x5ea   : > { %11750 = vrsqrt.f32 %v8837_v30 }
 0x5eb   : > { %11752 = vrsqrt.f32 %v8836_v49 }
 0x5f4   : > { %v11751_v35 = vpop.eup %11750 }
 0x5f5   : > { %v11753_v60 = vpop.eup %11752  ;;  %v8869_v8 = vmul.f32 %v11751_v35, %v16209_v45  ;;  %v9208_v45 = vld [vmem:[%s16770_s15 + $0x30] sm:$0xff] }
 0x5f6   : > { %v8868_v39 = vmul.f32 %v11753_v60, %v16212_v55  ;;  %v9209_v55 = vld [vmem:[%s16770_s15 + $0x38] sm:$0xff] }
 0x5f7   : > { %v8891_v22 = vmul.f32 %v16247_v20, %v8869_v8  ;;  %v11170_v34 = vpack.c.bf16 %v9209_v55, %v9208_v45 }
 0x5f8   : > { %v8890_v42 = vmul.f32 %v16247_v20, %v8868_v39 }
 0x5f9   : > { %v16350_v53 = vadd.f32 %v16254_v21, %v8891_v22  ;;  %11171 = vmatprep.subr.bf16.mxu0 %v11170_v34  ;;  %11193 = vmatprep.subr.bf16.mxu1 %v11170_v34 }
 0x5fa   : > { %v16347_v7 = vadd.f32 %v16254_v21, %v8890_v42  ;;  %11173 = vmatpush3.bf16.msra.mxu0 %v11170_v34  ;;  %11201 = vmatpush3.bf16.msra.mxu1 %v11170_v34 }
 0x5fb   : > { %11175 = vmatprep.subr.bf16.mxu0 %v11174_v31  ;;  %11194 = vmatprep.subr.bf16.mxu1 %v11174_v31 }
 0x5fc   : > { %11045 = vmatprep.mubr.msk.f32.mxu0 %vm820_vm0, %v16347_v7 }
 0x5fd   : > { %11046 = vmatmul.mubr.msk.f32.gmra.mrb[154].mxu0 %vm820_vm0, %v16350_v53 }
 0x5fe   : > { %11177 = vmatpush3.bf16.msra.mxu0 %v11174_v31  ;;  %11202 = vmatpush3.bf16.msra.mxu1 %v11174_v31 }
 0x5ff   : > { %11179 = vmatprep.subr.bf16.mxu0 %v11178_v56  ;;  %11195 = vmatprep.subr.bf16.mxu1 %v11178_v56 }
 0x602   : > { %11181 = vmatpush3.bf16.msra.mxu0 %v11178_v56  ;;  %11203 = vmatpush3.bf16.msra.mxu1 %v11178_v56 }
 0x603   : > { %11183 = vmatprep.subr.bf16.mxu0 %v11182_v62  ;;  %11196 = vmatprep.subr.bf16.mxu1 %v11182_v62 }
 0x606   : > { %11185 = vmatpush3.bf16.msra.mxu0 %v11182_v62  ;;  %11204 = vmatpush3.bf16.msra.mxu1 %v11182_v62 }
 0x607   : > { %11187 = vmatprep.subr.bf16.mxu0 %v11186_v18  ;;  %11197 = vmatprep.subr.bf16.mxu1 %v11186_v18 }
 0x60a   : > { %11189 = vmatpush3.bf16.msra.mxu0 %v11186_v18  ;;  %11205 = vmatpush3.bf16.msra.mxu1 %v11186_v18 }
 0x615   : > { %v8803_v36 = vpop.xlane.xlu0 %8802 }
 0x616   : > { %v8823_v51 = vmul.f32 0.03125, %v8803_v36  ;;  %v8800_v44 = vpop.xlane.xlu1 %8799 }
 0x617   : > { %v8822_v28 = vmul.f32 0.03125, %v8800_v44 }
 0x618   : > { %v8839_v15 = vadd.f32 1e-05, %v8823_v51 }
 0x619   : > { %v8838_v11 = vadd.f32 1e-05, %v8822_v28 }
 0x61a   : > { %11754 = vrsqrt.f32 %v8839_v15 }
 0x61b   : > { %11756 = vrsqrt.f32 %v8838_v11 }
 0x624   : > { %v11755_v33 = vpop.eup %11754 }
 0x625   : > { %v11757_v12 = vpop.eup %11756  ;;  %v8871_v5 = vmul.f32 %v11755_v33, %v16221_v16 }
 0x626   : > { %v8870_v9 = vmul.f32 %v11757_v12, %v16224_v50 }
 0x627   : > { %v8893_v14 = vmul.f32 %v16247_v20, %v8871_v5 }
 0x628   : > { %v8892_v24 = vmul.f32 %v16247_v20, %v8870_v9 }
 0x629   : > { %v16394_v48 = vadd.f32 %v16254_v21, %v8893_v14 }
 0x62a   : > { %v16391_v58 = vadd.f32 %v16254_v21, %v8892_v24 }
 0x62c   : > { %11048 = vmatprep.mubr.msk.f32.mxu0 %vm820_vm0, %v16391_v58 }
 0x62d   : > { %11049 = vmatmul.mubr.msk.f32.gmra.mrb[156].mxu0 %vm820_vm0, %v16394_v48  ;;  %v8809_v16 = vpop.xlane.xlu0 %8808 }
 0x62e   : > { %v8825_v50 = vmul.f32 0.03125, %v8809_v16  ;;  %v8806_v6 = vpop.xlane.xlu1 %8805 }
 0x62f   : > { %v8824_v47 = vmul.f32 0.03125, %v8806_v6 }
 0x630   : > { %v8841_v52 = vadd.f32 1e-05, %v8825_v50 }
 0x631   : > { %v8840_v29 = vadd.f32 1e-05, %v8824_v47 }
 0x632   : > { %11758 = vrsqrt.f32 %v8841_v52 }
 0x633   : > { %11760 = vrsqrt.f32 %v8840_v29 }
 0x63c   : > { %v11759_v32 = vpop.eup %11758 }
 0x63d   : > { %v11761_v38 = vpop.eup %11760  ;;  %v8873_v43 = vmul.f32 %v11759_v32, %v16233_v23  ;;  %v16417_v23 = vld [vmem:[%s16769_s14] ss:$0 sm:$0xff] }
 0x63e   : > { %v8872_v27 = vmul.f32 %v11761_v38, %v16236_v54 }
 0x63f   : > { %v8895_v41 = vmul.f32 %v16247_v20, %v8873_v43 }
 0x640   : > { %v8894_v30 = vmul.f32 %v16247_v20, %v8872_v27 }
 0x641   : > { %v16408_v35 = vadd.f32 %v16254_v21, %v8895_v41 }
 0x642   : > { %v16405_v49 = vadd.f32 %v16254_v21, %v8894_v30 }
 0x644   : > { %11051 = vmatprep.mubr.msk.f32.mxu0 %vm820_vm0, %v16405_v49 }
 0x645   : > { %11052 = vmatmul.mubr.msk.f32.gmra.mrb[158].mxu0 %vm820_vm0, %v16408_v35 }
 0x687   : > { %v11032_v54 = vpop.f32.mrb[144].mxu0 }
 0x688   : > { %v9049_v20 = vadd.f32 %v11032_v54, %v16417_v23  ;;  %v9043_v60 = vpop.f32.mrb[145].mxu0 }
 0x689   : > { %v9044_v8 = vadd.f32 %v16417_v23, %v9043_v60 }
 0x68a   : > { %v9139_v39 = vmul.f32 0.70710677, %v9049_v20  ;;  %v9123_v18 = vmul.f32 0.5, %v9049_v20 }
 0x68b   : > { %v9138_v21 = vmul.f32 0.70710677, %v9044_v8  ;;  %v11035_v22 = vpop.f32.mrb[146].mxu0  ;;  %v9122_v3 = vmul.f32 0.5, %v9044_v8 }
 0x68c   : > { %11762 = verf.f32 %v9139_v39  ;;  %v9059_v42 = vadd.f32 %v11035_v22, %v16417_v23  ;;  %v9053_v36 = vpop.f32.mrb[147].mxu0 }
 0x68d   : > { %11764 = verf.f32 %v9138_v21  ;;  %v9054_v45 = vadd.f32 %v16417_v23, %v9053_v36 }
 0x68e   : > { %v9141_v55 = vmul.f32 0.70710677, %v9059_v42  ;;  %v9125_v6 = vmul.f32 0.5, %v9059_v42 }
 0x68f   : > { %v9140_v51 = vmul.f32 0.70710677, %v9054_v45  ;;  %v11038_v44 = vpop.f32.mrb[148].mxu0  ;;  %v9124_v16 = vmul.f32 0.5, %v9054_v45  ;;  %v11880_v45 = vmov 0  }
 0x690   : > { %11766 = verf.f32 %v9141_v55  ;;  %v9069_v34 = vadd.f32 %v11038_v44, %v16417_v23  ;;  %v9063_v28 = vpop.f32.mrb[149].mxu0  ;;  %11216 = vset.pattern.permute.xlu1 %v11880_v45  ;;  %v9640_v55 = vld [vmem:[%s16431_s1] sm:$0xff]  ;;  %11217 = vset.pattern.permute.xlu0 %v11880_v45 }
 0x691   : > { %11768 = verf.f32 %v9140_v51  ;;  %v9064_v15 = vadd.f32 %v16417_v23, %v9063_v28  ;;  %9658 = vperm.xlu1 %11216, %v9640_v55  }
 0x692   : > { %v9143_v11 = vmul.f32 0.70710677, %v9069_v34  ;;  %v9127_v41 = vmul.f32 0.5, %v9069_v34 }
 0x693   : > { %v9142_v59 = vmul.f32 0.70710677, %v9064_v15  ;;  %v11041_v10 = vpop.f32.mrb[150].mxu0  ;;  %v9126_v43 = vmul.f32 0.5, %v9064_v15 }
 0x694   : > { %11770 = verf.f32 %v9143_v11  ;;  %v9079_v31 = vadd.f32 %v11041_v10, %v16417_v23  ;;  %v9073_v61 = vpop.f32.mrb[151].mxu0 }
 0x695   : > { %11772 = verf.f32 %v9142_v59  ;;  %v9074_v1 = vadd.f32 %v16417_v23, %v9073_v61 }
 0x696   : > { %v11763_v56 = vpop.eup %11762  ;;  %v9145_v4 = vmul.f32 0.70710677, %v9079_v31  ;;  %v9129_v22 = vmul.f32 0.5, %v9079_v31 }
 0x697   : > { %v11765_v46 = vpop.eup %11764  ;;  %v9171_v62 = vadd.f32 1.0, %v11763_v56  ;;  %v9144_v37 = vmul.f32 0.70710677, %v9074_v1  ;;  %v9128_v39 = vmul.f32 0.5, %v9074_v1 }
 0x698   : > { %v9170_v33 = vadd.f32 1.0, %v11765_v46  ;;  %11774 = verf.f32 %v9145_v4 }
 0x699   : > { %11776 = verf.f32 %v9144_v37  ;;  %v9187_v14 = vmul.f32 %v9171_v62, %v9123_v18 }
 0x69a   : > { %v11767_v12 = vpop.eup %11766  ;;  %v9186_v5 = vmul.f32 %v9170_v33, %v9122_v3 }
 0x69b   : > { %v11769_v9 = vpop.eup %11768  ;;  %v9173_v24 = vadd.f32 1.0, %v11767_v12 }
 0x69c   : > { %v9172_v50 = vadd.f32 1.0, %v11769_v9  ;;  %11086 = vmatprep.mubr.f32.mxu0 %v9186_v5 }
 0x69d   : > { %11087 = vmatmul.mubr.f32.vlgmr.msra.gmra.mrb[160].mxu0 %v9187_v14  ;;  %v9189_v32 = vmul.f32 %v9173_v24, %v9125_v6 }
 0x69e   : > { %v11771_v47 = vpop.eup %11770  ;;  %v9188_v52 = vmul.f32 %v9172_v50, %v9124_v16 }
 0x69f   : > { %v11773_v29 = vpop.eup %11772  ;;  %v9175_v38 = vadd.f32 1.0, %v11771_v47 }
 0x6a0   : > { %v9174_v27 = vadd.f32 1.0, %v11773_v29  ;;  %11089 = vmatprep.mubr.f32.mxu1 %v9188_v52 }
 0x6a1   : > { %11090 = vmatmul.mubr.f32.vlgmr.msra.gmra.mrb[144].mxu1 %v9189_v32  ;;  %v9191_v8 = vmul.f32 %v9175_v38, %v9127_v41 }
 0x6a2   : > { %v11775_v30 = vpop.eup %11774  ;;  %v9190_v54 = vmul.f32 %v9174_v27, %v9126_v43 }
 0x6a3   : > { %v11777_v20 = vpop.eup %11776  ;;  %v9177_v60 = vadd.f32 1.0, %v11775_v30 }
 0x6a4   : > { %v9176_v21 = vadd.f32 1.0, %v11777_v20  ;;  %11092 = vmatprep.mubr.f32.mxu1 %v9190_v54 }
 0x6a5   : > { %11093 = vmatmul.mubr.f32.gmra.mrb[146].mxu1 %v9191_v8  ;;  %v9193_v36 = vmul.f32 %v9177_v60, %v9129_v22 }
 0x6a6   : > { %v9192_v42 = vmul.f32 %v9176_v21, %v9128_v39 }
 0x6a8   : > { %11095 = vmatprep.mubr.f32.mxu1 %v9192_v42 }
 0x6a9   : > { %11096 = vmatmul.mubr.f32.gmra.mrb[148].mxu1 %v9193_v36 }
 0x6b8   : > { %v11044_v51 = vpop.f32.mrb[152].mxu0 }
 0x6b9   : > { %v9089_v44 = vadd.f32 %v11044_v51, %v16417_v23  ;;  %v9083_v34 = vpop.f32.mrb[153].mxu0 }
 0x6ba   : > { %v9084_v28 = vadd.f32 %v16417_v23, %v9083_v34 }
 0x6bb   : > { %v9147_v15 = vmul.f32 0.70710677, %v9089_v44  ;;  %v9131_v56 = vmul.f32 0.5, %v9089_v44 }
 0x6bc   : > { %v9146_v11 = vmul.f32 0.70710677, %v9084_v28  ;;  %v9130_v61 = vmul.f32 0.5, %v9084_v28 }
 0x6bd   : > { %11778 = verf.f32 %v9147_v15 }
 0x6be   : > { %11780 = verf.f32 %v9146_v11 }
 0x6c7   : > { %v11779_v59 = vpop.eup %11778 }
 0x6c8   : > { %v11781_v10 = vpop.eup %11780  ;;  %v9179_v31 = vadd.f32 1.0, %v11779_v59 }
 0x6c9   : > { %v9178_v1 = vadd.f32 1.0, %v11781_v10 }
 0x6ca   : > { %v9195_v46 = vmul.f32 %v9179_v31, %v9131_v56 }
 0x6cb   : > { %v9194_v4 = vmul.f32 %v9178_v1, %v9130_v61  ;;  %v16445_v61 = vld [vmem:[%s16771_s16] ss:$0 sm:$0xff] }
 0x6cd   : > { %11098 = vmatprep.mubr.f32.mxu1 %v9194_v4 }
 0x6ce   : > { %11099 = vmatmul.mubr.f32.gmra.mrb[150].mxu1 %v9195_v46 }
 0x6d0   : > { %v11047_v62 = vpop.f32.mrb[154].mxu0 }
 0x6d1   : > { %v9099_v37 = vadd.f32 %v11047_v62, %v16417_v23  ;;  %v9093_v3 = vpop.f32.mrb[155].mxu0 }
 0x6d2   : > { %v9094_v33 = vadd.f32 %v16417_v23, %v9093_v3 }
 0x6d3   : > { %v9149_v18 = vmul.f32 0.70710677, %v9099_v37  ;;  %v9133_v50 = vmul.f32 0.5, %v9099_v37 }
 0x6d4   : > { %v9148_v12 = vmul.f32 0.70710677, %v9094_v33  ;;  %v9132_v24 = vmul.f32 0.5, %v9094_v33 }
 0x6d5   : > { %11782 = verf.f32 %v9149_v18 }
 0x6d6   : > { %11784 = verf.f32 %v9148_v12 }
 0x6df   : > { %v11783_v5 = vpop.eup %11782 }
 0x6e0   : > { %v11785_v9 = vpop.eup %11784  ;;  %v9181_v14 = vadd.f32 1.0, %v11783_v5 }
 0x6e1   : > { %v9180_v16 = vadd.f32 1.0, %v11785_v9 }
 0x6e2   : > { %v9197_v47 = vmul.f32 %v9181_v14, %v9133_v50 }
 0x6e3   : > { %v9196_v6 = vmul.f32 %v9180_v16, %v9132_v24 }
 0x6e5   : > { %11101 = vmatprep.mubr.f32.mxu1 %v9196_v6 }
 0x6e6   : > { %11102 = vmatmul.mubr.f32.gmra.mrb[152].mxu1 %v9197_v47 }
 0x700   : > { %v11050_v52 = vpop.f32.mrb[156].mxu0 }
 0x701   : > { %v9109_v29 = vadd.f32 %v11050_v52, %v16417_v23  ;;  %v9103_v32 = vpop.f32.mrb[157].mxu0 }
 0x702   : > { %v9104_v38 = vadd.f32 %v16417_v23, %v9103_v32 }
 0x703   : > { %v9151_v43 = vmul.f32 0.70710677, %v9109_v29  ;;  %v9135_v8 = vmul.f32 0.5, %v9109_v29 }
 0x704   : > { %v9150_v27 = vmul.f32 0.70710677, %v9104_v38  ;;  %v9134_v20 = vmul.f32 0.5, %v9104_v38 }
 0x705   : > { %11786 = verf.f32 %v9151_v43 }
 0x706   : > { %11788 = verf.f32 %v9150_v27 }
 0x70f   : > { %v11787_v41 = vpop.eup %11786 }
 0x710   : > { %v11789_v30 = vpop.eup %11788  ;;  %v9183_v54 = vadd.f32 1.0, %v11787_v41 }
 0x711   : > { %v9182_v60 = vadd.f32 1.0, %v11789_v30 }
 0x712   : > { %v9199_v21 = vmul.f32 %v9183_v54, %v9135_v8 }
 0x713   : > { %v9198_v39 = vmul.f32 %v9182_v60, %v9134_v20 }
 0x715   : > { %11104 = vmatprep.mubr.f32.mxu1 %v9198_v39 }
 0x716   : > { %11105 = vmatmul.mubr.f32.gmra.mrb[154].mxu1 %v9199_v21 }
 0x718   : > { %v11053_v22 = vpop.f32.mrb[158].mxu0 }
 0x719   : > { %v9119_v42 = vadd.f32 %v11053_v22, %v16417_v23  ;;  %v9113_v36 = vpop.f32.mrb[159].mxu0 }
 0x71a   : > { %v9114_v45 = vadd.f32 %v16417_v23, %v9113_v36 }
 0x71b   : > { %v9153_v55 = vmul.f32 0.70710677, %v9119_v42  ;;  %v9137_v59 = vmul.f32 0.5, %v9119_v42 }
 0x71c   : > { %v9152_v51 = vmul.f32 0.70710677, %v9114_v45  ;;  %v9136_v15 = vmul.f32 0.5, %v9114_v45  ;;  %v16495_v45 = vpop.permute.xlu1 %9658 }
 0x71d   : > { %11790 = verf.f32 %v9153_v55 }
 0x71e   : > { %11792 = verf.f32 %v9152_v51 }
 0x727   : > { %v11791_v44 = vpop.eup %11790 }
 0x728   : > { %v11793_v34 = vpop.eup %11792  ;;  %v9185_v28 = vadd.f32 1.0, %v11791_v44 }
 0x729   : > { %v9184_v11 = vadd.f32 1.0, %v11793_v34 }
 0x72a   : > { %v9201_v31 = vmul.f32 %v9185_v28, %v9137_v59 }
 0x72b   : > { %v9200_v10 = vmul.f32 %v9184_v11, %v9136_v15 }
 0x72d   : > { %11107 = vmatprep.mubr.f32.mxu1 %v9200_v10 }
 0x72e   : > { %11108 = vmatmul.mubr.f32.gmra.mrb[156].mxu1 %v9201_v31 }
 0x770   : > { %v11088_v23 = vpop.f32.mrb[160].mxu0 }
 0x771   : > { %v9297_v1 = vadd.f32 %v11088_v23, %v16445_v61  ;;  %v9291_v56 = vpop.f32.mrb[161].mxu0 }
 0x772   : > { %v9292_v4 = vadd.f32 %v16445_v61, %v9291_v56 }
 0x773   : > { %v9371_v46 = vadd.f32 %v9297_v1, %v16264_v13 }
 0x774   : > { %v9370_v62 = vadd.f32 %v9292_v4, %v16260_v25  ;;  %v11091_v37 = vpop.f32.mrb[144].mxu1 }
 0x775   : > { %v9307_v3 = vadd.f32 %v11091_v37, %v16445_v61  ;;  %v9301_v33 = vpop.f32.mrb[145].mxu1  ;;  %v9391_v18 = vsel %vm820_vm0, %v9371_v46, 0.0 }
 0x776   : > { %v9302_v12 = vadd.f32 %v16445_v61, %v9301_v33  ;;  %9392 = vadd.xlane.f32.xlu0 %v9391_v18  ;;  %v9388_v5 = vsel %vm820_vm0, %v9370_v62, 0.0 }
 0x777   : > { %v9373_v9 = vadd.f32 %v9307_v3, %v16278_v2  ;;  %9389 = vadd.xlane.f32.xlu1 %v9388_v5 }
 0x778   : > { %v9372_v14 = vadd.f32 %v9302_v12, %v16274_v17  ;;  %v11094_v24 = vpop.f32.mrb[146].mxu1 }
 0x779   : > { %v9317_v13 = vadd.f32 %v11094_v24, %v16445_v61  ;;  %v9311_v25 = vpop.f32.mrb[147].mxu1  ;;  %v9397_v16 = vsel %vm820_vm0, %v9373_v9, 0.0 }
 0x77a   : > { %v9312_v50 = vadd.f32 %v16445_v61, %v9311_v25  ;;  %9398 = vadd.xlane.f32.xlu0 %v9397_v16  ;;  %v9394_v6 = vsel %vm820_vm0, %v9372_v14, 0.0 }
 0x77b   : > { %v16462_v47 = vadd.f32 %v9317_v13, %v16292_v0  ;;  %9395 = vadd.xlane.f32.xlu1 %v9394_v6 }
 0x77c   : > { %v16465_v2 = vadd.f32 %v9312_v50, %v16288_v26  ;;  %v11097_v52 = vpop.f32.mrb[148].mxu1 }
 0x77d   : > { %v9403_v17 = vsel %vm820_vm0, %v16462_v47, 0.0  ;;  %v9327_v29 = vadd.f32 %v11097_v52, %v16445_v61  ;;  %v9321_v32 = vpop.f32.mrb[149].mxu1 }
 0x77e   : > { %9404 = vadd.xlane.f32.xlu0 %v9403_v17  ;;  %v9400_v38 = vsel %vm820_vm0, %v16465_v2, 0.0  ;;  %v9322_v43 = vadd.f32 %v16445_v61, %v9321_v32 }
 0x77f   : > { %9401 = vadd.xlane.f32.xlu1 %v9400_v38  ;;  %v16474_v0 = vadd.f32 %v9327_v29, %v16304_v40 }
 0x780   : > { %v16477_v26 = vadd.f32 %v9322_v43, %v16301_v57 }
 0x781   : > { %v9409_v27 = vsel %vm820_vm0, %v16474_v0, 0.0 }
 0x782   : > { %9410 = vadd.xlane.f32.xlu0 %v9409_v27  ;;  %v9406_v41 = vsel %vm820_vm0, %v16477_v26, 0.0 }
 0x783   : > { %9407 = vadd.xlane.f32.xlu1 %v9406_v41 }
 0x7a1   : > { %v11100_v30 = vpop.f32.mrb[150].mxu1 }
 0x7a2   : > { %v9337_v54 = vadd.f32 %v11100_v30, %v16445_v61  ;;  %v9331_v20 = vpop.f32.mrb[151].mxu1 }
 0x7a3   : > { %v9332_v60 = vadd.f32 %v16445_v61, %v9331_v20  ;;  %v9643_v20 = vld [vmem:[%s16431_s1 + $0x18] sm:$0xff] }
 0x7a4   : > { %v16486_v40 = vadd.f32 %v9337_v54, %v16336_v63  ;;  %v9642_v54 = vld [vmem:[%s16431_s1 + $0x10] sm:$0xff] }
 0x7a5   : > { %v16489_v57 = vadd.f32 %v9332_v60, %v16333_v19  ;;  %v9644_v60 = vld [vmem:[%s16431_s1 + $0x20] sm:$0xff] }
 0x7a6   : > { %v9415_v8 = vsel %vm820_vm0, %v16486_v40, 0.0 }
 0x7a7   : > { %9416 = vadd.xlane.f32.xlu0 %v9415_v8  ;;  %v9412_v39 = vsel %vm820_vm0, %v16489_v57, 0.0  ;;  %v9650_v8 = vld [vmem:[%s16431_s1 + $0x50] sm:$0xff] }
 0x7a8   : > { %9413 = vadd.xlane.f32.xlu1 %v9412_v39  ;;  %v9645_v39 = vld [vmem:[%s16431_s1 + $0x28] sm:$0xff] }
 0x7b9   : > { %v11103_v21 = vpop.f32.mrb[152].mxu1 }
 0x7ba   : > { %v9341_v22 = vpop.f32.mrb[153].mxu1  ;;  %v9347_v28 = vadd.f32 %v11103_v21, %v16445_v61  ;;  %v9652_v21 = vld [vmem:[%s16431_s1 + $0x60] sm:$0xff] }
 0x7bb   : > { %v9342_v11 = vadd.f32 %v16445_v61, %v9341_v22  ;;  %v9646_v22 = vld [vmem:[%s16431_s1 + $0x30] sm:$0xff] }
 0x7bc   : > { %v16510_v37 = vadd.f32 %v9347_v28, %v16350_v53 }
 0x7be   : > { %v9421_v53 = vsel %vm820_vm0, %v16510_v37, 0.0 }
 0x7e9   : > { %v11106_v42 = vpop.f32.mrb[154].mxu1 }
 0x7ea   : > { %v9351_v36 = vpop.f32.mrb[155].mxu1  ;;  %v9357_v24 = vadd.f32 %v11106_v42, %v16445_v61  ;;  %v9647_v42 = vld [vmem:[%s16431_s1 + $0x38] sm:$0xff] }
 0x7ec   : > { %v16532_v50 = vadd.f32 %v9357_v24, %v16394_v48 }
 0x7ee   : > { %v9427_v48 = vsel %vm820_vm0, %v16532_v50, 0.0 }
 0x801   : > { %v11109_v55 = vpop.f32.mrb[156].mxu1 }
 0x802   : > { %v16497_v63 = vpop.f32.mrb[157].mxu1  ;;  %v9367_v38 = vadd.f32 %v11109_v55, %v16445_v61  ;;  %v9649_v55 = vld [vmem:[%s16431_s1 + $0x48] sm:$0xff] }
 0x803   : > { %v9393_v51 = vpop.xlane.xlu0 %9392 }
 0x804   : > { %v9437_v19 = vmul.f32 0.03125, %v9393_v51  ;;  %v9390_v44 = vpop.xlane.xlu1 %9389  ;;  %v16555_v43 = vadd.f32 %v9367_v38, %v16408_v35  ;;  %v9641_v35 = vld [vmem:[%s16431_s1 + $0x8] sm:$0xff] }
 0x805   : > { %v9436_v34 = vmul.f32 0.03125, %v9390_v44 }
 0x806   : > { %v16500_v15 = vsub.f32 %v9371_v46, %v9437_v19  ;;  %v9433_v30 = vsel %vm820_vm0, %v16555_v43, 0.0 }
 0x807   : > { %v16503_v59 = vsub.f32 %v9370_v62, %v9436_v34  ;;  %v9399_v10 = vpop.xlane.xlu0 %9398  ;;  %v16516_v62 = vadd.f32 %v9342_v11, %v16347_v7  ;;  %v9352_v7 = vadd.f32 %v16445_v61, %v9351_v36  ;;  %v9648_v36 = vld [vmem:[%s16431_s1 + $0x40] sm:$0xff] }
 0x808   : > { %v9439_v31 = vmul.f32 0.03125, %v9399_v10  ;;  %v9396_v23 = vpop.xlane.xlu1 %9395  ;;  %v9469_v1 = vmul.f32 %v16500_v15, %v16500_v15 }
 0x809   : > { %v9438_v56 = vmul.f32 0.03125, %v9396_v23  ;;  %v9468_v4 = vmul.f32 %v16503_v59, %v16503_v59  ;;  %v16539_v17 = vadd.f32 %v9352_v7, %v16391_v58 }
 0x80a   : > { %v16512_v3 = vsub.f32 %v9373_v9, %v9439_v31  ;;  %v9487_v46 = vsel %vm820_vm0, %v9469_v1, 0.0 }
 0x80b   : > { %v16518_v33 = vsub.f32 %v9372_v14, %v9438_v56  ;;  %9488 = vadd.xlane.f32.xlu0 %v9487_v46  ;;  %v9405_v18 = vpop.xlane.xlu0 %9404  ;;  %v9484_v12 = vsel %vm820_vm0, %v9468_v4, 0.0  ;;  %v9418_v14 = vsel %vm820_vm0, %v16516_v62, 0.0  ;;  %v9424_v58 = vsel %vm820_vm0, %v16539_v17, 0.0  ;;  %v9651_v4 = vld [vmem:[%s16431_s1 + $0x58] sm:$0xff]  ;;  %v9653_v46 = vld [vmem:[%s16431_s1 + $0x68] sm:$0xff] }
 0x80c   : > { %9485 = vadd.xlane.f32.xlu1 %v9484_v12  ;;  %v9402_v5 = vpop.xlane.xlu1 %9401  ;;  %v9441_v13 = vmul.f32 0.03125, %v9405_v18  ;;  %v9471_v9 = vmul.f32 %v16512_v3, %v16512_v3 }
 0x80d   : > { %v9440_v25 = vmul.f32 0.03125, %v9402_v5  ;;  %v9470_v16 = vmul.f32 %v16518_v33, %v16518_v33 }
 0x80e   : > { %v16535_v6 = vsub.f32 %v16462_v47, %v9441_v13  ;;  %v9493_v52 = vsel %vm820_vm0, %v9471_v9, 0.0 }
 0x80f   : > { %9422 = vadd.xlane.f32.xlu0 %v9421_v53  ;;  %v16542_v29 = vsub.f32 %v16465_v2, %v9440_v25  ;;  %v9490_v32 = vsel %vm820_vm0, %v9470_v16, 0.0  ;;  %v9411_v51 = vpop.xlane.xlu0 %9410 }
 0x810   : > { %9419 = vadd.xlane.f32.xlu1 %v9418_v14  ;;  %v9473_v47 = vmul.f32 %v16535_v6, %v16535_v6  ;;  %v9443_v19 = vmul.f32 0.03125, %v9411_v51  ;;  %v9408_v18 = vpop.xlane.xlu1 %9407 }
 0x811   : > { %v9472_v2 = vmul.f32 %v16542_v29, %v16542_v29  ;;  %v9442_v24 = vmul.f32 0.03125, %v9408_v18 }
 0x812   : > { %v9499_v27 = vsel %vm820_vm0, %v9473_v47, 0.0  ;;  %v16573_v34 = vsub.f32 %v16474_v0, %v9443_v19  ;;  %v9362_v0 = vadd.f32 %v16445_v61, %v16497_v63 }
 0x813   : > { %9494 = vadd.xlane.f32.xlu0 %v9493_v52  ;;  %v9496_v41 = vsel %vm820_vm0, %v9472_v2, 0.0  ;;  %v16594_v25 = vsub.f32 %v16477_v26, %v9442_v24 }
 0x814   : > { %9491 = vadd.xlane.f32.xlu1 %v9490_v32  ;;  %v9475_v10 = vmul.f32 %v16573_v34, %v16573_v34  ;;  %v16587_v56 = vadd.f32 %v9362_v0, %v16405_v49 }
 0x815   : > { %v9474_v26 = vmul.f32 %v16594_v25, %v16594_v25 }
 0x816   : > { %v9505_v31 = vsel %vm820_vm0, %v9475_v10, 0.0 }
 0x817   : > { %9428 = vadd.xlane.f32.xlu0 %v9427_v48 }
 0x818   : > { %9425 = vadd.xlane.f32.xlu1 %v9424_v58 }
 0x81b   : > { %9500 = vadd.xlane.f32.xlu0 %v9499_v27 }
 0x81c   : > { %9497 = vadd.xlane.f32.xlu1 %v9496_v41 }
 0x81f   : > { %9434 = vadd.xlane.f32.xlu0 %v9433_v30 }
 0x82d   : > { %9668 = vperm.xlu1 %11216, %v9642_v54  }
 0x831   : > { %9673 = vperm.xlu1 %11216, %v9643_v20  }
 0x834   : > { %v9417_v44 = vpop.xlane.xlu0 %9416 }
 0x835   : > { %9663 = vperm.xlu0 %11217, %v9641_v35   ;;  %9678 = vperm.xlu1 %11216, %v9644_v60   ;;  %v9445_v28 = vmul.f32 0.03125, %v9417_v44  ;;  %v9414_v12 = vpop.xlane.xlu1 %9413 }
 0x836   : > { %v9444_v61 = vmul.f32 0.03125, %v9414_v12 }
 0x837   : > { %v16576_v11 = vsub.f32 %v16486_v40, %v9445_v28  ;;  %v9430_v40 = vsel %vm820_vm0, %v16587_v56, 0.0 }
 0x838   : > { %v16600_v32 = vsub.f32 %v16489_v57, %v9444_v61 }
 0x839   : > { %9708 = vperm.xlu0 %11217, %v9650_v8   ;;  %9683 = vperm.xlu1 %11216, %v9645_v39   ;;  %v9477_v23 = vmul.f32 %v16576_v11, %v16576_v11  ;;  %v9502_v8 = vsel %vm820_vm0, %v9474_v26, 0.0 }
 0x83a   : > { %v9476_v20 = vmul.f32 %v16600_v32, %v16600_v32 }
 0x83b   : > { %v9511_v1 = vsel %vm820_vm0, %v9477_v23, 0.0 }
 0x83d   : > { %9718 = vperm.xlu0 %11217, %v9652_v21   ;;  %9688 = vperm.xlu1 %11216, %v9646_v22  }
 0x841   : > { %9693 = vperm.xlu1 %11216, %v9647_v42   ;;  %v16619_v42 = vld [vmem:[%s16772_s17] ss:$0 sm:$0xff] }
 0x845   : > { %9698 = vperm.xlu1 %11216, %v9648_v36  }
 0x849   : > { %9703 = vperm.xlu1 %11216, %v9649_v55   ;;  %v9508_v55 = vsel %vm820_vm0, %v9476_v20, 0.0 }
 0x85c   : > { %9506 = vadd.xlane.f32.xlu0 %v9505_v31  ;;  %v16633_v31 = vld [vmem:[%s16773_s18] ss:$0 sm:$0xff] }
 0x860   : > { %9512 = vadd.xlane.f32.xlu0 %v9511_v1 }
 0x86d   : > { %9431 = vadd.xlane.f32.xlu1 %v9430_v40 }
 0x87e   : > { %9713 = vperm.xlu1 %11216, %v9651_v4  }
 0x882   : > { %9723 = vperm.xlu1 %11216, %v9653_v46  }
 0x898   : > { %v9489_v5 = vpop.xlane.xlu0 %9488 }
 0x899   : > { %v9533_v13 = vmul.f32 0.03125, %v9489_v5  ;;  %v9486_v53 = vpop.xlane.xlu1 %9485 }
 0x89a   : > { %v9532_v9 = vmul.f32 0.03125, %v9486_v53 }
 0x89b   : > { %v9549_v7 = vadd.f32 1e-05, %v9533_v13 }
 0x89c   : > { %v9548_v63 = vadd.f32 1e-05, %v9532_v9  ;;  %v9423_v49 = vpop.xlane.xlu0 %9422 }
 0x89d   : > { %11794 = vrsqrt.f32 %v9549_v7  ;;  %v9447_v14 = vmul.f32 0.03125, %v9423_v49  ;;  %v9420_v16 = vpop.xlane.xlu1 %9419 }
 0x89e   : > { %11796 = vrsqrt.f32 %v9548_v63  ;;  %v9446_v38 = vmul.f32 0.03125, %v9420_v16 }
 0x89f   : > { %v16597_v52 = vsub.f32 %v16510_v37, %v9447_v14 }
 0x8a0   : > { %v9495_v48 = vpop.xlane.xlu0 %9494  ;;  %v16608_v37 = vsub.f32 %v16516_v62, %v9446_v38 }
 0x8a1   : > { %v9535_v47 = vmul.f32 0.03125, %v9495_v48  ;;  %v9492_v58 = vpop.xlane.xlu1 %9491  ;;  %v9479_v2 = vmul.f32 %v16597_v52, %v16597_v52 }
 0x8a2   : > { %v9534_v27 = vmul.f32 0.03125, %v9492_v58  ;;  %v9478_v51 = vmul.f32 %v16608_v37, %v16608_v37 }
 0x8a3   : > { %v9551_v41 = vadd.f32 1e-05, %v9535_v47  ;;  %v9517_v30 = vsel %vm820_vm0, %v9479_v2, 0.0 }
 0x8a4   : > { %v9550_v54 = vadd.f32 1e-05, %v9534_v27  ;;  %v9429_v57 = vpop.xlane.xlu0 %9428  ;;  %9518 = vadd.xlane.f32.xlu0 %v9517_v30  ;;  %v9514_v46 = vsel %vm820_vm0, %v9478_v51, 0.0 }
 0x8a5   : > { %11798 = vrsqrt.f32 %v9551_v41  ;;  %v9449_v35 = vmul.f32 0.03125, %v9429_v57  ;;  %v9426_v60 = vpop.xlane.xlu1 %9425 }
 0x8a6   : > { %11800 = vrsqrt.f32 %v9550_v54  ;;  %v9448_v39 = vmul.f32 0.03125, %v9426_v60  ;;  %9503 = vadd.xlane.f32.xlu1 %v9502_v8 }
 0x8a7   : > { %v11795_v21 = vpop.eup %11794  ;;  %v16614_v22 = vsub.f32 %v16532_v50, %v9449_v35 }
 0x8a8   : > { %v11797_v62 = vpop.eup %11796  ;;  %v9501_v36 = vpop.xlane.xlu0 %9500  ;;  %v16626_v44 = vsub.f32 %v16539_v17, %v9448_v39  ;;  %v9581_v17 = vmul.f32 %v11795_v21, %v16500_v15 }
 0x8a9   : > { %v9580_v19 = vmul.f32 %v11797_v62, %v16503_v59  ;;  %v9537_v28 = vmul.f32 0.03125, %v9501_v36  ;;  %v9498_v50 = vpop.xlane.xlu1 %9497  ;;  %v9481_v10 = vmul.f32 %v16614_v22, %v16614_v22 }
 0x8aa   : > { %v9536_v23 = vmul.f32 0.03125, %v9498_v50  ;;  %9509 = vadd.xlane.f32.xlu1 %v9508_v55  ;;  %v9480_v24 = vmul.f32 %v16626_v44, %v16626_v44  ;;  %v9603_v9 = vmul.f32 %v16619_v42, %v9581_v17 }
 0x8ab   : > { %v9602_v1 = vmul.f32 %v16619_v42, %v9580_v19  ;;  %v9553_v0 = vadd.f32 1e-05, %v9537_v28  ;;  %v9523_v59 = vsel %vm820_vm0, %v9481_v10, 0.0 }
 0x8ac   : > { %v9552_v40 = vadd.f32 1e-05, %v9536_v23  ;;  %9524 = vadd.xlane.f32.xlu0 %v9523_v59  ;;  %v9435_v4 = vpop.xlane.xlu0 %9434  ;;  %v9520_v14 = vsel %vm820_vm0, %v9480_v24, 0.0  ;;  %v9625_v38 = vadd.f32 %v16633_v31, %v9603_v9 }
 0x8ad   : > { %v9624_v18 = vadd.f32 %v16633_v31, %v9602_v1  ;;  %11802 = vrsqrt.f32 %v9553_v0  ;;  %v9451_v12 = vmul.f32 0.03125, %v9435_v4  ;;  %v9669_v5 = vpop.permute.xlu1 %9668 }
 0x8ae   : > { %11804 = vrsqrt.f32 %v9552_v40  ;;  %9515 = vadd.xlane.f32.xlu1 %v9514_v46 }
 0x8af   : > { %v11799_v15 = vpop.eup %11798  ;;  %v9736_v13 = vmul.f32 %v16495_v45, %v9624_v18  ;;  %v16650_v53 = vsub.f32 %v16555_v43, %v9451_v12 }
 0x8b0   : > { %v11801_v7 = vpop.eup %11800  ;;  %v9583_v61 = vmul.f32 %v11799_v15, %v16512_v3 }
 0x8b1   : > { %9752 = vst.msk [vmem:[%s16646_s29] sm:$0xff] %vm820_vm0, %v9736_v13  ;;  %v9582_v63 = vmul.f32 %v11801_v7, %v16518_v33  ;;  %v9674_v49 = vpop.permute.xlu1 %9673  ;;  %v9483_v16 = vmul.f32 %v16650_v53, %v16650_v53 }
 0x8b2   : > { %v9605_v45 = vmul.f32 %v16619_v42, %v9583_v61  ;;  %9521 = vadd.xlane.f32.xlu1 %v9520_v14 }
 0x8b3   : > { %v9604_v43 = vmul.f32 %v16619_v42, %v9582_v63  ;;  %v9529_v3 = vsel %vm820_vm0, %v9483_v16, 0.0 }
 0x8b4   : > { %v9627_v33 = vadd.f32 %v16633_v31, %v9605_v45  ;;  %9530 = vadd.xlane.f32.xlu0 %v9529_v3  ;;  %v9664_v48 = vpop.permute.xlu0 %9663 }
 0x8b5   : > { %v9626_v47 = vadd.f32 %v16633_v31, %v9604_v43  ;;  %v9737_v58 = vmul.f32 %v9664_v48, %v9625_v38  ;;  %v9679_v41 = vpop.permute.xlu1 %9678 }
 0x8b6   : > { %v9739_v2 = vmul.f32 %v9674_v49, %v9627_v33 }
 0x8b7   : > { %v11803_v26 = vpop.eup %11802  ;;  %v9738_v27 = vmul.f32 %v9669_v5, %v9626_v47  ;;  %9753 = vst.msk [vmem:[%s16646_s29 + $0x8] sm:$0xff] %vm820_vm0, %v9737_v58 }
 0x8b8   : > { %v11805_v30 = vpop.eup %11804  ;;  %9755 = vst.msk [vmem:[%s16646_s29 + $0x18] sm:$0xff] %vm820_vm0, %v9739_v2  ;;  %v9585_v54 = vmul.f32 %v11803_v26, %v16535_v6  ;;  %v9654_v6 = vld [vmem:[%s16431_s1 + $0x70] sm:$0xff]  ;;  %v16683_v36 = vpop.permute.xlu0 %9708 }
 0x8b9   : > { %9754 = vst.msk [vmem:[%s16646_s29 + $0x10] sm:$0xff] %vm820_vm0, %v9738_v27  ;;  %v9584_v57 = vmul.f32 %v11805_v30, %v16542_v29  ;;  %v9684_v39 = vpop.permute.xlu1 %9683 }
 0x8ba   : > { %v9607_v20 = vmul.f32 %v16619_v42, %v9585_v54 }
 0x8bb   : > { %v9606_v35 = vmul.f32 %v16619_v42, %v9584_v57 }
 0x8bc   : > { %v9629_v60 = vadd.f32 %v16633_v31, %v9607_v20  ;;  %v16685_v29 = vpop.permute.xlu0 %9718 }
 0x8bd   : > { %v9628_v8 = vadd.f32 %v16633_v31, %v9606_v35  ;;  %v16687_v55 = vpop.permute.xlu1 %9688 }
 0x8be   : > { %v9741_v21 = vmul.f32 %v9684_v39, %v9629_v60 }
 0x8bf   : > { %v9740_v62 = vmul.f32 %v9679_v41, %v9628_v8 }
 0x8c0   : > { %9757 = vst.msk [vmem:[%s16646_s29 + $0x28] sm:$0xff] %vm820_vm0, %v9741_v21 }
 0x8c1   : > { %9756 = vst.msk [vmem:[%s16646_s29 + $0x20] sm:$0xff] %vm820_vm0, %v9740_v62  ;;  %v9694_v19 = vpop.permute.xlu1 %9693 }
 0x8c5   : > { %v16689_v1 = vpop.permute.xlu1 %9698 }
 0x8c9   : > { %v9704_v59 = vpop.permute.xlu1 %9703 }
 0x8ca   : > { %9728 = vperm.xlu0 %11217, %v9654_v6  }
 0x8e9   : > { %v9507_v51 = vpop.xlane.xlu0 %9506 }
 0x8ea   : > { %v9539_v28 = vmul.f32 0.03125, %v9507_v51 }
 0x8ec   : > { %v9555_v50 = vadd.f32 1e-05, %v9539_v28 }
 0x8ed   : > { %v9513_v10 = vpop.xlane.xlu0 %9512 }
 0x8ee   : > { %11806 = vrsqrt.f32 %v9555_v50  ;;  %v9541_v23 = vmul.f32 0.03125, %v9513_v10 }
 0x8f0   : > { %v9557_v0 = vadd.f32 1e-05, %v9541_v23 }
 0x8f2   : > { %11808 = vrsqrt.f32 %v9557_v0 }
 0x8f8   : > { %v11807_v17 = vpop.eup %11806 }
 0x8f9   : > { %v9587_v40 = vmul.f32 %v11807_v17, %v16573_v34 }
 0x8fa   : > { %v9432_v4 = vpop.xlane.xlu1 %9431 }
 0x8fb   : > { %v9609_v46 = vmul.f32 %v16619_v42, %v9587_v40  ;;  %v9450_v18 = vmul.f32 0.03125, %v9432_v4 }
 0x8fc   : > { %v11809_v12 = vpop.eup %11808 }
 0x8fd   : > { %v9631_v5 = vadd.f32 %v16633_v31, %v9609_v46  ;;  %v9589_v24 = vmul.f32 %v11809_v12, %v16576_v11  ;;  %v16696_v15 = vsub.f32 %v16587_v56, %v9450_v18  ;;  %v9655_v11 = vld [vmem:[%s16431_s1 + $0x78] sm:$0xff] }
 0x8fe   : > { %v9714_v56 = vpop.permute.xlu1 %9713 }
 0x8ff   : > { %v9743_v13 = vmul.f32 %v9694_v19, %v9631_v5  ;;  %v9611_v9 = vmul.f32 %v16619_v42, %v9589_v24  ;;  %v9482_v34 = vmul.f32 %v16696_v15, %v16696_v15 }
 0x901   : > { %9759 = vst.msk [vmem:[%s16646_s29 + $0x38] sm:$0xff] %vm820_vm0, %v9743_v13  ;;  %v9633_v7 = vadd.f32 %v16633_v31, %v9611_v9  ;;  %v9526_v61 = vsel %vm820_vm0, %v9482_v34, 0.0 }
 0x902   : > { %9527 = vadd.xlane.f32.xlu1 %v9526_v61  ;;  %v9724_v49 = vpop.permute.xlu1 %9723 }
 0x903   : > { %v9745_v63 = vmul.f32 %v9704_v59, %v9633_v7 }
 0x905   : > { %9761 = vst.msk [vmem:[%s16646_s29 + $0x48] sm:$0xff] %vm820_vm0, %v9745_v63 }
 0x913   : > { %9733 = vperm.xlu1 %11216, %v9655_v11  }
 0x931   : > { %v9519_v14 = vpop.xlane.xlu0 %9518 }
 0x932   : > { %v9543_v16 = vmul.f32 0.03125, %v9519_v14 }
 0x933   : > { %v9504_v45 = vpop.xlane.xlu1 %9503 }
 0x934   : > { %v9559_v43 = vadd.f32 1e-05, %v9543_v16  ;;  %v9538_v3 = vmul.f32 0.03125, %v9504_v45 }
 0x936   : > { %11810 = vrsqrt.f32 %v9559_v43  ;;  %v9554_v38 = vadd.f32 1e-05, %v9538_v3 }
 0x937   : > { %v9510_v33 = vpop.xlane.xlu1 %9509 }
 0x938   : > { %11812 = vrsqrt.f32 %v9554_v38  ;;  %v9540_v48 = vmul.f32 0.03125, %v9510_v33 }
 0x939   : > { %v9525_v47 = vpop.xlane.xlu0 %9524 }
 0x93a   : > { %v9556_v58 = vadd.f32 1e-05, %v9540_v48  ;;  %v9545_v2 = vmul.f32 0.03125, %v9525_v47 }
 0x93b   : > { %v9516_v26 = vpop.xlane.xlu1 %9515 }
 0x93c   : > { %11814 = vrsqrt.f32 %v9556_v58  ;;  %v9561_v27 = vadd.f32 1e-05, %v9545_v2  ;;  %v9542_v41 = vmul.f32 0.03125, %v9516_v26 }
 0x93e   : > { %11816 = vrsqrt.f32 %v9561_v27  ;;  %v9558_v30 = vadd.f32 1e-05, %v9542_v41 }
 0x93f   : > { %v9522_v54 = vpop.xlane.xlu1 %9521 }
 0x940   : > { %v11811_v57 = vpop.eup %11810  ;;  %11818 = vrsqrt.f32 %v9558_v30  ;;  %v9544_v20 = vmul.f32 0.03125, %v9522_v54 }
 0x941   : > { %v9591_v35 = vmul.f32 %v11811_v57, %v16597_v52  ;;  %v9531_v13 = vpop.xlane.xlu0 %9530 }
 0x942   : > { %v11813_v60 = vpop.eup %11812  ;;  %v9560_v8 = vadd.f32 1e-05, %v9544_v20  ;;  %v9547_v9 = vmul.f32 0.03125, %v9531_v13 }
 0x943   : > { %v9613_v39 = vmul.f32 %v16619_v42, %v9591_v35  ;;  %v9586_v21 = vmul.f32 %v11813_v60, %v16594_v25 }
 0x944   : > { %11820 = vrsqrt.f32 %v9560_v8  ;;  %v9563_v34 = vadd.f32 1e-05, %v9547_v9 }
 0x945   : > { %v9635_v62 = vadd.f32 %v16633_v31, %v9613_v39  ;;  %v9608_v6 = vmul.f32 %v16619_v42, %v9586_v21 }
 0x946   : > { %v11815_v51 = vpop.eup %11814  ;;  %11822 = vrsqrt.f32 %v9563_v34 }
 0x947   : > { %v9747_v19 = vmul.f32 %v9714_v56, %v9635_v62  ;;  %v9630_v28 = vadd.f32 %v16633_v31, %v9608_v6  ;;  %v9588_v50 = vmul.f32 %v11815_v51, %v16600_v32 }
 0x948   : > { %v11817_v52 = vpop.eup %11816 }
 0x949   : > { %9763 = vst.msk [vmem:[%s16646_s29 + $0x58] sm:$0xff] %vm820_vm0, %v9747_v19  ;;  %v9742_v10 = vmul.f32 %v16687_v55, %v9630_v28  ;;  %v9610_v25 = vmul.f32 %v16619_v42, %v9588_v50  ;;  %v9593_v23 = vmul.f32 %v11817_v52, %v16614_v22  ;;  %v9729_v43 = vpop.permute.xlu0 %9728 }
 0x94a   : > { %v11819_v0 = vpop.eup %11818 }
 0x94b   : > { %9758 = vst.msk [vmem:[%s16646_s29 + $0x30] sm:$0xff] %vm820_vm0, %v9742_v10  ;;  %v9632_v59 = vadd.f32 %v16633_v31, %v9610_v25  ;;  %v9615_v17 = vmul.f32 %v16619_v42, %v9593_v23  ;;  %v9590_v32 = vmul.f32 %v11819_v0, %v16608_v37 }
 0x94d   : > { %v9744_v40 = vmul.f32 %v16689_v1, %v9632_v59  ;;  %v9637_v55 = vadd.f32 %v16633_v31, %v9615_v17  ;;  %v9612_v4 = vmul.f32 %v16619_v42, %v9590_v32 }
 0x94e   : > { %v11821_v46 = vpop.eup %11820 }
 0x94f   : > { %9760 = vst.msk [vmem:[%s16646_s29 + $0x40] sm:$0xff] %vm820_vm0, %v9744_v40  ;;  %v9749_v22 = vmul.f32 %v9724_v49, %v9637_v55  ;;  %v9634_v18 = vadd.f32 %v16633_v31, %v9612_v4  ;;  %v9592_v12 = vmul.f32 %v11821_v46, %v16626_v44 }
 0x950   : > { %v11823_v44 = vpop.eup %11822 }
 0x951   : > { %9765 = vst.msk [vmem:[%s16646_s29 + $0x68] sm:$0xff] %vm820_vm0, %v9749_v22  ;;  %v9746_v5 = vmul.f32 %v16683_v36, %v9634_v18  ;;  %v9614_v37 = vmul.f32 %v16619_v42, %v9592_v12  ;;  %v9595_v7 = vmul.f32 %v11823_v44, %v16650_v53 }
 0x953   : > { %9762 = vst.msk [vmem:[%s16646_s29 + $0x50] sm:$0xff] %vm820_vm0, %v9746_v5  ;;  %v9636_v1 = vadd.f32 %v16633_v31, %v9614_v37  ;;  %v9617_v36 = vmul.f32 %v16619_v42, %v9595_v7 }
 0x955   : > { %v9748_v24 = vmul.f32 %v16685_v29, %v9636_v1  ;;  %v9639_v56 = vadd.f32 %v16633_v31, %v9617_v36 }
 0x957   : > { %9764 = vst.msk [vmem:[%s16646_s29 + $0x60] sm:$0xff] %vm820_vm0, %v9748_v24 }
 0x98f   : > { %v9528_v61 = vpop.xlane.xlu1 %9527 }
 0x990   : > { %v9546_v63 = vmul.f32 0.03125, %v9528_v61 }
 0x992   : > { %v9562_v11 = vadd.f32 1e-05, %v9546_v63 }
 0x993   : > { %v9734_v49 = vpop.permute.xlu1 %9733 }
 0x994   : > { %11824 = vrsqrt.f32 %v9562_v11  ;;  %v9751_v29 = vmul.f32 %v9734_v49, %v9639_v56 }
 0x996   : > { %9767 = vst.msk [vmem:[%s16646_s29 + $0x78] sm:$0xff] %vm820_vm0, %v9751_v29 }
 0x99e   : > { %v11825_v14 = vpop.eup %11824 }
 0x99f   : > { %v9594_v16 = vmul.f32 %v11825_v14, %v16696_v15 }
 0x9a1   : > { %v9616_v45 = vmul.f32 %v16619_v42, %v9594_v16 }
 0x9a3   : > { %v9638_v53 = vadd.f32 %v16633_v31, %v9616_v45 }
 0x9a5   : > { %v9750_v3 = vmul.f32 %v9729_v43, %v9638_v53 }
 0x9a7   : > { %9766 = vst.msk [vmem:[%s16646_s29 + $0x70] sm:$0xff] %vm820_vm0, %v9750_v3 }
 0x9a8 PF: > { %s29_s0 = sadd.s32 1, %s11877_s0  }
 0x9a9   : > { %p26_p5 = scmp.ge.s32.totalorder %s29_s0, 4  }
 0x9ab   :  { %28 = sbr.rel (!%p26_p5) target bundleno = 5 (0x5), region = 135 }

</bundles_post_ra>
